<compile_context>
chip_gen: v7x
topology: tpu7x:2x2x1
jax: 0.10.0
libtpu: 0.0.40
codegen_flags: <defaults>
</compile_context>

<pallas_src>
import jax
import jax.numpy as jnp
from jax.experimental import pallas as pl
from jax.experimental.pallas import tpu as pltpu

# ---- model dimensions (fixed by the PyTorch module) --------------------------
H_ELEC = 62                               # EEG electrodes (conv kernel height)
W_TIME = 300                              # input time samples (forced by the flatten)
KW     = 45                               # conv kernel width
C_OUT  = 40                               # num_filters
T_CONV = W_TIME - KW + 1                  # 256
POOL_K, POOL_S = 10, 3
T_POOL = (T_CONV - POOL_K) // POOL_S + 1  # 83
FEAT   = C_OUT * T_POOL                   # 3320
HID    = 1024
NCLS   = 2
NHEAD  = 2 * NCLS                         # fc_lr + fc_subj fused -> 4 logits

# conv shift grouping: 45 shifts zero-padded to 48 = 3 groups of 16 -> K=992 matmuls.
# GROUP=16 keeps every per-group LHS row offset (0/16/32) aligned to the bf16
# sublane tile, with the same total MXU K-chunks as GROUP=4/8.
GROUP  = 16
KW_PAD = 48
NGRP   = KW_PAD // GROUP                  # 3
KDIM   = GROUP * H_ELEC                   # 992
T_SLAB = (NGRP - 1) * GROUP + T_CONV      # 288 slab rows actually read

# fc1 column tile (kernel 2 pipelining)
TILE_H = 256


# =============================== kernel 1 ====================================
def _conv_elu_pool_kernel(x_ref, w_ref, b_ref, o_ref, y_ref, m3_ref):
    """Per-sample conv(62x45) + ELU + max_pool2d((1,10), stride 3).

    x_ref: (288, 992) bf16 16-shift slab, w_ref: (3, 992, 40) bf16,
    b_ref: (1, 40) f32, o_ref: (83, 40) bf16,
    y_ref/m3_ref: VMEM (256, 40) f32 scratch (pool staging).
    """
    # Register accumulator, unrolled straight-line loop (no VMEM RMW round trips).
    acc = jnp.zeros((T_CONV, C_OUT), jnp.float32)
    for g in range(NGRP):
        start = g * GROUP                                 # 0, 16, 32 -> aligned
        lhs = x_ref[pl.ds(start, T_CONV), :]              # (256, 992) bf16
        acc = acc + jnp.dot(lhs, w_ref[g],
                            preferred_element_type=jnp.float32)

    y = acc + b_ref[...]                                  # conv bias (1, 40)
    # ELU(alpha=1): x if x > 0 else exp(x) - 1   (overflow-safe exp argument)
    y = jnp.where(y > 0, y, jnp.exp(jnp.minimum(y, 0.0)) - 1.0)
    y_ref[...] = y

    # Running 3-max over consecutive rows: m3[t] = max(y[t], y[t+1], y[t+2]).
    m3 = jnp.maximum(jnp.maximum(y_ref[pl.ds(0, T_CONV - 2), :],
                                 y_ref[pl.ds(1, T_CONV - 2), :]),
                     y_ref[pl.ds(2, T_CONV - 2), :])
    m3_ref[pl.ds(0, T_CONV - 2), :] = m3                  # rows 254..255 unused

    # Window [3p .. 3p+9] == m3[3p] ∪ m3[3p+3] ∪ m3[3p+6] ∪ m3[3p+7]
    # -> only 4 stride-3 sublane reads (instead of 10).
    pooled = jnp.maximum(
        jnp.maximum(m3_ref[pl.ds(0, T_POOL, stride=POOL_S), :],
                    m3_ref[pl.ds(3, T_POOL, stride=POOL_S), :]),
        jnp.maximum(m3_ref[pl.ds(6, T_POOL, stride=POOL_S), :],
                    m3_ref[pl.ds(7, T_POOL, stride=POOL_S), :]))
    o_ref[...] = pooled.astype(o_ref.dtype)               # (83, 40) bf16


def conv_elu_pool(x_slab, w_grp, b_conv):
    """x_slab: (N, 288, 992) bf16; w_grp: (3, 992, 40) bf16; b_conv: (1, 40) f32
    -> (N, 83, 40) bf16."""
    N = x_slab.shape[0]
    return pl.pallas_call(
        _conv_elu_pool_kernel,
        out_shape=jax.ShapeDtypeStruct((N, T_POOL, C_OUT), jnp.bfloat16),
        grid_spec=pltpu.PrefetchScalarGridSpec(
            num_scalar_prefetch=0,
            grid=(N,),
            in_specs=[
                pl.BlockSpec((None, T_SLAB, KDIM), lambda i: (i, 0, 0)),
                pl.BlockSpec((NGRP, KDIM, C_OUT), lambda i: (0, 0, 0)),
                pl.BlockSpec((1, C_OUT), lambda i: (0, 0)),
            ],
            out_specs=pl.BlockSpec((None, T_POOL, C_OUT), lambda i: (i, 0, 0)),
            scratch_shapes=[pltpu.VMEM((T_CONV, C_OUT), jnp.float32),
                            pltpu.VMEM((T_CONV, C_OUT), jnp.float32)],
        ),
        compiler_params=pltpu.CompilerParams(
            dimension_semantics=("parallel",)),   # batch split across v7x cores
        cost_estimate=pl.CostEstimate(
            flops=2 * N * NGRP * T_CONV * KDIM * C_OUT,
            transcendentals=N * T_CONV * C_OUT,
            bytes_accessed=2 * N * (T_SLAB * KDIM + T_POOL * C_OUT)
                           + 2 * NGRP * KDIM * C_OUT + 4 * C_OUT,
        ),
    )(x_slab, w_grp, b_conv)


# =============================== kernel 2 ====================================
def _mlp_heads_kernel(f_ref, w1_ref, b1_ref, wh_ref, bh_ref,
                      olr_ref, osub_ref, acc_ref):
    """fc1 + ELU + fc_lr / fc_subj + log_softmax, HID tiled over the grid.

    Per step k: h_k = ELU(feat @ w1[:, k-tile] + b1[k-tile]) and the partial
    head logits h_k @ wh[k-tile, :] are accumulated into acc_ref (N, 4).
    """
    k = pl.program_id(0)

    @pl.when(k == 0)
    def _():
        acc_ref[...] = jnp.zeros_like(acc_ref)

    h = jnp.dot(f_ref[...], w1_ref[...],
                preferred_element_type=jnp.float32) + b1_ref[...]
    h = jnp.where(h > 0, h, jnp.exp(jnp.minimum(h, 0.0)) - 1.0)   # ELU
    # TODO(synk): F.dropout(p=0.5, training=self.training) is identity at inference;
    # a training-mode RNG dropout mask is not implemented here.
    acc_ref[...] += jnp.dot(h, wh_ref[...], preferred_element_type=jnp.float32)

    @pl.when(k == pl.num_programs(0) - 1)
    def _():
        logits = acc_ref[...] + bh_ref[...]                       # (N, 4)

        def log_softmax2(z):
            zmax = jnp.max(z, axis=1, keepdims=True)
            return z - (zmax + jnp.log(jnp.sum(jnp.exp(z - zmax),
                                               axis=1, keepdims=True)))

        olr_ref[...] = log_softmax2(logits[:, 0:NCLS])
        osub_ref[...] = log_softmax2(logits[:, NCLS:NHEAD])


def mlp_heads(feat, w1, b1, w_heads, b_heads):
    """feat: (N, 3320) bf16 -> (log_softmax_lr (N,2), log_softmax_subj (N,2))."""
    N = feat.shape[0]
    n_tiles = HID // TILE_H                                # 4
    return pl.pallas_call(
        _mlp_heads_kernel,
        out_shape=(jax.ShapeDtypeStruct((N, NCLS), jnp.float32),
                   jax.ShapeDtypeStruct((N, NCLS), jnp.float32)),
        grid_spec=pltpu.PrefetchScalarGridSpec(
            num_scalar_prefetch=0,
            grid=(n_tiles,),
            in_specs=[
                pl.BlockSpec((N, FEAT), lambda k: (0, 0)),        # resident
                pl.BlockSpec((FEAT, TILE_H), lambda k: (0, k)),   # streamed w1
                pl.BlockSpec((1, TILE_H), lambda k: (0, k)),
                pl.BlockSpec((TILE_H, NHEAD), lambda k: (k, 0)),
                pl.BlockSpec((1, NHEAD), lambda k: (0, 0)),
            ],
            out_specs=(pl.BlockSpec((N, NCLS), lambda k: (0, 0)),
                       pl.BlockSpec((N, NCLS), lambda k: (0, 0))),
            scratch_shapes=[pltpu.VMEM((N, NHEAD), jnp.float32)],
        ),
        # HID is a reduction into acc_ref -> "arbitrary".
        # TODO(synk): a v7x dual-TensorCore split of the HID stream (partial
        # logits per core + combine) is not implemented; HBM BW is shared anyway.
        compiler_params=pltpu.CompilerParams(
            dimension_semantics=("arbitrary",)),
        cost_estimate=pl.CostEstimate(
            flops=2 * N * FEAT * HID + 2 * N * HID * NHEAD,
            transcendentals=N * (HID + NHEAD),
            bytes_accessed=2 * (N * FEAT + FEAT * HID)
                           + 4 * (HID + HID * NHEAD + NHEAD + 2 * N * NCLS),
        ),
    )(feat, w1, b1, w_heads, b_heads)


# =============================== forward =====================================
def base_cnn_mult_forward(params, x):
    """x: (N, 1, 62, 300) float32 NCHW, same convention as the PyTorch module.
    Returns (log_softmax(fc_lr), log_softmax(fc_subj)), each (N, 2)."""
    N = x.shape[0]
    # channels-last, time-major, bf16: (N, T=300, H=62)
    xs = jnp.transpose(x[:, 0, :, :], (0, 2, 1)).astype(jnp.bfloat16)
    # 16-shift "im2col-lite" slab: x_slab[n, t, j*62 + h] = xs[n, t + j, h]
    # TODO(synk): for large N (slab bytes >> fc1 weight) assemble this slab inside
    # kernel 1 from xs (N, 303, 62) to avoid the HBM round trip; at small N the
    # fc1 stream dominates and the wrapper concat (bf16) is negligible.
    pad_t = T_SLAB + GROUP - 1 - W_TIME                    # 3
    x_pad = jnp.pad(xs, ((0, 0), (0, pad_t), (0, 0)))      # (N, 303, 62)
    x_slab = jnp.concatenate(
        [x_pad[:, j:j + T_SLAB, :] for j in range(GROUP)], axis=2)  # (N, 288, 992)

    pooled = conv_elu_pool(x_slab, params["w_grp"], params["b_conv"])  # (N, 83, 40)
    # Contiguous (free) flatten in (p, c) order; the fc1 weight rows were permuted
    # once in prepare_params to match, so no activation transpose is needed.
    feat = pooled.reshape(N, FEAT)
    return mlp_heads(feat, params["w1"], params["b1"],
                     params["w_heads"], params["b_heads"])


# =============================== parameters ==================================
def init_torch_params(key):
    """Deterministic synthetic parameters in native PyTorch layouts."""
    def u(k, shape, fan_in):
        bound = 1.0 / (fan_in ** 0.5)
        return jax.random.uniform(k, shape, jnp.float32, -bound, bound)

    ks = jax.random.split(key, 8)
    fan_conv = 1 * H_ELEC * KW
    return {
        "conv1.weight":   u(ks[0], (C_OUT, 1, H_ELEC, KW), fan_conv),
        "conv1.bias":     u(ks[1], (C_OUT,), fan_conv),
        "fc1.weight":     u(ks[2], (HID, FEAT), FEAT),
        "fc1.bias":       u(ks[3], (HID,), FEAT),
        "fc_lr.weight":   u(ks[4], (NCLS, HID), HID),
        "fc_lr.bias":     u(ks[5], (NCLS,), HID),
        "fc_subj.weight": u(ks[6], (NCLS, HID), HID),
        "fc_subj.bias":   u(ks[7], (NCLS,), HID),
    }
    # NOTE: self.bn (BatchNorm1d) and self.fc2 exist in the module but are never
    # used in forward(), so they have no parameters here.


def prepare_params(tp):
    """Convert PyTorch-layout weights into the layouts/dtypes the kernels expect."""
    # conv1.weight (co, 1, h, k) -> (k, h, co), zero-pad k 45->48,
    # group into (3, 992, 40), bf16 for the MXU.
    w_khc = jnp.transpose(tp["conv1.weight"][:, 0, :, :], (2, 1, 0))       # (45, 62, 40)
    w_khc = jnp.pad(w_khc, ((0, KW_PAD - KW), (0, 0), (0, 0)))             # (48, 62, 40)
    w_grp = w_khc.reshape(NGRP, KDIM, C_OUT).astype(jnp.bfloat16)          # (3, 992, 40)
    b_conv = tp["conv1.bias"].reshape(1, C_OUT).astype(jnp.float32)

    # torch flatten index is c*83 + p; the kernels flatten pooled (N, 83, 40) as
    # p*40 + c, so permute fc1 weight rows once here to compensate. bf16 weight,
    # f32 accumulation in-kernel.
    w1_t = jnp.transpose(tp["fc1.weight"], (1, 0))                         # (3320, 1024)
    w1 = (w1_t.reshape(C_OUT, T_POOL, HID).transpose(1, 0, 2)
          .reshape(FEAT, HID).astype(jnp.bfloat16))
    b1 = tp["fc1.bias"].reshape(1, HID).astype(jnp.float32)

    w_heads = jnp.concatenate([jnp.transpose(tp["fc_lr.weight"], (1, 0)),
                               jnp.transpose(tp["fc_subj.weight"], (1, 0))],
                              axis=1).astype(jnp.float32)                  # (1024, 4)
    b_heads = jnp.concatenate([tp["fc_lr.bias"],
                               tp["fc_subj.bias"]]).reshape(1, NHEAD).astype(jnp.float32)

    return {"w_grp": w_grp, "b_conv": b_conv, "w1": w1, "b1": b1,
            "w_heads": w_heads, "b_heads": b_heads}


# ================================= main ======================================
if __name__ == "__main__":
    key = jax.random.PRNGKey(0)
    pkey, xkey = jax.random.split(key)
    torch_params = init_torch_params(pkey)
    params = prepare_params(torch_params)

    # Input shape is pinned by the module's hard-coded x.view(-1, 40*1*83):
    # (N, 1, 62, 300) -> conv width 256 -> pooled width 83.
    x = jax.random.normal(xkey, (2, 1, H_ELEC, W_TIME), dtype=jnp.float32)

    fwd = jax.jit(base_cnn_mult_forward)
    x1, x2 = fwd(params, x)
    (x1, x2) = jax.block_until_ready((x1, x2))

    assert x1.shape == (2, NCLS) and x2.shape == (2, NCLS)
    assert bool(jnp.all(jnp.isfinite(x1))) and bool(jnp.all(jnp.isfinite(x2)))
    # log_softmax rows must exponentiate-sum to 1
    assert bool(jnp.allclose(jnp.exp(x1).sum(axis=1), 1.0, atol=1e-4))
    assert bool(jnp.allclose(jnp.exp(x2).sum(axis=1), 1.0, atol=1e-4))
    print("KERNEL_OK")
</pallas_src>

<mosaic_0001>
module attributes {stable_mosaic.version = 11 : i64} {
  func.func @_conv_elu_pool_kernel(%arg0: i32, %arg1: memref<1x288x992xbf16, #tpu.memory_space<vmem>>, %arg2: memref<3x992x40xbf16, #tpu.memory_space<vmem>>, %arg3: memref<1x40xf32, #tpu.memory_space<vmem>>, %arg4: memref<1x83x40xbf16, #tpu.memory_space<vmem>>, %arg5: memref<256x40xf32, #tpu.memory_space<vmem>>, %arg6: memref<256x40xf32, #tpu.memory_space<vmem>>) attributes {dimension_semantics = [#tpu.dimension_semantics<parallel>], iteration_bounds = array<i64: 2>, scalar_prefetch = 0 : i64, scratch_operands = 2 : i64, tpu.core_type = #tpu.core_type<tc>, window_params = [{transform_indices = @transform_0, window_bounds = array<i64: 1, 288, 992>}, {pipeline_mode = #tpu.pipeline_mode<synchronous>, transform_indices = @transform_1, window_bounds = array<i64: 3, 992, 40>}, {pipeline_mode = #tpu.pipeline_mode<synchronous>, transform_indices = @transform_2, window_bounds = array<i64: 1, 40>}, {transform_indices = @transform_3, window_bounds = array<i64: 1, 83, 40>}]} {
    %cst = arith.constant 0.000000e+00 : f32
    %0 = vector.broadcast %cst : f32 to vector<256x40xf32>
    %c0 = arith.constant 0 : index
    %c0_0 = arith.constant 0 : index
    %c0_1 = arith.constant 0 : index
    %1 = vector.load %arg1[%c0, %c0_0, %c0_1] : memref<1x288x992xbf16, #tpu.memory_space<vmem>>, vector<1x256x992xbf16>
    %2 = vector.shape_cast %1 : vector<1x256x992xbf16> to vector<256x992xbf16>
    %c0_2 = arith.constant 0 : index
    %c0_3 = arith.constant 0 : index
    %c0_4 = arith.constant 0 : index
    %3 = vector.load %arg2[%c0_2, %c0_3, %c0_4] : memref<3x992x40xbf16, #tpu.memory_space<vmem>>, vector<1x992x40xbf16>
    %4 = vector.shape_cast %3 : vector<1x992x40xbf16> to vector<992x40xbf16>
    %cst_5 = arith.constant dense<0.000000e+00> : vector<256x40xf32>
    %5 = tpu.matmul %2, %4, %cst_5 {dimension_numbers = #tpu.dot_dimension_numbers<[1], [0], [0], [1], [0, 0, 1, 1], [], []>} : vector<256x992xbf16>, vector<992x40xbf16>, vector<256x40xf32> -> vector<256x40xf32>
    %6 = arith.addf %0, %5 : vector<256x40xf32>
    %c0_6 = arith.constant 0 : index
    %c16 = arith.constant 16 : index
    %c0_7 = arith.constant 0 : index
    %7 = vector.load %arg1[%c0_6, %c16, %c0_7] : memref<1x288x992xbf16, #tpu.memory_space<vmem>>, vector<1x256x992xbf16>
    %8 = vector.shape_cast %7 : vector<1x256x992xbf16> to vector<256x992xbf16>
    %c1 = arith.constant 1 : index
    %c0_8 = arith.constant 0 : index
    %c0_9 = arith.constant 0 : index
    %9 = vector.load %arg2[%c1, %c0_8, %c0_9] : memref<3x992x40xbf16, #tpu.memory_space<vmem>>, vector<1x992x40xbf16>
    %10 = vector.shape_cast %9 : vector<1x992x40xbf16> to vector<992x40xbf16>
    %cst_10 = arith.constant dense<0.000000e+00> : vector<256x40xf32>
    %11 = tpu.matmul %8, %10, %cst_10 {dimension_numbers = #tpu.dot_dimension_numbers<[1], [0], [0], [1], [0, 0, 1, 1], [], []>} : vector<256x992xbf16>, vector<992x40xbf16>, vector<256x40xf32> -> vector<256x40xf32>
    %12 = arith.addf %6, %11 : vector<256x40xf32>
    %c0_11 = arith.constant 0 : index
    %c32 = arith.constant 32 : index
    %c0_12 = arith.constant 0 : index
    %13 = vector.load %arg1[%c0_11, %c32, %c0_12] : memref<1x288x992xbf16, #tpu.memory_space<vmem>>, vector<1x256x992xbf16>
    %14 = vector.shape_cast %13 : vector<1x256x992xbf16> to vector<256x992xbf16>
    %c2 = arith.constant 2 : index
    %c0_13 = arith.constant 0 : index
    %c0_14 = arith.constant 0 : index
    %15 = vector.load %arg2[%c2, %c0_13, %c0_14] : memref<3x992x40xbf16, #tpu.memory_space<vmem>>, vector<1x992x40xbf16>
    %16 = vector.shape_cast %15 : vector<1x992x40xbf16> to vector<992x40xbf16>
    %cst_15 = arith.constant dense<0.000000e+00> : vector<256x40xf32>
    %17 = tpu.matmul %14, %16, %cst_15 {dimension_numbers = #tpu.dot_dimension_numbers<[1], [0], [0], [1], [0, 0, 1, 1], [], []>} : vector<256x992xbf16>, vector<992x40xbf16>, vector<256x40xf32> -> vector<256x40xf32>
    %18 = arith.addf %12, %17 : vector<256x40xf32>
    %c0_16 = arith.constant 0 : index
    %c0_17 = arith.constant 0 : index
    %19 = vector.load %arg3[%c0_16, %c0_17] : memref<1x40xf32, #tpu.memory_space<vmem>>, vector<1x40xf32>
    %20 = vector.broadcast %19 : vector<1x40xf32> to vector<256x40xf32>
    %21 = arith.addf %18, %20 : vector<256x40xf32>
    %cst_18 = arith.constant 0.000000e+00 : f32
    %22 = vector.broadcast %cst_18 : f32 to vector<256x40xf32>
    %23 = arith.cmpf ogt, %21, %22 : vector<256x40xf32>
    %cst_19 = arith.constant 0.000000e+00 : f32
    %24 = vector.broadcast %cst_19 : f32 to vector<256x40xf32>
    %25 = arith.minimumf %21, %24 : vector<256x40xf32>
    %26 = math.exp %25 : vector<256x40xf32>
    %cst_20 = arith.constant 1.000000e+00 : f32
    %27 = vector.broadcast %cst_20 : f32 to vector<256x40xf32>
    %28 = arith.subf %26, %27 : vector<256x40xf32>
    %29 = arith.select %23, %21, %28 : vector<256x40xi1>, vector<256x40xf32>
    %c0_21 = arith.constant 0 : index
    %c0_22 = arith.constant 0 : index
    %30 = vector.load %arg5[%c0_21, %c0_22] : memref<256x40xf32, #tpu.memory_space<vmem>>, vector<256x40xf32>
    tpu.vector_store %arg5[%c0_21, %c0_22], %29 {strides = array<i32>} : memref<256x40xf32, #tpu.memory_space<vmem>>, vector<256x40xf32>,
    %c0_23 = arith.constant 0 : index
    %c0_24 = arith.constant 0 : index
    %31 = vector.load %arg5[%c0_23, %c0_24] : memref<256x40xf32, #tpu.memory_space<vmem>>, vector<254x40xf32>
    %c1_25 = arith.constant 1 : index
    %c0_26 = arith.constant 0 : index
    %32 = vector.load %arg5[%c1_25, %c0_26] : memref<256x40xf32, #tpu.memory_space<vmem>>, vector<254x40xf32>
    %33 = arith.maximumf %31, %32 : vector<254x40xf32>
    %c2_27 = arith.constant 2 : index
    %c0_28 = arith.constant 0 : index
    %34 = vector.load %arg5[%c2_27, %c0_28] : memref<256x40xf32, #tpu.memory_space<vmem>>, vector<254x40xf32>
    %35 = arith.maximumf %33, %34 : vector<254x40xf32>
    %c0_29 = arith.constant 0 : index
    %c0_30 = arith.constant 0 : index
    %36 = vector.load %arg6[%c0_29, %c0_30] : memref<256x40xf32, #tpu.memory_space<vmem>>, vector<254x40xf32>
    tpu.vector_store %arg6[%c0_29, %c0_30], %35 {strides = array<i32>} : memref<256x40xf32, #tpu.memory_space<vmem>>, vector<254x40xf32>,
    %c0_31 = arith.constant 0 : index
    %c0_32 = arith.constant 0 : index
    %37 = tpu.strided_load %arg6[%c0_31, %c0_32] {strides = array<i32: 3, 1>} : memref<256x40xf32, #tpu.memory_space<vmem>>, vector<83x40xf32>
    %c3 = arith.constant 3 : index
    %c0_33 = arith.constant 0 : index
    %38 = tpu.strided_load %arg6[%c3, %c0_33] {strides = array<i32: 3, 1>} : memref<256x40xf32, #tpu.memory_space<vmem>>, vector<83x40xf32>
    %39 = arith.maximumf %37, %38 : vector<83x40xf32>
    %c6 = arith.constant 6 : index
    %c0_34 = arith.constant 0 : index
    %40 = tpu.strided_load %arg6[%c6, %c0_34] {strides = array<i32: 3, 1>} : memref<256x40xf32, #tpu.memory_space<vmem>>, vector<83x40xf32>
    %c7 = arith.constant 7 : index
    %c0_35 = arith.constant 0 : index
    %41 = tpu.strided_load %arg6[%c7, %c0_35] {strides = array<i32: 3, 1>} : memref<256x40xf32, #tpu.memory_space<vmem>>, vector<83x40xf32>
    %42 = arith.maximumf %40, %41 : vector<83x40xf32>
    %43 = arith.maximumf %39, %42 : vector<83x40xf32>
    %44 = arith.truncf %43 : vector<83x40xf32> to vector<83x40xbf16>
    %c0_36 = arith.constant 0 : index
    %c0_37 = arith.constant 0 : index
    %c0_38 = arith.constant 0 : index
    %45 = vector.load %arg4[%c0_36, %c0_37, %c0_38] : memref<1x83x40xbf16, #tpu.memory_space<vmem>>, vector<1x83x40xbf16>
    %46 = vector.shape_cast %45 : vector<1x83x40xbf16> to vector<83x40xbf16>
    %47 = vector.shape_cast %44 : vector<83x40xbf16> to vector<1x83x40xbf16>
    tpu.vector_store %arg4[%c0_36, %c0_37, %c0_38], %47 {strides = array<i32>} : memref<1x83x40xbf16, #tpu.memory_space<vmem>>, vector<1x83x40xbf16>,
    return
  }
  func.func @transform_0(%arg0: i32) -> (i32, i32, i32) {
    %c0_i32 = arith.constant 0 : i32
    %c0_i32_0 = arith.constant 0 : i32
    %c0_i32_1 = arith.constant 0 : i32
    return %arg0, %c0_i32, %c0_i32_0 : i32, i32, i32
  }
  func.func @transform_1(%arg0: i32) -> (i32, i32, i32) {
    %c0_i32 = arith.constant 0 : i32
    %c0_i32_0 = arith.constant 0 : i32
    %c0_i32_1 = arith.constant 0 : i32
    %c0_i32_2 = arith.constant 0 : i32
    return %c0_i32, %c0_i32_0, %c0_i32_1 : i32, i32, i32
  }
  func.func @transform_2(%arg0: i32) -> (i32, i32) {
    %c0_i32 = arith.constant 0 : i32
    %c0_i32_0 = arith.constant 0 : i32
    %c0_i32_1 = arith.constant 0 : i32
    return %c0_i32, %c0_i32_0 : i32, i32
  }
  func.func @transform_3(%arg0: i32) -> (i32, i32, i32) {
    %c0_i32 = arith.constant 0 : i32
    %c0_i32_0 = arith.constant 0 : i32
    %c0_i32_1 = arith.constant 0 : i32
    return %arg0, %c0_i32, %c0_i32_0 : i32, i32, i32
  }
}

module attributes {stable_mosaic.version = 11 : i64} {
  func.func @_mlp_heads_kernel(%arg0: i32, %arg1: memref<2x3320xbf16, #tpu.memory_space<vmem>>, %arg2: memref<3320x256xbf16, #tpu.memory_space<vmem>>, %arg3: memref<1x256xf32, #tpu.memory_space<vmem>>, %arg4: memref<256x4xf32, #tpu.memory_space<vmem>>, %arg5: memref<1x4xf32, #tpu.memory_space<vmem>>, %arg6: memref<2x2xf32, #tpu.memory_space<vmem>>, %arg7: memref<2x2xf32, #tpu.memory_space<vmem>>, %arg8: memref<2x4xf32, #tpu.memory_space<vmem>>) attributes {dimension_semantics = [#tpu.dimension_semantics<arbitrary>], iteration_bounds = array<i64: 4>, scalar_prefetch = 0 : i64, scratch_operands = 1 : i64, tpu.core_type = #tpu.core_type<tc>, window_params = [{pipeline_mode = #tpu.pipeline_mode<synchronous>, transform_indices = @transform_0, window_bounds = array<i64: 2, 3320>}, {transform_indices = @transform_1, window_bounds = array<i64: 3320, 256>}, {transform_indices = @transform_2, window_bounds = array<i64: 1, 256>}, {transform_indices = @transform_3, window_bounds = array<i64: 256, 4>}, {pipeline_mode = #tpu.pipeline_mode<synchronous>, transform_indices = @transform_4, window_bounds = array<i64: 1, 4>}, {pipeline_mode = #tpu.pipeline_mode<synchronous>, transform_indices = @transform_5, window_bounds = array<i64: 2, 2>}, {pipeline_mode = #tpu.pipeline_mode<synchronous>, transform_indices = @transform_6, window_bounds = array<i64: 2, 2>}]} {
    %c0_i32 = arith.constant 0 : i32
    %0 = arith.cmpi eq, %arg0, %c0_i32 : i32
    %1 = arith.extui %0 : i1 to i32
    %c0_i32_0 = arith.constant 0 : i32
    %2 = arith.cmpi ne, %1, %c0_i32_0 : i32
    scf.if %2 {
      %cst_17 = arith.constant 0.000000e+00 : f32
      %25 = vector.broadcast %cst_17 : f32 to vector<2x4xf32>
      %c0_18 = arith.constant 0 : index
      %c0_19 = arith.constant 0 : index
      %26 = vector.load %arg8[%c0_18, %c0_19] : memref<2x4xf32, #tpu.memory_space<vmem>>, vector<2x4xf32>
      tpu.vector_store %arg8[%c0_18, %c0_19], %25 {strides = array<i32>} : memref<2x4xf32, #tpu.memory_space<vmem>>, vector<2x4xf32>,
    } else {
    }
    %c0 = arith.constant 0 : index
    %c0_1 = arith.constant 0 : index
    %3 = vector.load %arg1[%c0, %c0_1] : memref<2x3320xbf16, #tpu.memory_space<vmem>>, vector<2x3320xbf16>
    %c0_2 = arith.constant 0 : index
    %c0_3 = arith.constant 0 : index
    %4 = vector.load %arg2[%c0_2, %c0_3] : memref<3320x256xbf16, #tpu.memory_space<vmem>>, vector<3320x256xbf16>
    %cst = arith.constant dense<0.000000e+00> : vector<2x256xf32>
    %5 = tpu.matmul %3, %4, %cst {dimension_numbers = #tpu.dot_dimension_numbers<[1], [0], [0], [1], [0, 0, 1, 1], [], []>} : vector<2x3320xbf16>, vector<3320x256xbf16>, vector<2x256xf32> -> vector<2x256xf32>
    %c0_4 = arith.constant 0 : index
    %c0_5 = arith.constant 0 : index
    %6 = vector.load %arg3[%c0_4, %c0_5] : memref<1x256xf32, #tpu.memory_space<vmem>>, vector<1x256xf32>
    %7 = vector.broadcast %6 : vector<1x256xf32> to vector<2x256xf32>
    %8 = arith.addf %5, %7 : vector<2x256xf32>
    %cst_6 = arith.constant 0.000000e+00 : f32
    %9 = vector.broadcast %cst_6 : f32 to vector<2x256xf32>
    %10 = arith.cmpf ogt, %8, %9 : vector<2x256xf32>
    %cst_7 = arith.constant 0.000000e+00 : f32
    %11 = vector.broadcast %cst_7 : f32 to vector<2x256xf32>
    %12 = arith.minimumf %8, %11 : vector<2x256xf32>
    %13 = math.exp %12 : vector<2x256xf32>
    %cst_8 = arith.constant 1.000000e+00 : f32
    %14 = vector.broadcast %cst_8 : f32 to vector<2x256xf32>
    %15 = arith.subf %13, %14 : vector<2x256xf32>
    %16 = arith.select %10, %8, %15 : vector<2x256xi1>, vector<2x256xf32>
    %c0_9 = arith.constant 0 : index
    %c0_10 = arith.constant 0 : index
    %17 = vector.load %arg8[%c0_9, %c0_10] : memref<2x4xf32, #tpu.memory_space<vmem>>, vector<2x4xf32>
    %c0_11 = arith.constant 0 : index
    %c0_12 = arith.constant 0 : index
    %18 = vector.load %arg4[%c0_11, %c0_12] : memref<256x4xf32, #tpu.memory_space<vmem>>, vector<256x4xf32>
    %cst_13 = arith.constant dense<0.000000e+00> : vector<2x4xf32>
    %19 = tpu.matmul %16, %18, %cst_13 {dimension_numbers = #tpu.dot_dimension_numbers<[1], [0], [0], [1], [0, 0, 1, 1], [], []>} : vector<2x256xf32>, vector<256x4xf32>, vector<2x4xf32> -> vector<2x4xf32>
    %20 = arith.addf %17, %19 : vector<2x4xf32>
    %c0_14 = arith.constant 0 : index
    %c0_15 = arith.constant 0 : index
    %21 = vector.load %arg8[%c0_14, %c0_15] : memref<2x4xf32, #tpu.memory_space<vmem>>, vector<2x4xf32>
    tpu.vector_store %arg8[%c0_14, %c0_15], %20 {strides = array<i32>} : memref<2x4xf32, #tpu.memory_space<vmem>>, vector<2x4xf32>,
    %c3_i32 = arith.constant 3 : i32
    %22 = arith.cmpi eq, %arg0, %c3_i32 : i32
    %23 = arith.extui %22 : i1 to i32
    %c0_i32_16 = arith.constant 0 : i32
    %24 = arith.cmpi ne, %23, %c0_i32_16 : i32
    scf.if %24 {
      %c0_17 = arith.constant 0 : index
      %c0_18 = arith.constant 0 : index
      %25 = vector.load %arg8[%c0_17, %c0_18] : memref<2x4xf32, #tpu.memory_space<vmem>>, vector<2x4xf32>
      %c0_19 = arith.constant 0 : index
      %c0_20 = arith.constant 0 : index
      %26 = vector.load %arg5[%c0_19, %c0_20] : memref<1x4xf32, #tpu.memory_space<vmem>>, vector<1x4xf32>
      %27 = vector.broadcast %26 : vector<1x4xf32> to vector<2x4xf32>
      %28 = arith.addf %25, %27 : vector<2x4xf32>
      %29 = vector.extract_strided_slice %28 {offsets = [0, 0], sizes = [2, 2], strides = [1, 1]} : vector<2x4xf32> to vector<2x2xf32>
      %cst_21 = arith.constant dense<0xFF800000> : vector<2xf32>
      %30 = vector.multi_reduction <maximumf>, %29, %cst_21 [1] : vector<2x2xf32> to vector<2xf32>
      %31 = vector.shape_cast %30 : vector<2xf32> to vector<2x1xf32>
      %32 = vector.broadcast %31 : vector<2x1xf32> to vector<2x2xf32>
      %33 = arith.subf %29, %32 : vector<2x2xf32>
      %34 = math.exp %33 : vector<2x2xf32>
      %cst_22 = arith.constant dense<0.000000e+00> : vector<2xf32>
      %35 = vector.multi_reduction <add>, %34, %cst_22 [1] : vector<2x2xf32> to vector<2xf32>
      %36 = vector.shape_cast %35 : vector<2xf32> to vector<2x1xf32>
      %37 = math.log %36 : vector<2x1xf32>
      %38 = arith.addf %31, %37 : vector<2x1xf32>
      %39 = vector.broadcast %38 : vector<2x1xf32> to vector<2x2xf32>
      %40 = arith.subf %29, %39 : vector<2x2xf32>
      %c0_23 = arith.constant 0 : index
      %c0_24 = arith.constant 0 : index
      %41 = vector.load %arg6[%c0_23, %c0_24] : memref<2x2xf32, #tpu.memory_space<vmem>>, vector<2x2xf32>
      tpu.vector_store %arg6[%c0_23, %c0_24], %40 {strides = array<i32>} : memref<2x2xf32, #tpu.memory_space<vmem>>, vector<2x2xf32>,
      %42 = vector.extract_strided_slice %28 {offsets = [0, 2], sizes = [2, 2], strides = [1, 1]} : vector<2x4xf32> to vector<2x2xf32>
      %cst_25 = arith.constant dense<0xFF800000> : vector<2xf32>
      %43 = vector.multi_reduction <maximumf>, %42, %cst_25 [1] : vector<2x2xf32> to vector<2xf32>
      %44 = vector.shape_cast %43 : vector<2xf32> to vector<2x1xf32>
      %45 = vector.broadcast %44 : vector<2x1xf32> to vector<2x2xf32>
      %46 = arith.subf %42, %45 : vector<2x2xf32>
      %47 = math.exp %46 : vector<2x2xf32>
      %cst_26 = arith.constant dense<0.000000e+00> : vector<2xf32>
      %48 = vector.multi_reduction <add>, %47, %cst_26 [1] : vector<2x2xf32> to vector<2xf32>
      %49 = vector.shape_cast %48 : vector<2xf32> to vector<2x1xf32>
      %50 = math.log %49 : vector<2x1xf32>
      %51 = arith.addf %44, %50 : vector<2x1xf32>
      %52 = vector.broadcast %51 : vector<2x1xf32> to vector<2x2xf32>
      %53 = arith.subf %42, %52 : vector<2x2xf32>
      %c0_27 = arith.constant 0 : index
      %c0_28 = arith.constant 0 : index
      %54 = vector.load %arg7[%c0_27, %c0_28] : memref<2x2xf32, #tpu.memory_space<vmem>>, vector<2x2xf32>
      tpu.vector_store %arg7[%c0_27, %c0_28], %53 {strides = array<i32>} : memref<2x2xf32, #tpu.memory_space<vmem>>, vector<2x2xf32>,
    } else {
    }
    return
  }
  func.func @transform_0(%arg0: i32) -> (i32, i32) {
    %c0_i32 = arith.constant 0 : i32
    %c0_i32_0 = arith.constant 0 : i32
    %c0_i32_1 = arith.constant 0 : i32
    return %c0_i32, %c0_i32_0 : i32, i32
  }
  func.func @transform_1(%arg0: i32) -> (i32, i32) {
    %c0_i32 = arith.constant 0 : i32
    %c0_i32_0 = arith.constant 0 : i32
    return %c0_i32, %arg0 : i32, i32
  }
  func.func @transform_2(%arg0: i32) -> (i32, i32) {
    %c0_i32 = arith.constant 0 : i32
    %c0_i32_0 = arith.constant 0 : i32
    return %c0_i32, %arg0 : i32, i32
  }
  func.func @transform_3(%arg0: i32) -> (i32, i32) {
    %c0_i32 = arith.constant 0 : i32
    %c0_i32_0 = arith.constant 0 : i32
    return %arg0, %c0_i32 : i32, i32
  }
  func.func @transform_4(%arg0: i32) -> (i32, i32) {
    %c0_i32 = arith.constant 0 : i32
    %c0_i32_0 = arith.constant 0 : i32
    %c0_i32_1 = arith.constant 0 : i32
    return %c0_i32, %c0_i32_0 : i32, i32
  }
  func.func @transform_5(%arg0: i32) -> (i32, i32) {
    %c0_i32 = arith.constant 0 : i32
    %c0_i32_0 = arith.constant 0 : i32
    %c0_i32_1 = arith.constant 0 : i32
    return %c0_i32, %c0_i32_0 : i32, i32
  }
  func.func @transform_6(%arg0: i32) -> (i32, i32) {
    %c0_i32 = arith.constant 0 : i32
    %c0_i32_0 = arith.constant 0 : i32
    %c0_i32_1 = arith.constant 0 : i32
    return %c0_i32, %c0_i32_0 : i32, i32
  }
}

</mosaic_0001>

<bundles_post_ra>
// kernel: base_cnn_mult_forward.3
= control target key start
LH: loop header
LB: loop body
LE: loop exit
PB: predicated region body
PF: predicated region fallthrough
CT: control target
= control target key end

     0   :  { %12 = vsyncpa [#allocation5], 0  ;;  %s8381_s0 = inlined_call_operand.vmem [shape: bf16[2,3320], index: 0, kind: input, shape index: {}]   ;;  %s8382_s1 = inlined_call_operand.vmem [shape: bf16[3320,1024], index: 1, kind: input, shape index: {}]   ;;  %s8383_s2 = inlined_call_operand.vmem [shape: f32[1,1024], index: 2, kind: input, shape index: {}]   ;;  %s8384_s3 = inlined_call_operand.vmem [shape: f32[1024,4], index: 3, kind: input, shape index: {}]   ;;  %s8385_s4 = inlined_call_operand.vmem [shape: f32[1,4], index: 4, kind: input, shape index: {}]   ;;  %s8386_s5 = inlined_call_operand.hbm [shape: f32[2,2], index: 5, kind: output, shape index: {0}]   ;;  %s8387_s6 = inlined_call_operand.hbm [shape: f32[2,2], index: 6, kind: output, shape index: {1}]  }
   0x1   :  { %13 = vsyncpa [#allocation7], 0  ;;  %s6850_s21 = smov 0   ;;  %s6852_s22 = smov 0  }
   0x2   :  { %s6854_s23 = smov 0  }
   0x3 LB: > { %s6866_s24 = sadd.s32 4294967295, %s6808_s23   ;;  %s6869_s25 = sadd.s32 1, %s6808_s23   ;;  %s6808_s23 = sphi %s6854_s23, %s8390_s23   ;;  %s6804_s22 = sphi %s6852_s22, %s8389_s22   ;;  %s6800_s21 = sphi %s6850_s21, %s8388_s21  }
   0x4   : > { %s44_s26 = ssub.s32 %s6808_s23, %s6869_s25  ;;  %s47_s27 = sadd.s32 1, %s6804_s22 }
   0x5   : > { %p45_p0 = scmp.eq.s32.totalorder %s44_s26, 0  ;;  %p54_p1 = scmp.ne.s32.totalorder %s6804_s22, %s6800_s21 }
   0x6   : > { %p55_p2 = scmp.eq.s32.totalorder %s6808_s23, 0  ;;  %p5490_p4 = scmp.ge.s32.totalorder %s6808_s23, 4 }
   0x7   : > { %s6878_s28 = scalar_select %p45_p0, %s6804_s22, %s47_s27  }
   0x8   : > { %p56_p3 = por %p55_p2, %p54_p1  ;;  %201 = sbr.rel (%p5490_p4) target bundleno = 434 (0x1b2), region = 24 }
   0xf   : > { %204 = sbr.rel (!%p56_p3) target bundleno = 434 (0x1b2), region = 28  ;;  %s206_s29 = sand.u32 (%p56_p3), 1, %s6804_s22  }
  0x10   : > { %s5927_s30 = sshll.u32 (%p56_p3), %s6808_s23, 3  ;;  %s6043_s7 = smul.u32 (%p56_p3), 3320, %s206_s29 }
  0x11   : > { %s6886_s10 = scalar_lea.vmem (%p56_p3), %s8382_s1, %s5927_s30 }
  0x12   : > { %v1067_v0 = vld [vmem:[%s6886_s10] sm:$0xff] (%p56_p3)  ;;  %s6894_s11 = scalar_lea.vmem (%p56_p3), [#allocation3], %s6043_s7 }
  0x13   : > { %v1069_v1 = vld [vmem:[%s6886_s10 + $0x20] sm:$0xff] (%p56_p3)  ;;  %1068 = vst [vmem:[%s6894_s11] sm:$0xff] (%p56_p3), %v1067_v0 }
  0x14   : > { %v1071_v2 = vld [vmem:[%s6886_s10 + $0x40] sm:$0xff] (%p56_p3)  ;;  %1070 = vst [vmem:[%s6894_s11 + $0x8] sm:$0xff] (%p56_p3), %v1069_v1 }
  0x15   : > { %v1073_v3 = vld [vmem:[%s6886_s10 + $0x60] sm:$0xff] (%p56_p3)  ;;  %1072 = vst [vmem:[%s6894_s11 + $0x10] sm:$0xff] (%p56_p3), %v1071_v2 }
  0x16   : > { %v1075_v4 = vld [vmem:[%s6886_s10 + $0x80] sm:$0xff]  ;;  %1074 = vst [vmem:[%s6894_s11 + $0x18] sm:$0xff] %v1073_v3 }
  0x17   : > { %v1077_v5 = vld [vmem:[%s6886_s10 + $0xa0] sm:$0xff]  ;;  %1076 = vst [vmem:[%s6894_s11 + $0x20] sm:$0xff] %v1075_v4 }
  0x18   : > { %1078 = vst [vmem:[%s6894_s11 + $0x28] sm:$0xff] %v1077_v5  ;;  %v1079_v6 = vld [vmem:[%s6886_s10 + $0xc0] sm:$0xff] }
  0x19   : > { %v1081_v7 = vld [vmem:[%s6886_s10 + $0xe0] sm:$0xff]  ;;  %1080 = vst [vmem:[%s6894_s11 + $0x30] sm:$0xff] %v1079_v6 }
  0x1a   : > { %v1083_v8 = vld [vmem:[%s6886_s10 + $0x100] sm:$0xff]  ;;  %1082 = vst [vmem:[%s6894_s11 + $0x38] sm:$0xff] %v1081_v7 }
  0x1b   : > { %1084 = vst [vmem:[%s6894_s11 + $0x40] sm:$0xff] %v1083_v8  ;;  %v1085_v9 = vld [vmem:[%s6886_s10 + $0x120] sm:$0xff] }
  0x1c   : > { %v1087_v10 = vld [vmem:[%s6886_s10 + $0x140] sm:$0xff]  ;;  %1086 = vst [vmem:[%s6894_s11 + $0x48] sm:$0xff] %v1085_v9 }
  0x1d   : > { %v1089_v11 = vld [vmem:[%s6886_s10 + $0x160] sm:$0xff]  ;;  %1088 = vst [vmem:[%s6894_s11 + $0x50] sm:$0xff] %v1087_v10 }
  0x1e   : > { %1090 = vst [vmem:[%s6894_s11 + $0x58] sm:$0xff] %v1089_v11  ;;  %v1091_v12 = vld [vmem:[%s6886_s10 + $0x180] sm:$0xff] }
  0x1f   : > { %v1093_v13 = vld [vmem:[%s6886_s10 + $0x1a0] sm:$0xff]  ;;  %1092 = vst [vmem:[%s6894_s11 + $0x60] sm:$0xff] %v1091_v12 }
  0x20   : > { %v1095_v14 = vld [vmem:[%s6886_s10 + $0x1c0] sm:$0xff]  ;;  %1094 = vst [vmem:[%s6894_s11 + $0x68] sm:$0xff] %v1093_v13 }
  0x21   : > { %1096 = vst [vmem:[%s6894_s11 + $0x70] sm:$0xff] %v1095_v14  ;;  %v1097_v15 = vld [vmem:[%s6886_s10 + $0x1e0] sm:$0xff] }
  0x22   : > { %v1099_v16 = vld [vmem:[%s6886_s10 + $0x200] sm:$0xff]  ;;  %1098 = vst [vmem:[%s6894_s11 + $0x78] sm:$0xff] %v1097_v15 }
  0x23   : > { %v1101_v17 = vld [vmem:[%s6886_s10 + $0x220] sm:$0xff]  ;;  %1100 = vst [vmem:[%s6894_s11 + $0x80] sm:$0xff] %v1099_v16 }
  0x24   : > { %1102 = vst [vmem:[%s6894_s11 + $0x88] sm:$0xff] %v1101_v17  ;;  %v1103_v18 = vld [vmem:[%s6886_s10 + $0x240] sm:$0xff] }
  0x25   : > { %v1105_v19 = vld [vmem:[%s6886_s10 + $0x260] sm:$0xff]  ;;  %1104 = vst [vmem:[%s6894_s11 + $0x90] sm:$0xff] %v1103_v18 }
  0x26   : > { %v1107_v20 = vld [vmem:[%s6886_s10 + $0x280] sm:$0xff]  ;;  %1106 = vst [vmem:[%s6894_s11 + $0x98] sm:$0xff] %v1105_v19 }
  0x27   : > { %1108 = vst [vmem:[%s6894_s11 + $0xa0] sm:$0xff] %v1107_v20  ;;  %v1109_v21 = vld [vmem:[%s6886_s10 + $0x2a0] sm:$0xff] }
  0x28   : > { %v1111_v22 = vld [vmem:[%s6886_s10 + $0x2c0] sm:$0xff]  ;;  %1110 = vst [vmem:[%s6894_s11 + $0xa8] sm:$0xff] %v1109_v21 }
  0x29   : > { %v1113_v23 = vld [vmem:[%s6886_s10 + $0x2e0] sm:$0xff]  ;;  %1112 = vst [vmem:[%s6894_s11 + $0xb0] sm:$0xff] %v1111_v22 }
  0x2a   : > { %1114 = vst [vmem:[%s6894_s11 + $0xb8] sm:$0xff] %v1113_v23  ;;  %v1115_v24 = vld [vmem:[%s6886_s10 + $0x300] sm:$0xff] }
  0x2b   : > { %v1117_v25 = vld [vmem:[%s6886_s10 + $0x320] sm:$0xff]  ;;  %1116 = vst [vmem:[%s6894_s11 + $0xc0] sm:$0xff] %v1115_v24 }
  0x2c   : > { %v1119_v26 = vld [vmem:[%s6886_s10 + $0x340] sm:$0xff]  ;;  %1118 = vst [vmem:[%s6894_s11 + $0xc8] sm:$0xff] %v1117_v25 }
  0x2d   : > { %1120 = vst [vmem:[%s6894_s11 + $0xd0] sm:$0xff] %v1119_v26  ;;  %v1121_v27 = vld [vmem:[%s6886_s10 + $0x360] sm:$0xff] }
  0x2e   : > { %v1123_v28 = vld [vmem:[%s6886_s10 + $0x380] sm:$0xff]  ;;  %1122 = vst [vmem:[%s6894_s11 + $0xd8] sm:$0xff] %v1121_v27 }
  0x2f   : > { %v1125_v29 = vld [vmem:[%s6886_s10 + $0x3a0] sm:$0xff]  ;;  %1124 = vst [vmem:[%s6894_s11 + $0xe0] sm:$0xff] %v1123_v28 }
  0x30   : > { %1126 = vst [vmem:[%s6894_s11 + $0xe8] sm:$0xff] %v1125_v29  ;;  %v1127_v30 = vld [vmem:[%s6886_s10 + $0x3c0] sm:$0xff] }
  0x31   : > { %v1129_v31 = vld [vmem:[%s6886_s10 + $0x3e0] sm:$0xff]  ;;  %1128 = vst [vmem:[%s6894_s11 + $0xf0] sm:$0xff] %v1127_v30 }
  0x32   : > { %v1131_v32 = vld [vmem:[%s6886_s10 + $0x400] sm:$0xff]  ;;  %1130 = vst [vmem:[%s6894_s11 + $0xf8] sm:$0xff] %v1129_v31 }
  0x33   : > { %1132 = vst [vmem:[%s6894_s11 + $0x100] sm:$0xff] %v1131_v32  ;;  %v1133_v33 = vld [vmem:[%s6886_s10 + $0x420] sm:$0xff] }
  0x34   : > { %v1135_v34 = vld [vmem:[%s6886_s10 + $0x440] sm:$0xff]  ;;  %1134 = vst [vmem:[%s6894_s11 + $0x108] sm:$0xff] %v1133_v33 }
  0x35   : > { %v1137_v35 = vld [vmem:[%s6886_s10 + $0x460] sm:$0xff]  ;;  %1136 = vst [vmem:[%s6894_s11 + $0x110] sm:$0xff] %v1135_v34 }
  0x36   : > { %1138 = vst [vmem:[%s6894_s11 + $0x118] sm:$0xff] %v1137_v35  ;;  %v1139_v36 = vld [vmem:[%s6886_s10 + $0x480] sm:$0xff] }
  0x37   : > { %v1141_v37 = vld [vmem:[%s6886_s10 + $0x4a0] sm:$0xff]  ;;  %1140 = vst [vmem:[%s6894_s11 + $0x120] sm:$0xff] %v1139_v36 }
  0x38   : > { %v1143_v38 = vld [vmem:[%s6886_s10 + $0x4c0] sm:$0xff]  ;;  %1142 = vst [vmem:[%s6894_s11 + $0x128] sm:$0xff] %v1141_v37 }
  0x39   : > { %1144 = vst [vmem:[%s6894_s11 + $0x130] sm:$0xff] %v1143_v38  ;;  %v1145_v39 = vld [vmem:[%s6886_s10 + $0x4e0] sm:$0xff] }
  0x3a   : > { %v1147_v40 = vld [vmem:[%s6886_s10 + $0x500] sm:$0xff]  ;;  %1146 = vst [vmem:[%s6894_s11 + $0x138] sm:$0xff] %v1145_v39 }
  0x3b   : > { %v1149_v41 = vld [vmem:[%s6886_s10 + $0x520] sm:$0xff]  ;;  %1148 = vst [vmem:[%s6894_s11 + $0x140] sm:$0xff] %v1147_v40 }
  0x3c   : > { %1150 = vst [vmem:[%s6894_s11 + $0x148] sm:$0xff] %v1149_v41  ;;  %v1151_v42 = vld [vmem:[%s6886_s10 + $0x540] sm:$0xff] }
  0x3d   : > { %v1153_v43 = vld [vmem:[%s6886_s10 + $0x560] sm:$0xff]  ;;  %1152 = vst [vmem:[%s6894_s11 + $0x150] sm:$0xff] %v1151_v42 }
  0x3e   : > { %v1155_v44 = vld [vmem:[%s6886_s10 + $0x580] sm:$0xff]  ;;  %1154 = vst [vmem:[%s6894_s11 + $0x158] sm:$0xff] %v1153_v43 }
  0x3f   : > { %1156 = vst [vmem:[%s6894_s11 + $0x160] sm:$0xff] %v1155_v44  ;;  %v1157_v45 = vld [vmem:[%s6886_s10 + $0x5a0] sm:$0xff] }
  0x40   : > { %v1159_v46 = vld [vmem:[%s6886_s10 + $0x5c0] sm:$0xff]  ;;  %1158 = vst [vmem:[%s6894_s11 + $0x168] sm:$0xff] %v1157_v45 }
  0x41   : > { %v1161_v47 = vld [vmem:[%s6886_s10 + $0x5e0] sm:$0xff]  ;;  %1160 = vst [vmem:[%s6894_s11 + $0x170] sm:$0xff] %v1159_v46 }
  0x42   : > { %1162 = vst [vmem:[%s6894_s11 + $0x178] sm:$0xff] %v1161_v47  ;;  %v1163_v48 = vld [vmem:[%s6886_s10 + $0x600] sm:$0xff] }
  0x43   : > { %v1165_v49 = vld [vmem:[%s6886_s10 + $0x620] sm:$0xff]  ;;  %1164 = vst [vmem:[%s6894_s11 + $0x180] sm:$0xff] %v1163_v48 }
  0x44   : > { %v1167_v50 = vld [vmem:[%s6886_s10 + $0x640] sm:$0xff]  ;;  %1166 = vst [vmem:[%s6894_s11 + $0x188] sm:$0xff] %v1165_v49 }
  0x45   : > { %1168 = vst [vmem:[%s6894_s11 + $0x190] sm:$0xff] %v1167_v50  ;;  %v1169_v51 = vld [vmem:[%s6886_s10 + $0x660] sm:$0xff] }
  0x46   : > { %v1171_v52 = vld [vmem:[%s6886_s10 + $0x680] sm:$0xff]  ;;  %1170 = vst [vmem:[%s6894_s11 + $0x198] sm:$0xff] %v1169_v51 }
  0x47   : > { %v1173_v53 = vld [vmem:[%s6886_s10 + $0x6a0] sm:$0xff]  ;;  %1172 = vst [vmem:[%s6894_s11 + $0x1a0] sm:$0xff] %v1171_v52 }
  0x48   : > { %1174 = vst [vmem:[%s6894_s11 + $0x1a8] sm:$0xff] %v1173_v53  ;;  %v1175_v54 = vld [vmem:[%s6886_s10 + $0x6c0] sm:$0xff] }
  0x49   : > { %v1177_v55 = vld [vmem:[%s6886_s10 + $0x6e0] sm:$0xff]  ;;  %1176 = vst [vmem:[%s6894_s11 + $0x1b0] sm:$0xff] %v1175_v54 }
  0x4a   : > { %v1179_v56 = vld [vmem:[%s6886_s10 + $0x700] sm:$0xff]  ;;  %1178 = vst [vmem:[%s6894_s11 + $0x1b8] sm:$0xff] %v1177_v55 }
  0x4b   : > { %1180 = vst [vmem:[%s6894_s11 + $0x1c0] sm:$0xff] %v1179_v56  ;;  %v1181_v57 = vld [vmem:[%s6886_s10 + $0x720] sm:$0xff] }
  0x4c   : > { %v1183_v58 = vld [vmem:[%s6886_s10 + $0x740] sm:$0xff]  ;;  %1182 = vst [vmem:[%s6894_s11 + $0x1c8] sm:$0xff] %v1181_v57 }
  0x4d   : > { %v1185_v59 = vld [vmem:[%s6886_s10 + $0x760] sm:$0xff]  ;;  %1184 = vst [vmem:[%s6894_s11 + $0x1d0] sm:$0xff] %v1183_v58 }
  0x4e   : > { %1186 = vst [vmem:[%s6894_s11 + $0x1d8] sm:$0xff] %v1185_v59  ;;  %v1187_v60 = vld [vmem:[%s6886_s10 + $0x780] sm:$0xff] }
  0x4f   : > { %v1189_v61 = vld [vmem:[%s6886_s10 + $0x7a0] sm:$0xff]  ;;  %1188 = vst [vmem:[%s6894_s11 + $0x1e0] sm:$0xff] %v1187_v60 }
  0x50   : > { %v1191_v62 = vld [vmem:[%s6886_s10 + $0x7c0] sm:$0xff]  ;;  %1190 = vst [vmem:[%s6894_s11 + $0x1e8] sm:$0xff] %v1189_v61 }
  0x51   : > { %1192 = vst [vmem:[%s6894_s11 + $0x1f0] sm:$0xff] %v1191_v62  ;;  %v1193_v63 = vld [vmem:[%s6886_s10 + $0x7e0] sm:$0xff] }
  0x52   : > { %v1195_v0 = vld [vmem:[%s6886_s10 + $0x800] sm:$0xff]  ;;  %1194 = vst [vmem:[%s6894_s11 + $0x1f8] sm:$0xff] %v1193_v63 }
  0x53   : > { %v1197_v1 = vld [vmem:[%s6886_s10 + $0x820] sm:$0xff]  ;;  %1196 = vst [vmem:[%s6894_s11 + $0x200] sm:$0xff] %v1195_v0 }
  0x54   : > { %1198 = vst [vmem:[%s6894_s11 + $0x208] sm:$0xff] %v1197_v1  ;;  %v1199_v2 = vld [vmem:[%s6886_s10 + $0x840] sm:$0xff] }
  0x55   : > { %v1201_v3 = vld [vmem:[%s6886_s10 + $0x860] sm:$0xff]  ;;  %1200 = vst [vmem:[%s6894_s11 + $0x210] sm:$0xff] %v1199_v2 }
  0x56   : > { %v1203_v4 = vld [vmem:[%s6886_s10 + $0x880] sm:$0xff]  ;;  %1202 = vst [vmem:[%s6894_s11 + $0x218] sm:$0xff] %v1201_v3 }
  0x57   : > { %1204 = vst [vmem:[%s6894_s11 + $0x220] sm:$0xff] %v1203_v4  ;;  %v1205_v5 = vld [vmem:[%s6886_s10 + $0x8a0] sm:$0xff] }
  0x58   : > { %v1207_v6 = vld [vmem:[%s6886_s10 + $0x8c0] sm:$0xff]  ;;  %1206 = vst [vmem:[%s6894_s11 + $0x228] sm:$0xff] %v1205_v5 }
  0x59   : > { %v1209_v7 = vld [vmem:[%s6886_s10 + $0x8e0] sm:$0xff]  ;;  %1208 = vst [vmem:[%s6894_s11 + $0x230] sm:$0xff] %v1207_v6 }
  0x5a   : > { %1210 = vst [vmem:[%s6894_s11 + $0x238] sm:$0xff] %v1209_v7  ;;  %v1211_v8 = vld [vmem:[%s6886_s10 + $0x900] sm:$0xff] }
  0x5b   : > { %v1213_v9 = vld [vmem:[%s6886_s10 + $0x920] sm:$0xff]  ;;  %1212 = vst [vmem:[%s6894_s11 + $0x240] sm:$0xff] %v1211_v8 }
  0x5c   : > { %v1215_v10 = vld [vmem:[%s6886_s10 + $0x940] sm:$0xff]  ;;  %1214 = vst [vmem:[%s6894_s11 + $0x248] sm:$0xff] %v1213_v9 }
  0x5d   : > { %1216 = vst [vmem:[%s6894_s11 + $0x250] sm:$0xff] %v1215_v10  ;;  %v1217_v11 = vld [vmem:[%s6886_s10 + $0x960] sm:$0xff] }
  0x5e   : > { %v1219_v12 = vld [vmem:[%s6886_s10 + $0x980] sm:$0xff]  ;;  %1218 = vst [vmem:[%s6894_s11 + $0x258] sm:$0xff] %v1217_v11 }
  0x5f   : > { %v1221_v13 = vld [vmem:[%s6886_s10 + $0x9a0] sm:$0xff]  ;;  %1220 = vst [vmem:[%s6894_s11 + $0x260] sm:$0xff] %v1219_v12 }
  0x60   : > { %1222 = vst [vmem:[%s6894_s11 + $0x268] sm:$0xff] %v1221_v13  ;;  %v1223_v14 = vld [vmem:[%s6886_s10 + $0x9c0] sm:$0xff] }
  0x61   : > { %v1225_v15 = vld [vmem:[%s6886_s10 + $0x9e0] sm:$0xff]  ;;  %1224 = vst [vmem:[%s6894_s11 + $0x270] sm:$0xff] %v1223_v14 }
  0x62   : > { %v1227_v16 = vld [vmem:[%s6886_s10 + $0xa00] sm:$0xff]  ;;  %1226 = vst [vmem:[%s6894_s11 + $0x278] sm:$0xff] %v1225_v15 }
  0x63   : > { %1228 = vst [vmem:[%s6894_s11 + $0x280] sm:$0xff] %v1227_v16  ;;  %v1229_v17 = vld [vmem:[%s6886_s10 + $0xa20] sm:$0xff] }
  0x64   : > { %v1231_v18 = vld [vmem:[%s6886_s10 + $0xa40] sm:$0xff]  ;;  %1230 = vst [vmem:[%s6894_s11 + $0x288] sm:$0xff] %v1229_v17 }
  0x65   : > { %v1233_v19 = vld [vmem:[%s6886_s10 + $0xa60] sm:$0xff]  ;;  %1232 = vst [vmem:[%s6894_s11 + $0x290] sm:$0xff] %v1231_v18 }
  0x66   : > { %1234 = vst [vmem:[%s6894_s11 + $0x298] sm:$0xff] %v1233_v19  ;;  %v1235_v20 = vld [vmem:[%s6886_s10 + $0xa80] sm:$0xff] }
  0x67   : > { %v1237_v21 = vld [vmem:[%s6886_s10 + $0xaa0] sm:$0xff]  ;;  %1236 = vst [vmem:[%s6894_s11 + $0x2a0] sm:$0xff] %v1235_v20 }
  0x68   : > { %v1239_v22 = vld [vmem:[%s6886_s10 + $0xac0] sm:$0xff]  ;;  %1238 = vst [vmem:[%s6894_s11 + $0x2a8] sm:$0xff] %v1237_v21 }
  0x69   : > { %1240 = vst [vmem:[%s6894_s11 + $0x2b0] sm:$0xff] %v1239_v22  ;;  %v1241_v23 = vld [vmem:[%s6886_s10 + $0xae0] sm:$0xff] }
  0x6a   : > { %v1243_v24 = vld [vmem:[%s6886_s10 + $0xb00] sm:$0xff]  ;;  %1242 = vst [vmem:[%s6894_s11 + $0x2b8] sm:$0xff] %v1241_v23 }
  0x6b   : > { %v1245_v25 = vld [vmem:[%s6886_s10 + $0xb20] sm:$0xff]  ;;  %1244 = vst [vmem:[%s6894_s11 + $0x2c0] sm:$0xff] %v1243_v24 }
  0x6c   : > { %1246 = vst [vmem:[%s6894_s11 + $0x2c8] sm:$0xff] %v1245_v25  ;;  %v1247_v26 = vld [vmem:[%s6886_s10 + $0xb40] sm:$0xff] }
  0x6d   : > { %v1249_v27 = vld [vmem:[%s6886_s10 + $0xb60] sm:$0xff]  ;;  %1248 = vst [vmem:[%s6894_s11 + $0x2d0] sm:$0xff] %v1247_v26 }
  0x6e   : > { %v1251_v28 = vld [vmem:[%s6886_s10 + $0xb80] sm:$0xff]  ;;  %1250 = vst [vmem:[%s6894_s11 + $0x2d8] sm:$0xff] %v1249_v27 }
  0x6f   : > { %1252 = vst [vmem:[%s6894_s11 + $0x2e0] sm:$0xff] %v1251_v28  ;;  %v1253_v29 = vld [vmem:[%s6886_s10 + $0xba0] sm:$0xff] }
  0x70   : > { %v1255_v30 = vld [vmem:[%s6886_s10 + $0xbc0] sm:$0xff]  ;;  %1254 = vst [vmem:[%s6894_s11 + $0x2e8] sm:$0xff] %v1253_v29 }
  0x71   : > { %v1257_v31 = vld [vmem:[%s6886_s10 + $0xbe0] sm:$0xff]  ;;  %1256 = vst [vmem:[%s6894_s11 + $0x2f0] sm:$0xff] %v1255_v30 }
  0x72   : > { %1258 = vst [vmem:[%s6894_s11 + $0x2f8] sm:$0xff] %v1257_v31  ;;  %v1259_v32 = vld [vmem:[%s6886_s10 + $0xc00] sm:$0xff] }
  0x73   : > { %v1261_v33 = vld [vmem:[%s6886_s10 + $0xc20] sm:$0xff]  ;;  %1260 = vst [vmem:[%s6894_s11 + $0x300] sm:$0xff] %v1259_v32 }
  0x74   : > { %v1263_v34 = vld [vmem:[%s6886_s10 + $0xc40] sm:$0xff]  ;;  %1262 = vst [vmem:[%s6894_s11 + $0x308] sm:$0xff] %v1261_v33 }
  0x75   : > { %1264 = vst [vmem:[%s6894_s11 + $0x310] sm:$0xff] %v1263_v34  ;;  %v1265_v35 = vld [vmem:[%s6886_s10 + $0xc60] sm:$0xff] }
  0x76   : > { %v1267_v36 = vld [vmem:[%s6886_s10 + $0xc80] sm:$0xff]  ;;  %1266 = vst [vmem:[%s6894_s11 + $0x318] sm:$0xff] %v1265_v35 }
  0x77   : > { %v1269_v37 = vld [vmem:[%s6886_s10 + $0xca0] sm:$0xff]  ;;  %1268 = vst [vmem:[%s6894_s11 + $0x320] sm:$0xff] %v1267_v36 }
  0x78   : > { %1270 = vst [vmem:[%s6894_s11 + $0x328] sm:$0xff] %v1269_v37  ;;  %v1271_v38 = vld [vmem:[%s6886_s10 + $0xcc0] sm:$0xff] }
  0x79   : > { %v1273_v39 = vld [vmem:[%s6886_s10 + $0xce0] sm:$0xff]  ;;  %1272 = vst [vmem:[%s6894_s11 + $0x330] sm:$0xff] %v1271_v38 }
  0x7a   : > { %v1275_v40 = vld [vmem:[%s6886_s10 + $0xd00] sm:$0xff]  ;;  %1274 = vst [vmem:[%s6894_s11 + $0x338] sm:$0xff] %v1273_v39 }
  0x7b   : > { %1276 = vst [vmem:[%s6894_s11 + $0x340] sm:$0xff] %v1275_v40  ;;  %v1277_v41 = vld [vmem:[%s6886_s10 + $0xd20] sm:$0xff] }
  0x7c   : > { %v1279_v42 = vld [vmem:[%s6886_s10 + $0xd40] sm:$0xff]  ;;  %1278 = vst [vmem:[%s6894_s11 + $0x348] sm:$0xff] %v1277_v41 }
  0x7d   : > { %v1281_v43 = vld [vmem:[%s6886_s10 + $0xd60] sm:$0xff]  ;;  %1280 = vst [vmem:[%s6894_s11 + $0x350] sm:$0xff] %v1279_v42 }
  0x7e   : > { %1282 = vst [vmem:[%s6894_s11 + $0x358] sm:$0xff] %v1281_v43  ;;  %v1283_v44 = vld [vmem:[%s6886_s10 + $0xd80] sm:$0xff] }
  0x7f   : > { %v1285_v45 = vld [vmem:[%s6886_s10 + $0xda0] sm:$0xff]  ;;  %1284 = vst [vmem:[%s6894_s11 + $0x360] sm:$0xff] %v1283_v44 }
  0x80   : > { %v1287_v46 = vld [vmem:[%s6886_s10 + $0xdc0] sm:$0xff]  ;;  %1286 = vst [vmem:[%s6894_s11 + $0x368] sm:$0xff] %v1285_v45 }
  0x81   : > { %1288 = vst [vmem:[%s6894_s11 + $0x370] sm:$0xff] %v1287_v46  ;;  %v1289_v47 = vld [vmem:[%s6886_s10 + $0xde0] sm:$0xff] }
  0x82   : > { %v1291_v48 = vld [vmem:[%s6886_s10 + $0xe00] sm:$0xff]  ;;  %1290 = vst [vmem:[%s6894_s11 + $0x378] sm:$0xff] %v1289_v47 }
  0x83   : > { %v1293_v49 = vld [vmem:[%s6886_s10 + $0xe20] sm:$0xff]  ;;  %1292 = vst [vmem:[%s6894_s11 + $0x380] sm:$0xff] %v1291_v48 }
  0x84   : > { %1294 = vst [vmem:[%s6894_s11 + $0x388] sm:$0xff] %v1293_v49  ;;  %v1295_v50 = vld [vmem:[%s6886_s10 + $0xe40] sm:$0xff] }
  0x85   : > { %v1297_v51 = vld [vmem:[%s6886_s10 + $0xe60] sm:$0xff]  ;;  %1296 = vst [vmem:[%s6894_s11 + $0x390] sm:$0xff] %v1295_v50 }
  0x86   : > { %v1299_v52 = vld [vmem:[%s6886_s10 + $0xe80] sm:$0xff]  ;;  %1298 = vst [vmem:[%s6894_s11 + $0x398] sm:$0xff] %v1297_v51 }
  0x87   : > { %1300 = vst [vmem:[%s6894_s11 + $0x3a0] sm:$0xff] %v1299_v52  ;;  %v1301_v53 = vld [vmem:[%s6886_s10 + $0xea0] sm:$0xff] }
  0x88   : > { %v1303_v54 = vld [vmem:[%s6886_s10 + $0xec0] sm:$0xff]  ;;  %1302 = vst [vmem:[%s6894_s11 + $0x3a8] sm:$0xff] %v1301_v53 }
  0x89   : > { %v1305_v55 = vld [vmem:[%s6886_s10 + $0xee0] sm:$0xff]  ;;  %1304 = vst [vmem:[%s6894_s11 + $0x3b0] sm:$0xff] %v1303_v54 }
  0x8a   : > { %1306 = vst [vmem:[%s6894_s11 + $0x3b8] sm:$0xff] %v1305_v55  ;;  %v1307_v56 = vld [vmem:[%s6886_s10 + $0xf00] sm:$0xff] }
  0x8b   : > { %v1309_v57 = vld [vmem:[%s6886_s10 + $0xf20] sm:$0xff]  ;;  %1308 = vst [vmem:[%s6894_s11 + $0x3c0] sm:$0xff] %v1307_v56 }
  0x8c   : > { %v1311_v58 = vld [vmem:[%s6886_s10 + $0xf40] sm:$0xff]  ;;  %1310 = vst [vmem:[%s6894_s11 + $0x3c8] sm:$0xff] %v1309_v57 }
  0x8d   : > { %1312 = vst [vmem:[%s6894_s11 + $0x3d0] sm:$0xff] %v1311_v58  ;;  %v1313_v59 = vld [vmem:[%s6886_s10 + $0xf60] sm:$0xff] }
  0x8e   : > { %v1315_v60 = vld [vmem:[%s6886_s10 + $0xf80] sm:$0xff]  ;;  %1314 = vst [vmem:[%s6894_s11 + $0x3d8] sm:$0xff] %v1313_v59 }
  0x8f   : > { %v1317_v61 = vld [vmem:[%s6886_s10 + $0xfa0] sm:$0xff]  ;;  %1316 = vst [vmem:[%s6894_s11 + $0x3e0] sm:$0xff] %v1315_v60 }
  0x90   : > { %1318 = vst [vmem:[%s6894_s11 + $0x3e8] sm:$0xff] %v1317_v61  ;;  %v1319_v62 = vld [vmem:[%s6886_s10 + $0xfc0] sm:$0xff] }
  0x91   : > { %v1321_v63 = vld [vmem:[%s6886_s10 + $0xfe0] sm:$0xff]  ;;  %1320 = vst [vmem:[%s6894_s11 + $0x3f0] sm:$0xff] %v1319_v62 }
  0x92   : > { %v1323_v0 = vld [vmem:[%s6886_s10 + $0x1000] sm:$0xff]  ;;  %1322 = vst [vmem:[%s6894_s11 + $0x3f8] sm:$0xff] %v1321_v63 }
  0x93   : > { %1324 = vst [vmem:[%s6894_s11 + $0x400] sm:$0xff] %v1323_v0  ;;  %v1325_v1 = vld [vmem:[%s6886_s10 + $0x1020] sm:$0xff] }
  0x94   : > { %v1327_v2 = vld [vmem:[%s6886_s10 + $0x1040] sm:$0xff]  ;;  %1326 = vst [vmem:[%s6894_s11 + $0x408] sm:$0xff] %v1325_v1 }
  0x95   : > { %v1329_v3 = vld [vmem:[%s6886_s10 + $0x1060] sm:$0xff]  ;;  %1328 = vst [vmem:[%s6894_s11 + $0x410] sm:$0xff] %v1327_v2 }
  0x96   : > { %1330 = vst [vmem:[%s6894_s11 + $0x418] sm:$0xff] %v1329_v3  ;;  %v1331_v4 = vld [vmem:[%s6886_s10 + $0x1080] sm:$0xff] }
  0x97   : > { %v1333_v5 = vld [vmem:[%s6886_s10 + $0x10a0] sm:$0xff]  ;;  %1332 = vst [vmem:[%s6894_s11 + $0x420] sm:$0xff] %v1331_v4 }
  0x98   : > { %v1335_v6 = vld [vmem:[%s6886_s10 + $0x10c0] sm:$0xff]  ;;  %1334 = vst [vmem:[%s6894_s11 + $0x428] sm:$0xff] %v1333_v5 }
  0x99   : > { %1336 = vst [vmem:[%s6894_s11 + $0x430] sm:$0xff] %v1335_v6  ;;  %v1337_v7 = vld [vmem:[%s6886_s10 + $0x10e0] sm:$0xff] }
  0x9a   : > { %v1339_v8 = vld [vmem:[%s6886_s10 + $0x1100] sm:$0xff]  ;;  %1338 = vst [vmem:[%s6894_s11 + $0x438] sm:$0xff] %v1337_v7 }
  0x9b   : > { %v1341_v9 = vld [vmem:[%s6886_s10 + $0x1120] sm:$0xff]  ;;  %1340 = vst [vmem:[%s6894_s11 + $0x440] sm:$0xff] %v1339_v8 }
  0x9c   : > { %1342 = vst [vmem:[%s6894_s11 + $0x448] sm:$0xff] %v1341_v9  ;;  %v1343_v10 = vld [vmem:[%s6886_s10 + $0x1140] sm:$0xff] }
  0x9d   : > { %v1345_v11 = vld [vmem:[%s6886_s10 + $0x1160] sm:$0xff]  ;;  %1344 = vst [vmem:[%s6894_s11 + $0x450] sm:$0xff] %v1343_v10 }
  0x9e   : > { %v1347_v12 = vld [vmem:[%s6886_s10 + $0x1180] sm:$0xff]  ;;  %1346 = vst [vmem:[%s6894_s11 + $0x458] sm:$0xff] %v1345_v11 }
  0x9f   : > { %1348 = vst [vmem:[%s6894_s11 + $0x460] sm:$0xff] %v1347_v12  ;;  %v1349_v13 = vld [vmem:[%s6886_s10 + $0x11a0] sm:$0xff] }
  0xa0   : > { %v1351_v14 = vld [vmem:[%s6886_s10 + $0x11c0] sm:$0xff]  ;;  %1350 = vst [vmem:[%s6894_s11 + $0x468] sm:$0xff] %v1349_v13 }
  0xa1   : > { %v1353_v15 = vld [vmem:[%s6886_s10 + $0x11e0] sm:$0xff]  ;;  %1352 = vst [vmem:[%s6894_s11 + $0x470] sm:$0xff] %v1351_v14 }
  0xa2   : > { %1354 = vst [vmem:[%s6894_s11 + $0x478] sm:$0xff] %v1353_v15  ;;  %v1355_v16 = vld [vmem:[%s6886_s10 + $0x1200] sm:$0xff] }
  0xa3   : > { %v1357_v17 = vld [vmem:[%s6886_s10 + $0x1220] sm:$0xff]  ;;  %1356 = vst [vmem:[%s6894_s11 + $0x480] sm:$0xff] %v1355_v16 }
  0xa4   : > { %v1359_v18 = vld [vmem:[%s6886_s10 + $0x1240] sm:$0xff]  ;;  %1358 = vst [vmem:[%s6894_s11 + $0x488] sm:$0xff] %v1357_v17 }
  0xa5   : > { %1360 = vst [vmem:[%s6894_s11 + $0x490] sm:$0xff] %v1359_v18  ;;  %v1361_v19 = vld [vmem:[%s6886_s10 + $0x1260] sm:$0xff] }
  0xa6   : > { %v1363_v20 = vld [vmem:[%s6886_s10 + $0x1280] sm:$0xff]  ;;  %1362 = vst [vmem:[%s6894_s11 + $0x498] sm:$0xff] %v1361_v19 }
  0xa7   : > { %v1365_v21 = vld [vmem:[%s6886_s10 + $0x12a0] sm:$0xff]  ;;  %1364 = vst [vmem:[%s6894_s11 + $0x4a0] sm:$0xff] %v1363_v20 }
  0xa8   : > { %1366 = vst [vmem:[%s6894_s11 + $0x4a8] sm:$0xff] %v1365_v21  ;;  %v1367_v22 = vld [vmem:[%s6886_s10 + $0x12c0] sm:$0xff] }
  0xa9   : > { %v1369_v23 = vld [vmem:[%s6886_s10 + $0x12e0] sm:$0xff]  ;;  %1368 = vst [vmem:[%s6894_s11 + $0x4b0] sm:$0xff] %v1367_v22 }
  0xaa   : > { %v1371_v24 = vld [vmem:[%s6886_s10 + $0x1300] sm:$0xff]  ;;  %1370 = vst [vmem:[%s6894_s11 + $0x4b8] sm:$0xff] %v1369_v23 }
  0xab   : > { %1372 = vst [vmem:[%s6894_s11 + $0x4c0] sm:$0xff] %v1371_v24  ;;  %v1373_v25 = vld [vmem:[%s6886_s10 + $0x1320] sm:$0xff] }
  0xac   : > { %v1375_v26 = vld [vmem:[%s6886_s10 + $0x1340] sm:$0xff]  ;;  %1374 = vst [vmem:[%s6894_s11 + $0x4c8] sm:$0xff] %v1373_v25 }
  0xad   : > { %v1377_v27 = vld [vmem:[%s6886_s10 + $0x1360] sm:$0xff]  ;;  %1376 = vst [vmem:[%s6894_s11 + $0x4d0] sm:$0xff] %v1375_v26 }
  0xae   : > { %1378 = vst [vmem:[%s6894_s11 + $0x4d8] sm:$0xff] %v1377_v27  ;;  %v1379_v28 = vld [vmem:[%s6886_s10 + $0x1380] sm:$0xff] }
  0xaf   : > { %v1381_v29 = vld [vmem:[%s6886_s10 + $0x13a0] sm:$0xff]  ;;  %1380 = vst [vmem:[%s6894_s11 + $0x4e0] sm:$0xff] %v1379_v28 }
  0xb0   : > { %v1383_v30 = vld [vmem:[%s6886_s10 + $0x13c0] sm:$0xff]  ;;  %1382 = vst [vmem:[%s6894_s11 + $0x4e8] sm:$0xff] %v1381_v29 }
  0xb1   : > { %1384 = vst [vmem:[%s6894_s11 + $0x4f0] sm:$0xff] %v1383_v30  ;;  %v1385_v31 = vld [vmem:[%s6886_s10 + $0x13e0] sm:$0xff] }
  0xb2   : > { %v1387_v32 = vld [vmem:[%s6886_s10 + $0x1400] sm:$0xff]  ;;  %1386 = vst [vmem:[%s6894_s11 + $0x4f8] sm:$0xff] %v1385_v31 }
  0xb3   : > { %v1389_v33 = vld [vmem:[%s6886_s10 + $0x1420] sm:$0xff]  ;;  %1388 = vst [vmem:[%s6894_s11 + $0x500] sm:$0xff] %v1387_v32 }
  0xb4   : > { %1390 = vst [vmem:[%s6894_s11 + $0x508] sm:$0xff] %v1389_v33  ;;  %v1391_v34 = vld [vmem:[%s6886_s10 + $0x1440] sm:$0xff] }
  0xb5   : > { %v1393_v35 = vld [vmem:[%s6886_s10 + $0x1460] sm:$0xff]  ;;  %1392 = vst [vmem:[%s6894_s11 + $0x510] sm:$0xff] %v1391_v34 }
  0xb6   : > { %v1395_v36 = vld [vmem:[%s6886_s10 + $0x1480] sm:$0xff]  ;;  %1394 = vst [vmem:[%s6894_s11 + $0x518] sm:$0xff] %v1393_v35 }
  0xb7   : > { %1396 = vst [vmem:[%s6894_s11 + $0x520] sm:$0xff] %v1395_v36  ;;  %v1397_v37 = vld [vmem:[%s6886_s10 + $0x14a0] sm:$0xff] }
  0xb8   : > { %v1399_v38 = vld [vmem:[%s6886_s10 + $0x14c0] sm:$0xff]  ;;  %1398 = vst [vmem:[%s6894_s11 + $0x528] sm:$0xff] %v1397_v37 }
  0xb9   : > { %v1401_v39 = vld [vmem:[%s6886_s10 + $0x14e0] sm:$0xff]  ;;  %1400 = vst [vmem:[%s6894_s11 + $0x530] sm:$0xff] %v1399_v38 }
  0xba   : > { %1402 = vst [vmem:[%s6894_s11 + $0x538] sm:$0xff] %v1401_v39  ;;  %v1403_v40 = vld [vmem:[%s6886_s10 + $0x1500] sm:$0xff] }
  0xbb   : > { %v1405_v41 = vld [vmem:[%s6886_s10 + $0x1520] sm:$0xff]  ;;  %1404 = vst [vmem:[%s6894_s11 + $0x540] sm:$0xff] %v1403_v40 }
  0xbc   : > { %v1407_v42 = vld [vmem:[%s6886_s10 + $0x1540] sm:$0xff]  ;;  %1406 = vst [vmem:[%s6894_s11 + $0x548] sm:$0xff] %v1405_v41 }
  0xbd   : > { %1408 = vst [vmem:[%s6894_s11 + $0x550] sm:$0xff] %v1407_v42  ;;  %v1409_v43 = vld [vmem:[%s6886_s10 + $0x1560] sm:$0xff] }
  0xbe   : > { %v1411_v44 = vld [vmem:[%s6886_s10 + $0x1580] sm:$0xff]  ;;  %1410 = vst [vmem:[%s6894_s11 + $0x558] sm:$0xff] %v1409_v43 }
  0xbf   : > { %v1413_v45 = vld [vmem:[%s6886_s10 + $0x15a0] sm:$0xff]  ;;  %1412 = vst [vmem:[%s6894_s11 + $0x560] sm:$0xff] %v1411_v44 }
  0xc0   : > { %1414 = vst [vmem:[%s6894_s11 + $0x568] sm:$0xff] %v1413_v45  ;;  %v1415_v46 = vld [vmem:[%s6886_s10 + $0x15c0] sm:$0xff] }
  0xc1   : > { %v1417_v47 = vld [vmem:[%s6886_s10 + $0x15e0] sm:$0xff]  ;;  %1416 = vst [vmem:[%s6894_s11 + $0x570] sm:$0xff] %v1415_v46 }
  0xc2   : > { %v1419_v48 = vld [vmem:[%s6886_s10 + $0x1600] sm:$0xff]  ;;  %1418 = vst [vmem:[%s6894_s11 + $0x578] sm:$0xff] %v1417_v47 }
  0xc3   : > { %1420 = vst [vmem:[%s6894_s11 + $0x580] sm:$0xff] %v1419_v48  ;;  %v1421_v49 = vld [vmem:[%s6886_s10 + $0x1620] sm:$0xff] }
  0xc4   : > { %v1423_v50 = vld [vmem:[%s6886_s10 + $0x1640] sm:$0xff]  ;;  %1422 = vst [vmem:[%s6894_s11 + $0x588] sm:$0xff] %v1421_v49 }
  0xc5   : > { %v1425_v51 = vld [vmem:[%s6886_s10 + $0x1660] sm:$0xff]  ;;  %1424 = vst [vmem:[%s6894_s11 + $0x590] sm:$0xff] %v1423_v50 }
  0xc6   : > { %1426 = vst [vmem:[%s6894_s11 + $0x598] sm:$0xff] %v1425_v51  ;;  %v1427_v52 = vld [vmem:[%s6886_s10 + $0x1680] sm:$0xff] }
  0xc7   : > { %v1429_v53 = vld [vmem:[%s6886_s10 + $0x16a0] sm:$0xff]  ;;  %1428 = vst [vmem:[%s6894_s11 + $0x5a0] sm:$0xff] %v1427_v52 }
  0xc8   : > { %v1431_v54 = vld [vmem:[%s6886_s10 + $0x16c0] sm:$0xff]  ;;  %1430 = vst [vmem:[%s6894_s11 + $0x5a8] sm:$0xff] %v1429_v53 }
  0xc9   : > { %1432 = vst [vmem:[%s6894_s11 + $0x5b0] sm:$0xff] %v1431_v54  ;;  %v1433_v55 = vld [vmem:[%s6886_s10 + $0x16e0] sm:$0xff] }
  0xca   : > { %v1435_v56 = vld [vmem:[%s6886_s10 + $0x1700] sm:$0xff]  ;;  %1434 = vst [vmem:[%s6894_s11 + $0x5b8] sm:$0xff] %v1433_v55 }
  0xcb   : > { %v1437_v57 = vld [vmem:[%s6886_s10 + $0x1720] sm:$0xff]  ;;  %1436 = vst [vmem:[%s6894_s11 + $0x5c0] sm:$0xff] %v1435_v56 }
  0xcc   : > { %1438 = vst [vmem:[%s6894_s11 + $0x5c8] sm:$0xff] %v1437_v57  ;;  %v1439_v58 = vld [vmem:[%s6886_s10 + $0x1740] sm:$0xff] }
  0xcd   : > { %v1441_v59 = vld [vmem:[%s6886_s10 + $0x1760] sm:$0xff]  ;;  %1440 = vst [vmem:[%s6894_s11 + $0x5d0] sm:$0xff] %v1439_v58 }
  0xce   : > { %v1443_v60 = vld [vmem:[%s6886_s10 + $0x1780] sm:$0xff]  ;;  %1442 = vst [vmem:[%s6894_s11 + $0x5d8] sm:$0xff] %v1441_v59 }
  0xcf   : > { %1444 = vst [vmem:[%s6894_s11 + $0x5e0] sm:$0xff] %v1443_v60  ;;  %v1445_v61 = vld [vmem:[%s6886_s10 + $0x17a0] sm:$0xff] }
  0xd0   : > { %v1447_v62 = vld [vmem:[%s6886_s10 + $0x17c0] sm:$0xff]  ;;  %1446 = vst [vmem:[%s6894_s11 + $0x5e8] sm:$0xff] %v1445_v61 }
  0xd1   : > { %v1449_v63 = vld [vmem:[%s6886_s10 + $0x17e0] sm:$0xff]  ;;  %1448 = vst [vmem:[%s6894_s11 + $0x5f0] sm:$0xff] %v1447_v62 }
  0xd2   : > { %1450 = vst [vmem:[%s6894_s11 + $0x5f8] sm:$0xff] %v1449_v63  ;;  %v1451_v0 = vld [vmem:[%s6886_s10 + $0x1800] sm:$0xff] }
  0xd3   : > { %v1453_v1 = vld [vmem:[%s6886_s10 + $0x1820] sm:$0xff]  ;;  %1452 = vst [vmem:[%s6894_s11 + $0x600] sm:$0xff] %v1451_v0 }
  0xd4   : > { %v1455_v2 = vld [vmem:[%s6886_s10 + $0x1840] sm:$0xff]  ;;  %1454 = vst [vmem:[%s6894_s11 + $0x608] sm:$0xff] %v1453_v1 }
  0xd5   : > { %1456 = vst [vmem:[%s6894_s11 + $0x610] sm:$0xff] %v1455_v2  ;;  %v1457_v3 = vld [vmem:[%s6886_s10 + $0x1860] sm:$0xff] }
  0xd6   : > { %v1459_v4 = vld [vmem:[%s6886_s10 + $0x1880] sm:$0xff]  ;;  %1458 = vst [vmem:[%s6894_s11 + $0x618] sm:$0xff] %v1457_v3 }
  0xd7   : > { %v1461_v5 = vld [vmem:[%s6886_s10 + $0x18a0] sm:$0xff]  ;;  %1460 = vst [vmem:[%s6894_s11 + $0x620] sm:$0xff] %v1459_v4 }
  0xd8   : > { %1462 = vst [vmem:[%s6894_s11 + $0x628] sm:$0xff] %v1461_v5  ;;  %v1463_v6 = vld [vmem:[%s6886_s10 + $0x18c0] sm:$0xff] }
  0xd9   : > { %v1465_v7 = vld [vmem:[%s6886_s10 + $0x18e0] sm:$0xff]  ;;  %1464 = vst [vmem:[%s6894_s11 + $0x630] sm:$0xff] %v1463_v6 }
  0xda   : > { %v1467_v8 = vld [vmem:[%s6886_s10 + $0x1900] sm:$0xff]  ;;  %1466 = vst [vmem:[%s6894_s11 + $0x638] sm:$0xff] %v1465_v7 }
  0xdb   : > { %1468 = vst [vmem:[%s6894_s11 + $0x640] sm:$0xff] %v1467_v8  ;;  %v1469_v9 = vld [vmem:[%s6886_s10 + $0x1920] sm:$0xff] }
  0xdc   : > { %v1471_v10 = vld [vmem:[%s6886_s10 + $0x1940] sm:$0xff]  ;;  %1470 = vst [vmem:[%s6894_s11 + $0x648] sm:$0xff] %v1469_v9 }
  0xdd   : > { %v1473_v11 = vld [vmem:[%s6886_s10 + $0x1960] sm:$0xff]  ;;  %1472 = vst [vmem:[%s6894_s11 + $0x650] sm:$0xff] %v1471_v10 }
  0xde   : > { %1474 = vst [vmem:[%s6894_s11 + $0x658] sm:$0xff] %v1473_v11  ;;  %v1475_v12 = vld [vmem:[%s6886_s10 + $0x1980] sm:$0xff] }
  0xdf   : > { %v1477_v13 = vld [vmem:[%s6886_s10 + $0x19a0] sm:$0xff]  ;;  %1476 = vst [vmem:[%s6894_s11 + $0x660] sm:$0xff] %v1475_v12 }
  0xe0   : > { %v1479_v14 = vld [vmem:[%s6886_s10 + $0x19c0] sm:$0xff]  ;;  %1478 = vst [vmem:[%s6894_s11 + $0x668] sm:$0xff] %v1477_v13 }
  0xe1   : > { %1480 = vst [vmem:[%s6894_s11 + $0x670] sm:$0xff] %v1479_v14  ;;  %v1481_v15 = vld [vmem:[%s6886_s10 + $0x19e0] sm:$0xff] }
  0xe2   : > { %v1483_v16 = vld [vmem:[%s6886_s10 + $0x1a00] sm:$0xff]  ;;  %1482 = vst [vmem:[%s6894_s11 + $0x678] sm:$0xff] %v1481_v15 }
  0xe3   : > { %v1485_v17 = vld [vmem:[%s6886_s10 + $0x1a20] sm:$0xff]  ;;  %1484 = vst [vmem:[%s6894_s11 + $0x680] sm:$0xff] %v1483_v16 }
  0xe4   : > { %1486 = vst [vmem:[%s6894_s11 + $0x688] sm:$0xff] %v1485_v17  ;;  %v1487_v18 = vld [vmem:[%s6886_s10 + $0x1a40] sm:$0xff] }
  0xe5   : > { %v1489_v19 = vld [vmem:[%s6886_s10 + $0x1a60] sm:$0xff]  ;;  %1488 = vst [vmem:[%s6894_s11 + $0x690] sm:$0xff] %v1487_v18 }
  0xe6   : > { %v1491_v20 = vld [vmem:[%s6886_s10 + $0x1a80] sm:$0xff]  ;;  %1490 = vst [vmem:[%s6894_s11 + $0x698] sm:$0xff] %v1489_v19 }
  0xe7   : > { %1492 = vst [vmem:[%s6894_s11 + $0x6a0] sm:$0xff] %v1491_v20  ;;  %v1493_v21 = vld [vmem:[%s6886_s10 + $0x1aa0] sm:$0xff] }
  0xe8   : > { %v1495_v22 = vld [vmem:[%s6886_s10 + $0x1ac0] sm:$0xff]  ;;  %1494 = vst [vmem:[%s6894_s11 + $0x6a8] sm:$0xff] %v1493_v21 }
  0xe9   : > { %v1497_v23 = vld [vmem:[%s6886_s10 + $0x1ae0] sm:$0xff]  ;;  %1496 = vst [vmem:[%s6894_s11 + $0x6b0] sm:$0xff] %v1495_v22 }
  0xea   : > { %1498 = vst [vmem:[%s6894_s11 + $0x6b8] sm:$0xff] %v1497_v23  ;;  %v1499_v24 = vld [vmem:[%s6886_s10 + $0x1b00] sm:$0xff] }
  0xeb   : > { %v1501_v25 = vld [vmem:[%s6886_s10 + $0x1b20] sm:$0xff]  ;;  %1500 = vst [vmem:[%s6894_s11 + $0x6c0] sm:$0xff] %v1499_v24 }
  0xec   : > { %v1503_v26 = vld [vmem:[%s6886_s10 + $0x1b40] sm:$0xff]  ;;  %1502 = vst [vmem:[%s6894_s11 + $0x6c8] sm:$0xff] %v1501_v25 }
  0xed   : > { %1504 = vst [vmem:[%s6894_s11 + $0x6d0] sm:$0xff] %v1503_v26  ;;  %v1505_v27 = vld [vmem:[%s6886_s10 + $0x1b60] sm:$0xff] }
  0xee   : > { %v1507_v28 = vld [vmem:[%s6886_s10 + $0x1b80] sm:$0xff]  ;;  %1506 = vst [vmem:[%s6894_s11 + $0x6d8] sm:$0xff] %v1505_v27 }
  0xef   : > { %v1509_v29 = vld [vmem:[%s6886_s10 + $0x1ba0] sm:$0xff]  ;;  %1508 = vst [vmem:[%s6894_s11 + $0x6e0] sm:$0xff] %v1507_v28 }
  0xf0   : > { %1510 = vst [vmem:[%s6894_s11 + $0x6e8] sm:$0xff] %v1509_v29  ;;  %v1511_v30 = vld [vmem:[%s6886_s10 + $0x1bc0] sm:$0xff] }
  0xf1   : > { %v1513_v31 = vld [vmem:[%s6886_s10 + $0x1be0] sm:$0xff]  ;;  %1512 = vst [vmem:[%s6894_s11 + $0x6f0] sm:$0xff] %v1511_v30 }
  0xf2   : > { %v1515_v32 = vld [vmem:[%s6886_s10 + $0x1c00] sm:$0xff]  ;;  %1514 = vst [vmem:[%s6894_s11 + $0x6f8] sm:$0xff] %v1513_v31 }
  0xf3   : > { %1516 = vst [vmem:[%s6894_s11 + $0x700] sm:$0xff] %v1515_v32  ;;  %v1517_v33 = vld [vmem:[%s6886_s10 + $0x1c20] sm:$0xff] }
  0xf4   : > { %v1519_v34 = vld [vmem:[%s6886_s10 + $0x1c40] sm:$0xff]  ;;  %1518 = vst [vmem:[%s6894_s11 + $0x708] sm:$0xff] %v1517_v33 }
  0xf5   : > { %v1521_v35 = vld [vmem:[%s6886_s10 + $0x1c60] sm:$0xff]  ;;  %1520 = vst [vmem:[%s6894_s11 + $0x710] sm:$0xff] %v1519_v34 }
  0xf6   : > { %1522 = vst [vmem:[%s6894_s11 + $0x718] sm:$0xff] %v1521_v35  ;;  %v1523_v36 = vld [vmem:[%s6886_s10 + $0x1c80] sm:$0xff] }
  0xf7   : > { %v1525_v37 = vld [vmem:[%s6886_s10 + $0x1ca0] sm:$0xff]  ;;  %1524 = vst [vmem:[%s6894_s11 + $0x720] sm:$0xff] %v1523_v36 }
  0xf8   : > { %v1527_v38 = vld [vmem:[%s6886_s10 + $0x1cc0] sm:$0xff]  ;;  %1526 = vst [vmem:[%s6894_s11 + $0x728] sm:$0xff] %v1525_v37 }
  0xf9   : > { %1528 = vst [vmem:[%s6894_s11 + $0x730] sm:$0xff] %v1527_v38  ;;  %v1529_v39 = vld [vmem:[%s6886_s10 + $0x1ce0] sm:$0xff] }
  0xfa   : > { %v1531_v40 = vld [vmem:[%s6886_s10 + $0x1d00] sm:$0xff]  ;;  %1530 = vst [vmem:[%s6894_s11 + $0x738] sm:$0xff] %v1529_v39 }
  0xfb   : > { %v1533_v41 = vld [vmem:[%s6886_s10 + $0x1d20] sm:$0xff]  ;;  %1532 = vst [vmem:[%s6894_s11 + $0x740] sm:$0xff] %v1531_v40 }
  0xfc   : > { %1534 = vst [vmem:[%s6894_s11 + $0x748] sm:$0xff] %v1533_v41  ;;  %v1535_v42 = vld [vmem:[%s6886_s10 + $0x1d40] sm:$0xff] }
  0xfd   : > { %v1537_v43 = vld [vmem:[%s6886_s10 + $0x1d60] sm:$0xff]  ;;  %1536 = vst [vmem:[%s6894_s11 + $0x750] sm:$0xff] %v1535_v42 }
  0xfe   : > { %v1539_v44 = vld [vmem:[%s6886_s10 + $0x1d80] sm:$0xff]  ;;  %1538 = vst [vmem:[%s6894_s11 + $0x758] sm:$0xff] %v1537_v43 }
  0xff   : > { %1540 = vst [vmem:[%s6894_s11 + $0x760] sm:$0xff] %v1539_v44  ;;  %v1541_v45 = vld [vmem:[%s6886_s10 + $0x1da0] sm:$0xff] }
 0x100   : > { %v1543_v46 = vld [vmem:[%s6886_s10 + $0x1dc0] sm:$0xff]  ;;  %1542 = vst [vmem:[%s6894_s11 + $0x768] sm:$0xff] %v1541_v45 }
 0x101   : > { %v1545_v47 = vld [vmem:[%s6886_s10 + $0x1de0] sm:$0xff]  ;;  %1544 = vst [vmem:[%s6894_s11 + $0x770] sm:$0xff] %v1543_v46 }
 0x102   : > { %1546 = vst [vmem:[%s6894_s11 + $0x778] sm:$0xff] %v1545_v47  ;;  %v1547_v48 = vld [vmem:[%s6886_s10 + $0x1e00] sm:$0xff] }
 0x103   : > { %v1549_v49 = vld [vmem:[%s6886_s10 + $0x1e20] sm:$0xff]  ;;  %1548 = vst [vmem:[%s6894_s11 + $0x780] sm:$0xff] %v1547_v48 }
 0x104   : > { %v1551_v50 = vld [vmem:[%s6886_s10 + $0x1e40] sm:$0xff]  ;;  %1550 = vst [vmem:[%s6894_s11 + $0x788] sm:$0xff] %v1549_v49 }
 0x105   : > { %1552 = vst [vmem:[%s6894_s11 + $0x790] sm:$0xff] %v1551_v50  ;;  %v1553_v51 = vld [vmem:[%s6886_s10 + $0x1e60] sm:$0xff] }
 0x106   : > { %v1555_v52 = vld [vmem:[%s6886_s10 + $0x1e80] sm:$0xff]  ;;  %1554 = vst [vmem:[%s6894_s11 + $0x798] sm:$0xff] %v1553_v51 }
 0x107   : > { %v1557_v53 = vld [vmem:[%s6886_s10 + $0x1ea0] sm:$0xff]  ;;  %1556 = vst [vmem:[%s6894_s11 + $0x7a0] sm:$0xff] %v1555_v52 }
 0x108   : > { %1558 = vst [vmem:[%s6894_s11 + $0x7a8] sm:$0xff] %v1557_v53  ;;  %v1559_v54 = vld [vmem:[%s6886_s10 + $0x1ec0] sm:$0xff] }
 0x109   : > { %v1561_v55 = vld [vmem:[%s6886_s10 + $0x1ee0] sm:$0xff]  ;;  %1560 = vst [vmem:[%s6894_s11 + $0x7b0] sm:$0xff] %v1559_v54 }
 0x10a   : > { %v1563_v56 = vld [vmem:[%s6886_s10 + $0x1f00] sm:$0xff]  ;;  %1562 = vst [vmem:[%s6894_s11 + $0x7b8] sm:$0xff] %v1561_v55 }
 0x10b   : > { %1564 = vst [vmem:[%s6894_s11 + $0x7c0] sm:$0xff] %v1563_v56  ;;  %v1565_v57 = vld [vmem:[%s6886_s10 + $0x1f20] sm:$0xff] }
 0x10c   : > { %v1567_v58 = vld [vmem:[%s6886_s10 + $0x1f40] sm:$0xff]  ;;  %1566 = vst [vmem:[%s6894_s11 + $0x7c8] sm:$0xff] %v1565_v57 }
 0x10d   : > { %v1569_v59 = vld [vmem:[%s6886_s10 + $0x1f60] sm:$0xff]  ;;  %1568 = vst [vmem:[%s6894_s11 + $0x7d0] sm:$0xff] %v1567_v58 }
 0x10e   : > { %1570 = vst [vmem:[%s6894_s11 + $0x7d8] sm:$0xff] %v1569_v59  ;;  %v1571_v60 = vld [vmem:[%s6886_s10 + $0x1f80] sm:$0xff] }
 0x10f   : > { %v1573_v61 = vld [vmem:[%s6886_s10 + $0x1fa0] sm:$0xff]  ;;  %1572 = vst [vmem:[%s6894_s11 + $0x7e0] sm:$0xff] %v1571_v60 }
 0x110   : > { %v1575_v62 = vld [vmem:[%s6886_s10 + $0x1fc0] sm:$0xff]  ;;  %1574 = vst [vmem:[%s6894_s11 + $0x7e8] sm:$0xff] %v1573_v61 }
 0x111   : > { %1576 = vst [vmem:[%s6894_s11 + $0x7f0] sm:$0xff] %v1575_v62  ;;  %v1577_v63 = vld [vmem:[%s6886_s10 + $0x1fe0] sm:$0xff] }
 0x112   : > { %v1579_v0 = vld [vmem:[%s6886_s10 + $0x2000] sm:$0xff]  ;;  %1578 = vst [vmem:[%s6894_s11 + $0x7f8] sm:$0xff] %v1577_v63 }
 0x113   : > { %v1581_v1 = vld [vmem:[%s6886_s10 + $0x2020] sm:$0xff]  ;;  %1580 = vst [vmem:[%s6894_s11 + $0x800] sm:$0xff] %v1579_v0 }
 0x114   : > { %1582 = vst [vmem:[%s6894_s11 + $0x808] sm:$0xff] %v1581_v1  ;;  %v1583_v2 = vld [vmem:[%s6886_s10 + $0x2040] sm:$0xff] }
 0x115   : > { %v1585_v3 = vld [vmem:[%s6886_s10 + $0x2060] sm:$0xff]  ;;  %1584 = vst [vmem:[%s6894_s11 + $0x810] sm:$0xff] %v1583_v2 }
 0x116   : > { %v1587_v4 = vld [vmem:[%s6886_s10 + $0x2080] sm:$0xff]  ;;  %1586 = vst [vmem:[%s6894_s11 + $0x818] sm:$0xff] %v1585_v3 }
 0x117   : > { %1588 = vst [vmem:[%s6894_s11 + $0x820] sm:$0xff] %v1587_v4  ;;  %v1589_v5 = vld [vmem:[%s6886_s10 + $0x20a0] sm:$0xff] }
 0x118   : > { %v1591_v6 = vld [vmem:[%s6886_s10 + $0x20c0] sm:$0xff]  ;;  %1590 = vst [vmem:[%s6894_s11 + $0x828] sm:$0xff] %v1589_v5 }
 0x119   : > { %v1593_v7 = vld [vmem:[%s6886_s10 + $0x20e0] sm:$0xff]  ;;  %1592 = vst [vmem:[%s6894_s11 + $0x830] sm:$0xff] %v1591_v6 }
 0x11a   : > { %1594 = vst [vmem:[%s6894_s11 + $0x838] sm:$0xff] %v1593_v7  ;;  %v1595_v8 = vld [vmem:[%s6886_s10 + $0x2100] sm:$0xff] }
 0x11b   : > { %v1597_v9 = vld [vmem:[%s6886_s10 + $0x2120] sm:$0xff]  ;;  %1596 = vst [vmem:[%s6894_s11 + $0x840] sm:$0xff] %v1595_v8 }
 0x11c   : > { %v1599_v10 = vld [vmem:[%s6886_s10 + $0x2140] sm:$0xff]  ;;  %1598 = vst [vmem:[%s6894_s11 + $0x848] sm:$0xff] %v1597_v9 }
 0x11d   : > { %1600 = vst [vmem:[%s6894_s11 + $0x850] sm:$0xff] %v1599_v10  ;;  %v1601_v11 = vld [vmem:[%s6886_s10 + $0x2160] sm:$0xff] }
 0x11e   : > { %v1603_v12 = vld [vmem:[%s6886_s10 + $0x2180] sm:$0xff]  ;;  %1602 = vst [vmem:[%s6894_s11 + $0x858] sm:$0xff] %v1601_v11 }
 0x11f   : > { %v1605_v13 = vld [vmem:[%s6886_s10 + $0x21a0] sm:$0xff]  ;;  %1604 = vst [vmem:[%s6894_s11 + $0x860] sm:$0xff] %v1603_v12 }
 0x120   : > { %1606 = vst [vmem:[%s6894_s11 + $0x868] sm:$0xff] %v1605_v13  ;;  %v1607_v14 = vld [vmem:[%s6886_s10 + $0x21c0] sm:$0xff] }
 0x121   : > { %v1609_v15 = vld [vmem:[%s6886_s10 + $0x21e0] sm:$0xff]  ;;  %1608 = vst [vmem:[%s6894_s11 + $0x870] sm:$0xff] %v1607_v14 }
 0x122   : > { %v1611_v16 = vld [vmem:[%s6886_s10 + $0x2200] sm:$0xff]  ;;  %1610 = vst [vmem:[%s6894_s11 + $0x878] sm:$0xff] %v1609_v15 }
 0x123   : > { %1612 = vst [vmem:[%s6894_s11 + $0x880] sm:$0xff] %v1611_v16  ;;  %v1613_v17 = vld [vmem:[%s6886_s10 + $0x2220] sm:$0xff] }
 0x124   : > { %v1615_v18 = vld [vmem:[%s6886_s10 + $0x2240] sm:$0xff]  ;;  %1614 = vst [vmem:[%s6894_s11 + $0x888] sm:$0xff] %v1613_v17 }
 0x125   : > { %v1617_v19 = vld [vmem:[%s6886_s10 + $0x2260] sm:$0xff]  ;;  %1616 = vst [vmem:[%s6894_s11 + $0x890] sm:$0xff] %v1615_v18 }
 0x126   : > { %1618 = vst [vmem:[%s6894_s11 + $0x898] sm:$0xff] %v1617_v19  ;;  %v1619_v20 = vld [vmem:[%s6886_s10 + $0x2280] sm:$0xff] }
 0x127   : > { %v1621_v21 = vld [vmem:[%s6886_s10 + $0x22a0] sm:$0xff]  ;;  %1620 = vst [vmem:[%s6894_s11 + $0x8a0] sm:$0xff] %v1619_v20 }
 0x128   : > { %v1623_v22 = vld [vmem:[%s6886_s10 + $0x22c0] sm:$0xff]  ;;  %1622 = vst [vmem:[%s6894_s11 + $0x8a8] sm:$0xff] %v1621_v21 }
 0x129   : > { %1624 = vst [vmem:[%s6894_s11 + $0x8b0] sm:$0xff] %v1623_v22  ;;  %v1625_v23 = vld [vmem:[%s6886_s10 + $0x22e0] sm:$0xff] }
 0x12a   : > { %v1627_v24 = vld [vmem:[%s6886_s10 + $0x2300] sm:$0xff]  ;;  %1626 = vst [vmem:[%s6894_s11 + $0x8b8] sm:$0xff] %v1625_v23 }
 0x12b   : > { %v1629_v25 = vld [vmem:[%s6886_s10 + $0x2320] sm:$0xff]  ;;  %1628 = vst [vmem:[%s6894_s11 + $0x8c0] sm:$0xff] %v1627_v24 }
 0x12c   : > { %1630 = vst [vmem:[%s6894_s11 + $0x8c8] sm:$0xff] %v1629_v25  ;;  %v1631_v26 = vld [vmem:[%s6886_s10 + $0x2340] sm:$0xff] }
 0x12d   : > { %v1633_v27 = vld [vmem:[%s6886_s10 + $0x2360] sm:$0xff]  ;;  %1632 = vst [vmem:[%s6894_s11 + $0x8d0] sm:$0xff] %v1631_v26 }
 0x12e   : > { %v1635_v28 = vld [vmem:[%s6886_s10 + $0x2380] sm:$0xff]  ;;  %1634 = vst [vmem:[%s6894_s11 + $0x8d8] sm:$0xff] %v1633_v27 }
 0x12f   : > { %1636 = vst [vmem:[%s6894_s11 + $0x8e0] sm:$0xff] %v1635_v28  ;;  %v1637_v29 = vld [vmem:[%s6886_s10 + $0x23a0] sm:$0xff] }
 0x130   : > { %v1639_v30 = vld [vmem:[%s6886_s10 + $0x23c0] sm:$0xff]  ;;  %1638 = vst [vmem:[%s6894_s11 + $0x8e8] sm:$0xff] %v1637_v29 }
 0x131   : > { %v1641_v31 = vld [vmem:[%s6886_s10 + $0x23e0] sm:$0xff]  ;;  %1640 = vst [vmem:[%s6894_s11 + $0x8f0] sm:$0xff] %v1639_v30 }
 0x132   : > { %1642 = vst [vmem:[%s6894_s11 + $0x8f8] sm:$0xff] %v1641_v31  ;;  %v1643_v32 = vld [vmem:[%s6886_s10 + $0x2400] sm:$0xff] }
 0x133   : > { %v1645_v33 = vld [vmem:[%s6886_s10 + $0x2420] sm:$0xff]  ;;  %1644 = vst [vmem:[%s6894_s11 + $0x900] sm:$0xff] %v1643_v32 }
 0x134   : > { %v1647_v34 = vld [vmem:[%s6886_s10 + $0x2440] sm:$0xff]  ;;  %1646 = vst [vmem:[%s6894_s11 + $0x908] sm:$0xff] %v1645_v33 }
 0x135   : > { %1648 = vst [vmem:[%s6894_s11 + $0x910] sm:$0xff] %v1647_v34  ;;  %v1649_v35 = vld [vmem:[%s6886_s10 + $0x2460] sm:$0xff] }
 0x136   : > { %v1651_v36 = vld [vmem:[%s6886_s10 + $0x2480] sm:$0xff]  ;;  %1650 = vst [vmem:[%s6894_s11 + $0x918] sm:$0xff] %v1649_v35 }
 0x137   : > { %v1653_v37 = vld [vmem:[%s6886_s10 + $0x24a0] sm:$0xff]  ;;  %1652 = vst [vmem:[%s6894_s11 + $0x920] sm:$0xff] %v1651_v36 }
 0x138   : > { %1654 = vst [vmem:[%s6894_s11 + $0x928] sm:$0xff] %v1653_v37  ;;  %v1655_v38 = vld [vmem:[%s6886_s10 + $0x24c0] sm:$0xff] }
 0x139   : > { %v1657_v39 = vld [vmem:[%s6886_s10 + $0x24e0] sm:$0xff]  ;;  %1656 = vst [vmem:[%s6894_s11 + $0x930] sm:$0xff] %v1655_v38 }
 0x13a   : > { %v1659_v40 = vld [vmem:[%s6886_s10 + $0x2500] sm:$0xff]  ;;  %1658 = vst [vmem:[%s6894_s11 + $0x938] sm:$0xff] %v1657_v39 }
 0x13b   : > { %1660 = vst [vmem:[%s6894_s11 + $0x940] sm:$0xff] %v1659_v40  ;;  %v1661_v41 = vld [vmem:[%s6886_s10 + $0x2520] sm:$0xff] }
 0x13c   : > { %v1663_v42 = vld [vmem:[%s6886_s10 + $0x2540] sm:$0xff]  ;;  %1662 = vst [vmem:[%s6894_s11 + $0x948] sm:$0xff] %v1661_v41 }
 0x13d   : > { %v1665_v43 = vld [vmem:[%s6886_s10 + $0x2560] sm:$0xff]  ;;  %1664 = vst [vmem:[%s6894_s11 + $0x950] sm:$0xff] %v1663_v42 }
 0x13e   : > { %1666 = vst [vmem:[%s6894_s11 + $0x958] sm:$0xff] %v1665_v43  ;;  %v1667_v44 = vld [vmem:[%s6886_s10 + $0x2580] sm:$0xff] }
 0x13f   : > { %v1669_v45 = vld [vmem:[%s6886_s10 + $0x25a0] sm:$0xff]  ;;  %1668 = vst [vmem:[%s6894_s11 + $0x960] sm:$0xff] %v1667_v44 }
 0x140   : > { %v1671_v46 = vld [vmem:[%s6886_s10 + $0x25c0] sm:$0xff]  ;;  %1670 = vst [vmem:[%s6894_s11 + $0x968] sm:$0xff] %v1669_v45 }
 0x141   : > { %1672 = vst [vmem:[%s6894_s11 + $0x970] sm:$0xff] %v1671_v46  ;;  %v1673_v47 = vld [vmem:[%s6886_s10 + $0x25e0] sm:$0xff] }
 0x142   : > { %v1675_v48 = vld [vmem:[%s6886_s10 + $0x2600] sm:$0xff]  ;;  %1674 = vst [vmem:[%s6894_s11 + $0x978] sm:$0xff] %v1673_v47 }
 0x143   : > { %v1677_v49 = vld [vmem:[%s6886_s10 + $0x2620] sm:$0xff]  ;;  %1676 = vst [vmem:[%s6894_s11 + $0x980] sm:$0xff] %v1675_v48 }
 0x144   : > { %1678 = vst [vmem:[%s6894_s11 + $0x988] sm:$0xff] %v1677_v49  ;;  %v1679_v50 = vld [vmem:[%s6886_s10 + $0x2640] sm:$0xff] }
 0x145   : > { %v1681_v51 = vld [vmem:[%s6886_s10 + $0x2660] sm:$0xff]  ;;  %1680 = vst [vmem:[%s6894_s11 + $0x990] sm:$0xff] %v1679_v50 }
 0x146   : > { %v1683_v52 = vld [vmem:[%s6886_s10 + $0x2680] sm:$0xff]  ;;  %1682 = vst [vmem:[%s6894_s11 + $0x998] sm:$0xff] %v1681_v51 }
 0x147   : > { %1684 = vst [vmem:[%s6894_s11 + $0x9a0] sm:$0xff] %v1683_v52  ;;  %v1685_v53 = vld [vmem:[%s6886_s10 + $0x26a0] sm:$0xff] }
 0x148   : > { %v1687_v54 = vld [vmem:[%s6886_s10 + $0x26c0] sm:$0xff]  ;;  %1686 = vst [vmem:[%s6894_s11 + $0x9a8] sm:$0xff] %v1685_v53 }
 0x149   : > { %v1689_v55 = vld [vmem:[%s6886_s10 + $0x26e0] sm:$0xff]  ;;  %1688 = vst [vmem:[%s6894_s11 + $0x9b0] sm:$0xff] %v1687_v54 }
 0x14a   : > { %1690 = vst [vmem:[%s6894_s11 + $0x9b8] sm:$0xff] %v1689_v55  ;;  %v1691_v56 = vld [vmem:[%s6886_s10 + $0x2700] sm:$0xff] }
 0x14b   : > { %v1693_v57 = vld [vmem:[%s6886_s10 + $0x2720] sm:$0xff]  ;;  %1692 = vst [vmem:[%s6894_s11 + $0x9c0] sm:$0xff] %v1691_v56 }
 0x14c   : > { %v1695_v58 = vld [vmem:[%s6886_s10 + $0x2740] sm:$0xff]  ;;  %1694 = vst [vmem:[%s6894_s11 + $0x9c8] sm:$0xff] %v1693_v57 }
 0x14d   : > { %1696 = vst [vmem:[%s6894_s11 + $0x9d0] sm:$0xff] %v1695_v58  ;;  %v1697_v59 = vld [vmem:[%s6886_s10 + $0x2760] sm:$0xff] }
 0x14e   : > { %v1699_v60 = vld [vmem:[%s6886_s10 + $0x2780] sm:$0xff]  ;;  %1698 = vst [vmem:[%s6894_s11 + $0x9d8] sm:$0xff] %v1697_v59 }
 0x14f   : > { %v1701_v61 = vld [vmem:[%s6886_s10 + $0x27a0] sm:$0xff]  ;;  %1700 = vst [vmem:[%s6894_s11 + $0x9e0] sm:$0xff] %v1699_v60 }
 0x150   : > { %1702 = vst [vmem:[%s6894_s11 + $0x9e8] sm:$0xff] %v1701_v61  ;;  %v1703_v62 = vld [vmem:[%s6886_s10 + $0x27c0] sm:$0xff] }
 0x151   : > { %v1705_v63 = vld [vmem:[%s6886_s10 + $0x27e0] sm:$0xff]  ;;  %1704 = vst [vmem:[%s6894_s11 + $0x9f0] sm:$0xff] %v1703_v62 }
 0x152   : > { %v1707_v0 = vld [vmem:[%s6886_s10 + $0x2800] sm:$0xff]  ;;  %1706 = vst [vmem:[%s6894_s11 + $0x9f8] sm:$0xff] %v1705_v63 }
 0x153   : > { %1708 = vst [vmem:[%s6894_s11 + $0xa00] sm:$0xff] %v1707_v0  ;;  %v1709_v1 = vld [vmem:[%s6886_s10 + $0x2820] sm:$0xff] }
 0x154   : > { %v1711_v2 = vld [vmem:[%s6886_s10 + $0x2840] sm:$0xff]  ;;  %1710 = vst [vmem:[%s6894_s11 + $0xa08] sm:$0xff] %v1709_v1 }
 0x155   : > { %v1713_v3 = vld [vmem:[%s6886_s10 + $0x2860] sm:$0xff]  ;;  %1712 = vst [vmem:[%s6894_s11 + $0xa10] sm:$0xff] %v1711_v2 }
 0x156   : > { %1714 = vst [vmem:[%s6894_s11 + $0xa18] sm:$0xff] %v1713_v3  ;;  %v1715_v4 = vld [vmem:[%s6886_s10 + $0x2880] sm:$0xff] }
 0x157   : > { %v1717_v5 = vld [vmem:[%s6886_s10 + $0x28a0] sm:$0xff]  ;;  %1716 = vst [vmem:[%s6894_s11 + $0xa20] sm:$0xff] %v1715_v4 }
 0x158   : > { %v1719_v6 = vld [vmem:[%s6886_s10 + $0x28c0] sm:$0xff]  ;;  %1718 = vst [vmem:[%s6894_s11 + $0xa28] sm:$0xff] %v1717_v5 }
 0x159   : > { %1720 = vst [vmem:[%s6894_s11 + $0xa30] sm:$0xff] %v1719_v6  ;;  %v1721_v7 = vld [vmem:[%s6886_s10 + $0x28e0] sm:$0xff] }
 0x15a   : > { %v1723_v8 = vld [vmem:[%s6886_s10 + $0x2900] sm:$0xff]  ;;  %1722 = vst [vmem:[%s6894_s11 + $0xa38] sm:$0xff] %v1721_v7 }
 0x15b   : > { %v1725_v9 = vld [vmem:[%s6886_s10 + $0x2920] sm:$0xff]  ;;  %1724 = vst [vmem:[%s6894_s11 + $0xa40] sm:$0xff] %v1723_v8 }
 0x15c   : > { %1726 = vst [vmem:[%s6894_s11 + $0xa48] sm:$0xff] %v1725_v9  ;;  %v1727_v10 = vld [vmem:[%s6886_s10 + $0x2940] sm:$0xff] }
 0x15d   : > { %v1729_v11 = vld [vmem:[%s6886_s10 + $0x2960] sm:$0xff]  ;;  %1728 = vst [vmem:[%s6894_s11 + $0xa50] sm:$0xff] %v1727_v10 }
 0x15e   : > { %v1731_v12 = vld [vmem:[%s6886_s10 + $0x2980] sm:$0xff]  ;;  %1730 = vst [vmem:[%s6894_s11 + $0xa58] sm:$0xff] %v1729_v11 }
 0x15f   : > { %1732 = vst [vmem:[%s6894_s11 + $0xa60] sm:$0xff] %v1731_v12  ;;  %v1733_v13 = vld [vmem:[%s6886_s10 + $0x29a0] sm:$0xff] }
 0x160   : > { %v1735_v14 = vld [vmem:[%s6886_s10 + $0x29c0] sm:$0xff]  ;;  %1734 = vst [vmem:[%s6894_s11 + $0xa68] sm:$0xff] %v1733_v13 }
 0x161   : > { %v1737_v15 = vld [vmem:[%s6886_s10 + $0x29e0] sm:$0xff]  ;;  %1736 = vst [vmem:[%s6894_s11 + $0xa70] sm:$0xff] %v1735_v14 }
 0x162   : > { %1738 = vst [vmem:[%s6894_s11 + $0xa78] sm:$0xff] %v1737_v15  ;;  %v1739_v16 = vld [vmem:[%s6886_s10 + $0x2a00] sm:$0xff] }
 0x163   : > { %v1741_v17 = vld [vmem:[%s6886_s10 + $0x2a20] sm:$0xff]  ;;  %1740 = vst [vmem:[%s6894_s11 + $0xa80] sm:$0xff] %v1739_v16 }
 0x164   : > { %v1743_v18 = vld [vmem:[%s6886_s10 + $0x2a40] sm:$0xff]  ;;  %1742 = vst [vmem:[%s6894_s11 + $0xa88] sm:$0xff] %v1741_v17 }
 0x165   : > { %1744 = vst [vmem:[%s6894_s11 + $0xa90] sm:$0xff] %v1743_v18  ;;  %v1745_v19 = vld [vmem:[%s6886_s10 + $0x2a60] sm:$0xff] }
 0x166   : > { %v1747_v20 = vld [vmem:[%s6886_s10 + $0x2a80] sm:$0xff]  ;;  %1746 = vst [vmem:[%s6894_s11 + $0xa98] sm:$0xff] %v1745_v19 }
 0x167   : > { %v1749_v21 = vld [vmem:[%s6886_s10 + $0x2aa0] sm:$0xff]  ;;  %1748 = vst [vmem:[%s6894_s11 + $0xaa0] sm:$0xff] %v1747_v20 }
 0x168   : > { %1750 = vst [vmem:[%s6894_s11 + $0xaa8] sm:$0xff] %v1749_v21  ;;  %v1751_v22 = vld [vmem:[%s6886_s10 + $0x2ac0] sm:$0xff] }
 0x169   : > { %v1753_v23 = vld [vmem:[%s6886_s10 + $0x2ae0] sm:$0xff]  ;;  %1752 = vst [vmem:[%s6894_s11 + $0xab0] sm:$0xff] %v1751_v22 }
 0x16a   : > { %v1755_v24 = vld [vmem:[%s6886_s10 + $0x2b00] sm:$0xff]  ;;  %1754 = vst [vmem:[%s6894_s11 + $0xab8] sm:$0xff] %v1753_v23 }
 0x16b   : > { %1756 = vst [vmem:[%s6894_s11 + $0xac0] sm:$0xff] %v1755_v24  ;;  %v1757_v25 = vld [vmem:[%s6886_s10 + $0x2b20] sm:$0xff] }
 0x16c   : > { %v1759_v26 = vld [vmem:[%s6886_s10 + $0x2b40] sm:$0xff]  ;;  %1758 = vst [vmem:[%s6894_s11 + $0xac8] sm:$0xff] %v1757_v25 }
 0x16d   : > { %v1761_v27 = vld [vmem:[%s6886_s10 + $0x2b60] sm:$0xff]  ;;  %1760 = vst [vmem:[%s6894_s11 + $0xad0] sm:$0xff] %v1759_v26 }
 0x16e   : > { %1762 = vst [vmem:[%s6894_s11 + $0xad8] sm:$0xff] %v1761_v27  ;;  %v1763_v28 = vld [vmem:[%s6886_s10 + $0x2b80] sm:$0xff] }
 0x16f   : > { %v1765_v29 = vld [vmem:[%s6886_s10 + $0x2ba0] sm:$0xff]  ;;  %1764 = vst [vmem:[%s6894_s11 + $0xae0] sm:$0xff] %v1763_v28 }
 0x170   : > { %v1767_v30 = vld [vmem:[%s6886_s10 + $0x2bc0] sm:$0xff]  ;;  %1766 = vst [vmem:[%s6894_s11 + $0xae8] sm:$0xff] %v1765_v29 }
 0x171   : > { %1768 = vst [vmem:[%s6894_s11 + $0xaf0] sm:$0xff] %v1767_v30  ;;  %v1769_v31 = vld [vmem:[%s6886_s10 + $0x2be0] sm:$0xff] }
 0x172   : > { %v1771_v32 = vld [vmem:[%s6886_s10 + $0x2c00] sm:$0xff]  ;;  %1770 = vst [vmem:[%s6894_s11 + $0xaf8] sm:$0xff] %v1769_v31 }
 0x173   : > { %v1773_v33 = vld [vmem:[%s6886_s10 + $0x2c20] sm:$0xff]  ;;  %1772 = vst [vmem:[%s6894_s11 + $0xb00] sm:$0xff] %v1771_v32 }
 0x174   : > { %1774 = vst [vmem:[%s6894_s11 + $0xb08] sm:$0xff] %v1773_v33  ;;  %v1775_v34 = vld [vmem:[%s6886_s10 + $0x2c40] sm:$0xff] }
 0x175   : > { %v1777_v35 = vld [vmem:[%s6886_s10 + $0x2c60] sm:$0xff]  ;;  %1776 = vst [vmem:[%s6894_s11 + $0xb10] sm:$0xff] %v1775_v34 }
 0x176   : > { %v1779_v36 = vld [vmem:[%s6886_s10 + $0x2c80] sm:$0xff]  ;;  %1778 = vst [vmem:[%s6894_s11 + $0xb18] sm:$0xff] %v1777_v35 }
 0x177   : > { %1780 = vst [vmem:[%s6894_s11 + $0xb20] sm:$0xff] %v1779_v36  ;;  %v1781_v37 = vld [vmem:[%s6886_s10 + $0x2ca0] sm:$0xff] }
 0x178   : > { %v1783_v38 = vld [vmem:[%s6886_s10 + $0x2cc0] sm:$0xff]  ;;  %1782 = vst [vmem:[%s6894_s11 + $0xb28] sm:$0xff] %v1781_v37 }
 0x179   : > { %v1785_v39 = vld [vmem:[%s6886_s10 + $0x2ce0] sm:$0xff]  ;;  %1784 = vst [vmem:[%s6894_s11 + $0xb30] sm:$0xff] %v1783_v38 }
 0x17a   : > { %1786 = vst [vmem:[%s6894_s11 + $0xb38] sm:$0xff] %v1785_v39  ;;  %v1787_v40 = vld [vmem:[%s6886_s10 + $0x2d00] sm:$0xff] }
 0x17b   : > { %v1789_v41 = vld [vmem:[%s6886_s10 + $0x2d20] sm:$0xff]  ;;  %1788 = vst [vmem:[%s6894_s11 + $0xb40] sm:$0xff] %v1787_v40 }
 0x17c   : > { %v1791_v42 = vld [vmem:[%s6886_s10 + $0x2d40] sm:$0xff]  ;;  %1790 = vst [vmem:[%s6894_s11 + $0xb48] sm:$0xff] %v1789_v41 }
 0x17d   : > { %1792 = vst [vmem:[%s6894_s11 + $0xb50] sm:$0xff] %v1791_v42  ;;  %v1793_v43 = vld [vmem:[%s6886_s10 + $0x2d60] sm:$0xff] }
 0x17e   : > { %v1795_v44 = vld [vmem:[%s6886_s10 + $0x2d80] sm:$0xff]  ;;  %1794 = vst [vmem:[%s6894_s11 + $0xb58] sm:$0xff] %v1793_v43 }
 0x17f   : > { %v1797_v45 = vld [vmem:[%s6886_s10 + $0x2da0] sm:$0xff]  ;;  %1796 = vst [vmem:[%s6894_s11 + $0xb60] sm:$0xff] %v1795_v44 }
 0x180   : > { %1798 = vst [vmem:[%s6894_s11 + $0xb68] sm:$0xff] %v1797_v45  ;;  %v1799_v46 = vld [vmem:[%s6886_s10 + $0x2dc0] sm:$0xff] }
 0x181   : > { %v1801_v47 = vld [vmem:[%s6886_s10 + $0x2de0] sm:$0xff]  ;;  %1800 = vst [vmem:[%s6894_s11 + $0xb70] sm:$0xff] %v1799_v46 }
 0x182   : > { %v1803_v48 = vld [vmem:[%s6886_s10 + $0x2e00] sm:$0xff]  ;;  %1802 = vst [vmem:[%s6894_s11 + $0xb78] sm:$0xff] %v1801_v47 }
 0x183   : > { %1804 = vst [vmem:[%s6894_s11 + $0xb80] sm:$0xff] %v1803_v48  ;;  %v1805_v49 = vld [vmem:[%s6886_s10 + $0x2e20] sm:$0xff] }
 0x184   : > { %v1807_v50 = vld [vmem:[%s6886_s10 + $0x2e40] sm:$0xff]  ;;  %1806 = vst [vmem:[%s6894_s11 + $0xb88] sm:$0xff] %v1805_v49 }
 0x185   : > { %v1809_v51 = vld [vmem:[%s6886_s10 + $0x2e60] sm:$0xff]  ;;  %1808 = vst [vmem:[%s6894_s11 + $0xb90] sm:$0xff] %v1807_v50 }
 0x186   : > { %1810 = vst [vmem:[%s6894_s11 + $0xb98] sm:$0xff] %v1809_v51  ;;  %v1811_v52 = vld [vmem:[%s6886_s10 + $0x2e80] sm:$0xff] }
 0x187   : > { %v1813_v53 = vld [vmem:[%s6886_s10 + $0x2ea0] sm:$0xff]  ;;  %1812 = vst [vmem:[%s6894_s11 + $0xba0] sm:$0xff] %v1811_v52 }
 0x188   : > { %v1815_v54 = vld [vmem:[%s6886_s10 + $0x2ec0] sm:$0xff]  ;;  %1814 = vst [vmem:[%s6894_s11 + $0xba8] sm:$0xff] %v1813_v53 }
 0x189   : > { %1816 = vst [vmem:[%s6894_s11 + $0xbb0] sm:$0xff] %v1815_v54  ;;  %v1817_v55 = vld [vmem:[%s6886_s10 + $0x2ee0] sm:$0xff] }
 0x18a   : > { %v1819_v56 = vld [vmem:[%s6886_s10 + $0x2f00] sm:$0xff]  ;;  %1818 = vst [vmem:[%s6894_s11 + $0xbb8] sm:$0xff] %v1817_v55 }
 0x18b   : > { %v1821_v57 = vld [vmem:[%s6886_s10 + $0x2f20] sm:$0xff]  ;;  %1820 = vst [vmem:[%s6894_s11 + $0xbc0] sm:$0xff] %v1819_v56 }
 0x18c   : > { %1822 = vst [vmem:[%s6894_s11 + $0xbc8] sm:$0xff] %v1821_v57  ;;  %v1823_v58 = vld [vmem:[%s6886_s10 + $0x2f40] sm:$0xff] }
 0x18d   : > { %v1825_v59 = vld [vmem:[%s6886_s10 + $0x2f60] sm:$0xff]  ;;  %1824 = vst [vmem:[%s6894_s11 + $0xbd0] sm:$0xff] %v1823_v58 }
 0x18e   : > { %v1827_v60 = vld [vmem:[%s6886_s10 + $0x2f80] sm:$0xff]  ;;  %1826 = vst [vmem:[%s6894_s11 + $0xbd8] sm:$0xff] %v1825_v59 }
 0x18f   : > { %1828 = vst [vmem:[%s6894_s11 + $0xbe0] sm:$0xff] %v1827_v60  ;;  %v1829_v61 = vld [vmem:[%s6886_s10 + $0x2fa0] sm:$0xff] }
 0x190   : > { %v1831_v62 = vld [vmem:[%s6886_s10 + $0x2fc0] sm:$0xff]  ;;  %1830 = vst [vmem:[%s6894_s11 + $0xbe8] sm:$0xff] %v1829_v61 }
 0x191   : > { %v1833_v63 = vld [vmem:[%s6886_s10 + $0x2fe0] sm:$0xff]  ;;  %1832 = vst [vmem:[%s6894_s11 + $0xbf0] sm:$0xff] %v1831_v62 }
 0x192   : > { %1834 = vst [vmem:[%s6894_s11 + $0xbf8] sm:$0xff] %v1833_v63  ;;  %v1835_v0 = vld [vmem:[%s6886_s10 + $0x3000] sm:$0xff] }
 0x193   : > { %v1837_v1 = vld [vmem:[%s6886_s10 + $0x3020] sm:$0xff]  ;;  %1836 = vst [vmem:[%s6894_s11 + $0xc00] sm:$0xff] %v1835_v0 }
 0x194   : > { %v1839_v2 = vld [vmem:[%s6886_s10 + $0x3040] sm:$0xff]  ;;  %1838 = vst [vmem:[%s6894_s11 + $0xc08] sm:$0xff] %v1837_v1 }
 0x195   : > { %1840 = vst [vmem:[%s6894_s11 + $0xc10] sm:$0xff] %v1839_v2  ;;  %v1841_v3 = vld [vmem:[%s6886_s10 + $0x3060] sm:$0xff] }
 0x196   : > { %v1843_v4 = vld [vmem:[%s6886_s10 + $0x3080] sm:$0xff]  ;;  %1842 = vst [vmem:[%s6894_s11 + $0xc18] sm:$0xff] %v1841_v3 }
 0x197   : > { %v1845_v5 = vld [vmem:[%s6886_s10 + $0x30a0] sm:$0xff]  ;;  %1844 = vst [vmem:[%s6894_s11 + $0xc20] sm:$0xff] %v1843_v4 }
 0x198   : > { %1846 = vst [vmem:[%s6894_s11 + $0xc28] sm:$0xff] %v1845_v5  ;;  %v1847_v6 = vld [vmem:[%s6886_s10 + $0x30c0] sm:$0xff] }
 0x199   : > { %v1849_v7 = vld [vmem:[%s6886_s10 + $0x30e0] sm:$0xff]  ;;  %1848 = vst [vmem:[%s6894_s11 + $0xc30] sm:$0xff] %v1847_v6 }
 0x19a   : > { %v1851_v8 = vld [vmem:[%s6886_s10 + $0x3100] sm:$0xff]  ;;  %1850 = vst [vmem:[%s6894_s11 + $0xc38] sm:$0xff] %v1849_v7 }
 0x19b   : > { %1852 = vst [vmem:[%s6894_s11 + $0xc40] sm:$0xff] %v1851_v8  ;;  %v1853_v9 = vld [vmem:[%s6886_s10 + $0x3120] sm:$0xff] }
 0x19c   : > { %v1855_v10 = vld [vmem:[%s6886_s10 + $0x3140] sm:$0xff]  ;;  %1854 = vst [vmem:[%s6894_s11 + $0xc48] sm:$0xff] %v1853_v9 }
 0x19d   : > { %v1857_v11 = vld [vmem:[%s6886_s10 + $0x3160] sm:$0xff]  ;;  %1856 = vst [vmem:[%s6894_s11 + $0xc50] sm:$0xff] %v1855_v10 }
 0x19e   : > { %1858 = vst [vmem:[%s6894_s11 + $0xc58] sm:$0xff] %v1857_v11  ;;  %v1859_v12 = vld [vmem:[%s6886_s10 + $0x3180] sm:$0xff] }
 0x19f   : > { %v1861_v13 = vld [vmem:[%s6886_s10 + $0x31a0] sm:$0xff]  ;;  %1860 = vst [vmem:[%s6894_s11 + $0xc60] sm:$0xff] %v1859_v12 }
 0x1a0   : > { %v1863_v14 = vld [vmem:[%s6886_s10 + $0x31c0] sm:$0xff]  ;;  %1862 = vst [vmem:[%s6894_s11 + $0xc68] sm:$0xff] %v1861_v13 }
 0x1a1   : > { %1864 = vst [vmem:[%s6894_s11 + $0xc70] sm:$0xff] %v1863_v14  ;;  %v1865_v15 = vld [vmem:[%s6886_s10 + $0x31e0] sm:$0xff] }
 0x1a2   : > { %v1867_v16 = vld [vmem:[%s6886_s10 + $0x3200] sm:$0xff]  ;;  %1866 = vst [vmem:[%s6894_s11 + $0xc78] sm:$0xff] %v1865_v15 }
 0x1a3   : > { %v1869_v17 = vld [vmem:[%s6886_s10 + $0x3220] sm:$0xff]  ;;  %1868 = vst [vmem:[%s6894_s11 + $0xc80] sm:$0xff] %v1867_v16 }
 0x1a4   : > { %1870 = vst [vmem:[%s6894_s11 + $0xc88] sm:$0xff] %v1869_v17  ;;  %v1871_v18 = vld [vmem:[%s6886_s10 + $0x3240] sm:$0xff] }
 0x1a5   : > { %v1873_v19 = vld [vmem:[%s6886_s10 + $0x3260] sm:$0xff]  ;;  %1872 = vst [vmem:[%s6894_s11 + $0xc90] sm:$0xff] %v1871_v18 }
 0x1a6   : > { %v1875_v20 = vld [vmem:[%s6886_s10 + $0x3280] sm:$0xff]  ;;  %1874 = vst [vmem:[%s6894_s11 + $0xc98] sm:$0xff] %v1873_v19 }
 0x1a7   : > { %1876 = vst [vmem:[%s6894_s11 + $0xca0] sm:$0xff] %v1875_v20  ;;  %v1877_v21 = vld [vmem:[%s6886_s10 + $0x32a0] sm:$0xff] }
 0x1a8   : > { %v1879_v22 = vld [vmem:[%s6886_s10 + $0x32c0] sm:$0xff]  ;;  %1878 = vst [vmem:[%s6894_s11 + $0xca8] sm:$0xff] %v1877_v21 }
 0x1a9   : > { %v1881_v23 = vld [vmem:[%s6886_s10 + $0x32e0] sm:$0xff]  ;;  %1880 = vst [vmem:[%s6894_s11 + $0xcb0] sm:$0xff] %v1879_v22 }
 0x1aa   : > { %1882 = vst [vmem:[%s6894_s11 + $0xcb8] sm:$0xff] %v1881_v23  ;;  %v1883_v24 = vld [vmem:[%s6886_s10 + $0x3300] sm:$0xff] }
 0x1ab   : > { %v1885_v25 = vld [vmem:[%s6886_s10 + $0x3320] sm:$0xff]  ;;  %1884 = vst [vmem:[%s6894_s11 + $0xcc0] sm:$0xff] %v1883_v24 }
 0x1ac   : > { %v1887_v26 = vld [vmem:[%s6886_s10 + $0x3340] sm:$0xff]  ;;  %1886 = vst [vmem:[%s6894_s11 + $0xcc8] sm:$0xff] %v1885_v25 }
 0x1ad   : > { %1888 = vst [vmem:[%s6894_s11 + $0xcd0] sm:$0xff] %v1887_v26  ;;  %v1889_v27 = vld [vmem:[%s6886_s10 + $0x3360] sm:$0xff] }
 0x1ae   : > { %v1891_v28 = vld [vmem:[%s6886_s10 + $0x3380] sm:$0xff]  ;;  %1890 = vst [vmem:[%s6894_s11 + $0xcd8] sm:$0xff] %v1889_v27 }
 0x1af   : > { %v1893_v29 = vld [vmem:[%s6886_s10 + $0x33a0] sm:$0xff]  ;;  %1892 = vst [vmem:[%s6894_s11 + $0xce0] sm:$0xff] %v1891_v28 }
 0x1b0   : > { %1894 = vst [vmem:[%s6894_s11 + $0xce8] sm:$0xff] %v1893_v29  ;;  %v1895_v30 = vld [vmem:[%s6886_s10 + $0x33c0] sm:$0xff] }
 0x1b1   : > { %1896 = vst [vmem:[%s6894_s11 + $0xcf0] sm:$0xff] %v1895_v30 }
 0x1b2 PF: > { %p5493_p5 = scmp.ge.s32.totalorder %s6808_s23, 1  ;;  %p1918_p6 = scmp.lt.s32.totalorder %s6808_s23, 5 }
 0x1b4   : > { %p1919_p7 = pnand %p5493_p5, %p1918_p6 }
 0x1b5   : > { %s1925_s12 = sand.u32 (!%p1919_p7), 1, %s6800_s21   ;;  %s5494_s13 = sshll.u32 (!%p1919_p7), %s6866_s24, 1 }
 0x1b6   : > { %1922 = sbr.rel (%p1919_p7) target bundleno = 1962 (0x7aa), region = 74  ;;  %p1960_p8 = scmp.lt.s32.totalorder (!%p1919_p7), %s5494_s13, 7 }
 0x1b7   : > { %s6044_s14 = smul.u32 (!%p1919_p7), 3320, %s1925_s12  ;;  %s5495_s15 = sshll.u32 (!%p1919_p7), %s6866_s24, 5 }
 0x1b8   : > { %p1965_p9 = scmp.lt.s32.totalorder (!%p1919_p7), %s5495_s15, 127  ;;  %p5497_p10 = scmp.ne.s32.totalorder (!%p1919_p7), %s6866_s24, 0 }
 0x1b9   : > { %s7736_s21 = scalar_lea.vmem (!%p1919_p7), [#allocation3], %s6044_s14 }
 0x1bd   : > { %s8392_s13 = smov (!%p1960_p8, %s5494_s13), 7  ;;  %s8394_s15 = smov (!%p1965_p9, %s5495_s15), 127 }
 0x1be   : > { %s1962_s18 = scalar_lea.vmem %s8383_s2, %s8392_s13  ;;  %s5496_s19 = sshll.u32 %s8394_s15, 3  ;;  %vm1974_vm0 = vcmask (!%p5497_p10), 25600   ;;  %v6810_v31 = vmov (!%p5497_p10), 0.0  }
 0x1bf   : > { %s7734_s26 = scalar_lea.vmem %s8384_s3, %s5496_s19  ;;  %1973 = sbr.rel (%p5497_p10) target bundleno = 454 (0x1c6), region = 82  ;;  %1975 = vst.msk [vmem:[#allocation2] sm:$0x3] (!%p5497_p10), %vm1974_vm0, %v6810_v31 }
 0x1c6 PF: > { %v6086_v32 = vld [vmem:[%s7736_s21 + $0x4] ss:$8 sps:$4 sm:$0xff]   ;;  %v6090_v34 = vld [vmem:[%s7736_s21] ss:$8 sps:$4 sm:$0xff]   ;;  %v6092_v36 = vld [vmem:[%s7736_s21 + $0x14] ss:$8 sps:$4 sm:$0xff]   ;;  %v2397_v4 = vlaneseq }
 0x1c7   : > { %v6088_v33 = vld [vmem:[%s7736_s21 + $0x604] ss:$8 sps:$4 sm:$0xff]   ;;  %4691 = vmatprep.subr.bf16.mxu1 %v6086_v32  ;;  %v6091_v35 = vld [vmem:[%s7736_s21 + $0x600] ss:$8 sps:$4 sm:$0xff]   ;;  %v6094_v37 = vld [vmem:[%s7736_s21 + $0x614] ss:$8 sps:$4 sm:$0xff]  }
 0x1c8   : > { %4937 = vmatprep.subr.bf16.mxu0 %v6088_v33  ;;  %4692 = vmatpush1.bf16.msra.mxu1 %v6090_v34  ;;  %v6096_v38 = vld [vmem:[%s7736_s21 + $0x10] ss:$8 sps:$4 sm:$0xff]   ;;  %v6098_v40 = vld [vmem:[%s7736_s21 + $0x24] ss:$8 sps:$4 sm:$0xff]   ;;  %v6102_v42 = vld [vmem:[%s7736_s21 + $0x20] ss:$8 sps:$4 sm:$0xff]  }
 0x1c9   : > { %4938 = vmatpush1.bf16.msra.mxu0 %v6091_v35  ;;  %4693 = vmatprep.subr.bf16.mxu1 %v6092_v36  ;;  %v6097_v39 = vld [vmem:[%s7736_s21 + $0x610] ss:$8 sps:$4 sm:$0xff]   ;;  %v6100_v41 = vld [vmem:[%s7736_s21 + $0x624] ss:$8 sps:$4 sm:$0xff]   ;;  %v6103_v43 = vld [vmem:[%s7736_s21 + $0x620] ss:$8 sps:$4 sm:$0xff]  }
 0x1ca   : > { %4939 = vmatprep.subr.bf16.mxu0 %v6094_v37  ;;  %v6104_v44 = vld [vmem:[%s7736_s21 + $0x34] ss:$8 sps:$4 sm:$0xff]   ;;  %v6108_v46 = vld [vmem:[%s7736_s21 + $0x30] ss:$8 sps:$4 sm:$0xff]   ;;  %v6110_v48 = vld [vmem:[%s7736_s21 + $0x44] ss:$8 sps:$4 sm:$0xff]  }
 0x1cb   : > { %v6106_v45 = vld [vmem:[%s7736_s21 + $0x634] ss:$8 sps:$4 sm:$0xff]   ;;  %v6109_v47 = vld [vmem:[%s7736_s21 + $0x630] ss:$8 sps:$4 sm:$0xff]   ;;  %v6112_v49 = vld [vmem:[%s7736_s21 + $0x644] ss:$8 sps:$4 sm:$0xff]  }
 0x1cc   : > { %4694 = vmatpush1.bf16.msra.mxu1 %v6096_v38  ;;  %v6114_v50 = vld [vmem:[%s7736_s21 + $0x40] ss:$8 sps:$4 sm:$0xff]   ;;  %v6116_v52 = vld [vmem:[%s7736_s21 + $0x54] ss:$8 sps:$4 sm:$0xff]   ;;  %v6120_v54 = vld [vmem:[%s7736_s21 + $0x50] ss:$8 sps:$4 sm:$0xff]  }
 0x1cd   : > { %4940 = vmatpush1.bf16.msra.mxu0 %v6097_v39  ;;  %4695 = vmatprep.subr.bf16.mxu1 %v6098_v40  ;;  %v6115_v51 = vld [vmem:[%s7736_s21 + $0x640] ss:$8 sps:$4 sm:$0xff]   ;;  %v6118_v53 = vld [vmem:[%s7736_s21 + $0x654] ss:$8 sps:$4 sm:$0xff]   ;;  %v6121_v55 = vld [vmem:[%s7736_s21 + $0x650] ss:$8 sps:$4 sm:$0xff]  }
 0x1ce   : > { %4941 = vmatprep.subr.bf16.mxu0 %v6100_v41  ;;  %v6122_v56 = vld [vmem:[%s7736_s21 + $0x64] ss:$8 sps:$4 sm:$0xff]   ;;  %v6126_v58 = vld [vmem:[%s7736_s21 + $0x60] ss:$8 sps:$4 sm:$0xff]   ;;  %v6128_v60 = vld [vmem:[%s7736_s21 + $0x74] ss:$8 sps:$4 sm:$0xff]  }
 0x1cf   : > { %v6124_v57 = vld [vmem:[%s7736_s21 + $0x664] ss:$8 sps:$4 sm:$0xff]   ;;  %v6127_v59 = vld [vmem:[%s7736_s21 + $0x660] ss:$8 sps:$4 sm:$0xff]   ;;  %v6130_v61 = vld [vmem:[%s7736_s21 + $0x674] ss:$8 sps:$4 sm:$0xff]  }
 0x1d0   : > { %4696 = vmatpush1.bf16.msra.mxu1 %v6102_v42  ;;  %v6132_v62 = vld [vmem:[%s7736_s21 + $0x70] ss:$8 sps:$4 sm:$0xff]   ;;  %v6134_v0 = vld [vmem:[%s7736_s21 + $0x84] ss:$8 sps:$4 sm:$0xff]   ;;  %v6138_v2 = vld [vmem:[%s7736_s21 + $0x80] ss:$8 sps:$4 sm:$0xff]  }
 0x1d1   : > { %4942 = vmatpush1.bf16.msra.mxu0 %v6103_v43  ;;  %4697 = vmatprep.subr.bf16.mxu1 %v6104_v44  ;;  %v6133_v63 = vld [vmem:[%s7736_s21 + $0x670] ss:$8 sps:$4 sm:$0xff]   ;;  %v6136_v1 = vld [vmem:[%s7736_s21 + $0x684] ss:$8 sps:$4 sm:$0xff]   ;;  %v6139_v3 = vld [vmem:[%s7736_s21 + $0x680] ss:$8 sps:$4 sm:$0xff]  }
 0x1d2   : > { %4943 = vmatprep.subr.bf16.mxu0 %v6106_v45  ;;  %v6811_v5 = vmov 1966171168   ;;  %v6140_v7 = vld [vmem:[%s7736_s21 + $0x94] ss:$8 sps:$4 sm:$0xff]   ;;  %v6144_v9 = vld [vmem:[%s7736_s21 + $0x90] ss:$8 sps:$4 sm:$0xff]  }
 0x1d3   : > { %v2413_v6 = vunpack.c.l.s4 %v6811_v5  ;;  %v6142_v8 = vld [vmem:[%s7736_s21 + $0x694] ss:$8 sps:$4 sm:$0xff]   ;;  %v7778_v10 = vshrl.u32 %v2397_v4, 7  ;;  %v6145_v12 = vld [vmem:[%s7736_s21 + $0x690] ss:$8 sps:$4 sm:$0xff]   ;;  %vm4680_vm1 = vcmask 982016  }
 0x1d4   : > { %4698 = vmatpush1.bf16.msra.mxu1 %v6108_v46  ;;  %v6146_v13 = vld [vmem:[%s7736_s21 + $0xa4] ss:$8 sps:$4 sm:$0xff]   ;;  %v6150_v15 = vld [vmem:[%s7736_s21 + $0xa0] ss:$8 sps:$4 sm:$0xff]   ;;  %v6152_v18 = vld [vmem:[%s7736_s21 + $0xb4] ss:$8 sps:$4 sm:$0xff]  }
 0x1d5   : > { %4944 = vmatpush1.bf16.msra.mxu0 %v6109_v47  ;;  %4699 = vmatprep.subr.bf16.mxu1 %v6110_v48  ;;  %v2414_v11 = vunpack.c.0.s8 %v2413_v6  ;;  %v6148_v14 = vld [vmem:[%s7736_s21 + $0x6a4] ss:$8 sps:$4 sm:$0xff]   ;;  %v6151_v16 = vld [vmem:[%s7736_s21 + $0x6a0] ss:$8 sps:$4 sm:$0xff]   ;;  %v6154_v19 = vld [vmem:[%s7736_s21 + $0x6b4] ss:$8 sps:$4 sm:$0xff]  }
 0x1d6   : > { %4945 = vmatprep.subr.bf16.mxu0 %v6112_v49  ;;  %v7793_v20 = vld [vmem:[%s8381_s0] sm:$0xff]  ;;  %v6156_v21 = vld [vmem:[%s7736_s21 + $0xb0] ss:$8 sps:$4 sm:$0xff]   ;;  %vm4684_vm2 = vcmask 1043456   ;;  %vm5340_vm5 = vcmask 25600   ;;  %p5919_p11 = scmp.ne.s32.totalorder %s6866_s24, 3 }
 0x1d7   : > { %v7786_v17 = vsub.s32 %v2414_v11, %v7778_v10  ;;  %v6157_v23 = vld [vmem:[%s7736_s21 + $0x6b0] ss:$8 sps:$4 sm:$0xff]   ;;  %v6158_v25 = vld [vmem:[%s7736_s21 + $0xc4] ss:$8 sps:$4 sm:$0xff]   ;;  %v6162_v31 = vld [vmem:[%s7736_s21 + $0xc0] ss:$8 sps:$4 sm:$0xff]  }
 0x1d8   : > { %4700 = vmatpush1.bf16.msra.mxu1 %v6114_v50  ;;  %v1977_v24 = vld [vmem:[%s8381_s0 + $0x8] sm:$0xff]  ;;  %vm5370_vm6 = vcmask (!%p5919_p11), 25616   ;;  %vm5355_vm7 = vcmask (!%p5919_p11), 9216  }
 0x1d9   : > { %4946 = vmatpush1.bf16.msra.mxu0 %v6115_v51  ;;  %4701 = vmatprep.subr.bf16.mxu1 %v6116_v52  ;;  %v2418_v22 = vrot.slane %v7793_v20, %v7786_v17  ;;  %v6160_v26 = vld [vmem:[%s7736_s21 + $0x6c4] ss:$8 sps:$4 sm:$0xff]   ;;  %v2460_v28 = vcombine.high %v1977_v24, %v1977_v24  ;;  %v6163_v32 = vld [vmem:[%s7736_s21 + $0x6c0] ss:$8 sps:$4 sm:$0xff]   ;;  %v6164_v33 = vld [vmem:[%s7736_s21 + $0xd4] ss:$8 sps:$4 sm:$0xff]  }
 0x1da   : > { %4947 = vmatprep.subr.bf16.mxu0 %v6118_v53  ;;  %v6166_v34 = vld [vmem:[%s7736_s21 + $0x6d4] ss:$8 sps:$4 sm:$0xff]   ;;  %v6168_v37 = vld [vmem:[%s7736_s21 + $0xd0] ss:$8 sps:$4 sm:$0xff]   ;;  %v6170_v39 = vld [vmem:[%s7736_s21 + $0xe4] ss:$8 sps:$4 sm:$0xff]  }
 0x1db   : > { %v2426_v27 = vcombine.high %v2418_v22, %v2418_v22  ;;  %v2474_v30 = vrot.slane %v2460_v28, %v7786_v17  ;;  %v6169_v38 = vld [vmem:[%s7736_s21 + $0x6d0] ss:$8 sps:$4 sm:$0xff]   ;;  %v6172_v40 = vld [vmem:[%s7736_s21 + $0x6e4] ss:$8 sps:$4 sm:$0xff]   ;;  %v6174_v41 = vld [vmem:[%s7736_s21 + $0xe0] ss:$8 sps:$4 sm:$0xff]   ;;  %v7824_v49 = vrot.slane %v2418_v22, %v7786_v17 }
 0x1dc   : > { %4702 = vmatpush1.bf16.msra.mxu1 %v6120_v54  ;;  %v6175_v42 = vld [vmem:[%s7736_s21 + $0x6e0] ss:$8 sps:$4 sm:$0xff]   ;;  %v6176_v43 = vld [vmem:[%s7736_s21 + $0xf4] ss:$8 sps:$4 sm:$0xff]   ;;  %v6180_v45 = vld [vmem:[%s7736_s21 + $0xf0] ss:$8 sps:$4 sm:$0xff]  }
 0x1dd   : > { %4948 = vmatpush1.bf16.msra.mxu0 %v6121_v55  ;;  %4703 = vmatprep.subr.bf16.mxu1 %v6122_v56  ;;  %v2448_v29 = vrot.slane %v2426_v27, %v7786_v17  ;;  %v2476_v35 = vcombine.high %v2474_v30, %v2474_v30  ;;  %v6178_v44 = vld [vmem:[%s7736_s21 + $0x6f4] ss:$8 sps:$4 sm:$0xff]   ;;  %v6181_v46 = vld [vmem:[%s7736_s21 + $0x6f0] ss:$8 sps:$4 sm:$0xff]   ;;  %v6185_v47 = vld [vmem:[%s7736_s21 + $0x104] ss:$8 sps:$4 sm:$0xff]   ;;  %v7827_v50 = vrot.slane %v2474_v30, %v7786_v17 }
 0x1de   : > { %4949 = vmatprep.subr.bf16.mxu0 %v6124_v57  ;;  %v6189_v48 = vld [vmem:[%s7736_s21 + $0x704] ss:$8 sps:$4 sm:$0xff]   ;;  %v6183_v51 = vld [vmem:[%s7736_s21 + $0x100] ss:$8 sps:$4 sm:$0xff]   ;;  %v6192_v53 = vld [vmem:[%s7736_s21 + $0x114] ss:$8 sps:$4 sm:$0xff]  }
 0x1df   : > { %4723 = vmatprep.mubr.bf16.mxu1 %v2448_v29  ;;  %v2504_v36 = vrot.slane %v2476_v35, %v7786_v17  ;;  %v6187_v52 = vld [vmem:[%s7736_s21 + $0x700] ss:$8 sps:$4 sm:$0xff]   ;;  %v6195_v54 = vld [vmem:[%s7736_s21 + $0x714] ss:$8 sps:$4 sm:$0xff]   ;;  %v2458_v55 = vcombine.high %v2448_v29, %v2448_v29  ;;  %v6190_v57 = vld [vmem:[%s7736_s21 + $0x110] ss:$8 sps:$4 sm:$0xff]  }
 0x1e0   : > { %4704 = vmatpush1.bf16.msra.mxu1 %v6126_v58  ;;  %v6193_v58 = vld [vmem:[%s7736_s21 + $0x710] ss:$8 sps:$4 sm:$0xff]   ;;  %v6213_v4 = vld [vmem:[%s7736_s21 + $0x744] ss:$8 sps:$4 sm:$0xff]   ;;  %v6208_v5 = vld [vmem:[%s7736_s21 + $0x140] ss:$8 sps:$4 sm:$0xff]  }
 0x1e1   : > { %4950 = vmatpush1.bf16.msra.mxu0 %v6127_v59  ;;  %4705 = vmatprep.subr.bf16.mxu1 %v6128_v60  ;;  %v2508_v56 = vcombine.high %v2504_v36, %v2504_v36  ;;  %v6198_v59 = vld [vmem:[%s7736_s21 + $0x124] ss:$8 sps:$4 sm:$0xff]   ;;  %v6211_v6 = vld [vmem:[%s7736_s21 + $0x740] ss:$8 sps:$4 sm:$0xff]   ;;  %v6217_v11 = vld [vmem:[%s7736_s21 + $0x750] ss:$8 sps:$4 sm:$0xff]  }
 0x1e2   : > { %4951 = vmatprep.subr.bf16.mxu0 %v6130_v61  ;;  %4969 = vmatprep.mubr.bf16.mxu0 %v2504_v36  ;;  %v6201_v60 = vld [vmem:[%s7736_s21 + $0x724] ss:$8 sps:$4 sm:$0xff]   ;;  %v6196_v61 = vld [vmem:[%s7736_s21 + $0x120] ss:$8 sps:$4 sm:$0xff]   ;;  %v6243_v27 = vld [vmem:[%s7736_s21 + $0x794] ss:$8 sps:$4 sm:$0xff]  }
 0x1e3   : > { %v6234_v22 = vld [vmem:[%s7736_s21 + $0x184] ss:$8 sps:$4 sm:$0xff]   ;;  %v6232_v24 = vld [vmem:[%s7736_s21 + $0x180] ss:$8 sps:$4 sm:$0xff]   ;;  %v6238_v28 = vld [vmem:[%s7736_s21 + $0x190] ss:$8 sps:$4 sm:$0xff]  }
 0x1e4   : > { %4706 = vmatpush1.bf16.msra.mxu1 %v6132_v62  ;;  %v6199_v62 = vld [vmem:[%s7736_s21 + $0x720] ss:$8 sps:$4 sm:$0xff]   ;;  %v6241_v29 = vld [vmem:[%s7736_s21 + $0x790] ss:$8 sps:$4 sm:$0xff]   ;;  %v6246_v30 = vld [vmem:[%s7736_s21 + $0x1a4] ss:$8 sps:$4 sm:$0xff]  }
 0x1e5   : > { %4952 = vmatpush1.bf16.msra.mxu0 %v6133_v63  ;;  %4707 = vmatprep.subr.bf16.mxu1 %v6134_v0  ;;  %v6204_v63 = vld [vmem:[%s7736_s21 + $0x134] ss:$8 sps:$4 sm:$0xff]   ;;  %v6250_v36 = vld [vmem:[%s7736_s21 + $0x1b0] ss:$8 sps:$4 sm:$0xff]  }
 0x1e6   : > { %4953 = vmatprep.subr.bf16.mxu0 %v6136_v1  ;;  %v6207_v0 = vld [vmem:[%s7736_s21 + $0x734] ss:$8 sps:$4 sm:$0xff]   ;;  %v6202_v1 = vld [vmem:[%s7736_s21 + $0x130] ss:$8 sps:$4 sm:$0xff]  }
 0x1e7   : > { %v6255_v35 = vld [vmem:[%s7736_s21 + $0x7b4] ss:$8 sps:$4 sm:$0xff]  }
 0x1e8   : > { %4708 = vmatpush1.bf16.msra.mxu1 %v6138_v2  ;;  %v6205_v2 = vld [vmem:[%s7736_s21 + $0x730] ss:$8 sps:$4 sm:$0xff]  }
 0x1e9   : > { %4954 = vmatpush1.bf16.msra.mxu0 %v6139_v3  ;;  %4709 = vmatprep.subr.bf16.mxu1 %v6140_v7  ;;  %v6210_v3 = vld [vmem:[%s7736_s21 + $0x144] ss:$8 sps:$4 sm:$0xff]   ;;  %v6216_v7 = vld [vmem:[%s7736_s21 + $0x154] ss:$8 sps:$4 sm:$0xff]  }
 0x1ea   : > { %4955 = vmatprep.subr.bf16.mxu0 %v6142_v8  ;;  %v6219_v8 = vld [vmem:[%s7736_s21 + $0x754] ss:$8 sps:$4 sm:$0xff]  }
 0x1ec   : > { %4710 = vmatpush1.bf16.msra.mxu1 %v6144_v9  ;;  %v6214_v9 = vld [vmem:[%s7736_s21 + $0x150] ss:$8 sps:$4 sm:$0xff]  }
 0x1ed   : > { %4956 = vmatpush1.bf16.msra.mxu0 %v6145_v12  ;;  %4711 = vmatprep.subr.bf16.mxu1 %v6146_v13  ;;  %v6222_v12 = vld [vmem:[%s7736_s21 + $0x164] ss:$8 sps:$4 sm:$0xff]  }
 0x1ee   : > { %4957 = vmatprep.subr.bf16.mxu0 %v6148_v14  ;;  %v6225_v13 = vld [vmem:[%s7736_s21 + $0x764] ss:$8 sps:$4 sm:$0xff]   ;;  %v6220_v14 = vld [vmem:[%s7736_s21 + $0x160] ss:$8 sps:$4 sm:$0xff]  }
 0x1f0   : > { %4712 = vmatpush1.bf16.msra.mxu1 %v6150_v15  ;;  %v6223_v15 = vld [vmem:[%s7736_s21 + $0x760] ss:$8 sps:$4 sm:$0xff]  }
 0x1f1   : > { %4958 = vmatpush1.bf16.msra.mxu0 %v6151_v16  ;;  %4713 = vmatprep.subr.bf16.mxu1 %v6152_v18  ;;  %v6228_v16 = vld [vmem:[%s7736_s21 + $0x174] ss:$8 sps:$4 sm:$0xff]  }
 0x1f2   : > { %4959 = vmatprep.subr.bf16.mxu0 %v6154_v19  ;;  %v6231_v18 = vld [vmem:[%s7736_s21 + $0x774] ss:$8 sps:$4 sm:$0xff]   ;;  %v6226_v19 = vld [vmem:[%s7736_s21 + $0x170] ss:$8 sps:$4 sm:$0xff]  }
 0x1f4   : > { %4714 = vmatpush1.bf16.msra.mxu1 %v6156_v21  ;;  %v6229_v21 = vld [vmem:[%s7736_s21 + $0x770] ss:$8 sps:$4 sm:$0xff]  }
 0x1f5   : > { %4960 = vmatpush1.bf16.msra.mxu0 %v6157_v23  ;;  %4715 = vmatprep.subr.bf16.mxu1 %v6158_v25  ;;  %v6237_v23 = vld [vmem:[%s7736_s21 + $0x784] ss:$8 sps:$4 sm:$0xff]   ;;  %v6235_v25 = vld [vmem:[%s7736_s21 + $0x780] ss:$8 sps:$4 sm:$0xff]  }
 0x1f6   : > { %4961 = vmatprep.subr.bf16.mxu0 %v6160_v26  ;;  %v6240_v26 = vld [vmem:[%s7736_s21 + $0x194] ss:$8 sps:$4 sm:$0xff]  }
 0x1f8   : > { %4716 = vmatpush1.bf16.msra.mxu1 %v6162_v31  ;;  %v6249_v31 = vld [vmem:[%s7736_s21 + $0x7a4] ss:$8 sps:$4 sm:$0xff]  }
 0x1f9   : > { %4962 = vmatpush1.bf16.msra.mxu0 %v6163_v32  ;;  %4717 = vmatprep.subr.bf16.mxu1 %v6164_v33  ;;  %v6244_v32 = vld [vmem:[%s7736_s21 + $0x1a0] ss:$8 sps:$4 sm:$0xff]  }
 0x1fa   : > { %4963 = vmatprep.subr.bf16.mxu0 %v6166_v34  ;;  %v6247_v33 = vld [vmem:[%s7736_s21 + $0x7a0] ss:$8 sps:$4 sm:$0xff]   ;;  %v6252_v34 = vld [vmem:[%s7736_s21 + $0x1b4] ss:$8 sps:$4 sm:$0xff]  }
 0x1fc   : > { %4718 = vmatpush1.bf16.msra.mxu1 %v6168_v37  ;;  %v6253_v37 = vld [vmem:[%s7736_s21 + $0x7b0] ss:$8 sps:$4 sm:$0xff]  }
 0x1fd   : > { %4964 = vmatpush1.bf16.msra.mxu0 %v6169_v38  ;;  %4719 = vmatprep.subr.bf16.mxu1 %v6170_v39  ;;  %v6258_v38 = vld [vmem:[%s7736_s21 + $0x1c4] ss:$8 sps:$4 sm:$0xff]  }
 0x1fe   : > { %4965 = vmatprep.subr.bf16.mxu0 %v6172_v40  ;;  %v6261_v39 = vld [vmem:[%s7736_s21 + $0x7c4] ss:$8 sps:$4 sm:$0xff]   ;;  %v6256_v40 = vld [vmem:[%s7736_s21 + $0x1c0] ss:$8 sps:$4 sm:$0xff]  }
 0x200   : > { %4720 = vmatpush1.bf16.msra.mxu1 %v6174_v41  ;;  %v6259_v41 = vld [vmem:[%s7736_s21 + $0x7c0] ss:$8 sps:$4 sm:$0xff]  }
 0x201   : > { %4966 = vmatpush1.bf16.msra.mxu0 %v6175_v42  ;;  %4721 = vmatprep.subr.bf16.mxu1 %v6176_v43  ;;  %v6264_v42 = vld [vmem:[%s7736_s21 + $0x1d4] ss:$8 sps:$4 sm:$0xff]  }
 0x202   : > { %4967 = vmatprep.subr.bf16.mxu0 %v6178_v44  ;;  %v6267_v43 = vld [vmem:[%s7736_s21 + $0x7d4] ss:$8 sps:$4 sm:$0xff]   ;;  %v6262_v44 = vld [vmem:[%s7736_s21 + $0x1d0] ss:$8 sps:$4 sm:$0xff]  }
 0x204   : > { %4722 = vmatpush1.bf16.msra.mxu1 %v6180_v45  ;;  %v6265_v45 = vld [vmem:[%s7736_s21 + $0x7d0] ss:$8 sps:$4 sm:$0xff]  }
 0x205   : > { %4968 = vmatpush1.bf16.msra.mxu0 %v6181_v46  ;;  %4732 = vmatprep.subr.bf16.mxu1 %v6185_v47  ;;  %v6270_v46 = vld [vmem:[%s7736_s21 + $0x1e4] ss:$8 sps:$4 sm:$0xff]  }
 0x206   : > { %4978 = vmatprep.subr.bf16.mxu0 %v6189_v48  ;;  %v6273_v47 = vld [vmem:[%s7736_s21 + $0x7e4] ss:$8 sps:$4 sm:$0xff]   ;;  %v2411_v48 = vcombine.high %v7793_v20, %v7793_v20  ;;  %v6277_v20 = vld [vmem:[%s7736_s21 + $0x7f0] ss:$8 sps:$4 sm:$0xff]  }
 0x207   : > { %4724 = vmatmul.mubr.bf16.vlgmr.msra.gmra.mrb[0].mxu1 %v7824_v49 }
 0x208   : > { %4970 = vmatmul.mubr.bf16.vlgmr.msra.gmra.mrb[0].mxu0 %v7827_v50  ;;  %4733 = vmatpush1.bf16.msra.mxu1 %v6183_v51  ;;  %v6268_v51 = vld [vmem:[%s7736_s21 + $0x1e0] ss:$8 sps:$4 sm:$0xff]  }
 0x209   : > { %4979 = vmatpush1.bf16.msra.mxu0 %v6187_v52  ;;  %4734 = vmatprep.subr.bf16.mxu1 %v6192_v53  ;;  %v6271_v52 = vld [vmem:[%s7736_s21 + $0x7e0] ss:$8 sps:$4 sm:$0xff]   ;;  %v6276_v53 = vld [vmem:[%s7736_s21 + $0x1f4] ss:$8 sps:$4 sm:$0xff]  }
 0x20a   : > { %4980 = vmatprep.subr.bf16.mxu0 %v6195_v54  ;;  %4764 = vmatprep.mubr.bf16.mxu1 %v2458_v55  ;;  %v6279_v54 = vld [vmem:[%s7736_s21 + $0x7f4] ss:$8 sps:$4 sm:$0xff]   ;;  %v7894_v55 = vrot.slane %v2411_v48, %v7786_v17  ;;  %v6346_v48 = vld [vmem:[%s7736_s21 + $0x2b0] ss:$8 sps:$4 sm:$0xff]  }
 0x20b   : > { %5010 = vmatprep.mubr.bf16.mxu0 %v2508_v56  ;;  %v6274_v56 = vld [vmem:[%s7736_s21 + $0x1f0] ss:$8 sps:$4 sm:$0xff]  }
 0x20c   : > { %4735 = vmatpush1.bf16.msra.mxu1 %v6190_v57  ;;  %v6282_v57 = vld [vmem:[%s7736_s21 + $0x204] ss:$8 sps:$4 sm:$0xff]  }
 0x20d   : > { %4981 = vmatpush1.bf16.msra.mxu0 %v6193_v58  ;;  %4736 = vmatprep.subr.bf16.mxu1 %v6198_v59  ;;  %v6285_v58 = vld [vmem:[%s7736_s21 + $0x804] ss:$8 sps:$4 sm:$0xff]   ;;  %v2427_v59 = vcombine.high %v7894_v55, %v7894_v55 }
 0x20e   : > { %4982 = vmatprep.subr.bf16.mxu0 %v6201_v60  ;;  %v2456_v60 = vcombine.high %v7824_v49, %v7824_v49  ;;  %v7916_v49 = vld [vmem:[%s8381_s0 + $0x10] sm:$0xff] }
 0x210   : > { %4737 = vmatpush1.bf16.msra.mxu1 %v6196_v61  ;;  %v2506_v61 = vcombine.high %v7827_v50, %v7827_v50  ;;  %v6286_v50 = vld [vmem:[%s7736_s21 + $0x210] ss:$8 sps:$4 sm:$0xff]  }
 0x211   : > { %4983 = vmatpush1.bf16.msra.mxu0 %v6199_v62  ;;  %4738 = vmatprep.subr.bf16.mxu1 %v6204_v63  ;;  %v6280_v62 = vld [vmem:[%s7736_s21 + $0x200] ss:$8 sps:$4 sm:$0xff]  }
 0x212   : > { %4984 = vmatprep.subr.bf16.mxu0 %v6207_v0  ;;  %v6283_v63 = vld [vmem:[%s7736_s21 + $0x800] ss:$8 sps:$4 sm:$0xff]   ;;  %v6288_v0 = vld [vmem:[%s7736_s21 + $0x214] ss:$8 sps:$4 sm:$0xff]  }
 0x214   : > { %4739 = vmatpush1.bf16.msra.mxu1 %v6202_v1  ;;  %v6291_v1 = vld [vmem:[%s7736_s21 + $0x814] ss:$8 sps:$4 sm:$0xff]  }
 0x215   : > { %4985 = vmatpush1.bf16.msra.mxu0 %v6205_v2  ;;  %4740 = vmatprep.subr.bf16.mxu1 %v6210_v3  ;;  %v7911_v2 = vrot.slane %v2427_v59, %v7786_v17  ;;  %v7921_v3 = vrot.slane %v7916_v49, %v7786_v17  ;;  %v6361_v59 = vld [vmem:[%s7736_s21 + $0x8d0] ss:$8 sps:$4 sm:$0xff]  }
 0x216   : > { %4986 = vmatprep.subr.bf16.mxu0 %v6213_v4  ;;  %v6289_v4 = vld [vmem:[%s7736_s21 + $0x810] ss:$8 sps:$4 sm:$0xff]  }
 0x218   : > { %4741 = vmatpush1.bf16.msra.mxu1 %v6208_v5  ;;  %v6294_v5 = vld [vmem:[%s7736_s21 + $0x224] ss:$8 sps:$4 sm:$0xff]  }
 0x219   : > { %4987 = vmatpush1.bf16.msra.mxu0 %v6211_v6  ;;  %4742 = vmatprep.subr.bf16.mxu1 %v6216_v7  ;;  %v6297_v6 = vld [vmem:[%s7736_s21 + $0x824] ss:$8 sps:$4 sm:$0xff]   ;;  %v2524_v7 = vcombine.high %v7921_v3, %v7921_v3 }
 0x21a   : > { %4988 = vmatprep.subr.bf16.mxu0 %v6219_v8  ;;  %v6292_v8 = vld [vmem:[%s7736_s21 + $0x220] ss:$8 sps:$4 sm:$0xff]  }
 0x21c   : > { %4743 = vmatpush1.bf16.msra.mxu1 %v6214_v9  ;;  %v7931_v9 = vrot.slane %v2524_v7, %v7786_v17  ;;  %v6376_v7 = vld [vmem:[%s7736_s21 + $0x300] ss:$8 sps:$4 sm:$0xff]  }
 0x21d   : > { %4989 = vmatpush1.bf16.msra.mxu0 %v6217_v11  ;;  %4744 = vmatprep.subr.bf16.mxu1 %v6222_v12  ;;  %v6295_v11 = vld [vmem:[%s7736_s21 + $0x820] ss:$8 sps:$4 sm:$0xff]   ;;  %v6300_v12 = vld [vmem:[%s7736_s21 + $0x234] ss:$8 sps:$4 sm:$0xff]  }
 0x21e   : > { %4990 = vmatprep.subr.bf16.mxu0 %v6225_v13  ;;  %v6303_v13 = vld [vmem:[%s7736_s21 + $0x834] ss:$8 sps:$4 sm:$0xff]  }
 0x220   : > { %4745 = vmatpush1.bf16.msra.mxu1 %v6220_v14  ;;  %v6298_v14 = vld [vmem:[%s7736_s21 + $0x230] ss:$8 sps:$4 sm:$0xff]  }
 0x221   : > { %4991 = vmatpush1.bf16.msra.mxu0 %v6223_v15  ;;  %4746 = vmatprep.subr.bf16.mxu1 %v6228_v16  ;;  %v6301_v15 = vld [vmem:[%s7736_s21 + $0x830] ss:$8 sps:$4 sm:$0xff]   ;;  %v6306_v16 = vld [vmem:[%s7736_s21 + $0x244] ss:$8 sps:$4 sm:$0xff]  }
 0x222   : > { %4992 = vmatprep.subr.bf16.mxu0 %v6231_v18  ;;  %v6309_v18 = vld [vmem:[%s7736_s21 + $0x844] ss:$8 sps:$4 sm:$0xff]  }
 0x224   : > { %4747 = vmatpush1.bf16.msra.mxu1 %v6226_v19  ;;  %v6304_v19 = vld [vmem:[%s7736_s21 + $0x240] ss:$8 sps:$4 sm:$0xff]  }
 0x225   : > { %4993 = vmatpush1.bf16.msra.mxu0 %v6229_v21  ;;  %4748 = vmatprep.subr.bf16.mxu1 %v6234_v22  ;;  %v6307_v21 = vld [vmem:[%s7736_s21 + $0x840] ss:$8 sps:$4 sm:$0xff]   ;;  %v6312_v22 = vld [vmem:[%s7736_s21 + $0x254] ss:$8 sps:$4 sm:$0xff]  }
 0x226   : > { %4994 = vmatprep.subr.bf16.mxu0 %v6237_v23  ;;  %v6315_v23 = vld [vmem:[%s7736_s21 + $0x854] ss:$8 sps:$4 sm:$0xff]  }
 0x228   : > { %4749 = vmatpush1.bf16.msra.mxu1 %v6232_v24  ;;  %v6310_v24 = vld [vmem:[%s7736_s21 + $0x250] ss:$8 sps:$4 sm:$0xff]  }
 0x229   : > { %4995 = vmatpush1.bf16.msra.mxu0 %v6235_v25  ;;  %4750 = vmatprep.subr.bf16.mxu1 %v6240_v26  ;;  %v6313_v25 = vld [vmem:[%s7736_s21 + $0x850] ss:$8 sps:$4 sm:$0xff]   ;;  %v6318_v26 = vld [vmem:[%s7736_s21 + $0x264] ss:$8 sps:$4 sm:$0xff]  }
 0x22a   : > { %4996 = vmatprep.subr.bf16.mxu0 %v6243_v27  ;;  %v6321_v27 = vld [vmem:[%s7736_s21 + $0x864] ss:$8 sps:$4 sm:$0xff]  }
 0x22c   : > { %4751 = vmatpush1.bf16.msra.mxu1 %v6238_v28  ;;  %v6316_v28 = vld [vmem:[%s7736_s21 + $0x260] ss:$8 sps:$4 sm:$0xff]  }
 0x22d   : > { %4997 = vmatpush1.bf16.msra.mxu0 %v6241_v29  ;;  %4752 = vmatprep.subr.bf16.mxu1 %v6246_v30  ;;  %v6319_v29 = vld [vmem:[%s7736_s21 + $0x860] ss:$8 sps:$4 sm:$0xff]   ;;  %v6324_v30 = vld [vmem:[%s7736_s21 + $0x274] ss:$8 sps:$4 sm:$0xff]  }
 0x22e   : > { %4998 = vmatprep.subr.bf16.mxu0 %v6249_v31  ;;  %v6327_v31 = vld [vmem:[%s7736_s21 + $0x874] ss:$8 sps:$4 sm:$0xff]  }
 0x230   : > { %4753 = vmatpush1.bf16.msra.mxu1 %v6244_v32  ;;  %v6322_v32 = vld [vmem:[%s7736_s21 + $0x270] ss:$8 sps:$4 sm:$0xff]  }
 0x231   : > { %4999 = vmatpush1.bf16.msra.mxu0 %v6247_v33  ;;  %4754 = vmatprep.subr.bf16.mxu1 %v6252_v34  ;;  %v6325_v33 = vld [vmem:[%s7736_s21 + $0x870] ss:$8 sps:$4 sm:$0xff]   ;;  %v6330_v34 = vld [vmem:[%s7736_s21 + $0x284] ss:$8 sps:$4 sm:$0xff]  }
 0x232   : > { %5000 = vmatprep.subr.bf16.mxu0 %v6255_v35  ;;  %v6333_v35 = vld [vmem:[%s7736_s21 + $0x884] ss:$8 sps:$4 sm:$0xff]  }
 0x234   : > { %4755 = vmatpush1.bf16.msra.mxu1 %v6250_v36  ;;  %v6328_v36 = vld [vmem:[%s7736_s21 + $0x280] ss:$8 sps:$4 sm:$0xff]  }
 0x235   : > { %5001 = vmatpush1.bf16.msra.mxu0 %v6253_v37  ;;  %4756 = vmatprep.subr.bf16.mxu1 %v6258_v38  ;;  %v6331_v37 = vld [vmem:[%s7736_s21 + $0x880] ss:$8 sps:$4 sm:$0xff]   ;;  %v6336_v38 = vld [vmem:[%s7736_s21 + $0x294] ss:$8 sps:$4 sm:$0xff]  }
 0x236   : > { %5002 = vmatprep.subr.bf16.mxu0 %v6261_v39  ;;  %v6339_v39 = vld [vmem:[%s7736_s21 + $0x894] ss:$8 sps:$4 sm:$0xff]  }
 0x238   : > { %4757 = vmatpush1.bf16.msra.mxu1 %v6256_v40  ;;  %v6334_v40 = vld [vmem:[%s7736_s21 + $0x290] ss:$8 sps:$4 sm:$0xff]  }
 0x239   : > { %5003 = vmatpush1.bf16.msra.mxu0 %v6259_v41  ;;  %4758 = vmatprep.subr.bf16.mxu1 %v6264_v42  ;;  %v6337_v41 = vld [vmem:[%s7736_s21 + $0x890] ss:$8 sps:$4 sm:$0xff]   ;;  %v6342_v42 = vld [vmem:[%s7736_s21 + $0x2a4] ss:$8 sps:$4 sm:$0xff]  }
 0x23a   : > { %5004 = vmatprep.subr.bf16.mxu0 %v6267_v43  ;;  %v6345_v43 = vld [vmem:[%s7736_s21 + $0x8a4] ss:$8 sps:$4 sm:$0xff]  }
 0x23c   : > { %4759 = vmatpush1.bf16.msra.mxu1 %v6262_v44  ;;  %v6340_v44 = vld [vmem:[%s7736_s21 + $0x2a0] ss:$8 sps:$4 sm:$0xff]  }
 0x23d   : > { %5005 = vmatpush1.bf16.msra.mxu0 %v6265_v45  ;;  %4760 = vmatprep.subr.bf16.mxu1 %v6270_v46  ;;  %v6343_v45 = vld [vmem:[%s7736_s21 + $0x8a0] ss:$8 sps:$4 sm:$0xff]   ;;  %v6348_v46 = vld [vmem:[%s7736_s21 + $0x2b4] ss:$8 sps:$4 sm:$0xff]  }
 0x23e   : > { %5006 = vmatprep.subr.bf16.mxu0 %v6273_v47  ;;  %v6351_v47 = vld [vmem:[%s7736_s21 + $0x8b4] ss:$8 sps:$4 sm:$0xff]  }
 0x240   : > { %4761 = vmatpush1.bf16.msra.mxu1 %v6268_v51  ;;  %v6349_v51 = vld [vmem:[%s7736_s21 + $0x8b0] ss:$8 sps:$4 sm:$0xff]  }
 0x241   : > { %5007 = vmatpush1.bf16.msra.mxu0 %v6271_v52  ;;  %4762 = vmatprep.subr.bf16.mxu1 %v6276_v53  ;;  %v6354_v52 = vld [vmem:[%s7736_s21 + $0x2c4] ss:$8 sps:$4 sm:$0xff]  }
 0x242   : > { %5008 = vmatprep.subr.bf16.mxu0 %v6279_v54  ;;  %v6357_v53 = vld [vmem:[%s7736_s21 + $0x8c4] ss:$8 sps:$4 sm:$0xff]   ;;  %v6352_v54 = vld [vmem:[%s7736_s21 + $0x2c0] ss:$8 sps:$4 sm:$0xff]  }
 0x244   : > { %4763 = vmatpush1.bf16.msra.mxu1 %v6274_v56  ;;  %v6355_v56 = vld [vmem:[%s7736_s21 + $0x8c0] ss:$8 sps:$4 sm:$0xff]  }
 0x245   : > { %5009 = vmatpush1.bf16.msra.mxu0 %v6277_v20  ;;  %4773 = vmatprep.subr.bf16.mxu1 %v6282_v57  ;;  %v6360_v20 = vld [vmem:[%s7736_s21 + $0x2d4] ss:$8 sps:$4 sm:$0xff]  }
 0x246   : > { %5019 = vmatprep.subr.bf16.mxu0 %v6285_v58  ;;  %v6363_v57 = vld [vmem:[%s7736_s21 + $0x8d4] ss:$8 sps:$4 sm:$0xff]   ;;  %v6358_v58 = vld [vmem:[%s7736_s21 + $0x2d0] ss:$8 sps:$4 sm:$0xff]  }
 0x247   : > { %4765 = vmatmul.mubr.bf16.vlgmr.msra.gmra.mrb[0].mxu1 %v2456_v60  ;;  %v6366_v60 = vld [vmem:[%s7736_s21 + $0x2e4] ss:$8 sps:$4 sm:$0xff]  }
 0x248   : > { %5011 = vmatmul.mubr.bf16.vlgmr.msra.gmra.mrb[0].mxu0 %v2506_v61  ;;  %4774 = vmatpush1.bf16.msra.mxu1 %v6280_v62  ;;  %v6369_v61 = vld [vmem:[%s7736_s21 + $0x8e4] ss:$8 sps:$4 sm:$0xff]   ;;  %v6364_v62 = vld [vmem:[%s7736_s21 + $0x2e0] ss:$8 sps:$4 sm:$0xff]  }
 0x249   : > { %5020 = vmatpush1.bf16.msra.mxu0 %v6283_v63  ;;  %4775 = vmatprep.subr.bf16.mxu1 %v6288_v0  ;;  %v6367_v63 = vld [vmem:[%s7736_s21 + $0x8e0] ss:$8 sps:$4 sm:$0xff]   ;;  %v6372_v0 = vld [vmem:[%s7736_s21 + $0x2f4] ss:$8 sps:$4 sm:$0xff]  }
 0x24a   : > { %5021 = vmatprep.subr.bf16.mxu0 %v6291_v1  ;;  %4805 = vmatprep.mubr.bf16.mxu1 %v7911_v2  ;;  %v6375_v1 = vld [vmem:[%s7736_s21 + $0x8f4] ss:$8 sps:$4 sm:$0xff]  }
 0x24b   : > { %5051 = vmatprep.mubr.bf16.mxu0 %v7931_v9 }
 0x24c   : > { %4776 = vmatpush1.bf16.msra.mxu1 %v6286_v50  ;;  %v6370_v50 = vld [vmem:[%s7736_s21 + $0x2f0] ss:$8 sps:$4 sm:$0xff]  }
 0x24d   : > { %5022 = vmatpush1.bf16.msra.mxu0 %v6289_v4  ;;  %4777 = vmatprep.subr.bf16.mxu1 %v6294_v5  ;;  %v6373_v4 = vld [vmem:[%s7736_s21 + $0x8f0] ss:$8 sps:$4 sm:$0xff]   ;;  %v6378_v5 = vld [vmem:[%s7736_s21 + $0x304] ss:$8 sps:$4 sm:$0xff]  }
 0x24e   : > { %5023 = vmatprep.subr.bf16.mxu0 %v6297_v6  ;;  %v6381_v6 = vld [vmem:[%s7736_s21 + $0x904] ss:$8 sps:$4 sm:$0xff]  }
 0x250   : > { %4778 = vmatpush1.bf16.msra.mxu1 %v6292_v8  ;;  %v7992_v8 = vrot.slane %v7894_v55, %v7786_v17  ;;  %v2556_v55 = vcombine.high %v7931_v9, %v7931_v9  ;;  %v6388_v9 = vld [vmem:[%s7736_s21 + $0x320] ss:$8 sps:$4 sm:$0xff]  }
 0x251   : > { %5024 = vmatpush1.bf16.msra.mxu0 %v6295_v11  ;;  %4779 = vmatprep.subr.bf16.mxu1 %v6300_v12  ;;  %v7996_v11 = vrot.slane %v7921_v3, %v7786_v17  ;;  %v6379_v12 = vld [vmem:[%s7736_s21 + $0x900] ss:$8 sps:$4 sm:$0xff]   ;;  %v6382_v3 = vld [vmem:[%s7736_s21 + $0x310] ss:$8 sps:$4 sm:$0xff]  }
 0x252   : > { %5025 = vmatprep.subr.bf16.mxu0 %v6303_v13  ;;  %v6384_v13 = vld [vmem:[%s7736_s21 + $0x314] ss:$8 sps:$4 sm:$0xff]  }
 0x254   : > { %4780 = vmatpush1.bf16.msra.mxu1 %v6298_v14  ;;  %v6387_v14 = vld [vmem:[%s7736_s21 + $0x914] ss:$8 sps:$4 sm:$0xff]  }
 0x255   : > { %5026 = vmatpush1.bf16.msra.mxu0 %v6301_v15  ;;  %4781 = vmatprep.subr.bf16.mxu1 %v6306_v16  ;;  %v2459_v15 = vcombine.high %v7911_v2, %v7911_v2  ;;  %v6385_v16 = vld [vmem:[%s7736_s21 + $0x910] ss:$8 sps:$4 sm:$0xff]   ;;  %v6393_v2 = vld [vmem:[%s7736_s21 + $0x924] ss:$8 sps:$4 sm:$0xff]  }
 0x256   : > { %5027 = vmatprep.subr.bf16.mxu0 %v6309_v18  ;;  %v6390_v18 = vld [vmem:[%s7736_s21 + $0x324] ss:$8 sps:$4 sm:$0xff]  }
 0x258   : > { %4782 = vmatpush1.bf16.msra.mxu1 %v6304_v19  ;;  %v6391_v19 = vld [vmem:[%s7736_s21 + $0x920] ss:$8 sps:$4 sm:$0xff]  }
 0x259   : > { %5028 = vmatpush1.bf16.msra.mxu0 %v6307_v21  ;;  %4783 = vmatprep.subr.bf16.mxu1 %v6312_v22  ;;  %v6396_v21 = vld [vmem:[%s7736_s21 + $0x334] ss:$8 sps:$4 sm:$0xff]  }
 0x25a   : > { %5029 = vmatprep.subr.bf16.mxu0 %v6315_v23  ;;  %v6399_v22 = vld [vmem:[%s7736_s21 + $0x934] ss:$8 sps:$4 sm:$0xff]   ;;  %v6394_v23 = vld [vmem:[%s7736_s21 + $0x330] ss:$8 sps:$4 sm:$0xff]  }
 0x25c   : > { %4784 = vmatpush1.bf16.msra.mxu1 %v6310_v24  ;;  %v6397_v24 = vld [vmem:[%s7736_s21 + $0x930] ss:$8 sps:$4 sm:$0xff]  }
 0x25d   : > { %5030 = vmatpush1.bf16.msra.mxu0 %v6313_v25  ;;  %4785 = vmatprep.subr.bf16.mxu1 %v6318_v26  ;;  %v6402_v25 = vld [vmem:[%s7736_s21 + $0x344] ss:$8 sps:$4 sm:$0xff]  }
 0x25e   : > { %5031 = vmatprep.subr.bf16.mxu0 %v6321_v27  ;;  %v6405_v26 = vld [vmem:[%s7736_s21 + $0x944] ss:$8 sps:$4 sm:$0xff]   ;;  %v6400_v27 = vld [vmem:[%s7736_s21 + $0x340] ss:$8 sps:$4 sm:$0xff]  }
 0x260   : > { %4786 = vmatpush1.bf16.msra.mxu1 %v6316_v28  ;;  %v6403_v28 = vld [vmem:[%s7736_s21 + $0x940] ss:$8 sps:$4 sm:$0xff]  }
 0x261   : > { %5032 = vmatpush1.bf16.msra.mxu0 %v6319_v29  ;;  %4787 = vmatprep.subr.bf16.mxu1 %v6324_v30  ;;  %v6408_v29 = vld [vmem:[%s7736_s21 + $0x354] ss:$8 sps:$4 sm:$0xff]  }
 0x262   : > { %5033 = vmatprep.subr.bf16.mxu0 %v6327_v31  ;;  %v6411_v30 = vld [vmem:[%s7736_s21 + $0x954] ss:$8 sps:$4 sm:$0xff]   ;;  %v6406_v31 = vld [vmem:[%s7736_s21 + $0x350] ss:$8 sps:$4 sm:$0xff]  }
 0x264   : > { %4788 = vmatpush1.bf16.msra.mxu1 %v6322_v32  ;;  %v6409_v32 = vld [vmem:[%s7736_s21 + $0x950] ss:$8 sps:$4 sm:$0xff]  }
 0x265   : > { %5034 = vmatpush1.bf16.msra.mxu0 %v6325_v33  ;;  %4789 = vmatprep.subr.bf16.mxu1 %v6330_v34  ;;  %v6414_v33 = vld [vmem:[%s7736_s21 + $0x364] ss:$8 sps:$4 sm:$0xff]  }
 0x266   : > { %5035 = vmatprep.subr.bf16.mxu0 %v6333_v35  ;;  %v6417_v34 = vld [vmem:[%s7736_s21 + $0x964] ss:$8 sps:$4 sm:$0xff]   ;;  %v6412_v35 = vld [vmem:[%s7736_s21 + $0x360] ss:$8 sps:$4 sm:$0xff]  }
 0x268   : > { %4790 = vmatpush1.bf16.msra.mxu1 %v6328_v36  ;;  %v6415_v36 = vld [vmem:[%s7736_s21 + $0x960] ss:$8 sps:$4 sm:$0xff]  }
 0x269   : > { %5036 = vmatpush1.bf16.msra.mxu0 %v6331_v37  ;;  %4791 = vmatprep.subr.bf16.mxu1 %v6336_v38  ;;  %v6420_v37 = vld [vmem:[%s7736_s21 + $0x374] ss:$8 sps:$4 sm:$0xff]  }
 0x26a   : > { %5037 = vmatprep.subr.bf16.mxu0 %v6339_v39  ;;  %v6423_v38 = vld [vmem:[%s7736_s21 + $0x974] ss:$8 sps:$4 sm:$0xff]   ;;  %v6418_v39 = vld [vmem:[%s7736_s21 + $0x370] ss:$8 sps:$4 sm:$0xff]  }
 0x26c   : > { %4792 = vmatpush1.bf16.msra.mxu1 %v6334_v40  ;;  %v6421_v40 = vld [vmem:[%s7736_s21 + $0x970] ss:$8 sps:$4 sm:$0xff]  }
 0x26d   : > { %5038 = vmatpush1.bf16.msra.mxu0 %v6337_v41  ;;  %4793 = vmatprep.subr.bf16.mxu1 %v6342_v42  ;;  %v6426_v41 = vld [vmem:[%s7736_s21 + $0x384] ss:$8 sps:$4 sm:$0xff]  }
 0x26e   : > { %5039 = vmatprep.subr.bf16.mxu0 %v6345_v43  ;;  %v6429_v42 = vld [vmem:[%s7736_s21 + $0x984] ss:$8 sps:$4 sm:$0xff]   ;;  %v6424_v43 = vld [vmem:[%s7736_s21 + $0x380] ss:$8 sps:$4 sm:$0xff]  }
 0x270   : > { %4794 = vmatpush1.bf16.msra.mxu1 %v6340_v44  ;;  %v6427_v44 = vld [vmem:[%s7736_s21 + $0x980] ss:$8 sps:$4 sm:$0xff]  }
 0x271   : > { %5040 = vmatpush1.bf16.msra.mxu0 %v6343_v45  ;;  %4795 = vmatprep.subr.bf16.mxu1 %v6348_v46  ;;  %v6432_v45 = vld [vmem:[%s7736_s21 + $0x394] ss:$8 sps:$4 sm:$0xff]  }
 0x272   : > { %5041 = vmatprep.subr.bf16.mxu0 %v6351_v47  ;;  %v6435_v46 = vld [vmem:[%s7736_s21 + $0x994] ss:$8 sps:$4 sm:$0xff]   ;;  %v6430_v47 = vld [vmem:[%s7736_s21 + $0x390] ss:$8 sps:$4 sm:$0xff]  }
 0x274   : > { %4796 = vmatpush1.bf16.msra.mxu1 %v6346_v48  ;;  %v6433_v48 = vld [vmem:[%s7736_s21 + $0x990] ss:$8 sps:$4 sm:$0xff]  }
 0x275   : > { %5042 = vmatpush1.bf16.msra.mxu0 %v6349_v51  ;;  %4797 = vmatprep.subr.bf16.mxu1 %v6354_v52  ;;  %v6438_v51 = vld [vmem:[%s7736_s21 + $0x3a4] ss:$8 sps:$4 sm:$0xff]  }
 0x276   : > { %5043 = vmatprep.subr.bf16.mxu0 %v6357_v53  ;;  %v6441_v52 = vld [vmem:[%s7736_s21 + $0x9a4] ss:$8 sps:$4 sm:$0xff]   ;;  %v6436_v53 = vld [vmem:[%s7736_s21 + $0x3a0] ss:$8 sps:$4 sm:$0xff]  }
 0x278   : > { %4798 = vmatpush1.bf16.msra.mxu1 %v6352_v54  ;;  %v6439_v54 = vld [vmem:[%s7736_s21 + $0x9a0] ss:$8 sps:$4 sm:$0xff]  }
 0x279   : > { %5044 = vmatpush1.bf16.msra.mxu0 %v6355_v56  ;;  %4799 = vmatprep.subr.bf16.mxu1 %v6360_v20  ;;  %v6444_v56 = vld [vmem:[%s7736_s21 + $0x3b4] ss:$8 sps:$4 sm:$0xff]  }
 0x27a   : > { %5045 = vmatprep.subr.bf16.mxu0 %v6363_v57  ;;  %v6447_v20 = vld [vmem:[%s7736_s21 + $0x9b4] ss:$8 sps:$4 sm:$0xff]   ;;  %v6442_v57 = vld [vmem:[%s7736_s21 + $0x3b0] ss:$8 sps:$4 sm:$0xff]  }
 0x27c   : > { %4800 = vmatpush1.bf16.msra.mxu1 %v6358_v58  ;;  %v6445_v58 = vld [vmem:[%s7736_s21 + $0x9b0] ss:$8 sps:$4 sm:$0xff]  }
 0x27d   : > { %5046 = vmatpush1.bf16.msra.mxu0 %v6361_v59  ;;  %4801 = vmatprep.subr.bf16.mxu1 %v6366_v60  ;;  %v6450_v59 = vld [vmem:[%s7736_s21 + $0x3c4] ss:$8 sps:$4 sm:$0xff]  }
 0x27e   : > { %5047 = vmatprep.subr.bf16.mxu0 %v6369_v61  ;;  %v6453_v60 = vld [vmem:[%s7736_s21 + $0x9c4] ss:$8 sps:$4 sm:$0xff]   ;;  %v6448_v61 = vld [vmem:[%s7736_s21 + $0x3c0] ss:$8 sps:$4 sm:$0xff]  }
 0x280   : > { %4802 = vmatpush1.bf16.msra.mxu1 %v6364_v62  ;;  %v6451_v62 = vld [vmem:[%s7736_s21 + $0x9c0] ss:$8 sps:$4 sm:$0xff]  }
 0x281   : > { %5048 = vmatpush1.bf16.msra.mxu0 %v6367_v63  ;;  %4803 = vmatprep.subr.bf16.mxu1 %v6372_v0  ;;  %v6456_v63 = vld [vmem:[%s7736_s21 + $0x3d4] ss:$8 sps:$4 sm:$0xff]  }
 0x282   : > { %5049 = vmatprep.subr.bf16.mxu0 %v6375_v1  ;;  %v6459_v0 = vld [vmem:[%s7736_s21 + $0x9d4] ss:$8 sps:$4 sm:$0xff]   ;;  %v6454_v1 = vld [vmem:[%s7736_s21 + $0x3d0] ss:$8 sps:$4 sm:$0xff]  }
 0x284   : > { %4804 = vmatpush1.bf16.msra.mxu1 %v6370_v50  ;;  %v6457_v50 = vld [vmem:[%s7736_s21 + $0x9d0] ss:$8 sps:$4 sm:$0xff]  }
 0x285   : > { %5050 = vmatpush1.bf16.msra.mxu0 %v6373_v4  ;;  %4814 = vmatprep.subr.bf16.mxu1 %v6378_v5  ;;  %v6462_v4 = vld [vmem:[%s7736_s21 + $0x3e4] ss:$8 sps:$4 sm:$0xff]  }
 0x286   : > { %5060 = vmatprep.subr.bf16.mxu0 %v6381_v6  ;;  %v6465_v5 = vld [vmem:[%s7736_s21 + $0x9e4] ss:$8 sps:$4 sm:$0xff]   ;;  %v2509_v6 = vcombine.high %v7916_v49, %v7916_v49  ;;  %v6466_v49 = vld [vmem:[%s7736_s21 + $0x3f0] ss:$8 sps:$4 sm:$0xff]  }
 0x287   : > { %4806 = vmatmul.mubr.bf16.vlgmr.msra.gmra.mrb[0].mxu1 %v7992_v8 }
 0x288   : > { %5052 = vmatmul.mubr.bf16.vlgmr.msra.gmra.mrb[0].mxu0 %v7996_v11  ;;  %4815 = vmatpush1.bf16.msra.mxu1 %v6376_v7  ;;  %v6460_v7 = vld [vmem:[%s7736_s21 + $0x3e0] ss:$8 sps:$4 sm:$0xff]  }
 0x289   : > { %5061 = vmatpush1.bf16.msra.mxu0 %v6379_v12  ;;  %4816 = vmatprep.subr.bf16.mxu1 %v6384_v13  ;;  %v6463_v12 = vld [vmem:[%s7736_s21 + $0x9e0] ss:$8 sps:$4 sm:$0xff]   ;;  %v6468_v13 = vld [vmem:[%s7736_s21 + $0x3f4] ss:$8 sps:$4 sm:$0xff]  }
 0x28a   : > { %5062 = vmatprep.subr.bf16.mxu0 %v6387_v14  ;;  %4846 = vmatprep.mubr.bf16.mxu1 %v2459_v15  ;;  %v6471_v14 = vld [vmem:[%s7736_s21 + $0x9f4] ss:$8 sps:$4 sm:$0xff]  }
 0x28b   : > { %5092 = vmatprep.mubr.bf16.mxu0 %v2556_v55  ;;  %v8068_v15 = vld.sshfl [vmem:[%s8381_s0 + $0x8] sm:$0xff pattern:$0x75316420]  ;;  %v8071_v55 = vrot.slane %v2509_v6, %v7786_v17 }
 0x28c   : > { %4817 = vmatpush1.bf16.msra.mxu1 %v6382_v3  ;;  %v6469_v3 = vld [vmem:[%s7736_s21 + $0x9f0] ss:$8 sps:$4 sm:$0xff]  }
 0x28d   : > { %5063 = vmatpush1.bf16.msra.mxu0 %v6385_v16  ;;  %4818 = vmatprep.subr.bf16.mxu1 %v6390_v18  ;;  %v6474_v16 = vld [vmem:[%s7736_s21 + $0x404] ss:$8 sps:$4 sm:$0xff]   ;;  %v6541_v6 = vld [vmem:[%s7736_s21 + $0xab0] ss:$8 sps:$4 sm:$0xff]  }
 0x28e   : > { %5064 = vmatprep.subr.bf16.mxu0 %v6393_v2  ;;  %v6477_v18 = vld [vmem:[%s7736_s21 + $0xa04] ss:$8 sps:$4 sm:$0xff]   ;;  %v2475_v2 = vcombine.high %v8068_v15, %v8068_v15 }
 0x290   : > { %4819 = vmatpush1.bf16.msra.mxu1 %v6388_v9  ;;  %v2525_v9 = vcombine.high %v8071_v55, %v8071_v55 }
 0x291   : > { %5065 = vmatpush1.bf16.msra.mxu0 %v6391_v19  ;;  %4820 = vmatprep.subr.bf16.mxu1 %v6396_v21  ;;  %v6472_v19 = vld [vmem:[%s7736_s21 + $0x400] ss:$8 sps:$4 sm:$0xff]   ;;  %v2457_v21 = vcombine.high %v7992_v8, %v7992_v8 }
 0x292   : > { %5066 = vmatprep.subr.bf16.mxu0 %v6399_v22  ;;  %v2554_v22 = vcombine.high %v7996_v11, %v7996_v11  ;;  %v8095_v8 = vrot.slane %v2525_v9, %v7786_v17  ;;  %v6486_v11 = vld [vmem:[%s7736_s21 + $0x424] ss:$8 sps:$4 sm:$0xff]  }
 0x293   : > { %v6561_v9 = vld [vmem:[%s7736_s21 + $0xae4] ss:$8 sps:$4 sm:$0xff]  }
 0x294   : > { %4821 = vmatpush1.bf16.msra.mxu1 %v6394_v23  ;;  %v6475_v23 = vld [vmem:[%s7736_s21 + $0xa00] ss:$8 sps:$4 sm:$0xff]  }
 0x295   : > { %5067 = vmatpush1.bf16.msra.mxu0 %v6397_v24  ;;  %4822 = vmatprep.subr.bf16.mxu1 %v6402_v25  ;;  %v6480_v24 = vld [vmem:[%s7736_s21 + $0x414] ss:$8 sps:$4 sm:$0xff]  }
 0x296   : > { %5068 = vmatprep.subr.bf16.mxu0 %v6405_v26  ;;  %v6483_v25 = vld [vmem:[%s7736_s21 + $0xa14] ss:$8 sps:$4 sm:$0xff]   ;;  %v6478_v26 = vld [vmem:[%s7736_s21 + $0x410] ss:$8 sps:$4 sm:$0xff]  }
 0x298   : > { %4823 = vmatpush1.bf16.msra.mxu1 %v6400_v27  ;;  %v6481_v27 = vld [vmem:[%s7736_s21 + $0xa10] ss:$8 sps:$4 sm:$0xff]  }
 0x299   : > { %5069 = vmatpush1.bf16.msra.mxu0 %v6403_v28  ;;  %4824 = vmatprep.subr.bf16.mxu1 %v6408_v29  ;;  %v8092_v28 = vrot.slane %v2475_v2, %v7786_v17  ;;  %v6489_v29 = vld [vmem:[%s7736_s21 + $0xa24] ss:$8 sps:$4 sm:$0xff]  }
 0x29a   : > { %5070 = vmatprep.subr.bf16.mxu0 %v6411_v30  ;;  %v6484_v30 = vld [vmem:[%s7736_s21 + $0x420] ss:$8 sps:$4 sm:$0xff]   ;;  %v6558_v2 = vld [vmem:[%s7736_s21 + $0x4e4] ss:$8 sps:$4 sm:$0xff]  }
 0x29c   : > { %4825 = vmatpush1.bf16.msra.mxu1 %v6406_v31  ;;  %v6487_v31 = vld [vmem:[%s7736_s21 + $0xa20] ss:$8 sps:$4 sm:$0xff]  }
 0x29d   : > { %5071 = vmatpush1.bf16.msra.mxu0 %v6409_v32  ;;  %4826 = vmatprep.subr.bf16.mxu1 %v6414_v33  ;;  %v6492_v32 = vld [vmem:[%s7736_s21 + $0x434] ss:$8 sps:$4 sm:$0xff]  }
 0x29e   : > { %5072 = vmatprep.subr.bf16.mxu0 %v6417_v34  ;;  %v6495_v33 = vld [vmem:[%s7736_s21 + $0xa34] ss:$8 sps:$4 sm:$0xff]   ;;  %v6490_v34 = vld [vmem:[%s7736_s21 + $0x430] ss:$8 sps:$4 sm:$0xff]  }
 0x2a0   : > { %4827 = vmatpush1.bf16.msra.mxu1 %v6412_v35  ;;  %v6493_v35 = vld [vmem:[%s7736_s21 + $0xa30] ss:$8 sps:$4 sm:$0xff]  }
 0x2a1   : > { %5073 = vmatpush1.bf16.msra.mxu0 %v6415_v36  ;;  %4828 = vmatprep.subr.bf16.mxu1 %v6420_v37  ;;  %v6498_v36 = vld [vmem:[%s7736_s21 + $0x444] ss:$8 sps:$4 sm:$0xff]  }
 0x2a2   : > { %5074 = vmatprep.subr.bf16.mxu0 %v6423_v38  ;;  %v6501_v37 = vld [vmem:[%s7736_s21 + $0xa44] ss:$8 sps:$4 sm:$0xff]   ;;  %v6496_v38 = vld [vmem:[%s7736_s21 + $0x440] ss:$8 sps:$4 sm:$0xff]  }
 0x2a4   : > { %4829 = vmatpush1.bf16.msra.mxu1 %v6418_v39  ;;  %v6499_v39 = vld [vmem:[%s7736_s21 + $0xa40] ss:$8 sps:$4 sm:$0xff]  }
 0x2a5   : > { %5075 = vmatpush1.bf16.msra.mxu0 %v6421_v40  ;;  %4830 = vmatprep.subr.bf16.mxu1 %v6426_v41  ;;  %v6504_v40 = vld [vmem:[%s7736_s21 + $0x454] ss:$8 sps:$4 sm:$0xff]  }
 0x2a6   : > { %5076 = vmatprep.subr.bf16.mxu0 %v6429_v42  ;;  %v6507_v41 = vld [vmem:[%s7736_s21 + $0xa54] ss:$8 sps:$4 sm:$0xff]   ;;  %v6502_v42 = vld [vmem:[%s7736_s21 + $0x450] ss:$8 sps:$4 sm:$0xff]  }
 0x2a8   : > { %4831 = vmatpush1.bf16.msra.mxu1 %v6424_v43  ;;  %v6505_v43 = vld [vmem:[%s7736_s21 + $0xa50] ss:$8 sps:$4 sm:$0xff]  }
 0x2a9   : > { %5077 = vmatpush1.bf16.msra.mxu0 %v6427_v44  ;;  %4832 = vmatprep.subr.bf16.mxu1 %v6432_v45  ;;  %v6510_v44 = vld [vmem:[%s7736_s21 + $0x464] ss:$8 sps:$4 sm:$0xff]  }
 0x2aa   : > { %5078 = vmatprep.subr.bf16.mxu0 %v6435_v46  ;;  %v6513_v45 = vld [vmem:[%s7736_s21 + $0xa64] ss:$8 sps:$4 sm:$0xff]   ;;  %v6508_v46 = vld [vmem:[%s7736_s21 + $0x460] ss:$8 sps:$4 sm:$0xff]  }
 0x2ac   : > { %4833 = vmatpush1.bf16.msra.mxu1 %v6430_v47  ;;  %v6511_v47 = vld [vmem:[%s7736_s21 + $0xa60] ss:$8 sps:$4 sm:$0xff]  }
 0x2ad   : > { %5079 = vmatpush1.bf16.msra.mxu0 %v6433_v48  ;;  %4834 = vmatprep.subr.bf16.mxu1 %v6438_v51  ;;  %v6516_v48 = vld [vmem:[%s7736_s21 + $0x474] ss:$8 sps:$4 sm:$0xff]  }
 0x2ae   : > { %5080 = vmatprep.subr.bf16.mxu0 %v6441_v52  ;;  %v6519_v51 = vld [vmem:[%s7736_s21 + $0xa74] ss:$8 sps:$4 sm:$0xff]   ;;  %v6514_v52 = vld [vmem:[%s7736_s21 + $0x470] ss:$8 sps:$4 sm:$0xff]  }
 0x2b0   : > { %4835 = vmatpush1.bf16.msra.mxu1 %v6436_v53  ;;  %v6517_v53 = vld [vmem:[%s7736_s21 + $0xa70] ss:$8 sps:$4 sm:$0xff]  }
 0x2b1   : > { %5081 = vmatpush1.bf16.msra.mxu0 %v6439_v54  ;;  %4836 = vmatprep.subr.bf16.mxu1 %v6444_v56  ;;  %v6522_v54 = vld [vmem:[%s7736_s21 + $0x484] ss:$8 sps:$4 sm:$0xff]  }
 0x2b2   : > { %5082 = vmatprep.subr.bf16.mxu0 %v6447_v20  ;;  %v6525_v56 = vld [vmem:[%s7736_s21 + $0xa84] ss:$8 sps:$4 sm:$0xff]   ;;  %v6520_v20 = vld [vmem:[%s7736_s21 + $0x480] ss:$8 sps:$4 sm:$0xff]  }
 0x2b4   : > { %4837 = vmatpush1.bf16.msra.mxu1 %v6442_v57  ;;  %v6523_v57 = vld [vmem:[%s7736_s21 + $0xa80] ss:$8 sps:$4 sm:$0xff]  }
 0x2b5   : > { %5083 = vmatpush1.bf16.msra.mxu0 %v6445_v58  ;;  %4838 = vmatprep.subr.bf16.mxu1 %v6450_v59  ;;  %v6528_v58 = vld [vmem:[%s7736_s21 + $0x494] ss:$8 sps:$4 sm:$0xff]  }
 0x2b6   : > { %5084 = vmatprep.subr.bf16.mxu0 %v6453_v60  ;;  %v6531_v59 = vld [vmem:[%s7736_s21 + $0xa94] ss:$8 sps:$4 sm:$0xff]   ;;  %v6526_v60 = vld [vmem:[%s7736_s21 + $0x490] ss:$8 sps:$4 sm:$0xff]  }
 0x2b8   : > { %4839 = vmatpush1.bf16.msra.mxu1 %v6448_v61  ;;  %v6529_v61 = vld [vmem:[%s7736_s21 + $0xa90] ss:$8 sps:$4 sm:$0xff]  }
 0x2b9   : > { %5085 = vmatpush1.bf16.msra.mxu0 %v6451_v62  ;;  %4840 = vmatprep.subr.bf16.mxu1 %v6456_v63  ;;  %v6534_v62 = vld [vmem:[%s7736_s21 + $0x4a4] ss:$8 sps:$4 sm:$0xff]  }
 0x2ba   : > { %5086 = vmatprep.subr.bf16.mxu0 %v6459_v0  ;;  %v6537_v63 = vld [vmem:[%s7736_s21 + $0xaa4] ss:$8 sps:$4 sm:$0xff]   ;;  %v6532_v0 = vld [vmem:[%s7736_s21 + $0x4a0] ss:$8 sps:$4 sm:$0xff]  }
 0x2bc   : > { %4841 = vmatpush1.bf16.msra.mxu1 %v6454_v1  ;;  %v6535_v1 = vld [vmem:[%s7736_s21 + $0xaa0] ss:$8 sps:$4 sm:$0xff]  }
 0x2bd   : > { %5087 = vmatpush1.bf16.msra.mxu0 %v6457_v50  ;;  %4842 = vmatprep.subr.bf16.mxu1 %v6462_v4  ;;  %v6540_v50 = vld [vmem:[%s7736_s21 + $0x4b4] ss:$8 sps:$4 sm:$0xff]  }
 0x2be   : > { %5088 = vmatprep.subr.bf16.mxu0 %v6465_v5  ;;  %v6543_v4 = vld [vmem:[%s7736_s21 + $0xab4] ss:$8 sps:$4 sm:$0xff]   ;;  %v6538_v5 = vld [vmem:[%s7736_s21 + $0x4b0] ss:$8 sps:$4 sm:$0xff]  }
 0x2c0   : > { %4843 = vmatpush1.bf16.msra.mxu1 %v6460_v7  ;;  %v6546_v7 = vld [vmem:[%s7736_s21 + $0x4c4] ss:$8 sps:$4 sm:$0xff]  }
 0x2c1   : > { %5089 = vmatpush1.bf16.msra.mxu0 %v6463_v12  ;;  %4844 = vmatprep.subr.bf16.mxu1 %v6468_v13  ;;  %v6549_v12 = vld [vmem:[%s7736_s21 + $0xac4] ss:$8 sps:$4 sm:$0xff]   ;;  %v6544_v13 = vld [vmem:[%s7736_s21 + $0x4c0] ss:$8 sps:$4 sm:$0xff]  }
 0x2c2   : > { %5090 = vmatprep.subr.bf16.mxu0 %v6471_v14  ;;  %v6547_v14 = vld [vmem:[%s7736_s21 + $0xac0] ss:$8 sps:$4 sm:$0xff]  }
 0x2c4   : > { %4845 = vmatpush1.bf16.msra.mxu1 %v6466_v49  ;;  %v6552_v49 = vld [vmem:[%s7736_s21 + $0x4d4] ss:$8 sps:$4 sm:$0xff]  }
 0x2c5   : > { %5091 = vmatpush1.bf16.msra.mxu0 %v6469_v3  ;;  %4855 = vmatprep.subr.bf16.mxu1 %v6474_v16  ;;  %v6555_v3 = vld [vmem:[%s7736_s21 + $0xad4] ss:$8 sps:$4 sm:$0xff]   ;;  %v6550_v16 = vld [vmem:[%s7736_s21 + $0x4d0] ss:$8 sps:$4 sm:$0xff]  }
 0x2c6   : > { %5101 = vmatprep.subr.bf16.mxu0 %v6477_v18  ;;  %v6553_v18 = vld [vmem:[%s7736_s21 + $0xad0] ss:$8 sps:$4 sm:$0xff]  }
 0x2c7   : > { %4847 = vmatmul.mubr.bf16.vlgmr.msra.gmra.mrb[0].mxu1 %v2457_v21  ;;  %v6559_v21 = vld [vmem:[%s7736_s21 + $0xae0] ss:$8 sps:$4 sm:$0xff]  }
 0x2c8   : > { %5093 = vmatmul.mubr.bf16.vlgmr.msra.gmra.mrb[0].mxu0 %v2554_v22  ;;  %4856 = vmatpush1.bf16.msra.mxu1 %v6472_v19  ;;  %v6556_v19 = vld [vmem:[%s7736_s21 + $0x4e0] ss:$8 sps:$4 sm:$0xff]   ;;  %v6564_v22 = vld [vmem:[%s7736_s21 + $0x4f4] ss:$8 sps:$4 sm:$0xff]  }
 0x2c9   : > { %5102 = vmatpush1.bf16.msra.mxu0 %v6475_v23  ;;  %4857 = vmatprep.subr.bf16.mxu1 %v6480_v24  ;;  %v6567_v23 = vld [vmem:[%s7736_s21 + $0xaf4] ss:$8 sps:$4 sm:$0xff]   ;;  %v6562_v24 = vld [vmem:[%s7736_s21 + $0x4f0] ss:$8 sps:$4 sm:$0xff]  }
 0x2ca   : > { %5103 = vmatprep.subr.bf16.mxu0 %v6483_v25  ;;  %4887 = vmatprep.mubr.bf16.mxu1 %v8092_v28  ;;  %v6565_v25 = vld [vmem:[%s7736_s21 + $0xaf0] ss:$8 sps:$4 sm:$0xff]  }
 0x2cb   : > { %5133 = vmatprep.mubr.bf16.mxu0 %v8095_v8 }
 0x2cc   : > { %4858 = vmatpush1.bf16.msra.mxu1 %v6478_v26  ;;  %v6570_v26 = vld [vmem:[%s7736_s21 + $0x504] ss:$8 sps:$4 sm:$0xff]  }
 0x2cd   : > { %5104 = vmatpush1.bf16.msra.mxu0 %v6481_v27  ;;  %4859 = vmatprep.subr.bf16.mxu1 %v6486_v11  ;;  %v6574_v27 = vld [vmem:[%s7736_s21 + $0xb04] ss:$8 sps:$4 sm:$0xff]   ;;  %v8159_v11 = vrot.slane %v8068_v15, %v7786_v17  ;;  %v2507_v15 = vcombine.high %v8092_v28, %v8092_v28 }
 0x2ce   : > { %5105 = vmatprep.subr.bf16.mxu0 %v6489_v29  ;;  %v8163_v29 = vrot.slane %v8071_v55, %v7786_v17  ;;  %v6575_v55 = vld [vmem:[%s7736_s21 + $0x510] ss:$8 sps:$4 sm:$0xff]   ;;  %v6583_v28 = vld [vmem:[%s7736_s21 + $0x524] ss:$8 sps:$4 sm:$0xff]  }
 0x2d0   : > { %4860 = vmatpush1.bf16.msra.mxu1 %v6484_v30  ;;  %v6568_v30 = vld [vmem:[%s7736_s21 + $0x500] ss:$8 sps:$4 sm:$0xff]  }
 0x2d1   : > { %5106 = vmatpush1.bf16.msra.mxu0 %v6487_v31  ;;  %4861 = vmatprep.subr.bf16.mxu1 %v6492_v32  ;;  %v6572_v31 = vld [vmem:[%s7736_s21 + $0xb00] ss:$8 sps:$4 sm:$0xff]   ;;  %v6577_v32 = vld [vmem:[%s7736_s21 + $0x514] ss:$8 sps:$4 sm:$0xff]  }
 0x2d2   : > { %5107 = vmatprep.subr.bf16.mxu0 %v6495_v33  ;;  %v6580_v33 = vld [vmem:[%s7736_s21 + $0xb14] ss:$8 sps:$4 sm:$0xff]  }
 0x2d4   : > { %4862 = vmatpush1.bf16.msra.mxu1 %v6490_v34  ;;  %v2557_v34 = vcombine.high %v8095_v8, %v8095_v8  ;;  %v6581_v8 = vld [vmem:[%s7736_s21 + $0x520] ss:$8 sps:$4 sm:$0xff]  }
 0x2d5   : > { %5108 = vmatpush1.bf16.msra.mxu0 %v6493_v35  ;;  %4863 = vmatprep.subr.bf16.mxu1 %v6498_v36  ;;  %v6578_v35 = vld [vmem:[%s7736_s21 + $0xb10] ss:$8 sps:$4 sm:$0xff]   ;;  %v6586_v36 = vld [vmem:[%s7736_s21 + $0xb24] ss:$8 sps:$4 sm:$0xff]  }
 0x2d6   : > { %5109 = vmatprep.subr.bf16.mxu0 %v6501_v37  ;;  %v6584_v37 = vld [vmem:[%s7736_s21 + $0xb20] ss:$8 sps:$4 sm:$0xff]  }
 0x2d8   : > { %4864 = vmatpush1.bf16.msra.mxu1 %v6496_v38  ;;  %v6589_v38 = vld [vmem:[%s7736_s21 + $0x534] ss:$8 sps:$4 sm:$0xff]  }
 0x2d9   : > { %5110 = vmatpush1.bf16.msra.mxu0 %v6499_v39  ;;  %4865 = vmatprep.subr.bf16.mxu1 %v6504_v40  ;;  %v6592_v39 = vld [vmem:[%s7736_s21 + $0xb34] ss:$8 sps:$4 sm:$0xff]   ;;  %v6587_v40 = vld [vmem:[%s7736_s21 + $0x530] ss:$8 sps:$4 sm:$0xff]  }
 0x2da   : > { %5111 = vmatprep.subr.bf16.mxu0 %v6507_v41  ;;  %v6590_v41 = vld [vmem:[%s7736_s21 + $0xb30] ss:$8 sps:$4 sm:$0xff]  }
 0x2dc   : > { %4866 = vmatpush1.bf16.msra.mxu1 %v6502_v42  ;;  %v6595_v42 = vld [vmem:[%s7736_s21 + $0x544] ss:$8 sps:$4 sm:$0xff]  }
 0x2dd   : > { %5112 = vmatpush1.bf16.msra.mxu0 %v6505_v43  ;;  %4867 = vmatprep.subr.bf16.mxu1 %v6510_v44  ;;  %v6598_v43 = vld [vmem:[%s7736_s21 + $0xb44] ss:$8 sps:$4 sm:$0xff]   ;;  %v6593_v44 = vld [vmem:[%s7736_s21 + $0x540] ss:$8 sps:$4 sm:$0xff]  }
 0x2de   : > { %5113 = vmatprep.subr.bf16.mxu0 %v6513_v45  ;;  %v6596_v45 = vld [vmem:[%s7736_s21 + $0xb40] ss:$8 sps:$4 sm:$0xff]  }
 0x2e0   : > { %4868 = vmatpush1.bf16.msra.mxu1 %v6508_v46  ;;  %v6601_v46 = vld [vmem:[%s7736_s21 + $0x554] ss:$8 sps:$4 sm:$0xff]  }
 0x2e1   : > { %5114 = vmatpush1.bf16.msra.mxu0 %v6511_v47  ;;  %4869 = vmatprep.subr.bf16.mxu1 %v6516_v48  ;;  %v6604_v47 = vld [vmem:[%s7736_s21 + $0xb54] ss:$8 sps:$4 sm:$0xff]   ;;  %v6599_v48 = vld [vmem:[%s7736_s21 + $0x550] ss:$8 sps:$4 sm:$0xff]  }
 0x2e2   : > { %5115 = vmatprep.subr.bf16.mxu0 %v6519_v51  ;;  %v6602_v51 = vld [vmem:[%s7736_s21 + $0xb50] ss:$8 sps:$4 sm:$0xff]  }
 0x2e4   : > { %4870 = vmatpush1.bf16.msra.mxu1 %v6514_v52  ;;  %v6607_v52 = vld [vmem:[%s7736_s21 + $0x564] ss:$8 sps:$4 sm:$0xff]  }
 0x2e5   : > { %5116 = vmatpush1.bf16.msra.mxu0 %v6517_v53  ;;  %4871 = vmatprep.subr.bf16.mxu1 %v6522_v54  ;;  %v6610_v53 = vld [vmem:[%s7736_s21 + $0xb64] ss:$8 sps:$4 sm:$0xff]   ;;  %v6605_v54 = vld [vmem:[%s7736_s21 + $0x560] ss:$8 sps:$4 sm:$0xff]  }
 0x2e6   : > { %5117 = vmatprep.subr.bf16.mxu0 %v6525_v56  ;;  %v6608_v56 = vld [vmem:[%s7736_s21 + $0xb60] ss:$8 sps:$4 sm:$0xff]  }
 0x2e8   : > { %4872 = vmatpush1.bf16.msra.mxu1 %v6520_v20  ;;  %v6613_v20 = vld [vmem:[%s7736_s21 + $0x574] ss:$8 sps:$4 sm:$0xff]  }
 0x2e9   : > { %5118 = vmatpush1.bf16.msra.mxu0 %v6523_v57  ;;  %4873 = vmatprep.subr.bf16.mxu1 %v6528_v58  ;;  %v6616_v57 = vld [vmem:[%s7736_s21 + $0xb74] ss:$8 sps:$4 sm:$0xff]   ;;  %v6611_v58 = vld [vmem:[%s7736_s21 + $0x570] ss:$8 sps:$4 sm:$0xff]  }
 0x2ea   : > { %5119 = vmatprep.subr.bf16.mxu0 %v6531_v59  ;;  %v6614_v59 = vld [vmem:[%s7736_s21 + $0xb70] ss:$8 sps:$4 sm:$0xff]  }
 0x2ec   : > { %4874 = vmatpush1.bf16.msra.mxu1 %v6526_v60  ;;  %v6619_v60 = vld [vmem:[%s7736_s21 + $0x584] ss:$8 sps:$4 sm:$0xff]  }
 0x2ed   : > { %5120 = vmatpush1.bf16.msra.mxu0 %v6529_v61  ;;  %4875 = vmatprep.subr.bf16.mxu1 %v6534_v62  ;;  %v6622_v61 = vld [vmem:[%s7736_s21 + $0xb84] ss:$8 sps:$4 sm:$0xff]   ;;  %v6617_v62 = vld [vmem:[%s7736_s21 + $0x580] ss:$8 sps:$4 sm:$0xff]  }
 0x2ee   : > { %5121 = vmatprep.subr.bf16.mxu0 %v6537_v63  ;;  %v6620_v63 = vld [vmem:[%s7736_s21 + $0xb80] ss:$8 sps:$4 sm:$0xff]  }
 0x2f0   : > { %4876 = vmatpush1.bf16.msra.mxu1 %v6532_v0  ;;  %v6625_v0 = vld [vmem:[%s7736_s21 + $0x594] ss:$8 sps:$4 sm:$0xff]  }
 0x2f1   : > { %5122 = vmatpush1.bf16.msra.mxu0 %v6535_v1  ;;  %4877 = vmatprep.subr.bf16.mxu1 %v6540_v50  ;;  %v6628_v1 = vld [vmem:[%s7736_s21 + $0xb94] ss:$8 sps:$4 sm:$0xff]   ;;  %v6623_v50 = vld [vmem:[%s7736_s21 + $0x590] ss:$8 sps:$4 sm:$0xff]  }
 0x2f2   : > { %5123 = vmatprep.subr.bf16.mxu0 %v6543_v4  ;;  %v6626_v4 = vld [vmem:[%s7736_s21 + $0xb90] ss:$8 sps:$4 sm:$0xff]  }
 0x2f4   : > { %4878 = vmatpush1.bf16.msra.mxu1 %v6538_v5  ;;  %v6631_v5 = vld [vmem:[%s7736_s21 + $0x5a4] ss:$8 sps:$4 sm:$0xff]  }
 0x2f5   : > { %5124 = vmatpush1.bf16.msra.mxu0 %v6541_v6  ;;  %4879 = vmatprep.subr.bf16.mxu1 %v6546_v7  ;;  %v6634_v6 = vld [vmem:[%s7736_s21 + $0xba4] ss:$8 sps:$4 sm:$0xff]   ;;  %v6629_v7 = vld [vmem:[%s7736_s21 + $0x5a0] ss:$8 sps:$4 sm:$0xff]  }
 0x2f6   : > { %5125 = vmatprep.subr.bf16.mxu0 %v6549_v12  ;;  %v6632_v12 = vld [vmem:[%s7736_s21 + $0xba0] ss:$8 sps:$4 sm:$0xff]  }
 0x2f8   : > { %4880 = vmatpush1.bf16.msra.mxu1 %v6544_v13  ;;  %v6637_v13 = vld [vmem:[%s7736_s21 + $0x5b4] ss:$8 sps:$4 sm:$0xff]  }
 0x2f9   : > { %5126 = vmatpush1.bf16.msra.mxu0 %v6547_v14  ;;  %4881 = vmatprep.subr.bf16.mxu1 %v6552_v49  ;;  %v6640_v14 = vld [vmem:[%s7736_s21 + $0xbb4] ss:$8 sps:$4 sm:$0xff]   ;;  %v6635_v49 = vld [vmem:[%s7736_s21 + $0x5b0] ss:$8 sps:$4 sm:$0xff]  }
 0x2fa   : > { %5127 = vmatprep.subr.bf16.mxu0 %v6555_v3  ;;  %v6638_v3 = vld [vmem:[%s7736_s21 + $0xbb0] ss:$8 sps:$4 sm:$0xff]  }
 0x2fc   : > { %4882 = vmatpush1.bf16.msra.mxu1 %v6550_v16  ;;  %v6643_v16 = vld [vmem:[%s7736_s21 + $0x5c4] ss:$8 sps:$4 sm:$0xff]  }
 0x2fd   : > { %5128 = vmatpush1.bf16.msra.mxu0 %v6553_v18  ;;  %4883 = vmatprep.subr.bf16.mxu1 %v6558_v2  ;;  %v6646_v18 = vld [vmem:[%s7736_s21 + $0xbc4] ss:$8 sps:$4 sm:$0xff]   ;;  %v6641_v2 = vld [vmem:[%s7736_s21 + $0x5c0] ss:$8 sps:$4 sm:$0xff]  }
 0x2fe   : > { %5129 = vmatprep.subr.bf16.mxu0 %v6561_v9  ;;  %v6644_v9 = vld [vmem:[%s7736_s21 + $0xbc0] ss:$8 sps:$4 sm:$0xff]  }
 0x300   : > { %4884 = vmatpush1.bf16.msra.mxu1 %v6556_v19  ;;  %v6649_v19 = vld [vmem:[%s7736_s21 + $0x5d4] ss:$8 sps:$4 sm:$0xff]  }
 0x301   : > { %5130 = vmatpush1.bf16.msra.mxu0 %v6559_v21  ;;  %4885 = vmatprep.subr.bf16.mxu1 %v6564_v22  ;;  %v6652_v21 = vld [vmem:[%s7736_s21 + $0xbd4] ss:$8 sps:$4 sm:$0xff]   ;;  %v6647_v22 = vld [vmem:[%s7736_s21 + $0x5d0] ss:$8 sps:$4 sm:$0xff]  }
 0x302   : > { %5131 = vmatprep.subr.bf16.mxu0 %v6567_v23  ;;  %v6650_v23 = vld [vmem:[%s7736_s21 + $0xbd0] ss:$8 sps:$4 sm:$0xff]  }
 0x304   : > { %4886 = vmatpush1.bf16.msra.mxu1 %v6562_v24  ;;  %v6655_v24 = vld [vmem:[%s7736_s21 + $0x5e4] ss:$8 sps:$4 sm:$0xff]  }
 0x305   : > { %5132 = vmatpush1.bf16.msra.mxu0 %v6565_v25  ;;  %4896 = vmatprep.subr.bf16.mxu1 %v6570_v26  ;;  %v6658_v25 = vld [vmem:[%s7736_s21 + $0xbe4] ss:$8 sps:$4 sm:$0xff]   ;;  %v6653_v26 = vld [vmem:[%s7736_s21 + $0x5e0] ss:$8 sps:$4 sm:$0xff]  }
 0x306   : > { %5142 = vmatprep.subr.bf16.mxu0 %v6574_v27  ;;  %v6656_v27 = vld [vmem:[%s7736_s21 + $0xbe0] ss:$8 sps:$4 sm:$0xff]  }
 0x307   : > { %4888 = vmatmul.mubr.bf16.vlgmr.msra.gmra.mrb[0].mxu1 %v8159_v11 }
 0x308   : > { %5134 = vmatmul.mubr.bf16.vlgmr.msra.gmra.mrb[0].mxu0 %v8163_v29  ;;  %4897 = vmatpush1.bf16.msra.mxu1 %v6568_v30  ;;  %v6661_v30 = vld [vmem:[%s7736_s21 + $0x5f4] ss:$8 sps:$4 sm:$0xff]  }
 0x309   : > { %5143 = vmatpush1.bf16.msra.mxu0 %v6572_v31  ;;  %4898 = vmatprep.subr.bf16.mxu1 %v6577_v32  ;;  %v6664_v31 = vld [vmem:[%s7736_s21 + $0xbf4] ss:$8 sps:$4 sm:$0xff]  }
 0x30a   : > { %5144 = vmatprep.subr.bf16.mxu0 %v6580_v33  ;;  %4928 = vmatprep.mubr.bf16.mxu1 %v2507_v15  ;;  %v8234_v32 = vld.sshfl [vmem:[%s8381_s0 + $0x18] sm:$0x11 pattern:$0x75316420]  ;;  %v6659_v33 = vld [vmem:[%s7736_s21 + $0x5f0] ss:$8 sps:$4 sm:$0xff]  }
 0x30b   : > { %5174 = vmatprep.mubr.bf16.mxu0 %v2557_v34  ;;  %v6662_v15 = vld [vmem:[%s7736_s21 + $0xbf0] ss:$8 sps:$4 sm:$0xff]   ;;  %v2565_v34 = vcombine.high %v8234_v32, %v8234_v32 }
 0x30c   : > { %4899 = vmatpush1.bf16.msra.mxu1 %v6575_v55  ;;  %v6667_v55 = vld [vmem:[%s7736_s21 + $0xc04] ss:$8 sps:$4 sm:$0xff]  }
 0x30d   : > { %5145 = vmatpush1.bf16.msra.mxu0 %v6578_v35  ;;  %4900 = vmatprep.subr.bf16.mxu1 %v6583_v28  ;;  %v2505_v35 = vcombine.high %v8159_v11, %v8159_v11  ;;  %v2555_v28 = vcombine.high %v8163_v29, %v8163_v29  ;;  %v6668_v11 = vld [vmem:[%s7736_s21 + $0xc10] ss:$8 sps:$4 sm:$0xff]   ;;  %v6673_v29 = vld [vmem:[%s7736_s21 + $0xc24] ss:$8 sps:$4 sm:$0xff]  }
 0x30e   : > { %5146 = vmatprep.subr.bf16.mxu0 %v6586_v36  ;;  %v6665_v36 = vld [vmem:[%s7736_s21 + $0xc00] ss:$8 sps:$4 sm:$0xff]  }
 0x310   : > { %4901 = vmatpush1.bf16.msra.mxu1 %v6581_v8  ;;  %v2579_v8 = vrot.slane %v2565_v34, %v7786_v17  ;;  %v5261_v34 = vld [vmem:[%s7734_s26 + $0xc0] sm:$0xff] }
 0x311   : > { %5147 = vmatpush1.bf16.msra.mxu0 %v6584_v37  ;;  %4902 = vmatprep.subr.bf16.mxu1 %v6589_v38  ;;  %v6670_v37 = vld [vmem:[%s7736_s21 + $0xc14] ss:$8 sps:$4 sm:$0xff]   ;;  %v6671_v38 = vld [vmem:[%s7736_s21 + $0xc20] ss:$8 sps:$4 sm:$0xff]  }
 0x312   : > { %5148 = vmatprep.subr.bf16.mxu0 %v6592_v39  ;;  %v6676_v39 = vld [vmem:[%s7736_s21 + $0xc34] ss:$8 sps:$4 sm:$0xff]  }
 0x314   : > { %4903 = vmatpush1.bf16.msra.mxu1 %v6587_v40  ;;  %v6674_v40 = vld [vmem:[%s7736_s21 + $0xc30] ss:$8 sps:$4 sm:$0xff]  }
 0x315   : > { %5149 = vmatpush1.bf16.msra.mxu0 %v6590_v41  ;;  %4904 = vmatprep.subr.bf16.mxu1 %v6595_v42  ;;  %v6679_v41 = vld [vmem:[%s7736_s21 + $0xc44] ss:$8 sps:$4 sm:$0xff]   ;;  %v6677_v42 = vld [vmem:[%s7736_s21 + $0xc40] ss:$8 sps:$4 sm:$0xff]  }
 0x316   : > { %5150 = vmatprep.subr.bf16.mxu0 %v6598_v43  ;;  %v6682_v43 = vld [vmem:[%s7736_s21 + $0xc54] ss:$8 sps:$4 sm:$0xff]  }
 0x318   : > { %4905 = vmatpush1.bf16.msra.mxu1 %v6593_v44  ;;  %v6680_v44 = vld [vmem:[%s7736_s21 + $0xc50] ss:$8 sps:$4 sm:$0xff]  }
 0x319   : > { %5151 = vmatpush1.bf16.msra.mxu0 %v6596_v45  ;;  %4906 = vmatprep.subr.bf16.mxu1 %v6601_v46  ;;  %v6685_v45 = vld [vmem:[%s7736_s21 + $0xc64] ss:$8 sps:$4 sm:$0xff]   ;;  %v6683_v46 = vld [vmem:[%s7736_s21 + $0xc60] ss:$8 sps:$4 sm:$0xff]  }
 0x31a   : > { %5152 = vmatprep.subr.bf16.mxu0 %v6604_v47  ;;  %v6688_v47 = vld [vmem:[%s7736_s21 + $0xc74] ss:$8 sps:$4 sm:$0xff]  }
 0x31c   : > { %4907 = vmatpush1.bf16.msra.mxu1 %v6599_v48  ;;  %v6686_v48 = vld [vmem:[%s7736_s21 + $0xc70] ss:$8 sps:$4 sm:$0xff]  }
 0x31d   : > { %5153 = vmatpush1.bf16.msra.mxu0 %v6602_v51  ;;  %4908 = vmatprep.subr.bf16.mxu1 %v6607_v52  ;;  %v6691_v51 = vld [vmem:[%s7736_s21 + $0xc84] ss:$8 sps:$4 sm:$0xff]   ;;  %v6689_v52 = vld [vmem:[%s7736_s21 + $0xc80] ss:$8 sps:$4 sm:$0xff]  }
 0x31e   : > { %5154 = vmatprep.subr.bf16.mxu0 %v6610_v53  ;;  %v6694_v53 = vld [vmem:[%s7736_s21 + $0xc94] ss:$8 sps:$4 sm:$0xff]  }
 0x320   : > { %4909 = vmatpush1.bf16.msra.mxu1 %v6605_v54  ;;  %v6692_v54 = vld [vmem:[%s7736_s21 + $0xc90] ss:$8 sps:$4 sm:$0xff]  }
 0x321   : > { %5155 = vmatpush1.bf16.msra.mxu0 %v6608_v56  ;;  %4910 = vmatprep.subr.bf16.mxu1 %v6613_v20  ;;  %v6697_v56 = vld [vmem:[%s7736_s21 + $0xca4] ss:$8 sps:$4 sm:$0xff]   ;;  %v6695_v20 = vld [vmem:[%s7736_s21 + $0xca0] ss:$8 sps:$4 sm:$0xff]  }
 0x322   : > { %5156 = vmatprep.subr.bf16.mxu0 %v6616_v57  ;;  %v6700_v57 = vld [vmem:[%s7736_s21 + $0xcb4] ss:$8 sps:$4 sm:$0xff]  }
 0x324   : > { %4911 = vmatpush1.bf16.msra.mxu1 %v6611_v58  ;;  %v6698_v58 = vld [vmem:[%s7736_s21 + $0xcb0] ss:$8 sps:$4 sm:$0xff]  }
 0x325   : > { %5157 = vmatpush1.bf16.msra.mxu0 %v6614_v59  ;;  %4912 = vmatprep.subr.bf16.mxu1 %v6619_v60  ;;  %v6703_v59 = vld [vmem:[%s7736_s21 + $0xcc4] ss:$8 sps:$4 sm:$0xff]   ;;  %v6701_v60 = vld [vmem:[%s7736_s21 + $0xcc0] ss:$8 sps:$4 sm:$0xff]  }
 0x326   : > { %5158 = vmatprep.subr.bf16.mxu0 %v6622_v61  ;;  %v6706_v61 = vld [vmem:[%s7736_s21 + $0xcd4] ss:$8 sps:$4 sm:$0xff]  }
 0x328   : > { %4913 = vmatpush1.bf16.msra.mxu1 %v6617_v62  ;;  %v6704_v62 = vld [vmem:[%s7736_s21 + $0xcd0] ss:$8 sps:$4 sm:$0xff]  }
 0x329   : > { %5159 = vmatpush1.bf16.msra.mxu0 %v6620_v63  ;;  %4914 = vmatprep.subr.bf16.mxu1 %v6625_v0  ;;  %v6709_v63 = vld [vmem:[%s7736_s21 + $0xce4] ss:$8 sps:$4 sm:$0xff]   ;;  %v2394_v0 = vld [vmem:[%s7736_s21 + $0xcf0] sm:$0xff] }
 0x32a   : > { %5160 = vmatprep.subr.bf16.mxu0 %v6628_v1  ;;  %v6707_v1 = vld [vmem:[%s7736_s21 + $0xce0] ss:$8 sps:$4 sm:$0xff]  }
 0x32c   : > { %4915 = vmatpush1.bf16.msra.mxu1 %v6623_v50  ;;  %v5914_v50 = vcombine.high %v2394_v0, %v2394_v0 }
 0x32d   : > { %5161 = vmatpush1.bf16.msra.mxu0 %v6626_v4  ;;  %4916 = vmatprep.subr.bf16.mxu1 %v6631_v5  ;;  %v5913_v4 = vcombine.low %v2394_v0, %v2394_v0 }
 0x32e   : > { %5162 = vmatprep.subr.bf16.mxu0 %v6634_v6  ;;  %v2572_v6 = vrot.slane %v8234_v32, %v7786_v17  ;;  %v5258_v17 = vld [vmem:[%s7734_s26 + $0xa8] sm:$0xff]  ;;  %v5243_v32 = vld [vmem:[%s7734_s26 + $0x30] sm:$0xff] }
 0x32f   : > { %v4686_v5 = vsel %vm4684_vm2, %v5913_v4, 0 }
 0x330   : > { %4917 = vmatpush1.bf16.msra.mxu1 %v6629_v7  ;;  %v5253_v7 = vld [vmem:[%s7734_s26 + $0x80] sm:$0xff] }
 0x331   : > { %5163 = vmatpush1.bf16.msra.mxu0 %v6632_v12  ;;  %4918 = vmatprep.subr.bf16.mxu1 %v6637_v13  ;;  %v5254_v12 = vld [vmem:[%s7734_s26 + $0x88] sm:$0xff]  ;;  %v5237_v13 = vld [vmem:[%s7734_s26] sm:$0xff] }
 0x332   : > { %5164 = vmatprep.subr.bf16.mxu0 %v6640_v14  ;;  %v5963_v14 = vpack.c.bf16 %v5254_v12, %v5253_v7 }
 0x334   : > { %4919 = vmatpush1.bf16.msra.mxu1 %v6635_v49  ;;  %v5238_v49 = vld [vmem:[%s7734_s26 + $0x8] sm:$0xff] }
 0x335   : > { %5165 = vmatpush1.bf16.msra.mxu0 %v6638_v3  ;;  %4920 = vmatprep.subr.bf16.mxu1 %v6643_v16  ;;  %v5255_v3 = vld [vmem:[%s7734_s26 + $0x90] sm:$0xff]  ;;  %v5256_v16 = vld [vmem:[%s7734_s26 + $0x98] sm:$0xff] }
 0x336   : > { %5166 = vmatprep.subr.bf16.mxu0 %v6646_v18  ;;  %v5965_v18 = vpack.c.bf16 %v5238_v49, %v5237_v13 }
 0x338   : > { %4921 = vmatpush1.bf16.msra.mxu1 %v6641_v2  ;;  %v5967_v2 = vpack.c.bf16 %v5256_v16, %v5255_v3 }
 0x339   : > { %5167 = vmatpush1.bf16.msra.mxu0 %v6644_v9  ;;  %4922 = vmatprep.subr.bf16.mxu1 %v6649_v19  ;;  %v5239_v9 = vld [vmem:[%s7734_s26 + $0x10] sm:$0xff]  ;;  %v5240_v19 = vld [vmem:[%s7734_s26 + $0x18] sm:$0xff] }
 0x33a   : > { %5168 = vmatprep.subr.bf16.mxu0 %v6652_v21  ;;  %v5257_v21 = vld [vmem:[%s7734_s26 + $0xa0] sm:$0xff] }
 0x33c   : > { %4923 = vmatpush1.bf16.msra.mxu1 %v6647_v22  ;;  %v5969_v22 = vpack.c.bf16 %v5240_v19, %v5239_v9 }
 0x33d   : > { %5169 = vmatpush1.bf16.msra.mxu0 %v6650_v23  ;;  %4924 = vmatprep.subr.bf16.mxu1 %v6655_v24  ;;  %v5971_v23 = vpack.c.bf16 %v5258_v17, %v5257_v21  ;;  %v5241_v24 = vld [vmem:[%s7734_s26 + $0x20] sm:$0xff] }
 0x33e   : > { %5170 = vmatprep.subr.bf16.mxu0 %v6658_v25  ;;  %v5242_v25 = vld [vmem:[%s7734_s26 + $0x28] sm:$0xff]  ;;  %v5236_v17 = vld [vmem:[#allocation2] sm:$0x3] }
 0x340   : > { %4925 = vmatpush1.bf16.msra.mxu1 %v6653_v26  ;;  %v5973_v26 = vpack.c.bf16 %v5242_v25, %v5241_v24 }
 0x341   : > { %5171 = vmatpush1.bf16.msra.mxu0 %v6656_v27  ;;  %4926 = vmatprep.subr.bf16.mxu1 %v6661_v30  ;;  %v5259_v27 = vld [vmem:[%s7734_s26 + $0xb0] sm:$0xff]  ;;  %v5260_v30 = vld [vmem:[%s7734_s26 + $0xb8] sm:$0xff] }
 0x342   : > { %5172 = vmatprep.subr.bf16.mxu0 %v6664_v31  ;;  %v5975_v31 = vpack.c.bf16 %v5260_v30, %v5259_v27 }
 0x344   : > { %4927 = vmatpush1.bf16.msra.mxu1 %v6659_v33  ;;  %v5244_v33 = vld [vmem:[%s7734_s26 + $0x38] sm:$0xff] }
 0x345   : > { %5173 = vmatpush1.bf16.msra.mxu0 %v6662_v15  ;;  %5964 = vmatprep.subr.bf16.mxu1 %v5963_v14  ;;  %v5977_v15 = vpack.c.bf16 %v5244_v33, %v5243_v32 }
 0x346   : > { %5183 = vmatprep.subr.bf16.mxu0 %v6667_v55  ;;  %v5262_v55 = vld [vmem:[%s7734_s26 + $0xc8] sm:$0xff] }
 0x347   : > { %4929 = vmatmul.mubr.bf16.vlgmr.msra.gmra.mrb[0].mxu1 %v2505_v35  ;;  %v5979_v35 = vpack.c.bf16 %v5262_v55, %v5261_v34 }
 0x348   : > { %5175 = vmatmul.mubr.bf16.vlgmr.msra.gmra.mrb[0].mxu0 %v2555_v28  ;;  %5966 = vmatpush3.bf16.msra.mxu1 %v5965_v18  ;;  %v5245_v28 = vld [vmem:[%s7734_s26 + $0x40] sm:$0xff] }
 0x349   : > { %5184 = vmatpush1.bf16.msra.mxu0 %v6665_v36  ;;  %5916 = vmatprep.mubr.msk.bf16.mxu0 %vm4680_vm1, %v2579_v8  ;;  %v5246_v36 = vld [vmem:[%s7734_s26 + $0x48] sm:$0xff] }
 0x34a   : > { %5185 = vmatprep.subr.bf16.mxu0 %v6670_v37  ;;  %5968 = vmatprep.subr.bf16.mxu1 %v5967_v2  ;;  %v5981_v8 = vpack.c.bf16 %v5246_v36, %v5245_v28  ;;  %v5263_v37 = vld [vmem:[%s7734_s26 + $0xd0] sm:$0xff] }
 0x34c   : > { %5970 = vmatpush3.bf16.msra.mxu1 %v5969_v22 }
 0x34d   : > { %5186 = vmatpush1.bf16.msra.mxu0 %v6668_v11  ;;  %5972 = vmatprep.subr.bf16.mxu1 %v5971_v23  ;;  %v5264_v11 = vld [vmem:[%s7734_s26 + $0xd8] sm:$0xff] }
 0x34e   : > { %5187 = vmatprep.subr.bf16.mxu0 %v6673_v29  ;;  %v5247_v29 = vld [vmem:[%s7734_s26 + $0x50] sm:$0xff] }
 0x350   : > { %5974 = vmatpush3.bf16.msra.mxu1 %v5973_v26  ;;  %v5920_v26 = vld [vmem:[%s8385_s4] ss:$0 sm:$0xff] (!%p5919_p11) }
 0x351   : > { %5188 = vmatpush1.bf16.msra.mxu0 %v6671_v38  ;;  %5976 = vmatprep.subr.bf16.mxu1 %v5975_v31  ;;  %v5983_v38 = vpack.c.bf16 %v5264_v11, %v5263_v37 }
 0x352   : > { %5189 = vmatprep.subr.bf16.mxu0 %v6676_v39  ;;  %v5248_v39 = vld [vmem:[%s7734_s26 + $0x58] sm:$0xff] }
 0x354   : > { %5978 = vmatpush3.bf16.msra.mxu1 %v5977_v15 }
 0x355   : > { %5190 = vmatpush1.bf16.msra.mxu0 %v6674_v40  ;;  %5980 = vmatprep.subr.bf16.mxu1 %v5979_v35  ;;  %v5265_v40 = vld [vmem:[%s7734_s26 + $0xe0] sm:$0xff] }
 0x356   : > { %5191 = vmatprep.subr.bf16.mxu0 %v6679_v41  ;;  %v5266_v41 = vld [vmem:[%s7734_s26 + $0xe8] sm:$0xff] }
 0x358   : > { %5982 = vmatpush3.bf16.msra.mxu1 %v5981_v8 }
 0x359   : > { %5192 = vmatpush1.bf16.msra.mxu0 %v6677_v42  ;;  %v5985_v42 = vpack.c.bf16 %v5248_v39, %v5247_v29  ;;  %5984 = vmatprep.subr.bf16.mxu1 %v5983_v38 }
 0x35a   : > { %5193 = vmatprep.subr.bf16.mxu0 %v6682_v43  ;;  %v5987_v43 = vpack.c.bf16 %v5266_v41, %v5265_v40 }
 0x35c   : > { %5986 = vmatpush3.bf16.msra.mxu1 %v5985_v42 }
 0x35d   : > { %5194 = vmatpush1.bf16.msra.mxu0 %v6680_v44  ;;  %v5249_v44 = vld [vmem:[%s7734_s26 + $0x60] sm:$0xff]  ;;  %5988 = vmatprep.subr.bf16.mxu1 %v5987_v43 }
 0x35e   : > { %5195 = vmatprep.subr.bf16.mxu0 %v6685_v45  ;;  %v5250_v45 = vld [vmem:[%s7734_s26 + $0x68] sm:$0xff] }
 0x361   : > { %5196 = vmatpush1.bf16.msra.mxu0 %v6683_v46  ;;  %v5267_v46 = vld [vmem:[%s7734_s26 + $0xf0] sm:$0xff] }
 0x362   : > { %5197 = vmatprep.subr.bf16.mxu0 %v6688_v47  ;;  %v5268_v47 = vld [vmem:[%s7734_s26 + $0xf8] sm:$0xff] }
 0x365   : > { %5198 = vmatpush1.bf16.msra.mxu0 %v6686_v48  ;;  %v5989_v48 = vpack.c.bf16 %v5250_v45, %v5249_v44 }
 0x366   : > { %5199 = vmatprep.subr.bf16.mxu0 %v6691_v51  ;;  %v5991_v51 = vpack.c.bf16 %v5268_v47, %v5267_v46 }
 0x367   : > { %5990 = vmatpush3.bf16.msra.mxu1 %v5989_v48 }
 0x368   : > { %5992 = vmatprep.subr.bf16.mxu1 %v5991_v51 }
 0x369   : > { %5200 = vmatpush1.bf16.msra.mxu0 %v6689_v52  ;;  %v5251_v52 = vld [vmem:[%s7734_s26 + $0x70] sm:$0xff] }
 0x36a   : > { %5201 = vmatprep.subr.bf16.mxu0 %v6694_v53  ;;  %v5252_v53 = vld [vmem:[%s7734_s26 + $0x78] sm:$0xff] }
 0x36d   : > { %5202 = vmatpush1.bf16.msra.mxu0 %v6692_v54  ;;  %v5993_v54 = vpack.c.bf16 %v5252_v53, %v5251_v52 }
 0x36e   : > { %5203 = vmatprep.subr.bf16.mxu0 %v6697_v56 }
 0x36f   : > { %5994 = vmatpush3.bf16.msra.mxu1 %v5993_v54 }
 0x371   : > { %5204 = vmatpush1.bf16.msra.mxu0 %v6695_v20 }
 0x372   : > { %5205 = vmatprep.subr.bf16.mxu0 %v6700_v57 }
 0x375   : > { %5206 = vmatpush1.bf16.msra.mxu0 %v6698_v58 }
 0x376   : > { %5207 = vmatprep.subr.bf16.mxu0 %v6703_v59  ;;  %v2399_v59 = vsub.s32 0, %v7778_v10 }
 0x379   : > { %5208 = vmatpush1.bf16.msra.mxu0 %v6701_v60  ;;  %v2395_v60 = vld [vmem:[%s1962_s18] sm:$0x3]  ;;  %s6812_s18 = smov (!%p5919_p11), 126  }
 0x37a   : > { %5209 = vmatprep.subr.bf16.mxu0 %v6706_v61  ;;  %v2403_v61 = vsub.s32 1, %v7778_v10 }
 0x37d   : > { %5210 = vmatpush1.bf16.msra.mxu0 %v6704_v62  ;;  %v2400_v62 = vrot.slane %v2395_v60, %v2399_v59 }
 0x37e   : > { %5211 = vmatprep.subr.bf16.mxu0 %v6709_v63  ;;  %v2404_v63 = vrot.slane %v2395_v60, %v2403_v61 }
 0x381   : > { %5212 = vmatpush1.bf16.msra.mxu0 %v6707_v1 }
 0x382   : > { %5915 = vmatprep.subr.msk.bf16.mxu0 %vm4684_vm2, %v5914_v50 }
 0x385   : > { %5214 = vmatpush1.bf16.msra.mxu0 %v4686_v5 }
 0x388   : > { %5216 = vmatmul.mubr.bf16.vlgmr.msra.gmra.mrb[0].mxu0 %v2572_v6 }
 0x41a   : > { %v4930_v56 = vpop.f32.mrb[0].mxu1 }
 0x41b   : > { %v4932_v20 = vpop.f32.mrb[1].mxu1  ;;  %v5995_v0 = vadd.f32 %v4930_v56, %v2400_v62 }
 0x41c   : > { %v4934_v57 = vpop.f32.mrb[2].mxu1  ;;  %v5997_v1 = vadd.f32 %v4932_v20, %v2404_v63 }
 0x41d   : > { %v4935_v58 = vpop.f32.mrb[3].mxu1 }
 0x45b   : > { %v5217_v50 = vpop.f32.mrb[0].mxu0 }
 0x45c   : > { %v5996_v4 = vadd.f32 %v5995_v0, %v5217_v50  ;;  %v5219_v5 = vpop.f32.mrb[1].mxu0 }
 0x45d   : > { %v5998_v6 = vadd.f32 %v5997_v1, %v5219_v5  ;;  %v5221_v7 = vpop.f32.mrb[2].mxu0 }
 0x45e   : > { %v5226_v12 = vmin.f32 %v5996_v4, 0.0  ;;  %v5222_v13 = vpop.f32.mrb[3].mxu0  ;;  %vm5224_vm4 = vcmp.gt.f32.partialorder %v5996_v4, 0.0 }
 0x45f   : > { %v5227_v14 = vmin.f32 %v5998_v6, 0.0  ;;  %vm5225_vm3 = vcmp.gt.f32.partialorder %v5998_v6, 0.0 }
 0x460   : > { %v5228_v49 = vmul.f32 1.442695, %v5226_v12 }
 0x461   : > { %v5230_v3 = vmul.f32 1.442695, %v5227_v14 }
 0x462   : > { %6712 = vpow2.f32 %v5228_v49 }
 0x463   : > { %6714 = vpow2.f32 %v5230_v3 }
 0x46c   : > { %v6713_v16 = vpop.eup %6712 }
 0x46d   : > { %v6715_v18 = vpop.eup %6714  ;;  %v5917_v2 = vadd.f32 -1.0, %v6713_v16 }
 0x46e   : > { %v5918_v10 = vadd.f32 -1.0, %v6715_v18 }
 0x46f   : > { %v5234_v19 = vsel %vm5224_vm4, %v5996_v4, %v5917_v2 }
 0x470   : > { %v5235_v9 = vsel %vm5225_vm3, %v5998_v6, %v5918_v10 }
 0x471   : > { %5333 = vmatprep.mubr.f32.mxu1 %v5235_v9 }
 0x472   : > { %5334 = vmatmul.mubr.f32.vlgmr.msra.gmra.mrb[4].mxu1 %v5234_v19 }
 0x545   : > { %v5960_v21 = vpop.f32.mrb[4].mxu1  ;;  %5345 = sbr.rel (%p5919_p11) target bundleno = 1914 (0x77a), region = 86 }
 0x546   : > { %v5961_v22 = vpop.f32.mrb[5].mxu1 }
 0x547   : > { %v5962_v23 = vadd.f32 %v5961_v22, %v5960_v21 }
 0x549   : > { %v5339_v24 = vadd.f32 %v5962_v23, %v5236_v17 }
 0x54b   : > { %5341 = vst.msk [vmem:[#allocation2] sm:$0x3] %vm5340_vm5, %v5339_v24 }
 0x552   : > { %v5346_v25 = vld [vmem:[#allocation2] sm:$0x3] }
 0x553   : > { %v5354_v27 = vadd.f32 %v5920_v26, %v5346_v25 }
 0x555   : > { %v5371_v30 = vsel %vm5370_vm6, %v5354_v27, -inf  ;;  %v5356_v31 = vsel %vm5355_vm7, %v5354_v27, -inf }
 0x556   : > { %5372 = vmax.xlane.f32.xlu0 %v5371_v30  ;;  %5357 = vmax.xlane.f32.xlu1 %v5356_v31 }
 0x5e3   : > { %v5373_v32 = vpop.xlane.xlu0 %5372  ;;  %v5358_v55 = vpop.xlane.xlu1 %5357 }
 0x5e4   : > { %v5374_v33 = vsub.f32 %v5354_v27, %v5373_v32  ;;  %v5359_v35 = vsub.f32 %v5354_v27, %v5358_v55 }
 0x5e6   : > { %v5375_v15 = vmul.f32 1.442695, %v5374_v33  ;;  %v5360_v28 = vmul.f32 1.442695, %v5359_v35 }
 0x5e8   : > { %6717 = vpow2.f32 %v5375_v15 }
 0x5e9   : > { %6719 = vpow2.f32 %v5360_v28 }
 0x5f2   : > { %v6718_v34 = vpop.eup %6717 }
 0x5f3   : > { %5378 = vrot.lane.b32.xlu0 %v6718_v34, %s6812_s18  ;;  %v6720_v36 = vpop.eup %6719 }
 0x5f4   : > { %v5362_v11 = vsel %vm5355_vm7, %v6720_v36, 0.0 }
 0x665   : > { %v5379_v8 = vpop.permute.xlu0 %5378 }
 0x666   : > { %v5381_v37 = vsel %vm5355_vm7, %v5379_v8, 0.0 }
 0x667   : > { %5382 = vadd.xlane.f32.xlu1 %v5381_v37 }
 0x66b   : > { %5363 = vadd.xlane.f32.xlu1 %v5362_v11 }
 0x6f4   : > { %v5383_v29 = vpop.xlane.xlu1 %5382 }
 0x6f5   : > { %6721 = vlog2.f32 %v5383_v29 }
 0x6f8   : > { %v5364_v38 = vpop.xlane.xlu1 %5363 }
 0x6f9   : > { %6723 = vlog2.f32 %v5364_v38 }
 0x6ff   : > { %v6722_v39 = vpop.eup %6721 }
 0x700   : > { %v5385_v40 = vmul.f32 0.6931472, %v6722_v39 }
 0x702   : > { %v5386_v41 = vadd.f32 %v5385_v40, %v5373_v32 }
 0x703   : > { %v6724_v42 = vpop.eup %6723 }
 0x704   : > { %v5366_v43 = vmul.f32 0.6931472, %v6724_v42  ;;  %v5387_v44 = vsub.f32 %v5354_v27, %v5386_v41 }
 0x706   : > { %v5367_v45 = vadd.f32 %v5366_v43, %v5358_v55  ;;  %5389 = vrot.lane.b32.xlu1 %v5387_v44, %s6812_s18 }
 0x708   : > { %v5368_v46 = vsub.f32 %v5354_v27, %v5367_v45 }
 0x70a   : > { %5369 = vst.msk [vmem:[#allocation4] sm:$0x3] %vm5355_vm7, %v5368_v46 }
 0x778   : > { %v5390_v47 = vpop.permute.xlu1 %5389 }
 0x779   : > { %5392 = vst.msk [vmem:[#allocation6] sm:$0x3] %vm5355_vm7, %v5390_v47 }
 0x77a PF: > { %p6053_p12 = scmp.eq.s32.totalorder %s6866_s24, 3  ;;  %s6813_s19 = smov [#allocation4]  }
 0x77b   : > { %s5400_s20 = sshll.u32 %s6813_s19, 4  ;;  %s6814_s23 = smov [#allocation6]   ;;  %s5401_s20 = int_to_ptr.vmem [resolvable:$true] %s5400_s20 }
 0x77c   : > { %s5411_s26 = sshll.u32 %s6814_s23, 4  ;;  %s6726_s21 = scalar_lea.vmem %s5401_s20, 32  ;;  %s5412_s26 = int_to_ptr.vmem [resolvable:$true] %s5411_s26 }
 0x77d   : > { %p6727_p13 = scmp.ne.s32.totalorder %s5401_s20, %s6726_s21  ;;  %p6733_p2 = scmp.lt.s32.totalorder %s5401_s20, %s5401_s20 }
 0x77e   : > { %p6734_p3 = scmp.lt.s32.totalorder %s6726_s21, %s6726_s21 }
 0x77f   : > { %p6728_p0 = pnand %p6727_p13, %p6053_p12 }
 0x780   : > { %p6735_p4 = por %p6734_p3, %p6733_p2 }
 0x781   : > { %p6729_p1 = pneg %p6728_p0 }
 0x783   : > { %p6736_p5 = pnand %p6735_p4, %p6729_p1 }
 0x785   : > { %6739 = shalt.err (!%p6736_p5)
}
 0x786   : > { %s6740_s30 = scalar_lea.hbm %s8386_s5, 32 }
 0x787   : > { %p6741_p6 = scmp.ne.s32.totalorder %s8386_s5, %s6740_s30  ;;  %p6746_p9 = scmp.lt.u32.totalorder %s6740_s30, %s8386_s5 }
 0x789   : > { %p6742_p7 = pnand %p6741_p6, %p6053_p12 }
 0x78b   : > { %p6743_p8 = pneg %p6742_p7 }
 0x78d   : > { %p6748_p10 = pnand %p6746_p9, %p6743_p8 }
 0x78f   : > { %6751 = shalt.err (!%p6748_p10)
}
 0x790   : > { %6046 = dma.vmem_to_hbm [thread:$0]  (%p6053_p12), %s5401_s20, 32, %s8386_s5, [#allocation5]  }
 0x791   : > { %s6752_s14 = scalar_lea.vmem %s5412_s26, 32  ;;  %p6759_p1 = scmp.lt.s32.totalorder %s5412_s26, %s5412_s26 }
 0x792   : > { %p6753_p11 = scmp.ne.s32.totalorder %s5412_s26, %s6752_s14  ;;  %p6760_p2 = scmp.lt.s32.totalorder %s6752_s14, %s6752_s14 }
 0x794   : > { %p6754_p13 = pnand %p6753_p11, %p6053_p12  ;;  %p6761_p3 = por %p6760_p2, %p6759_p1 }
 0x796   : > { %p6755_p0 = pneg %p6754_p13 }
 0x798   : > { %p6762_p4 = pnand %p6761_p3, %p6755_p0 }
 0x79a   : > { %6765 = shalt.err (!%p6762_p4)
}
 0x79b   : > { %s6766_s13 = scalar_lea.hbm %s8387_s6, 32 }
 0x79c   : > { %p6767_p5 = scmp.ne.s32.totalorder %s8387_s6, %s6766_s13  ;;  %p6772_p8 = scmp.lt.u32.totalorder %s6766_s13, %s8387_s6 }
 0x79e   : > { %p6768_p6 = pnand %p6767_p5, %p6053_p12 }
 0x7a0   : > { %p6769_p7 = pneg %p6768_p6 }
 0x7a2   : > { %p6774_p9 = pnand %p6772_p8, %p6769_p7 }
 0x7a4   : > { %6777 = shalt.err (!%p6774_p9)
}
 0x7a5   : > { %6048 = dma.vmem_to_hbm [thread:$0]  (%p6053_p12), %s5412_s26, 32, %s8387_s6, [#allocation7]  }
 0x7a6   : > { %6791 = dma.done.wait (%p6053_p12), [#allocation5], 32  }
 0x7a7   : > { %6793 = vsyncadd (%p6053_p12), [#allocation5], 4294967264 }
 0x7a8   : > { %6795 = dma.done.wait (%p6053_p12), [#allocation7], 32  }
 0x7a9   : > { %6797 = vsyncadd (%p6053_p12), [#allocation7], 4294967264 }
 0x7aa PF: > { %p16_p10 = scmp.ge.s32.totalorder %s6869_s25, 6   ;;  %s8388_s21 = smov %s6804_s22 }
 0x7ab   : > { %s8389_s22 = smov %s6878_s28  ;;  %s8390_s23 = smov %s6869_s25 }
 0x7ac   :  { %18 = sbr.rel (!%p16_p10) target bundleno = 3 (0x3), region = 132 }
 0x7b3   :  { %5428 = vsyncpa [#allocation5], 1 }
 0x7b4   :  { %5430 = vsyncpa [#allocation5 + $0x1], 1 }
 0x7b5   :  { %5431 = vsyncpa [#allocation7], 1 }

// kernel: base_cnn_mult_forward.2
= control target key start
LH: loop header
LB: loop body
LE: loop exit
PB: predicated region body
PF: predicated region fallthrough
CT: control target
= control target key end

     0   :  { %s8080_s12 = smov 0   ;;  %s10348_s0 = inlined_call_operand.vmem [shape: bf16[2,288,992], index: 0, kind: input, shape index: {}]   ;;  %s10349_s1 = inlined_call_operand.vmem [shape: bf16[3,992,40], index: 1, kind: input, shape index: {}]   ;;  %s10350_s2 = inlined_call_operand.vmem [shape: f32[1,40], index: 2, kind: input, shape index: {}]   ;;  %s10351_s3 = inlined_call_operand.vmem [shape: bf16[2,83,40], index: 3, kind: output, shape index: {}]  }
   0x1 LB: > { %s5971_s13 = sadd.s32 4294967295, %s8057_s12   ;;  %p5975_p0 = scmp.ge.s32.totalorder %s8057_s12, 1  ;;  %s8057_s12 = sphi %s8080_s12, %s13_s12  }
   0x2   : > { %p137_p1 = scmp.lt.s32.totalorder %s8057_s12, 3 }
   0x4   : > { %p138_p2 = pnand %p5975_p0, %p137_p1 }
   0x6   : > { %141 = sbr.rel (%p138_p2) target bundleno = 1084 (0x43c), region = 32 }
   0xd   : > { %v7800_v0 = vld [vmem:[%s10349_s1 + $0x230] sm:$0xff]   ;;  %v7804_v4 = vld [vmem:[%s10349_s1 + $0x238] sm:$0xff]   ;;  %v7808_v8 = vld [vmem:[%s10349_s1 + $0x240] sm:$0xff]   ;;  %p161_p3 = scmp.lt.s32.totalorder %s5971_s13, 1  ;;  %v10352_v41 = vmov 0   ;;  %vm1553_vm0 = vcmask 785408  }
   0xe   : > { %v7801_v1 = vld [vmem:[%s10349_s1 + $0x2b0] sm:$0xff]   ;;  %6781 = vmatprep.subr.bf16.mxu0 %v7800_v0  ;;  %v7805_v5 = vld [vmem:[%s10349_s1 + $0x2b8] sm:$0xff]   ;;  %v7809_v9 = vld [vmem:[%s10349_s1 + $0x2c0] sm:$0xff]   ;;  %vm5508_vm1 = vcmask 326656   ;;  %vm5899_vm13 = vcmask 322560  }
   0xf   : > { %v7802_v2 = vld [vmem:[%s10349_s1 + $0x1f0] sm:$0xff]   ;;  %6893 = vmatprep.subr.bf16.mxu1 %v7801_v1  ;;  %v7806_v6 = vld [vmem:[%s10349_s1 + $0x1f8] sm:$0xff]   ;;  %v7810_v10 = vld [vmem:[%s10349_s1 + $0x200] sm:$0xff]   ;;  %s10661_s13 = smov (!%p161_p3, %s5971_s13), 1 }
  0x10   : > { %v7803_v3 = vld [vmem:[%s10349_s1 + $0x270] sm:$0xff]   ;;  %6782 = vmatpush3.bf16.msra.mxu0 %v7802_v2  ;;  %v7807_v7 = vld [vmem:[%s10349_s1 + $0x278] sm:$0xff]   ;;  %v7811_v11 = vld [vmem:[%s10349_s1 + $0x280] sm:$0xff]   ;;  %s7789_s16 = smul.u32 1152, %s10661_s13 }
  0x11   : > { %6894 = vmatpush3.bf16.msra.mxu1 %v7803_v3  ;;  %6783 = vmatprep.subr.bf16.mxu0 %v7804_v4  ;;  %v7812_v12 = vld [vmem:[%s10349_s1 + $0x248] sm:$0xff]   ;;  %v7816_v16 = vld [vmem:[%s10349_s1 + $0x250] sm:$0xff]   ;;  %v7820_v20 = vld [vmem:[%s10349_s1 + $0x258] sm:$0xff]   ;;  %s7790_s29 = smul.u32 44, %s10661_s13 }
  0x12   : > { %6895 = vmatprep.subr.bf16.mxu1 %v7805_v5  ;;  %v7813_v13 = vld [vmem:[%s10349_s1 + $0x2c8] sm:$0xff]   ;;  %v7817_v17 = vld [vmem:[%s10349_s1 + $0x2d0] sm:$0xff]   ;;  %v7821_v21 = vld [vmem:[%s10349_s1 + $0x2d8] sm:$0xff]   ;;  %s8188_s27 = scalar_lea.vmem %s10348_s0, %s7789_s16 }
  0x13   : > { %v7814_v14 = vld [vmem:[%s10349_s1 + $0x208] sm:$0xff]   ;;  %v7818_v18 = vld [vmem:[%s10349_s1 + $0x210] sm:$0xff]   ;;  %v7822_v22 = vld [vmem:[%s10349_s1 + $0x218] sm:$0xff]   ;;  %s10120_s5 = scalar_lea.vmem %s10351_s3, %s7790_s29 }
  0x14   : > { %6784 = vmatpush3.bf16.msra.mxu0 %v7806_v6  ;;  %v7815_v15 = vld [vmem:[%s10349_s1 + $0x288] sm:$0xff]   ;;  %v7819_v19 = vld [vmem:[%s10349_s1 + $0x290] sm:$0xff]   ;;  %v7823_v23 = vld [vmem:[%s10349_s1 + $0x298] sm:$0xff]  }
  0x15   : > { %6896 = vmatpush3.bf16.msra.mxu1 %v7807_v7  ;;  %6785 = vmatprep.subr.bf16.mxu0 %v7808_v8  ;;  %v7824_v24 = vld [vmem:[%s10349_s1 + $0x260] sm:$0xff]   ;;  %v7828_v28 = vld [vmem:[%s10349_s1 + $0x268] sm:$0xff]   ;;  %v7832_v40 = vld [vmem:[%s10349_s1 + $0x330] sm:$0xff]  }
  0x16   : > { %6897 = vmatprep.subr.bf16.mxu1 %v7809_v9  ;;  %v7825_v25 = vld [vmem:[%s10349_s1 + $0x2e0] sm:$0xff]   ;;  %v7829_v29 = vld [vmem:[%s10349_s1 + $0x2e8] sm:$0xff]   ;;  %v7833_v42 = vld [vmem:[%s10349_s1 + $0x2f0] sm:$0xff]  }
  0x17   : > { %v7826_v26 = vld [vmem:[%s10349_s1 + $0x220] sm:$0xff]   ;;  %v7830_v30 = vld [vmem:[%s10349_s1 + $0x228] sm:$0xff]   ;;  %v7834_v43 = vld [vmem:[%s10349_s1 + $0x370] sm:$0xff]  }
  0x18   : > { %6786 = vmatpush3.bf16.msra.mxu0 %v7810_v10  ;;  %v7827_v27 = vld [vmem:[%s10349_s1 + $0x2a0] sm:$0xff]   ;;  %v7831_v31 = vld [vmem:[%s10349_s1 + $0x2a8] sm:$0xff]   ;;  %v7835_v54 = vld [vmem:[%s10349_s1 + $0x338] sm:$0xff]  }
  0x19   : > { %6898 = vmatpush3.bf16.msra.mxu1 %v7811_v11  ;;  %6787 = vmatprep.subr.bf16.mxu0 %v7812_v12  ;;  %v180_v32 = vld [vmem:[%s8188_s27 + $0x40] sm:$0xff]  ;;  %v181_v34 = vld [vmem:[%s8188_s27 + $0x48] sm:$0xff]  ;;  %v7836_v56 = vld [vmem:[%s10349_s1 + $0x378] sm:$0xff]  }
  0x1a   : > { %6899 = vmatprep.subr.bf16.mxu1 %v7813_v13  ;;  %v184_v33 = vld [vmem:[%s8188_s27 + $0x60] sm:$0xff]  ;;  %v185_v37 = vld [vmem:[%s8188_s27 + $0x68] sm:$0xff]  ;;  %v7837_v59 = vld [vmem:[%s10349_s1 + $0x2f8] sm:$0xff]  }
  0x1b   : > { %v8199_v35 = vcombine.low %v180_v32, %v184_v33  ;;  %v8201_v36 = vcombine.high %v180_v32, %v184_v33  ;;  %v8204_v38 = vcombine.low %v181_v34, %v185_v37  ;;  %v8206_v39 = vcombine.high %v181_v34, %v185_v37  ;;  %v188_v44 = vld [vmem:[%s8188_s27 + $0x80] sm:$0xff]  ;;  %v189_v47 = vld [vmem:[%s8188_s27 + $0x88] sm:$0xff]  ;;  %v7842_v9 = vld [vmem:[%s10349_s1 + $0x390] sm:$0xff]  }
  0x1c   : > { %6788 = vmatpush3.bf16.msra.mxu0 %v7814_v14  ;;  %v192_v45 = vld [vmem:[%s8188_s27 + $0xa0] sm:$0xff]  ;;  %v193_v48 = vld [vmem:[%s8188_s27 + $0xa8] sm:$0xff]  ;;  %v7850_v32 = vld [vmem:[%s10349_s1 + $0x358] sm:$0xff]  }
  0x1d   : > { %6900 = vmatpush3.bf16.msra.mxu1 %v7815_v15  ;;  %6789 = vmatprep.subr.bf16.mxu0 %v7816_v16  ;;  %v8224_v46 = vcombine.high %v188_v44, %v192_v45  ;;  %v196_v49 = vld [vmem:[%s8188_s27 + $0xc0] sm:$0xff]  ;;  %v8229_v50 = vcombine.high %v189_v47, %v193_v48  ;;  %v197_v52 = vld [vmem:[%s8188_s27 + $0xc8] sm:$0xff]  ;;  %v8240_v55 = vcombine.low %v188_v44, %v192_v45  ;;  %v7845_v16 = vld [vmem:[%s10349_s1 + $0x398] sm:$0xff]  }
  0x1e   : > { %6901 = vmatprep.subr.bf16.mxu1 %v7817_v17  ;;  %1634 = vmatprep.mubr.bf16.mxu0 %v8201_v36  ;;  %v200_v51 = vld [vmem:[%s8188_s27 + $0xe0] sm:$0xff]  ;;  %v201_v53 = vld [vmem:[%s8188_s27 + $0xe8] sm:$0xff]  ;;  %v8245_v57 = vcombine.low %v189_v47, %v193_v48  ;;  %v7851_v34 = vld [vmem:[%s10349_s1 + $0x3b0] sm:$0xff]  }
  0x1f   : > { %1795 = vmatprep.mubr.bf16.mxu1 %v8206_v39  ;;  %v8247_v58 = vcombine.high %v196_v49, %v200_v51  ;;  %v8252_v60 = vcombine.high %v197_v52, %v201_v53  ;;  %v204_v61 = vld [vmem:[%s8188_s27 + $0x100] sm:$0xff]  ;;  %v205_v0 = vld [vmem:[%s8188_s27 + $0x108] sm:$0xff]  ;;  %v8273_v4 = vcombine.low %v196_v49, %v200_v51  ;;  %v8278_v6 = vcombine.low %v197_v52, %v201_v53  ;;  %v7852_v37 = vld [vmem:[%s10349_s1 + $0x318] sm:$0xff]  }
  0x20   : > { %6790 = vmatpush3.bf16.msra.mxu0 %v7818_v18  ;;  %v208_v62 = vld [vmem:[%s8188_s27 + $0x120] sm:$0xff]  ;;  %v209_v1 = vld [vmem:[%s8188_s27 + $0x128] sm:$0xff]  ;;  %v7853_v44 = vld [vmem:[%s10349_s1 + $0x3b8] sm:$0xff]  }
  0x21   : > { %6902 = vmatpush3.bf16.msra.mxu1 %v7819_v19  ;;  %6791 = vmatprep.subr.bf16.mxu0 %v7820_v20  ;;  %v7838_v63 = vld [vmem:[%s10349_s1 + $0x380] sm:$0xff]   ;;  %v7841_v5 = vld [vmem:[%s10349_s1 + $0x388] sm:$0xff]   ;;  %v8280_v7 = vcombine.high %v204_v61, %v208_v62  ;;  %v8282_v8 = vcombine.high %v205_v0, %v209_v1  ;;  %v8306_v17 = vcombine.low %v204_v61, %v208_v62 }
  0x22   : > { %6903 = vmatprep.subr.bf16.mxu1 %v7821_v21  ;;  %v7839_v2 = vld [vmem:[%s10349_s1 + $0x340] sm:$0xff]   ;;  %v7843_v12 = vld [vmem:[%s10349_s1 + $0x348] sm:$0xff]   ;;  %v8308_v18 = vcombine.low %v205_v0, %v209_v1 }
  0x23   : > { %v7840_v3 = vld [vmem:[%s10349_s1 + $0x300] sm:$0xff]   ;;  %v7844_v13 = vld [vmem:[%s10349_s1 + $0x308] sm:$0xff]  }
  0x24   : > { %6792 = vmatpush3.bf16.msra.mxu0 %v7822_v22  ;;  %v212_v10 = vld [vmem:[%s8188_s27 + $0x140] sm:$0xff]  ;;  %v213_v14 = vld [vmem:[%s8188_s27 + $0x148] sm:$0xff]  ;;  %v7847_v22 = vld [vmem:[%s10349_s1 + $0x350] sm:$0xff]  }
  0x25   : > { %6904 = vmatpush3.bf16.msra.mxu1 %v7823_v23  ;;  %6793 = vmatprep.subr.bf16.mxu0 %v7824_v24  ;;  %v216_v11 = vld [vmem:[%s8188_s27 + $0x160] sm:$0xff]  ;;  %v217_v15 = vld [vmem:[%s8188_s27 + $0x168] sm:$0xff]  ;;  %v7848_v23 = vld [vmem:[%s10349_s1 + $0x310] sm:$0xff]  }
  0x26   : > { %6905 = vmatprep.subr.bf16.mxu1 %v7825_v25  ;;  %v8310_v19 = vcombine.high %v212_v10, %v216_v11  ;;  %v8312_v20 = vcombine.high %v213_v14, %v217_v15  ;;  %v7846_v21 = vld [vmem:[%s10349_s1 + $0x3a0] sm:$0xff]   ;;  %v233_v45 = vld [vmem:[%s8188_s27 + $0x1e8] sm:$0xff] }
  0x27   : > { %v220_v24 = vld [vmem:[%s8188_s27 + $0x180] sm:$0xff]  ;;  %v237_v61 = vld [vmem:[%s8188_s27 + $0x208] sm:$0xff] }
  0x28   : > { %6794 = vmatpush3.bf16.msra.mxu0 %v7826_v26  ;;  %v224_v25 = vld [vmem:[%s8188_s27 + $0x1a0] sm:$0xff]  ;;  %v7849_v26 = vld [vmem:[%s10349_s1 + $0x3a8] sm:$0xff]  }
  0x29   : > { %6906 = vmatpush3.bf16.msra.mxu1 %v7827_v27  ;;  %6795 = vmatprep.subr.bf16.mxu0 %v7828_v28  ;;  %v221_v27 = vld [vmem:[%s8188_s27 + $0x188] sm:$0xff]  ;;  %v8366_v47 = vcombine.low %v220_v24, %v224_v25  ;;  %v7854_v48 = vld [vmem:[%s10349_s1 + $0x360] sm:$0xff]  }
  0x2a   : > { %6907 = vmatprep.subr.bf16.mxu1 %v7829_v29  ;;  %v225_v28 = vld [vmem:[%s8188_s27 + $0x1a8] sm:$0xff]  ;;  %v8336_v29 = vcombine.low %v212_v10, %v216_v11  ;;  %v7855_v52 = vld [vmem:[%s10349_s1 + $0x320] sm:$0xff]   ;;  %v7860_v10 = vld [vmem:[%s10349_s1 + $0x3d0] sm:$0xff]  }
  0x2b   : > { %v8345_v33 = vcombine.high %v221_v27, %v225_v28  ;;  %v8371_v49 = vcombine.low %v221_v27, %v225_v28  ;;  %v241_v62 = vld [vmem:[%s8188_s27 + $0x228] sm:$0xff]  ;;  %v244_v11 = vld [vmem:[%s8188_s27 + $0x240] sm:$0xff] }
  0x2c   : > { %6796 = vmatpush3.bf16.msra.mxu0 %v7830_v30  ;;  %v8338_v30 = vcombine.low %v213_v14, %v217_v15  ;;  %v7858_v0 = vld [vmem:[%s10349_s1 + $0x368] sm:$0xff]   ;;  %v7862_v15 = vld [vmem:[%s10349_s1 + $0x40] sm:$0xff]  }
  0x2d   : > { %6908 = vmatpush3.bf16.msra.mxu1 %v7831_v31  ;;  %7005 = vmatprep.subr.bf16.mxu0 %v7832_v40  ;;  %v8340_v31 = vcombine.high %v220_v24, %v224_v25  ;;  %v228_v40 = vld [vmem:[%s8188_s27 + $0x1c0] sm:$0xff]  ;;  %v7859_v1 = vld [vmem:[%s10349_s1 + $0x328] sm:$0xff]  }
  0x2e   : > { %2085 = vmatprep.subr.bf16.mxu1 %v10352_v41  ;;  %v249_v14 = vld [vmem:[%s8188_s27 + $0x268] sm:$0xff]  ;;  %v256_v27 = vld [vmem:[%s8188_s27 + $0x2a0] sm:$0xff] }
  0x2f   : > { %1635 = vmatmul.mubr.bf16.vlgmr.msra.gmra.mrb[0].mxu0 %v8199_v35  ;;  %v253_v28 = vld [vmem:[%s8188_s27 + $0x288] sm:$0xff] }
  0x30   : > { %1796 = vmatmul.mubr.bf16.vlgmr.msra.gmra.mrb[0].mxu1 %v8204_v38  ;;  %7006 = vmatpush3.bf16.msra.mxu0 %v7833_v42  ;;  %v232_v42 = vld [vmem:[%s8188_s27 + $0x1e0] sm:$0xff] }
  0x31   : > { %2086 = vmatpush1.bf16.msra.mxu1 %v7834_v43  ;;  %1642 = vmatprep.mubr.bf16.mxu0 %v8224_v46  ;;  %v229_v43 = vld [vmem:[%s8188_s27 + $0x1c8] sm:$0xff]  ;;  %v8373_v51 = vcombine.high %v228_v40, %v232_v42 }
  0x32   : > { %2087 = vmatprep.subr.bf16.mxu1 %v10352_v41  ;;  %1803 = vmatprep.mubr.bf16.mxu1 %v8229_v50  ;;  %v8378_v53 = vcombine.high %v229_v43, %v233_v45 }
  0x33   : > { %7007 = vmatprep.subr.bf16.mxu0 %v7835_v54  ;;  %v7856_v54 = vld [vmem:[%s10349_s1 + $0x3c0] sm:$0xff]  }
  0x34   : > { %7008 = vmatpush3.bf16.msra.mxu0 %v7837_v59  ;;  %v240_v59 = vld [vmem:[%s8188_s27 + $0x220] sm:$0xff] }
  0x35   : > { %2088 = vmatpush1.bf16.msra.mxu1 %v7836_v56  ;;  %7009 = vmatprep.subr.bf16.mxu0 %v7839_v2  ;;  %v236_v56 = vld [vmem:[%s8188_s27 + $0x200] sm:$0xff]  ;;  %v8402_v2 = vcombine.low %v228_v40, %v232_v42 }
  0x36   : > { %2089 = vmatprep.subr.bf16.mxu1 %v10352_v41 }
  0x37   : > { %1643 = vmatmul.mubr.bf16.gmra.mrb[4].mxu0 %v8240_v55 }
  0x38   : > { %1804 = vmatmul.mubr.bf16.gmra.mrb[4].mxu1 %v8245_v57  ;;  %1650 = vmatprep.mubr.bf16.mxu0 %v8247_v58 }
  0x39   : > { %1811 = vmatprep.mubr.bf16.mxu1 %v8252_v60  ;;  %2090 = vmatpush1.bf16.msra.mxu1 %v7838_v63  ;;  %v7857_v63 = vld [vmem:[%s10349_s1 + $0x3c8] sm:$0xff]  }
  0x3a   : > { %2091 = vmatprep.subr.bf16.mxu1 %v10352_v41  ;;  %7010 = vmatpush3.bf16.msra.mxu0 %v7840_v3  ;;  %v8404_v3 = vcombine.low %v229_v43, %v233_v45  ;;  %v260_v43 = vld [vmem:[%s8188_s27 + $0x2c0] sm:$0xff]  ;;  %v261_v45 = vld [vmem:[%s8188_s27 + $0x2c8] sm:$0xff] }
  0x3b   : > { %7011 = vmatprep.subr.bf16.mxu0 %v7843_v12  ;;  %v248_v12 = vld [vmem:[%s8188_s27 + $0x260] sm:$0xff] }
  0x3c   : > { %v8436_v24 = vcombine.high %v244_v11, %v248_v12 }
  0x3d   : > { %2092 = vmatpush1.bf16.msra.mxu1 %v7841_v5  ;;  %v8406_v5 = vcombine.high %v236_v56, %v240_v59 }
  0x3e   : > { %2093 = vmatprep.subr.bf16.mxu1 %v10352_v41  ;;  %7012 = vmatpush3.bf16.msra.mxu0 %v7844_v13  ;;  %v245_v13 = vld [vmem:[%s8188_s27 + $0x248] sm:$0xff] }
  0x3f   : > { %1651 = vmatmul.mubr.bf16.gmra.mrb[8].mxu0 %v8273_v4  ;;  %7013 = vmatprep.subr.bf16.mxu0 %v7847_v22  ;;  %v8432_v22 = vcombine.low %v236_v56, %v240_v59  ;;  %v8438_v25 = vcombine.high %v245_v13, %v249_v14 }
  0x40   : > { %1812 = vmatmul.mubr.bf16.gmra.mrb[8].mxu1 %v8278_v6  ;;  %1658 = vmatprep.mubr.bf16.mxu0 %v8280_v7 }
  0x41   : > { %1819 = vmatprep.mubr.bf16.mxu1 %v8282_v8  ;;  %2094 = vmatpush1.bf16.msra.mxu1 %v7842_v9  ;;  %v8408_v9 = vcombine.high %v237_v61, %v241_v62 }
  0x42   : > { %2095 = vmatprep.subr.bf16.mxu1 %v10352_v41  ;;  %7014 = vmatpush3.bf16.msra.mxu0 %v7848_v23  ;;  %v8434_v23 = vcombine.low %v237_v61, %v241_v62  ;;  %v268_v61 = vld [vmem:[%s8188_s27 + $0x300] sm:$0xff] }
  0x43   : > { %7015 = vmatprep.subr.bf16.mxu0 %v7850_v32  ;;  %v257_v32 = vld [vmem:[%s8188_s27 + $0x2a8] sm:$0xff]  ;;  %v272_v62 = vld [vmem:[%s8188_s27 + $0x320] sm:$0xff] }
  0x44   : > { %v8454_v42 = vcombine.high %v253_v28, %v257_v32 }
  0x45   : > { %2096 = vmatpush1.bf16.msra.mxu1 %v7845_v16  ;;  %v7861_v16 = vld [vmem:[%s10349_s1 + $0x3d8] sm:$0xff]  }
  0x46   : > { %2097 = vmatprep.subr.bf16.mxu1 %v10352_v41  ;;  %7016 = vmatpush3.bf16.msra.mxu0 %v7852_v37  ;;  %v8450_v37 = vcombine.low %v245_v13, %v249_v14  ;;  %10437 = vst [vmem:[#allocation4_spill] sm:$0xff] %v8454_v42  ;;  %v276_v13 = vld [vmem:[%s8188_s27 + $0x340] sm:$0xff] }
  0x47   : > { %1659 = vmatmul.mubr.bf16.gmra.mrb[12].mxu0 %v8306_v17  ;;  %7017 = vmatprep.subr.bf16.mxu0 %v7854_v48  ;;  %v265_v48 = vld [vmem:[%s8188_s27 + $0x2e8] sm:$0xff]  ;;  %v280_v14 = vld [vmem:[%s8188_s27 + $0x360] sm:$0xff] }
  0x48   : > { %1820 = vmatmul.mubr.bf16.gmra.mrb[12].mxu1 %v8308_v18  ;;  %1666 = vmatprep.mubr.bf16.mxu0 %v8310_v19  ;;  %v8470_v59 = vcombine.high %v261_v45, %v265_v48 }
  0x49   : > { %1827 = vmatprep.mubr.bf16.mxu1 %v8312_v20  ;;  %2098 = vmatpush1.bf16.msra.mxu1 %v7846_v21  ;;  %v7864_v21 = vld [vmem:[%s10349_s1 + $0xc0] sm:$0xff]  }
  0x4a   : > { %2099 = vmatprep.subr.bf16.mxu1 %v10352_v41  ;;  %7018 = vmatpush3.bf16.msra.mxu0 %v7855_v52  ;;  %10441 = vst [vmem:[#allocation8_spill] sm:$0xff] %v8470_v59 }
  0x4b   : > { %7019 = vmatprep.subr.bf16.mxu0 %v7858_v0  ;;  %v273_v0 = vld [vmem:[%s8188_s27 + $0x328] sm:$0xff] }
  0x4d   : > { %2100 = vmatpush1.bf16.msra.mxu1 %v7849_v26  ;;  %v252_v26 = vld [vmem:[%s8188_s27 + $0x280] sm:$0xff] }
  0x4e   : > { %2101 = vmatprep.subr.bf16.mxu1 %v10352_v41  ;;  %7020 = vmatpush3.bf16.msra.mxu0 %v7859_v1  ;;  %v8452_v40 = vcombine.high %v252_v26, %v256_v27  ;;  %v8464_v52 = vcombine.low %v252_v26, %v256_v27  ;;  %v8500_v27 = vcombine.high %v276_v13, %v280_v14 }
  0x4f   : > { %1667 = vmatmul.mubr.bf16.gmra.mrb[16].mxu0 %v8336_v29  ;;  %7117 = vmatprep.subr.bf16.mxu0 %v7862_v15  ;;  %v277_v15 = vld [vmem:[%s8188_s27 + $0x348] sm:$0xff] }
  0x50   : > { %1828 = vmatmul.mubr.bf16.gmra.mrb[16].mxu1 %v8338_v30  ;;  %1674 = vmatprep.mubr.bf16.mxu0 %v8340_v31  ;;  %10438 = vst [vmem:[#allocation5_spill] sm:$0xff] %v8464_v52  ;;  %10448 = vst [vmem:[#allocation15_spill] sm:$0xff] %v8500_v27 }
  0x51   : > { %1835 = vmatprep.mubr.bf16.mxu1 %v8345_v33  ;;  %2102 = vmatpush1.bf16.msra.mxu1 %v7851_v34  ;;  %v8448_v34 = vcombine.low %v244_v11, %v248_v12  ;;  %v8484_v11 = vcombine.high %v268_v61, %v272_v62 }
  0x52   : > { %2103 = vmatprep.subr.bf16.mxu1 %v10352_v41 }
  0x53   : > { %10444 = vst [vmem:[#allocation11_spill] sm:$0xff] %v8484_v11 }
  0x55   : > { %2104 = vmatpush1.bf16.msra.mxu1 %v7853_v44  ;;  %v264_v44 = vld [vmem:[%s8188_s27 + $0x2e0] sm:$0xff] }
  0x56   : > { %2105 = vmatprep.subr.bf16.mxu1 %v10352_v41  ;;  %v8468_v56 = vcombine.high %v260_v43, %v264_v44  ;;  %v8480_v1 = vcombine.low %v260_v43, %v264_v44  ;;  %v288_v43 = vld [vmem:[%s8188_s27 + $0x3a0] sm:$0xff]  ;;  %v285_v44 = vld [vmem:[%s8188_s27 + $0x388] sm:$0xff] }
  0x57   : > { %1675 = vmatmul.mubr.bf16.gmra.mrb[20].mxu0 %v8366_v47 }
  0x58   : > { %1836 = vmatmul.mubr.bf16.gmra.mrb[20].mxu1 %v8371_v49  ;;  %1682 = vmatprep.mubr.bf16.mxu0 %v8373_v51  ;;  %10440 = vst [vmem:[#allocation7_spill] sm:$0xff] %v8468_v56  ;;  %10442 = vst [vmem:[#allocation9_spill] sm:$0xff] %v8480_v1 }
  0x59   : > { %1843 = vmatprep.mubr.bf16.mxu1 %v8378_v53  ;;  %2106 = vmatpush1.bf16.msra.mxu1 %v7856_v54  ;;  %v8466_v54 = vcombine.low %v253_v28, %v257_v32  ;;  %v284_v32 = vld [vmem:[%s8188_s27 + $0x380] sm:$0xff] }
  0x5a   : > { %2107 = vmatprep.subr.bf16.mxu1 %v10352_v41 }
  0x5b   : > { %10439 = vst [vmem:[#allocation6_spill] sm:$0xff] %v8466_v54 }
  0x5d   : > { %2108 = vmatpush1.bf16.msra.mxu1 %v7857_v63  ;;  %v269_v63 = vld [vmem:[%s8188_s27 + $0x308] sm:$0xff] }
  0x5e   : > { %2109 = vmatprep.subr.bf16.mxu1 %v10352_v41  ;;  %v8486_v12 = vcombine.high %v269_v63, %v273_v0  ;;  %v8498_v26 = vcombine.low %v269_v63, %v273_v0  ;;  %v292_v0 = vld [vmem:[%s8188_s27 + $0x3c0] sm:$0xff] }
  0x5f   : > { %1683 = vmatmul.mubr.bf16.gmra.mrb[24].mxu0 %v8402_v2 }
  0x60   : > { %1844 = vmatmul.mubr.bf16.gmra.mrb[24].mxu1 %v8404_v3  ;;  %1690 = vmatprep.mubr.bf16.mxu0 %v8406_v5  ;;  %10445 = vst [vmem:[#allocation12_spill] sm:$0xff] %v8486_v12  ;;  %10447 = vst [vmem:[#allocation14_spill] sm:$0xff] %v8498_v26 }
  0x61   : > { %1851 = vmatprep.mubr.bf16.mxu1 %v8408_v9  ;;  %2110 = vmatpush1.bf16.msra.mxu1 %v7860_v10  ;;  %v8482_v10 = vcombine.low %v261_v45, %v265_v48  ;;  %v289_v45 = vld [vmem:[%s8188_s27 + $0x3a8] sm:$0xff]  ;;  %v8512_v48 = vcombine.low %v276_v13, %v280_v14 }
  0x62   : > { %2111 = vmatprep.subr.bf16.mxu1 %v10352_v41  ;;  %v8518_v63 = vcombine.high %v285_v44, %v289_v45  ;;  %v296_v41 = vld [vmem:[%s8188_s27 + $0x3e0] sm:$0xff]  ;;  %v293_v13 = vld [vmem:[%s8188_s27 + $0x3c8] sm:$0xff] }
  0x63   : > { %10443 = vst [vmem:[#allocation10_spill] sm:$0xff] %v8482_v10  ;;  %10450 = vst [vmem:[#allocation17_spill] sm:$0xff] %v8512_v48  ;;  %v297_v14 = vld [vmem:[%s8188_s27 + $0x3e8] sm:$0xff] }
  0x64   : > { %10453 = vst [vmem:[#allocation20_spill] sm:$0xff] %v8518_v63 }
  0x65   : > { %2112 = vmatpush1.bf16.msra.mxu1 %v7861_v16  ;;  %v281_v16 = vld [vmem:[%s8188_s27 + $0x368] sm:$0xff] }
  0x66   : > { %7229 = vmatprep.subr.bf16.mxu1 %v7864_v21  ;;  %v8496_v21 = vcombine.low %v268_v61, %v272_v62  ;;  %v8502_v28 = vcombine.high %v277_v15, %v281_v16  ;;  %v8514_v61 = vcombine.low %v277_v15, %v281_v16  ;;  %v8516_v62 = vcombine.high %v284_v32, %v288_v43 }
  0x67   : > { %1691 = vmatmul.mubr.bf16.gmra.mrb[28].mxu0 %v8432_v22  ;;  %v8528_v15 = vcombine.low %v284_v32, %v288_v43  ;;  %v8530_v16 = vcombine.low %v285_v44, %v289_v45  ;;  %v425_v32 = vld [vmem:[%s8188_s27 + $0x408] sm:$0xff]  ;;  %v8544_v44 = vcombine.low %v292_v0, %v296_v41  ;;  %v8546_v45 = vcombine.low %v293_v13, %v297_v14 }
  0x68   : > { %1852 = vmatmul.mubr.bf16.gmra.mrb[28].mxu1 %v8434_v23  ;;  %1698 = vmatprep.mubr.bf16.mxu0 %v8436_v24  ;;  %10446 = vst [vmem:[#allocation13_spill] sm:$0xff] %v8496_v21  ;;  %10449 = vst [vmem:[#allocation16_spill] sm:$0xff] %v8502_v28  ;;  %v429_v43 = vld [vmem:[%s8188_s27 + $0x428] sm:$0xff] }
  0x69   : > { %1859 = vmatprep.mubr.bf16.mxu1 %v8438_v25  ;;  %10451 = vst [vmem:[#allocation18_spill] sm:$0xff] %v8514_v61  ;;  %10452 = vst [vmem:[#allocation19_spill] sm:$0xff] %v8516_v62 }
  0x6a   : > { %10454 = vst [vmem:[#allocation21_spill] sm:$0xff] %v8528_v15  ;;  %10455 = vst [vmem:[#allocation22_spill] sm:$0xff] %v8530_v16 }
  0x6b   : > { %10458 = vst [vmem:[#allocation25_spill] sm:$0xff] %v8544_v44  ;;  %10459 = vst [vmem:[#allocation26_spill] sm:$0xff] %v8546_v45 }
  0x6f   : > { %1699 = vmatmul.mubr.bf16.gmra.mrb[32].mxu0 %v8448_v34 }
  0x70   : > { %1860 = vmatmul.mubr.bf16.gmra.mrb[32].mxu1 %v8450_v37  ;;  %1706 = vmatprep.mubr.bf16.mxu0 %v8452_v40 }
  0x71   : > { %1867 = vmatprep.mubr.bf16.mxu1 %v8454_v42 }
  0x77   : > { %1707 = vmatmul.mubr.bf16.gmra.mrb[36].mxu0 %v8464_v52 }
  0x78   : > { %1868 = vmatmul.mubr.bf16.gmra.mrb[36].mxu1 %v8466_v54  ;;  %1714 = vmatprep.mubr.bf16.mxu0 %v8468_v56 }
  0x79   : > { %1875 = vmatprep.mubr.bf16.mxu1 %v8470_v59 }
  0x7f   : > { %1715 = vmatmul.mubr.bf16.gmra.mrb[40].mxu0 %v8480_v1 }
  0x80   : > { %1876 = vmatmul.mubr.bf16.gmra.mrb[40].mxu1 %v8482_v10  ;;  %1722 = vmatprep.mubr.bf16.mxu0 %v8484_v11 }
  0x81   : > { %1883 = vmatprep.mubr.bf16.mxu1 %v8486_v12  ;;  %v7870_v12 = vld [vmem:[%s10349_s1 + $0x50] sm:$0xff]  }
  0x87   : > { %1723 = vmatmul.mubr.bf16.gmra.mrb[44].mxu0 %v8496_v21  ;;  %v203_v21 = vld [vmem:[%s8188_s27 + $0xf8] sm:$0xff] }
  0x88   : > { %1884 = vmatmul.mubr.bf16.gmra.mrb[44].mxu1 %v8498_v26  ;;  %1730 = vmatprep.mubr.bf16.mxu0 %v8500_v27  ;;  %v428_v27 = vld [vmem:[%s8188_s27 + $0x420] sm:$0xff]  ;;  %v186_v26 = vld [vmem:[%s8188_s27 + $0x70] sm:$0xff] }
  0x89   : > { %1891 = vmatprep.mubr.bf16.mxu1 %v8502_v28  ;;  %v8532_v28 = vcombine.high %v292_v0, %v296_v41  ;;  %v6224_v0 = vcombine.low %v425_v32, %v429_v43 }
  0x8b   : > { %10456 = vst [vmem:[#allocation23_spill] sm:$0xff] %v8532_v28 }
  0x8f   : > { %1731 = vmatmul.mubr.bf16.gmra.mrb[48].mxu0 %v8512_v48  ;;  %v8534_v48 = vcombine.high %v293_v13, %v297_v14 }
  0x90   : > { %1892 = vmatmul.mubr.bf16.gmra.mrb[48].mxu1 %v8514_v61  ;;  %1738 = vmatprep.mubr.bf16.mxu0 %v8516_v62  ;;  %v424_v61 = vld [vmem:[%s8188_s27 + $0x400] sm:$0xff]  ;;  %v6225_v62 = vcombine.high %v425_v32, %v429_v43 }
  0x91   : > { %1899 = vmatprep.mubr.bf16.mxu1 %v8518_v63  ;;  %10457 = vst [vmem:[#allocation24_spill] sm:$0xff] %v8534_v48  ;;  %v6223_v63 = vcombine.high %v424_v61, %v428_v27  ;;  %v6222_v41 = vcombine.low %v424_v61, %v428_v27  ;;  %v7863_v32 = vld [vmem:[%s10349_s1] sm:$0xff]  }
  0x92   : > { %v7865_v43 = vld [vmem:[%s10349_s1 + $0x80] sm:$0xff]  }
  0x97   : > { %1739 = vmatmul.mubr.bf16.gmra.mrb[52].mxu0 %v8528_v15  ;;  %v182_v15 = vld [vmem:[%s8188_s27 + $0x50] sm:$0xff] }
  0x98   : > { %1900 = vmatmul.mubr.bf16.gmra.mrb[52].mxu1 %v8530_v16  ;;  %1746 = vmatprep.mubr.bf16.mxu0 %v8532_v28  ;;  %v187_v28 = vld [vmem:[%s8188_s27 + $0x78] sm:$0xff]  ;;  %v8554_v13 = vcombine.high %v182_v15, %v186_v26  ;;  %v8565_v27 = vcombine.low %v182_v15, %v186_v26  ;;  %v7868_v26 = vld [vmem:[%s10349_s1 + $0xc8] sm:$0xff]   ;;  %v198_v15 = vld [vmem:[%s8188_s27 + $0xd0] sm:$0xff] }
  0x99   : > { %1907 = vmatprep.mubr.bf16.mxu1 %v8534_v48  ;;  %v183_v48 = vld [vmem:[%s8188_s27 + $0x58] sm:$0xff] }
  0x9a   : > { %10460 = vst [vmem:[#allocation27_spill] sm:$0xff] %v8554_v13  ;;  %v8556_v14 = vcombine.high %v183_v48, %v187_v28  ;;  %10462 = vst [vmem:[#allocation29_spill] sm:$0xff] %v8565_v27  ;;  %v8567_v61 = vcombine.low %v183_v48, %v187_v28  ;;  %v7867_v48 = vld [vmem:[%s10349_s1 + $0x8] sm:$0xff]   ;;  %v199_v16 = vld [vmem:[%s8188_s27 + $0xd8] sm:$0xff] }
  0x9b   : > { %v8652_v11 = vcombine.low %v199_v16, %v203_v21 }
  0x9c   : > { %10461 = vst [vmem:[#allocation28_spill] sm:$0xff] %v8556_v14  ;;  %10463 = vst [vmem:[#allocation30_spill] sm:$0xff] %v8567_v61 }
  0x9d   : > { %10471 = vst [vmem:[#allocation38_spill] sm:$0xff] %v8652_v11 }
  0x9f   : > { %1747 = vmatmul.mubr.bf16.gmra.mrb[56].mxu0 %v8544_v44  ;;  %v190_v44 = vld [vmem:[%s8188_s27 + $0x90] sm:$0xff] }
  0xa0   : > { %1908 = vmatmul.mubr.bf16.gmra.mrb[56].mxu1 %v8546_v45  ;;  %1754 = vmatprep.mubr.bf16.mxu0 %v6223_v63  ;;  %v194_v45 = vld [vmem:[%s8188_s27 + $0xb0] sm:$0xff]  ;;  %v195_v63 = vld [vmem:[%s8188_s27 + $0xb8] sm:$0xff] }
  0xa1   : > { %1915 = vmatprep.mubr.bf16.mxu1 %v6225_v62  ;;  %v191_v62 = vld [vmem:[%s8188_s27 + $0x98] sm:$0xff] }
  0xa2   : > { %v8583_v28 = vcombine.high %v191_v62, %v195_v63 }
  0xa4   : > { %10465 = vst [vmem:[#allocation32_spill] sm:$0xff] %v8583_v28 }
  0xa7   : > { %1755 = vmatmul.mubr.bf16.gmra.mrb[60].mxu0 %v6222_v41  ;;  %v7866_v41 = vld [vmem:[%s10349_s1 + $0x48] sm:$0xff]  }
  0xa8   : > { %1916 = vmatmul.mubr.bf16.gmra.mrb[60].mxu1 %v6224_v0  ;;  %1956 = vmatprep.mubr.bf16.mxu0 %v8554_v13  ;;  %v8578_v0 = vcombine.high %v190_v44, %v194_v45  ;;  %v7869_v13 = vld [vmem:[%s10349_s1 + $0x88] sm:$0xff]  }
  0xa9   : > { %6292 = vmatprep.mubr.msk.bf16.mxu1 %vm1553_vm0, %v8556_v14  ;;  %v202_v14 = vld [vmem:[%s8188_s27 + $0xf0] sm:$0xff] }
  0xaa   : > { %10464 = vst [vmem:[#allocation31_spill] sm:$0xff] %v8578_v0 }
  0xaf   : > { %1957 = vmatmul.mubr.bf16.vlgmr.msra.gmra.mrb[64].mxu0 %v8565_v27  ;;  %v7872_v27 = vld [vmem:[%s10349_s1 + $0xd0] sm:$0xff]  }
  0xb0   : > { %2118 = vmatmul.mubr.bf16.vlgmr.msra.gmra.mrb[64].mxu1 %v8567_v61  ;;  %7118 = vmatpush3.bf16.msra.mxu0 %v7863_v32  ;;  %v8606_v32 = vcombine.low %v190_v44, %v194_v45  ;;  %v8613_v61 = vcombine.high %v198_v15, %v202_v14  ;;  %v7874_v44 = vld [vmem:[%s10349_s1 + $0x58] sm:$0xff]   ;;  %v8621_v45 = vcombine.high %v199_v16, %v203_v21  ;;  %v7884_v21 = vld [vmem:[%s10349_s1 + $0xe8] sm:$0xff]   ;;  %v214_v16 = vld [vmem:[%s8188_s27 + $0x150] sm:$0xff] }
  0xb1   : > { %7230 = vmatpush3.bf16.msra.mxu1 %v7865_v43  ;;  %1964 = vmatprep.mubr.bf16.mxu0 %v8578_v0  ;;  %v7871_v43 = vld [vmem:[%s10349_s1 + $0x10] sm:$0xff]   ;;  %v8611_v0 = vcombine.low %v191_v62, %v195_v63  ;;  %v7876_v62 = vld [vmem:[%s10349_s1 + $0xd8] sm:$0xff]  }
  0xb2   : > { %6293 = vmatprep.mubr.msk.bf16.mxu1 %vm1553_vm0, %v8583_v28  ;;  %7119 = vmatprep.subr.bf16.mxu0 %v7866_v41  ;;  %10466 = vst [vmem:[#allocation33_spill] sm:$0xff] %v8606_v32  ;;  %10468 = vst [vmem:[#allocation35_spill] sm:$0xff] %v8613_v61  ;;  %v7873_v28 = vld [vmem:[%s10349_s1 + $0x90] sm:$0xff]  }
  0xb3   : > { %7231 = vmatprep.subr.bf16.mxu1 %v7868_v26  ;;  %10467 = vst [vmem:[#allocation34_spill] sm:$0xff] %v8611_v0  ;;  %10469 = vst [vmem:[#allocation36_spill] sm:$0xff] %v8621_v45  ;;  %v206_v63 = vld [vmem:[%s8188_s27 + $0x110] sm:$0xff]  ;;  %v7875_v26 = vld [vmem:[%s10349_s1 + $0x18] sm:$0xff]  }
  0xb4   : > { %7120 = vmatpush3.bf16.msra.mxu0 %v7867_v48  ;;  %v210_v41 = vld [vmem:[%s8188_s27 + $0x130] sm:$0xff]  ;;  %v207_v48 = vld [vmem:[%s8188_s27 + $0x118] sm:$0xff] }
  0xb5   : > { %7232 = vmatpush3.bf16.msra.mxu1 %v7869_v13  ;;  %7121 = vmatprep.subr.bf16.mxu0 %v7870_v12  ;;  %v211_v13 = vld [vmem:[%s8188_s27 + $0x138] sm:$0xff] }
  0xb6   : > { %7233 = vmatprep.subr.bf16.mxu1 %v7872_v27  ;;  %v7877_v12 = vld [vmem:[%s10349_s1 + $0x98] sm:$0xff]   ;;  %v7878_v27 = vld [vmem:[%s10349_s1 + $0x60] sm:$0xff]  }
  0xb7   : > { %1965 = vmatmul.mubr.bf16.gmra.mrb[68].mxu0 %v8606_v32  ;;  %v7879_v32 = vld [vmem:[%s10349_s1 + $0x20] sm:$0xff]  }
  0xb8   : > { %2126 = vmatmul.mubr.bf16.gmra.mrb[68].mxu1 %v8611_v0  ;;  %1972 = vmatprep.mubr.bf16.mxu0 %v8613_v61  ;;  %v7880_v0 = vld [vmem:[%s10349_s1 + $0xe0] sm:$0xff]   ;;  %v8647_v61 = vcombine.low %v198_v15, %v202_v14  ;;  %v7882_v14 = vld [vmem:[%s10349_s1 + $0x68] sm:$0xff]   ;;  %v218_v15 = vld [vmem:[%s8188_s27 + $0x170] sm:$0xff] }
  0xb9   : > { %6294 = vmatprep.mubr.msk.bf16.mxu1 %vm1553_vm0, %v8621_v45  ;;  %7122 = vmatpush3.bf16.msra.mxu0 %v7871_v43  ;;  %v8654_v45 = vcombine.high %v206_v63, %v210_v41  ;;  %v7881_v43 = vld [vmem:[%s10349_s1 + $0xa0] sm:$0xff]  }
  0xba   : > { %7234 = vmatpush3.bf16.msra.mxu1 %v7873_v28  ;;  %7123 = vmatprep.subr.bf16.mxu0 %v7874_v44  ;;  %10470 = vst [vmem:[#allocation37_spill] sm:$0xff] %v8647_v61  ;;  %v8662_v28 = vcombine.high %v207_v48, %v211_v13  ;;  %v7883_v44 = vld [vmem:[%s10349_s1 + $0x28] sm:$0xff]  }
  0xbb   : > { %7235 = vmatprep.subr.bf16.mxu1 %v7876_v62  ;;  %10472 = vst [vmem:[#allocation39_spill] sm:$0xff] %v8654_v45  ;;  %v215_v62 = vld [vmem:[%s8188_s27 + $0x158] sm:$0xff] }
  0xbc   : > { %10473 = vst [vmem:[#allocation40_spill] sm:$0xff] %v8662_v28 }
  0xbd   : > { %7124 = vmatpush3.bf16.msra.mxu0 %v7875_v26  ;;  %v219_v26 = vld [vmem:[%s8188_s27 + $0x178] sm:$0xff] }
  0xbe   : > { %7236 = vmatpush3.bf16.msra.mxu1 %v7877_v12  ;;  %7125 = vmatprep.subr.bf16.mxu0 %v7878_v27  ;;  %v7885_v12 = vld [vmem:[%s10349_s1 + $0xa8] sm:$0xff]   ;;  %v7888_v27 = vld [vmem:[%s10349_s1 + $0xf0] sm:$0xff]  }
  0xbf   : > { %1973 = vmatmul.mubr.bf16.gmra.mrb[72].mxu0 %v8647_v61  ;;  %7237 = vmatprep.subr.bf16.mxu1 %v7880_v0  ;;  %v7886_v0 = vld [vmem:[%s10349_s1 + $0x70] sm:$0xff]  }
  0xc0   : > { %2134 = vmatmul.mubr.bf16.gmra.mrb[72].mxu1 %v8652_v11  ;;  %1980 = vmatprep.mubr.bf16.mxu0 %v8654_v45  ;;  %v8688_v45 = vcombine.low %v206_v63, %v210_v41  ;;  %v8695_v11 = vcombine.high %v214_v16, %v218_v15  ;;  %v7889_v61 = vld [vmem:[%s10349_s1 + $0xb0] sm:$0xff]   ;;  %v7890_v63 = vld [vmem:[%s10349_s1 + $0x78] sm:$0xff]   ;;  %v8703_v41 = vcombine.high %v215_v62, %v219_v26 }
  0xc1   : > { %6295 = vmatprep.mubr.msk.bf16.mxu1 %vm1553_vm0, %v8662_v28  ;;  %7126 = vmatpush3.bf16.msra.mxu0 %v7879_v32  ;;  %v7887_v32 = vld [vmem:[%s10349_s1 + $0x30] sm:$0xff]   ;;  %v8693_v28 = vcombine.low %v207_v48, %v211_v13  ;;  %v7892_v48 = vld [vmem:[%s10349_s1 + $0xf8] sm:$0xff]  }
  0xc2   : > { %7238 = vmatpush3.bf16.msra.mxu1 %v7881_v43  ;;  %7127 = vmatprep.subr.bf16.mxu0 %v7882_v14  ;;  %10474 = vst [vmem:[#allocation41_spill] sm:$0xff] %v8688_v45  ;;  %10476 = vst [vmem:[#allocation43_spill] sm:$0xff] %v8695_v11  ;;  %v222_v13 = vld [vmem:[%s8188_s27 + $0x190] sm:$0xff]  ;;  %v7891_v14 = vld [vmem:[%s10349_s1 + $0x38] sm:$0xff]  }
  0xc3   : > { %7239 = vmatprep.subr.bf16.mxu1 %v7884_v21  ;;  %10475 = vst [vmem:[#allocation42_spill] sm:$0xff] %v8693_v28  ;;  %10477 = vst [vmem:[#allocation44_spill] sm:$0xff] %v8703_v41  ;;  %v226_v43 = vld [vmem:[%s8188_s27 + $0x1b0] sm:$0xff]  ;;  %v223_v21 = vld [vmem:[%s8188_s27 + $0x198] sm:$0xff] }
  0xc5   : > { %7128 = vmatpush3.bf16.msra.mxu0 %v7883_v44  ;;  %v227_v44 = vld [vmem:[%s8188_s27 + $0x1b8] sm:$0xff] }
  0xc6   : > { %7240 = vmatpush3.bf16.msra.mxu1 %v7885_v12  ;;  %7129 = vmatprep.subr.bf16.mxu0 %v7886_v0  ;;  %v7893_v12 = vld [vmem:[%s10349_s1 + $0xb8] sm:$0xff]   ;;  %v7894_v0 = vld [vmem:[%s10349_s1 + $0x140] sm:$0xff]  }
  0xc7   : > { %1981 = vmatmul.mubr.bf16.gmra.mrb[76].mxu0 %v8688_v45  ;;  %7241 = vmatprep.subr.bf16.mxu1 %v7888_v27  ;;  %v8726_v27 = vcombine.low %v214_v16, %v218_v15  ;;  %v8732_v45 = vcombine.high %v223_v21, %v227_v44  ;;  %v234_v16 = vld [vmem:[%s8188_s27 + $0x1f0] sm:$0xff]  ;;  %v231_v15 = vld [vmem:[%s8188_s27 + $0x1d8] sm:$0xff] }
  0xc8   : > { %2142 = vmatmul.mubr.bf16.gmra.mrb[76].mxu1 %v8693_v28  ;;  %1988 = vmatprep.mubr.bf16.mxu0 %v8695_v11  ;;  %v8728_v11 = vcombine.low %v215_v62, %v219_v26  ;;  %v8730_v28 = vcombine.high %v222_v13, %v226_v43  ;;  %v235_v62 = vld [vmem:[%s8188_s27 + $0x1f8] sm:$0xff]  ;;  %v8744_v26 = vcombine.low %v222_v13, %v226_v43  ;;  %v238_v13 = vld [vmem:[%s8188_s27 + $0x210] sm:$0xff] }
  0xc9   : > { %6296 = vmatprep.mubr.msk.bf16.mxu1 %vm1553_vm0, %v8703_v41  ;;  %7130 = vmatpush3.bf16.msra.mxu0 %v7887_v32  ;;  %10478 = vst [vmem:[#allocation45_spill] sm:$0xff] %v8726_v27  ;;  %10481 = vst [vmem:[#allocation48_spill] sm:$0xff] %v8732_v45  ;;  %v230_v32 = vld [vmem:[%s8188_s27 + $0x1d0] sm:$0xff] }
  0xca   : > { %7242 = vmatpush3.bf16.msra.mxu1 %v7889_v61  ;;  %7131 = vmatprep.subr.bf16.mxu0 %v7890_v63  ;;  %10479 = vst [vmem:[#allocation46_spill] sm:$0xff] %v8728_v11  ;;  %10480 = vst [vmem:[#allocation47_spill] sm:$0xff] %v8730_v28  ;;  %v10482_v61 = vmov 0   ;;  %v8746_v63 = vcombine.low %v223_v21, %v227_v44  ;;  %v242_v43 = vld [vmem:[%s8188_s27 + $0x230] sm:$0xff]  ;;  %v239_v21 = vld [vmem:[%s8188_s27 + $0x218] sm:$0xff] }
  0xcb   : > { %7243 = vmatprep.subr.bf16.mxu1 %v7892_v48  ;;  %10483 = vst [vmem:[#allocation49_spill] sm:$0xff] %v8744_v26  ;;  %v8748_v48 = vcombine.high %v230_v32, %v234_v16  ;;  %v243_v44 = vld [vmem:[%s8188_s27 + $0x238] sm:$0xff] }
  0xcc   : > { %10484 = vst [vmem:[#allocation50_spill] sm:$0xff] %v8746_v63 }
  0xcd   : > { %7132 = vmatpush3.bf16.msra.mxu0 %v7891_v14  ;;  %10485 = vst [vmem:[#allocation51_spill] sm:$0xff] %v8748_v48  ;;  %v8750_v14 = vcombine.high %v231_v15, %v235_v62 }
  0xce   : > { %7244 = vmatpush3.bf16.msra.mxu1 %v7893_v12  ;;  %7341 = vmatprep.subr.bf16.mxu0 %v7894_v0  ;;  %v8761_v12 = vcombine.low %v230_v32, %v234_v16  ;;  %v8763_v0 = vcombine.low %v231_v15, %v235_v62  ;;  %v246_v32 = vld [vmem:[%s8188_s27 + $0x250] sm:$0xff]  ;;  %v247_v15 = vld [vmem:[%s8188_s27 + $0x258] sm:$0xff] }
  0xcf   : > { %1989 = vmatmul.mubr.bf16.gmra.mrb[80].mxu0 %v8726_v27  ;;  %3143 = vmatprep.subr.bf16.mxu1 %v10482_v61  ;;  %10486 = vst [vmem:[#allocation52_spill] sm:$0xff] %v8750_v14  ;;  %v250_v16 = vld [vmem:[%s8188_s27 + $0x270] sm:$0xff]  ;;  %v251_v62 = vld [vmem:[%s8188_s27 + $0x278] sm:$0xff] }
  0xd0   : > { %2150 = vmatmul.mubr.bf16.gmra.mrb[80].mxu1 %v8728_v11  ;;  %1996 = vmatprep.mubr.bf16.mxu0 %v8730_v28  ;;  %10487 = vst [vmem:[#allocation53_spill] sm:$0xff] %v8761_v12  ;;  %10488 = vst [vmem:[#allocation54_spill] sm:$0xff] %v8763_v0 }
  0xd1   : > { %6297 = vmatprep.mubr.msk.bf16.mxu1 %vm1553_vm0, %v8732_v45  ;;  %v8767_v45 = vcombine.high %v239_v21, %v243_v44 }
  0xd3   : > { %10490 = vst [vmem:[#allocation56_spill] sm:$0xff] %v8767_v45 }
  0xd7   : > { %1997 = vmatmul.mubr.bf16.gmra.mrb[84].mxu0 %v8744_v26  ;;  %v8765_v26 = vcombine.high %v238_v13, %v242_v43 }
  0xd8   : > { %2158 = vmatmul.mubr.bf16.gmra.mrb[84].mxu1 %v8746_v63  ;;  %2004 = vmatprep.mubr.bf16.mxu0 %v8748_v48  ;;  %v8780_v48 = vcombine.low %v239_v21, %v243_v44  ;;  %v8784_v63 = vcombine.high %v247_v15, %v251_v62  ;;  %v255_v21 = vld [vmem:[%s8188_s27 + $0x298] sm:$0xff] }
  0xd9   : > { %6298 = vmatprep.mubr.msk.bf16.mxu1 %vm1553_vm0, %v8750_v14  ;;  %10489 = vst [vmem:[#allocation55_spill] sm:$0xff] %v8765_v26  ;;  %v8778_v14 = vcombine.low %v238_v13, %v242_v43  ;;  %v254_v13 = vld [vmem:[%s8188_s27 + $0x290] sm:$0xff]  ;;  %v259_v44 = vld [vmem:[%s8188_s27 + $0x2b8] sm:$0xff] }
  0xda   : > { %10492 = vst [vmem:[#allocation58_spill] sm:$0xff] %v8780_v48  ;;  %10494 = vst [vmem:[#allocation60_spill] sm:$0xff] %v8784_v63  ;;  %v258_v43 = vld [vmem:[%s8188_s27 + $0x2b0] sm:$0xff] }
  0xdb   : > { %10491 = vst [vmem:[#allocation57_spill] sm:$0xff] %v8778_v14 }
  0xdf   : > { %2005 = vmatmul.mubr.bf16.gmra.mrb[88].mxu0 %v8761_v12  ;;  %v8782_v12 = vcombine.high %v246_v32, %v250_v16 }
  0xe0   : > { %2166 = vmatmul.mubr.bf16.gmra.mrb[88].mxu1 %v8763_v0  ;;  %2012 = vmatprep.mubr.bf16.mxu0 %v8765_v26  ;;  %v8797_v26 = vcombine.low %v247_v15, %v251_v62  ;;  %v8801_v0 = vcombine.high %v255_v21, %v259_v44  ;;  %v263_v15 = vld [vmem:[%s8188_s27 + $0x2d8] sm:$0xff] }
  0xe1   : > { %6299 = vmatprep.mubr.msk.bf16.mxu1 %vm1553_vm0, %v8767_v45  ;;  %10493 = vst [vmem:[#allocation59_spill] sm:$0xff] %v8782_v12  ;;  %v8795_v45 = vcombine.low %v246_v32, %v250_v16  ;;  %v262_v32 = vld [vmem:[%s8188_s27 + $0x2d0] sm:$0xff]  ;;  %v267_v62 = vld [vmem:[%s8188_s27 + $0x2f8] sm:$0xff] }
  0xe2   : > { %10496 = vst [vmem:[#allocation62_spill] sm:$0xff] %v8797_v26  ;;  %10498 = vst [vmem:[#allocation64_spill] sm:$0xff] %v8801_v0  ;;  %v266_v16 = vld [vmem:[%s8188_s27 + $0x2f0] sm:$0xff] }
  0xe3   : > { %10495 = vst [vmem:[#allocation61_spill] sm:$0xff] %v8795_v45 }
  0xe7   : > { %2013 = vmatmul.mubr.bf16.gmra.mrb[92].mxu0 %v8778_v14  ;;  %v8799_v14 = vcombine.high %v254_v13, %v258_v43 }
  0xe8   : > { %2174 = vmatmul.mubr.bf16.gmra.mrb[92].mxu1 %v8780_v48  ;;  %2020 = vmatprep.mubr.bf16.mxu0 %v8782_v12  ;;  %v8814_v12 = vcombine.low %v255_v21, %v259_v44  ;;  %v8818_v48 = vcombine.high %v263_v15, %v267_v62  ;;  %v271_v21 = vld [vmem:[%s8188_s27 + $0x318] sm:$0xff] }
  0xe9   : > { %6300 = vmatprep.mubr.msk.bf16.mxu1 %vm1553_vm0, %v8784_v63  ;;  %10497 = vst [vmem:[#allocation63_spill] sm:$0xff] %v8799_v14  ;;  %v8812_v63 = vcombine.low %v254_v13, %v258_v43  ;;  %v270_v13 = vld [vmem:[%s8188_s27 + $0x310] sm:$0xff]  ;;  %v275_v44 = vld [vmem:[%s8188_s27 + $0x338] sm:$0xff] }
  0xea   : > { %10500 = vst [vmem:[#allocation66_spill] sm:$0xff] %v8814_v12  ;;  %10502 = vst [vmem:[#allocation68_spill] sm:$0xff] %v8818_v48  ;;  %v274_v43 = vld [vmem:[%s8188_s27 + $0x330] sm:$0xff] }
  0xeb   : > { %10499 = vst [vmem:[#allocation65_spill] sm:$0xff] %v8812_v63  ;;  %v8846_v28 = vcombine.low %v270_v13, %v274_v43 }
  0xed   : > { %10507 = vst [vmem:[#allocation73_spill] sm:$0xff] %v8846_v28 }
  0xef   : > { %2021 = vmatmul.mubr.bf16.gmra.mrb[96].mxu0 %v8795_v45  ;;  %v8816_v45 = vcombine.high %v262_v32, %v266_v16 }
  0xf0   : > { %2182 = vmatmul.mubr.bf16.gmra.mrb[96].mxu1 %v8797_v26  ;;  %2028 = vmatprep.mubr.bf16.mxu0 %v8799_v14  ;;  %v8831_v14 = vcombine.low %v263_v15, %v267_v62  ;;  %v8835_v26 = vcombine.high %v271_v21, %v275_v44 }
  0xf1   : > { %6301 = vmatprep.mubr.msk.bf16.mxu1 %vm1553_vm0, %v8801_v0  ;;  %10501 = vst [vmem:[#allocation67_spill] sm:$0xff] %v8816_v45  ;;  %v8829_v0 = vcombine.low %v262_v32, %v266_v16  ;;  %v279_v32 = vld [vmem:[%s8188_s27 + $0x358] sm:$0xff] }
  0xf2   : > { %10504 = vst [vmem:[#allocation70_spill] sm:$0xff] %v8831_v14  ;;  %10506 = vst [vmem:[#allocation72_spill] sm:$0xff] %v8835_v26  ;;  %v283_v16 = vld [vmem:[%s8188_s27 + $0x378] sm:$0xff] }
  0xf3   : > { %10503 = vst [vmem:[#allocation69_spill] sm:$0xff] %v8829_v0  ;;  %v8852_v1 = vcombine.high %v279_v32, %v283_v16 }
  0xf5   : > { %10510 = vst [vmem:[#allocation76_spill] sm:$0xff] %v8852_v1 }
  0xf7   : > { %2029 = vmatmul.mubr.bf16.gmra.mrb[100].mxu0 %v8812_v63  ;;  %v8833_v63 = vcombine.high %v270_v13, %v274_v43 }
  0xf8   : > { %2190 = vmatmul.mubr.bf16.gmra.mrb[100].mxu1 %v8814_v12  ;;  %2036 = vmatprep.mubr.bf16.mxu0 %v8816_v45  ;;  %v282_v45 = vld [vmem:[%s8188_s27 + $0x370] sm:$0xff] }
  0xf9   : > { %6302 = vmatprep.mubr.msk.bf16.mxu1 %vm1553_vm0, %v8818_v48  ;;  %10505 = vst [vmem:[#allocation71_spill] sm:$0xff] %v8833_v63  ;;  %v278_v48 = vld [vmem:[%s8188_s27 + $0x350] sm:$0xff] }
  0xff   : > { %2037 = vmatmul.mubr.bf16.gmra.mrb[104].mxu0 %v8829_v0  ;;  %v8848_v0 = vcombine.low %v271_v21, %v275_v44  ;;  %v290_v21 = vld [vmem:[%s8188_s27 + $0x3b0] sm:$0xff] }
 0x100   : > { %2198 = vmatmul.mubr.bf16.gmra.mrb[104].mxu1 %v8831_v14  ;;  %2044 = vmatprep.mubr.bf16.mxu0 %v8833_v63  ;;  %v8850_v63 = vcombine.high %v278_v48, %v282_v45 }
 0x101   : > { %6303 = vmatprep.mubr.msk.bf16.mxu1 %vm1553_vm0, %v8835_v26  ;;  %10508 = vst [vmem:[#allocation74_spill] sm:$0xff] %v8848_v0 }
 0x102   : > { %v6797_v12 = vpop.f32.mrb[0].mxu0  ;;  %10509 = vst [vmem:[#allocation75_spill] sm:$0xff] %v8850_v63 }
 0x103   : > { %v6909_v15 = vpop.f32.mrb[0].mxu1  ;;  %v6798_v62 = vpop.f32.mrb[1].mxu0 }
 0x104   : > { %v6799_v11 = vadd.f32 %v6798_v62, %v6797_v12  ;;  %v6910_v27 = vpop.f32.mrb[1].mxu1  ;;  %v6800_v41 = vpop.f32.mrb[2].mxu0 }
 0x105   : > { %v6911_v14 = vadd.f32 %v6910_v27, %v6909_v15  ;;  %v6912_v26 = vpop.f32.mrb[2].mxu1  ;;  %v6801_v10 = vpop.f32.mrb[3].mxu0  ;;  %v286_v27 = vld [vmem:[%s8188_s27 + $0x390] sm:$0xff]  ;;  %v287_v15 = vld [vmem:[%s8188_s27 + $0x398] sm:$0xff] }
 0x106   : > { %v6802_v59 = vadd.f32 %v6801_v10, %v6800_v41  ;;  %v6913_v56 = vpop.f32.mrb[3].mxu1  ;;  %v291_v10 = vld [vmem:[%s8188_s27 + $0x3b8] sm:$0xff] }
 0x107   : > { %v8854_v13 = vadd.f32 %v6911_v14, %v6799_v11  ;;  %v6914_v12 = vadd.f32 %v6913_v56, %v6912_v26  ;;  %2045 = vmatmul.mubr.bf16.gmra.mrb[108].mxu0 %v8846_v28  ;;  %v8867_v14 = vcombine.low %v278_v48, %v282_v45  ;;  %v8873_v28 = vcombine.high %v287_v15, %v291_v10 }
 0x108   : > { %2206 = vmatmul.mubr.bf16.gmra.mrb[108].mxu1 %v8848_v0  ;;  %2052 = vmatprep.mubr.bf16.mxu0 %v8850_v63  ;;  %v8869_v0 = vcombine.low %v279_v32, %v283_v16  ;;  %v294_v16 = vld [vmem:[%s8188_s27 + $0x3d0] sm:$0xff] }
 0x109   : > { %10511 = vst [vmem:[#allocation77_spill] sm:$0xff] %v8854_v13  ;;  %v8859_v43 = vadd.f32 %v6914_v12, %v6802_v59  ;;  %6304 = vmatprep.mubr.msk.bf16.mxu1 %vm1553_vm0, %v8852_v1  ;;  %10513 = vst [vmem:[#allocation79_spill] sm:$0xff] %v8867_v14  ;;  %v8871_v59 = vcombine.high %v286_v27, %v290_v21 }
 0x10a   : > { %v6803_v44 = vpop.f32.mrb[4].mxu0  ;;  %10514 = vst [vmem:[#allocation80_spill] sm:$0xff] %v8869_v0  ;;  %10516 = vst [vmem:[#allocation82_spill] sm:$0xff] %v8873_v28 }
 0x10b   : > { %10512 = vst [vmem:[#allocation78_spill] sm:$0xff] %v8859_v43  ;;  %v6915_v41 = vpop.f32.mrb[4].mxu1  ;;  %v6804_v11 = vpop.f32.mrb[5].mxu0  ;;  %10515 = vst [vmem:[#allocation81_spill] sm:$0xff] %v8871_v59 }
 0x10c   : > { %v6805_v56 = vadd.f32 %v6804_v11, %v6803_v44  ;;  %v6916_v26 = vpop.f32.mrb[5].mxu1  ;;  %v6806_v62 = vpop.f32.mrb[6].mxu0  ;;  %v298_v44 = vld [vmem:[%s8188_s27 + $0x3f0] sm:$0xff]  ;;  %v295_v11 = vld [vmem:[%s8188_s27 + $0x3d8] sm:$0xff] }
 0x10d   : > { %v6917_v12 = vadd.f32 %v6916_v26, %v6915_v41  ;;  %v6918_v1 = vpop.f32.mrb[6].mxu1  ;;  %v6807_v63 = vpop.f32.mrb[7].mxu0 }
 0x10e   : > { %v6808_v43 = vadd.f32 %v6807_v63, %v6806_v62  ;;  %v6919_v13 = vpop.f32.mrb[7].mxu1  ;;  %v299_v63 = vld [vmem:[%s8188_s27 + $0x3f8] sm:$0xff]  ;;  %v8888_v62 = vcombine.low %v286_v27, %v290_v21 }
 0x10f   : > { %v8875_v45 = vadd.f32 %v6917_v12, %v6805_v56  ;;  %v6920_v48 = vadd.f32 %v6919_v13, %v6918_v1  ;;  %2053 = vmatmul.mubr.bf16.gmra.mrb[112].mxu0 %v8867_v14  ;;  %v8894_v14 = vcombine.high %v295_v11, %v299_v63 }
 0x110   : > { %2214 = vmatmul.mubr.bf16.gmra.mrb[112].mxu1 %v8869_v0  ;;  %2060 = vmatprep.mubr.bf16.mxu0 %v8871_v59  ;;  %10519 = vst [vmem:[#allocation85_spill] sm:$0xff] %v8888_v62  ;;  %v8890_v0 = vcombine.low %v287_v15, %v291_v10  ;;  %v426_v10 = vld [vmem:[%s8188_s27 + $0x410] sm:$0xff] }
 0x111   : > { %10517 = vst [vmem:[#allocation83_spill] sm:$0xff] %v8875_v45  ;;  %v8880_v32 = vadd.f32 %v6920_v48, %v6808_v43  ;;  %6305 = vmatprep.mubr.msk.bf16.mxu1 %vm1553_vm0, %v8873_v28  ;;  %v8892_v43 = vcombine.high %v294_v16, %v298_v44  ;;  %10522 = vst [vmem:[#allocation88_spill] sm:$0xff] %v8894_v14 }
 0x112   : > { %v6809_v41 = vpop.f32.mrb[8].mxu0  ;;  %10520 = vst [vmem:[#allocation86_spill] sm:$0xff] %v8890_v0 }
 0x113   : > { %10518 = vst [vmem:[#allocation84_spill] sm:$0xff] %v8880_v32  ;;  %v6921_v26 = vpop.f32.mrb[8].mxu1  ;;  %v6810_v56 = vpop.f32.mrb[9].mxu0  ;;  %10521 = vst [vmem:[#allocation87_spill] sm:$0xff] %v8892_v43 }
 0x114   : > { %v6811_v1 = vadd.f32 %v6810_v56, %v6809_v41  ;;  %v6922_v13 = vpop.f32.mrb[9].mxu1  ;;  %v6812_v12 = vpop.f32.mrb[10].mxu0  ;;  %v430_v41 = vld [vmem:[%s8188_s27 + $0x430] sm:$0xff]  ;;  %v427_v56 = vld [vmem:[%s8188_s27 + $0x418] sm:$0xff] }
 0x115   : > { %v6923_v48 = vadd.f32 %v6922_v13, %v6921_v26  ;;  %v6924_v28 = vpop.f32.mrb[10].mxu1  ;;  %v6813_v59 = vpop.f32.mrb[11].mxu0 }
 0x116   : > { %v6814_v32 = vadd.f32 %v6813_v59, %v6812_v12  ;;  %v6925_v45 = vpop.f32.mrb[11].mxu1  ;;  %v431_v59 = vld [vmem:[%s8188_s27 + $0x438] sm:$0xff]  ;;  %v8909_v12 = vcombine.low %v294_v16, %v298_v44 }
 0x117   : > { %v8896_v27 = vadd.f32 %v6923_v48, %v6811_v1  ;;  %v6926_v21 = vadd.f32 %v6925_v45, %v6924_v28  ;;  %2061 = vmatmul.mubr.bf16.gmra.mrb[116].mxu0 %v8888_v62  ;;  %v6229_v62 = vcombine.high %v427_v56, %v431_v59 }
 0x118   : > { %2222 = vmatmul.mubr.bf16.gmra.mrb[116].mxu1 %v8890_v0  ;;  %2068 = vmatprep.mubr.bf16.mxu0 %v8892_v43  ;;  %10525 = vst [vmem:[#allocation91_spill] sm:$0xff] %v8909_v12  ;;  %v8911_v0 = vcombine.low %v295_v11, %v299_v63  ;;  %v172_v11 = vld [vmem:[%s8188_s27] sm:$0xff] }
 0x119   : > { %10523 = vst [vmem:[#allocation89_spill] sm:$0xff] %v8896_v27  ;;  %v8901_v15 = vadd.f32 %v6926_v21, %v6814_v32  ;;  %6306 = vmatprep.mubr.msk.bf16.mxu1 %vm1553_vm0, %v8894_v14  ;;  %v6227_v32 = vcombine.high %v426_v10, %v430_v41  ;;  %v176_v63 = vld [vmem:[%s8188_s27 + $0x20] sm:$0xff] }
 0x11a   : > { %v6815_v26 = vpop.f32.mrb[12].mxu0  ;;  %10526 = vst [vmem:[#allocation92_spill] sm:$0xff] %v8911_v0 }
 0x11b   : > { %10524 = vst [vmem:[#allocation90_spill] sm:$0xff] %v8901_v15  ;;  %v6927_v13 = vpop.f32.mrb[12].mxu1  ;;  %v6816_v1 = vpop.f32.mrb[13].mxu0 }
 0x11c   : > { %v6817_v28 = vadd.f32 %v6816_v1, %v6815_v26  ;;  %v6928_v45 = vpop.f32.mrb[13].mxu1  ;;  %v6818_v48 = vpop.f32.mrb[14].mxu0  ;;  %v177_v1 = vld [vmem:[%s8188_s27 + $0x28] sm:$0xff] }
 0x11d   : > { %v6929_v21 = vadd.f32 %v6928_v45, %v6927_v13  ;;  %v6930_v14 = vpop.f32.mrb[14].mxu1  ;;  %v6819_v43 = vpop.f32.mrb[15].mxu0  ;;  %v173_v13 = vld [vmem:[%s8188_s27 + $0x8] sm:$0xff] }
 0x11e   : > { %v6820_v15 = vadd.f32 %v6819_v43, %v6818_v48  ;;  %v6931_v27 = vpop.f32.mrb[15].mxu1  ;;  %v6226_v48 = vcombine.low %v426_v10, %v430_v41 }
 0x11f   : > { %v8913_v54 = vadd.f32 %v6929_v21, %v6817_v28  ;;  %v6932_v16 = vadd.f32 %v6931_v27, %v6930_v14  ;;  %2069 = vmatmul.mubr.bf16.gmra.mrb[120].mxu0 %v8909_v12  ;;  %v6228_v27 = vcombine.low %v427_v56, %v431_v59  ;;  %v6309_v12 = vcombine.high %v172_v11, %v176_v63 }
 0x120   : > { %2230 = vmatmul.mubr.bf16.gmra.mrb[120].mxu1 %v8911_v0  ;;  %2076 = vmatprep.mubr.bf16.mxu0 %v6227_v32  ;;  %v6308_v56 = vcombine.low %v172_v11, %v176_v63  ;;  %v7897_v63 = vld [vmem:[%s10349_s1 + $0x148] sm:$0xff]  }
 0x121   : > { %10527 = vst [vmem:[#allocation93_spill] sm:$0xff] %v8913_v54  ;;  %v8917_v44 = vadd.f32 %v6932_v16, %v6820_v15  ;;  %6307 = vmatprep.mubr.msk.bf16.mxu1 %vm1553_vm0, %v6229_v62  ;;  %v6311_v15 = vcombine.high %v173_v13, %v177_v1 }
 0x122   : > { %v6821_v26 = vpop.f32.mrb[16].mxu0 }
 0x123   : > { %10528 = vst [vmem:[#allocation94_spill] sm:$0xff] %v8917_v44  ;;  %v6933_v45 = vpop.f32.mrb[16].mxu1  ;;  %v6822_v43 = vpop.f32.mrb[17].mxu0 }
 0x124   : > { %v6823_v28 = vadd.f32 %v6822_v43, %v6821_v26  ;;  %v6934_v21 = vpop.f32.mrb[17].mxu1  ;;  %v6824_v14 = vpop.f32.mrb[18].mxu0 }
 0x125   : > { %v6935_v54 = vadd.f32 %v6934_v21, %v6933_v45  ;;  %v6936_v0 = vpop.f32.mrb[18].mxu1  ;;  %v6825_v32 = vpop.f32.mrb[19].mxu0  ;;  %v6310_v21 = vcombine.low %v173_v13, %v177_v1  ;;  %v7899_v13 = vld [vmem:[%s10349_s1 + $0x108] sm:$0xff]  }
 0x126   : > { %v6826_v16 = vadd.f32 %v6825_v32, %v6824_v14  ;;  %v6937_v44 = vpop.f32.mrb[19].mxu1  ;;  %v7901_v32 = vld [vmem:[%s10349_s1 + $0x150] sm:$0xff]  }
 0x127   : > { %v8924_v62 = vadd.f32 %v6935_v54, %v6823_v28  ;;  %v6938_v52 = vadd.f32 %v6937_v44, %v6936_v0  ;;  %2077 = vmatmul.mubr.bf16.gmra.mrb[124].mxu0 %v6226_v48  ;;  %v7895_v54 = vld [vmem:[%s10349_s1 + $0x100] sm:$0xff]  }
 0x128   : > { %2238 = vmatmul.mubr.bf16.gmra.mrb[124].mxu1 %v6228_v27  ;;  %2692 = vmatprep.mubr.bf16.mxu0 %v6309_v12  ;;  %v7898_v27 = vld [vmem:[%s10349_s1 + $0x188] sm:$0xff]  }
 0x129   : > { %v8926_v42 = vadd.f32 %v6938_v52, %v6826_v16  ;;  %2853 = vmatprep.mubr.bf16.mxu1 %v6311_v15  ;;  %v7896_v52 = vld [vmem:[%s10349_s1 + $0x180] sm:$0xff]  }
 0x12a   : > { %v6827_v10 = vpop.f32.mrb[20].mxu0 }
 0x12b   : > { %v6939_v41 = vpop.f32.mrb[20].mxu1  ;;  %v6828_v26 = vpop.f32.mrb[21].mxu0 }
 0x12c   : > { %v6829_v59 = vadd.f32 %v6828_v26, %v6827_v10  ;;  %v6940_v45 = vpop.f32.mrb[21].mxu1  ;;  %v6830_v43 = vpop.f32.mrb[22].mxu0 }
 0x12d   : > { %v6941_v28 = vadd.f32 %v6940_v45, %v6939_v41  ;;  %v6942_v0 = vpop.f32.mrb[22].mxu1  ;;  %v6831_v44 = vpop.f32.mrb[23].mxu0 }
 0x12e   : > { %v6832_v12 = vadd.f32 %v6831_v44, %v6830_v43  ;;  %v6943_v48 = vpop.f32.mrb[23].mxu1  ;;  %v7900_v43 = vld [vmem:[%s10349_s1 + $0x190] sm:$0xff]   ;;  %v7905_v44 = vld [vmem:[%s10349_s1 + $0x158] sm:$0xff]  }
 0x12f   : > { %v8934_v14 = vadd.f32 %v6941_v28, %v6829_v59  ;;  %v6944_v11 = vadd.f32 %v6943_v48, %v6942_v0  ;;  %2693 = vmatmul.mubr.bf16.vlgmr.msra.gmra.mrb[128].mxu0 %v6308_v56 }
 0x130   : > { %2854 = vmatmul.mubr.bf16.vlgmr.msra.gmra.mrb[128].mxu1 %v6310_v21  ;;  %7342 = vmatpush3.bf16.msra.mxu0 %v7895_v54  ;;  %v7902_v54 = vld [vmem:[%s10349_s1 + $0x110] sm:$0xff]  }
 0x131   : > { %v8942_v1 = vadd.f32 %v6944_v11, %v6832_v12  ;;  %3144 = vmatpush1.bf16.msra.mxu1 %v7896_v52  ;;  %2700 = vmatprep.mubr.bf16.mxu0 %v8201_v36  ;;  %v7903_v12 = vld [vmem:[%s10349_s1 + $0x198] sm:$0xff]  }
 0x132   : > { %v6833_v15 = vpop.f32.mrb[24].mxu0  ;;  %2861 = vmatprep.mubr.bf16.mxu1 %v8206_v39  ;;  %3145 = vmatprep.subr.bf16.mxu1 %v10482_v61 }
 0x133   : > { %v6945_v16 = vpop.f32.mrb[24].mxu1  ;;  %v6834_v10 = vpop.f32.mrb[25].mxu0  ;;  %7343 = vmatprep.subr.bf16.mxu0 %v7897_v63 }
 0x134   : > { %v6835_v41 = vadd.f32 %v6834_v10, %v6833_v15  ;;  %v6946_v26 = vpop.f32.mrb[25].mxu1  ;;  %v6836_v56 = vpop.f32.mrb[26].mxu0  ;;  %7344 = vmatpush3.bf16.msra.mxu0 %v7899_v13 }
 0x135   : > { %v6947_v36 = vadd.f32 %v6946_v26, %v6945_v16  ;;  %v6948_v59 = vpop.f32.mrb[26].mxu1  ;;  %v6837_v45 = vpop.f32.mrb[27].mxu0  ;;  %3146 = vmatpush1.bf16.msra.mxu1 %v7898_v27  ;;  %7345 = vmatprep.subr.bf16.mxu0 %v7901_v32  ;;  %v7904_v16 = vld [vmem:[%s10349_s1 + $0x1a0] sm:$0xff]  }
 0x136   : > { %v6838_v21 = vadd.f32 %v6837_v45, %v6836_v56  ;;  %v6949_v39 = vpop.f32.mrb[27].mxu1  ;;  %3147 = vmatprep.subr.bf16.mxu1 %v10482_v61  ;;  %v7910_v26 = vld [vmem:[%s10349_s1 + $0x120] sm:$0xff]  }
 0x137   : > { %v8960_v28 = vadd.f32 %v6947_v36, %v6835_v41  ;;  %v6950_v0 = vadd.f32 %v6949_v39, %v6948_v59  ;;  %2701 = vmatmul.mubr.bf16.gmra.mrb[132].mxu0 %v8199_v35  ;;  %v7906_v35 = vld [vmem:[%s10349_s1 + $0x118] sm:$0xff]   ;;  %v7912_v59 = vld [vmem:[%s10349_s1 + $0x168] sm:$0xff]  }
 0x138   : > { %2862 = vmatmul.mubr.bf16.gmra.mrb[132].mxu1 %v8204_v38  ;;  %2708 = vmatprep.mubr.bf16.mxu0 %v8224_v46  ;;  %v7909_v46 = vld [vmem:[%s10349_s1 + $0x160] sm:$0xff]  }
 0x139   : > { %v8968_v52 = vadd.f32 %v6950_v0, %v6838_v21  ;;  %2869 = vmatprep.mubr.bf16.mxu1 %v8229_v50  ;;  %3148 = vmatpush1.bf16.msra.mxu1 %v7900_v43  ;;  %v7907_v43 = vld [vmem:[%s10349_s1 + $0x1a8] sm:$0xff]  }
 0x13a   : > { %v6839_v48 = vpop.f32.mrb[28].mxu0  ;;  %7346 = vmatpush3.bf16.msra.mxu0 %v7902_v54  ;;  %3149 = vmatprep.subr.bf16.mxu1 %v10482_v61 }
 0x13b   : > { %v6951_v38 = vpop.f32.mrb[28].mxu1  ;;  %v6840_v11 = vpop.f32.mrb[29].mxu0  ;;  %7347 = vmatprep.subr.bf16.mxu0 %v7905_v44 }
 0x13c   : > { %v6841_v50 = vadd.f32 %v6840_v11, %v6839_v48  ;;  %v6952_v63 = vpop.f32.mrb[29].mxu1  ;;  %v6842_v13 = vpop.f32.mrb[30].mxu0 }
 0x13d   : > { %v6953_v27 = vadd.f32 %v6952_v63, %v6951_v38  ;;  %v6954_v32 = vpop.f32.mrb[30].mxu1  ;;  %v6843_v15 = vpop.f32.mrb[31].mxu0  ;;  %3150 = vmatpush1.bf16.msra.mxu1 %v7903_v12 }
 0x13e   : > { %v6844_v10 = vadd.f32 %v6843_v15, %v6842_v13  ;;  %v6955_v41 = vpop.f32.mrb[31].mxu1  ;;  %3151 = vmatprep.subr.bf16.mxu1 %v10482_v61  ;;  %7348 = vmatpush3.bf16.msra.mxu0 %v7906_v35  ;;  %v7908_v35 = vld [vmem:[%s10349_s1 + $0x1b0] sm:$0xff]   ;;  %v7920_v13 = vld [vmem:[%s10349_s1 + $0x178] sm:$0xff]  }
 0x13f   : > { %v8988_v56 = vadd.f32 %v6953_v27, %v6841_v50  ;;  %v6956_v36 = vadd.f32 %v6955_v41, %v6954_v32  ;;  %2709 = vmatmul.mubr.bf16.gmra.mrb[136].mxu0 %v8240_v55  ;;  %7349 = vmatprep.subr.bf16.mxu0 %v7909_v46  ;;  %v7914_v55 = vld [vmem:[%s10349_s1 + $0x128] sm:$0xff]   ;;  %v7917_v46 = vld [vmem:[%s10349_s1 + $0x130] sm:$0xff]   ;;  %v7911_v32 = vld [vmem:[%s10349_s1 + $0x1b8] sm:$0xff]  }
 0x140   : > { %2870 = vmatmul.mubr.bf16.gmra.mrb[136].mxu1 %v8245_v57  ;;  %2716 = vmatprep.mubr.bf16.mxu0 %v8247_v58  ;;  %v7916_v58 = vld [vmem:[%s10349_s1 + $0x170] sm:$0xff]  }
 0x141   : > { %v8996_v45 = vadd.f32 %v6956_v36, %v6844_v10  ;;  %2877 = vmatprep.mubr.bf16.mxu1 %v8252_v60  ;;  %3152 = vmatpush1.bf16.msra.mxu1 %v7904_v16 }
 0x142   : > { %v6845_v21 = vpop.f32.mrb[32].mxu0  ;;  %3153 = vmatprep.subr.bf16.mxu1 %v10482_v61  ;;  %7350 = vmatpush3.bf16.msra.mxu0 %v7910_v26 }
 0x143   : > { %v6957_v57 = vpop.f32.mrb[32].mxu1  ;;  %v6846_v39 = vpop.f32.mrb[33].mxu0  ;;  %7351 = vmatprep.subr.bf16.mxu0 %v7912_v59 }
 0x144   : > { %v6847_v60 = vadd.f32 %v6846_v39, %v6845_v21  ;;  %v6958_v54 = vpop.f32.mrb[33].mxu1  ;;  %v6848_v0 = vpop.f32.mrb[34].mxu0 }
 0x145   : > { %v6959_v44 = vadd.f32 %v6958_v54, %v6957_v57  ;;  %v6960_v12 = vpop.f32.mrb[34].mxu1  ;;  %v6849_v48 = vpop.f32.mrb[35].mxu0  ;;  %3154 = vmatpush1.bf16.msra.mxu1 %v7907_v43  ;;  %v7913_v43 = vld [vmem:[%s10349_s1 + $0x1c0] sm:$0xff]  }
 0x146   : > { %v6850_v38 = vadd.f32 %v6849_v48, %v6848_v0  ;;  %v6961_v11 = vpop.f32.mrb[35].mxu1  ;;  %3155 = vmatprep.subr.bf16.mxu1 %v10482_v61  ;;  %7352 = vmatpush3.bf16.msra.mxu0 %v7914_v55 }
 0x147   : > { %v9016_v50 = vadd.f32 %v6959_v44, %v6847_v60  ;;  %v6962_v63 = vadd.f32 %v6961_v11, %v6960_v12  ;;  %2717 = vmatmul.mubr.bf16.gmra.mrb[140].mxu0 %v8273_v4  ;;  %7353 = vmatprep.subr.bf16.mxu0 %v7916_v58  ;;  %v7921_v4 = vld [vmem:[%s10349_s1 + $0x138] sm:$0xff]   ;;  %v7915_v60 = vld [vmem:[%s10349_s1 + $0x1c8] sm:$0xff]  }
 0x148   : > { %2878 = vmatmul.mubr.bf16.gmra.mrb[140].mxu1 %v8278_v6  ;;  %2724 = vmatprep.mubr.bf16.mxu0 %v8280_v7  ;;  %v7924_v7 = vld [vmem:[%s10349_s1 + $0x420] sm:$0xff]  }
 0x149   : > { %v9024_v27 = vadd.f32 %v6962_v63, %v6850_v38  ;;  %2885 = vmatprep.mubr.bf16.mxu1 %v8282_v8  ;;  %3156 = vmatpush1.bf16.msra.mxu1 %v7908_v35 }
 0x14a   : > { %v6851_v15 = vpop.f32.mrb[36].mxu0  ;;  %3157 = vmatprep.subr.bf16.mxu1 %v10482_v61  ;;  %7354 = vmatpush3.bf16.msra.mxu0 %v7917_v46 }
 0x14b   : > { %v6963_v6 = vpop.f32.mrb[36].mxu1  ;;  %v6852_v16 = vpop.f32.mrb[37].mxu0  ;;  %7355 = vmatprep.subr.bf16.mxu0 %v7920_v13 }
 0x14c   : > { %v6853_v8 = vadd.f32 %v6852_v16, %v6851_v15  ;;  %v6964_v10 = vpop.f32.mrb[37].mxu1  ;;  %v6854_v41 = vpop.f32.mrb[38].mxu0 }
 0x14d   : > { %v6965_v26 = vadd.f32 %v6964_v10, %v6963_v6  ;;  %v6966_v36 = vpop.f32.mrb[38].mxu1  ;;  %v6855_v59 = vpop.f32.mrb[39].mxu0  ;;  %3158 = vmatpush1.bf16.msra.mxu1 %v7911_v32  ;;  %v7919_v32 = vld [vmem:[%s10349_s1 + $0x1d8] sm:$0xff]  }
 0x14e   : > { %v6856_v21 = vadd.f32 %v6855_v59, %v6854_v41  ;;  %v6967_v55 = vpop.f32.mrb[39].mxu1  ;;  %3159 = vmatprep.subr.bf16.mxu1 %v10482_v61  ;;  %7356 = vmatpush3.bf16.msra.mxu0 %v7921_v4 }
 0x14f   : > { %v9041_v57 = vadd.f32 %v6965_v26, %v6853_v8  ;;  %v6968_v39 = vadd.f32 %v6967_v55, %v6966_v36  ;;  %2725 = vmatmul.mubr.bf16.gmra.mrb[144].mxu0 %v8306_v17  ;;  %7453 = vmatprep.subr.bf16.mxu0 %v7924_v7 }
 0x150   : > { %2886 = vmatmul.mubr.bf16.gmra.mrb[144].mxu1 %v8308_v18  ;;  %2732 = vmatprep.mubr.bf16.mxu0 %v8310_v19 }
 0x151   : > { %v9046_v58 = vadd.f32 %v6968_v39, %v6856_v21  ;;  %2893 = vmatprep.mubr.bf16.mxu1 %v8312_v20  ;;  %3160 = vmatpush1.bf16.msra.mxu1 %v7913_v43  ;;  %v7918_v20 = vld [vmem:[%s10349_s1 + $0x1d0] sm:$0xff]   ;;  %v7923_v43 = vld [vmem:[%s10349_s1 + $0x1e8] sm:$0xff]  }
 0x152   : > { %v6857_v54 = vpop.f32.mrb[40].mxu0  ;;  %3161 = vmatprep.subr.bf16.mxu1 %v10482_v61 }
 0x153   : > { %v6969_v0 = vpop.f32.mrb[40].mxu1  ;;  %v6858_v44 = vpop.f32.mrb[41].mxu0 }
 0x154   : > { %v6859_v17 = vadd.f32 %v6858_v44, %v6857_v54  ;;  %v6970_v12 = vpop.f32.mrb[41].mxu1  ;;  %v6860_v48 = vpop.f32.mrb[42].mxu0 }
 0x155   : > { %v6971_v18 = vadd.f32 %v6970_v12, %v6969_v0  ;;  %v6972_v35 = vpop.f32.mrb[42].mxu1  ;;  %v6861_v19 = vpop.f32.mrb[43].mxu0  ;;  %3162 = vmatpush1.bf16.msra.mxu1 %v7915_v60 }
 0x156   : > { %v6862_v38 = vadd.f32 %v6861_v19, %v6860_v48  ;;  %v6973_v11 = vpop.f32.mrb[43].mxu1  ;;  %3163 = vmatprep.subr.bf16.mxu1 %v10482_v61 }
 0x157   : > { %v9057_v46 = vadd.f32 %v6971_v18, %v6859_v17  ;;  %v6974_v63 = vadd.f32 %v6973_v11, %v6972_v35  ;;  %2733 = vmatmul.mubr.bf16.gmra.mrb[148].mxu0 %v8336_v29 }
 0x158   : > { %2894 = vmatmul.mubr.bf16.gmra.mrb[148].mxu1 %v8338_v30  ;;  %2740 = vmatprep.mubr.bf16.mxu0 %v8340_v31 }
 0x159   : > { %v9062_v13 = vadd.f32 %v6974_v63, %v6862_v38  ;;  %2901 = vmatprep.mubr.bf16.mxu1 %v8345_v33  ;;  %3164 = vmatpush1.bf16.msra.mxu1 %v7918_v20  ;;  %v7922_v33 = vld [vmem:[%s10349_s1 + $0x1e0] sm:$0xff]  }
 0x15a   : > { %v6863_v15 = vpop.f32.mrb[44].mxu0  ;;  %3165 = vmatprep.subr.bf16.mxu1 %v10482_v61 }
 0x15b   : > { %v6975_v4 = vpop.f32.mrb[44].mxu1  ;;  %v6864_v6 = vpop.f32.mrb[45].mxu0 }
 0x15c   : > { %v6865_v16 = vadd.f32 %v6864_v6, %v6863_v15  ;;  %v6976_v29 = vpop.f32.mrb[45].mxu1  ;;  %v6866_v7 = vpop.f32.mrb[46].mxu0 }
 0x15d   : > { %v6977_v30 = vadd.f32 %v6976_v29, %v6975_v4  ;;  %v6978_v8 = vpop.f32.mrb[46].mxu1  ;;  %v6867_v31 = vpop.f32.mrb[47].mxu0  ;;  %3166 = vmatpush1.bf16.msra.mxu1 %v7919_v32 }
 0x15e   : > { %v6868_v10 = vadd.f32 %v6867_v31, %v6866_v7  ;;  %v6979_v41 = vpop.f32.mrb[47].mxu1  ;;  %3167 = vmatprep.subr.bf16.mxu1 %v10482_v61 }
 0x15f   : > { %v9073_v26 = vadd.f32 %v6977_v30, %v6865_v16  ;;  %v6980_v36 = vadd.f32 %v6979_v41, %v6978_v8  ;;  %2741 = vmatmul.mubr.bf16.gmra.mrb[152].mxu0 %v8366_v47  ;;  %v7926_v47 = vld [vmem:[%s10349_s1 + $0x4a0] sm:$0xff]  }
 0x160   : > { %2902 = vmatmul.mubr.bf16.gmra.mrb[152].mxu1 %v8371_v49  ;;  %2748 = vmatprep.mubr.bf16.mxu0 %v8373_v51 }
 0x161   : > { %v9078_v59 = vadd.f32 %v6980_v36, %v6868_v10  ;;  %2909 = vmatprep.mubr.bf16.mxu1 %v8378_v53  ;;  %3168 = vmatpush1.bf16.msra.mxu1 %v7922_v33 }
 0x162   : > { %v6869_v21 = vpop.f32.mrb[48].mxu0  ;;  %3169 = vmatprep.subr.bf16.mxu1 %v10482_v61 }
 0x163   : > { %v6981_v55 = vpop.f32.mrb[48].mxu1  ;;  %v6870_v49 = vpop.f32.mrb[49].mxu0 }
 0x164   : > { %v6871_v39 = vadd.f32 %v6870_v49, %v6869_v21  ;;  %v6982_v51 = vpop.f32.mrb[49].mxu1  ;;  %v6872_v60 = vpop.f32.mrb[50].mxu0 }
 0x165   : > { %v6983_v54 = vadd.f32 %v6982_v51, %v6981_v55  ;;  %v6984_v0 = vpop.f32.mrb[50].mxu1  ;;  %v6873_v53 = vpop.f32.mrb[51].mxu0  ;;  %3170 = vmatpush1.bf16.msra.mxu1 %v7923_v43 }
 0x166   : > { %v6874_v44 = vadd.f32 %v6873_v53, %v6872_v60  ;;  %v6985_v17 = vpop.f32.mrb[51].mxu1  ;;  %7565 = vmatprep.subr.bf16.mxu1 %v7926_v47 }
 0x167   : > { %v9088_v12 = vadd.f32 %v6983_v54, %v6871_v39  ;;  %v6986_v48 = vadd.f32 %v6985_v17, %v6984_v0  ;;  %2749 = vmatmul.mubr.bf16.gmra.mrb[156].mxu0 %v8402_v2  ;;  %v10530_v17 = vld [vmem:[#allocation5_spill] sm:$0xff] }
 0x168   : > { %2910 = vmatmul.mubr.bf16.gmra.mrb[156].mxu1 %v8404_v3  ;;  %2756 = vmatprep.mubr.bf16.mxu0 %v8406_v5 }
 0x169   : > { %v9093_v18 = vadd.f32 %v6986_v48, %v6874_v44  ;;  %2917 = vmatprep.mubr.bf16.mxu1 %v8408_v9  ;;  %v10532_v48 = vld [vmem:[#allocation7_spill] sm:$0xff] }
 0x16a   : > { %v6875_v35 = vpop.f32.mrb[52].mxu0 }
 0x16b   : > { %v6987_v19 = vpop.f32.mrb[52].mxu1  ;;  %v6876_v20 = vpop.f32.mrb[53].mxu0 }
 0x16c   : > { %v6877_v38 = vadd.f32 %v6876_v20, %v6875_v35  ;;  %v6988_v11 = vpop.f32.mrb[53].mxu1  ;;  %v6878_v63 = vpop.f32.mrb[54].mxu0 }
 0x16d   : > { %v6989_v32 = vadd.f32 %v6988_v11, %v6987_v19  ;;  %v6990_v15 = vpop.f32.mrb[54].mxu1  ;;  %v6879_v4 = vpop.f32.mrb[55].mxu0  ;;  %v10533_v19 = vld [vmem:[#allocation8_spill] sm:$0xff] }
 0x16e   : > { %v6880_v6 = vadd.f32 %v6879_v4, %v6878_v63  ;;  %v6991_v16 = vpop.f32.mrb[55].mxu1 }
 0x16f   : > { %v9096_v2 = vadd.f32 %v6989_v32, %v6877_v38  ;;  %v6992_v3 = vadd.f32 %v6991_v16, %v6990_v15  ;;  %2757 = vmatmul.mubr.bf16.gmra.mrb[160].mxu0 %v8432_v22 }
 0x170   : > { %2918 = vmatmul.mubr.bf16.gmra.mrb[160].mxu1 %v8434_v23  ;;  %2764 = vmatprep.mubr.bf16.mxu0 %v8436_v24 }
 0x171   : > { %v9101_v5 = vadd.f32 %v6992_v3, %v6880_v6  ;;  %2925 = vmatprep.mubr.bf16.mxu1 %v8438_v25  ;;  %v10529_v25 = vld [vmem:[#allocation4_spill] sm:$0xff]  ;;  %v10534_v3 = vld [vmem:[#allocation77_spill] sm:$0xff] }
 0x172   : > { %v6881_v9 = vpop.f32.mrb[56].mxu0 }
 0x173   : > { %v6993_v29 = vpop.f32.mrb[56].mxu1  ;;  %v6882_v7 = vpop.f32.mrb[57].mxu0 }
 0x174   : > { %v6883_v30 = vadd.f32 %v6882_v7, %v6881_v9  ;;  %v6994_v8 = vpop.f32.mrb[57].mxu1  ;;  %v6884_v31 = vpop.f32.mrb[58].mxu0  ;;  %v10535_v7 = vld [vmem:[#allocation9_spill] sm:$0xff] }
 0x175   : > { %v6995_v33 = vadd.f32 %v6994_v8, %v6993_v29  ;;  %v6996_v10 = vpop.f32.mrb[58].mxu1  ;;  %v6885_v41 = vpop.f32.mrb[59].mxu0  ;;  %v10536_v8 = vld [vmem:[#allocation78_spill] sm:$0xff] }
 0x176   : > { %v6886_v36 = vadd.f32 %v6885_v41, %v6884_v31  ;;  %v6997_v43 = vpop.f32.mrb[59].mxu1  ;;  %v10539_v41 = vld [vmem:[#allocation12_spill] sm:$0xff] }
 0x177   : > { %v9104_v22 = vadd.f32 %v6995_v33, %v6883_v30  ;;  %v6998_v23 = vadd.f32 %v6997_v43, %v6996_v10  ;;  %2765 = vmatmul.mubr.bf16.gmra.mrb[164].mxu0 %v8448_v34  ;;  %v10537_v33 = vld [vmem:[#allocation10_spill] sm:$0xff]  ;;  %v10538_v10 = vld [vmem:[#allocation11_spill] sm:$0xff] }
 0x178   : > { %2926 = vmatmul.mubr.bf16.gmra.mrb[164].mxu1 %v8450_v37  ;;  %2772 = vmatprep.mubr.bf16.mxu0 %v8452_v40  ;;  %v10531_v40 = vld [vmem:[#allocation6_spill] sm:$0xff] }
 0x179   : > { %v9109_v24 = vadd.f32 %v6998_v23, %v6886_v36  ;;  %2933 = vmatprep.mubr.bf16.mxu1 %v10529_v25 }
 0x17a   : > { %v6887_v21 = vpop.f32.mrb[60].mxu0 }
 0x17b   : > { %v6999_v47 = vpop.f32.mrb[60].mxu1  ;;  %v6888_v55 = vpop.f32.mrb[61].mxu0 }
 0x17c   : > { %v6889_v49 = vadd.f32 %v6888_v55, %v6887_v21  ;;  %v7000_v39 = vpop.f32.mrb[61].mxu1  ;;  %v6890_v51 = vpop.f32.mrb[62].mxu0 }
 0x17d   : > { %v7001_v60 = vadd.f32 %v7000_v39, %v6999_v47  ;;  %v7002_v54 = vpop.f32.mrb[62].mxu1  ;;  %v6891_v0 = vpop.f32.mrb[63].mxu0 }
 0x17e   : > { %v6892_v53 = vadd.f32 %v6891_v0, %v6890_v51  ;;  %v7003_v44 = vpop.f32.mrb[63].mxu1 }
 0x17f   : > { %v9112_v34 = vadd.f32 %v7001_v60, %v6889_v49  ;;  %v7004_v37 = vadd.f32 %v7003_v44, %v7002_v54  ;;  %2773 = vmatmul.mubr.bf16.gmra.mrb[168].mxu0 %v10530_v17  ;;  %v10540_v60 = vld [vmem:[#allocation83_spill] sm:$0xff] }
 0x180   : > { %2934 = vmatmul.mubr.bf16.gmra.mrb[168].mxu1 %v10531_v40  ;;  %2780 = vmatprep.mubr.bf16.mxu0 %v10532_v48  ;;  %v10543_v40 = vld [vmem:[#allocation14_spill] sm:$0xff]  ;;  %v10544_v48 = vld [vmem:[#allocation15_spill] sm:$0xff] }
 0x181   : > { %v9117_v35 = vadd.f32 %v7004_v37, %v6892_v53  ;;  %2941 = vmatprep.mubr.bf16.mxu1 %v10533_v19  ;;  %v10541_v53 = vld [vmem:[#allocation13_spill] sm:$0xff]  ;;  %v10542_v37 = vld [vmem:[#allocation84_spill] sm:$0xff] }
 0x182   : > { %v7021_v20 = vpop.f32.mrb[64].mxu0  ;;  %v10545_v19 = vld [vmem:[#allocation16_spill] sm:$0xff] }
 0x183   : > { %v7022_v38 = vpop.f32.mrb[65].mxu0  ;;  %v2119_v11 = vpop.f32.mrb[64].mxu1 }
 0x184   : > { %v7023_v63 = vadd.f32 %v7022_v38, %v7021_v20  ;;  %v7024_v32 = vpop.f32.mrb[66].mxu0  ;;  %v2121_v15 = vpop.f32.mrb[65].mxu1 }
 0x185   : > { %v7025_v4 = vpop.f32.mrb[67].mxu0  ;;  %v2122_v6 = vpop.f32.mrb[66].mxu1 }
 0x186   : > { %v7026_v16 = vadd.f32 %v7025_v4, %v7024_v32  ;;  %v1959_v9 = vadd.f32 %v7023_v63, %v10534_v3  ;;  %v2124_v29 = vpop.f32.mrb[67].mxu1 }
 0x187   : > { %2781 = vmatmul.mubr.bf16.gmra.mrb[172].mxu0 %v10535_v7 }
 0x188   : > { %v9122_v30 = vadd.f32 %v2119_v11, %v1959_v9  ;;  %v1962_v31 = vadd.f32 %v7026_v16, %v10536_v8  ;;  %2942 = vmatmul.mubr.bf16.gmra.mrb[172].mxu1 %v10537_v33  ;;  %2788 = vmatprep.mubr.bf16.mxu0 %v10538_v10  ;;  %v10546_v9 = vld [vmem:[#allocation89_spill] sm:$0xff]  ;;  %v10548_v33 = vld [vmem:[#allocation90_spill] sm:$0xff] }
 0x189   : > { %2949 = vmatprep.mubr.bf16.mxu1 %v10539_v41  ;;  %v10547_v8 = vld [vmem:[#allocation17_spill] sm:$0xff]  ;;  %v10549_v41 = vld [vmem:[#allocation18_spill] sm:$0xff] }
 0x18a   : > { %v9128_v36 = vadd.f32 %v2122_v6, %v1962_v31  ;;  %v7027_v43 = vpop.f32.mrb[68].mxu0 }
 0x18b   : > { %v7028_v23 = vpop.f32.mrb[69].mxu0  ;;  %v2127_v25 = vpop.f32.mrb[68].mxu1 }
 0x18c   : > { %v7029_v21 = vadd.f32 %v7028_v23, %v7027_v43  ;;  %v7030_v47 = vpop.f32.mrb[70].mxu0  ;;  %v2129_v55 = vpop.f32.mrb[69].mxu1  ;;  %v10550_v43 = vld [vmem:[#allocation19_spill] sm:$0xff]  ;;  %v10551_v23 = vld [vmem:[#allocation20_spill] sm:$0xff] }
 0x18d   : > { %v7031_v49 = vpop.f32.mrb[71].mxu0  ;;  %v2130_v39 = vpop.f32.mrb[70].mxu1 }
 0x18e   : > { %v7032_v51 = vadd.f32 %v7031_v49, %v7030_v47  ;;  %v1967_v54 = vadd.f32 %v7029_v21, %v10540_v60  ;;  %v2132_v0 = vpop.f32.mrb[71].mxu1 }
 0x18f   : > { %2789 = vmatmul.mubr.bf16.gmra.mrb[176].mxu0 %v10541_v53  ;;  %v10552_v53 = vld [vmem:[#allocation93_spill] sm:$0xff] }
 0x190   : > { %v9132_v44 = vadd.f32 %v2127_v25, %v1967_v54  ;;  %v1970_v17 = vadd.f32 %v7032_v51, %v10542_v37  ;;  %2950 = vmatmul.mubr.bf16.gmra.mrb[176].mxu1 %v10543_v40  ;;  %2796 = vmatprep.mubr.bf16.mxu0 %v10544_v48  ;;  %v10553_v40 = vld [vmem:[#allocation21_spill] sm:$0xff] }
 0x191   : > { %2957 = vmatprep.mubr.bf16.mxu1 %v10545_v19  ;;  %v10554_v19 = vld [vmem:[#allocation94_spill] sm:$0xff] }
 0x192   : > { %v9138_v20 = vadd.f32 %v2130_v39, %v1970_v17  ;;  %v7033_v38 = vpop.f32.mrb[72].mxu0 }
 0x193   : > { %v7034_v11 = vpop.f32.mrb[73].mxu0  ;;  %v2135_v63 = vpop.f32.mrb[72].mxu1 }
 0x194   : > { %v7035_v32 = vadd.f32 %v7034_v11, %v7033_v38  ;;  %v7036_v15 = vpop.f32.mrb[74].mxu0  ;;  %v2137_v4 = vpop.f32.mrb[73].mxu1  ;;  %v10555_v11 = vld [vmem:[#allocation22_spill] sm:$0xff] }
 0x195   : > { %v7037_v6 = vpop.f32.mrb[75].mxu0  ;;  %v2138_v16 = vpop.f32.mrb[74].mxu1  ;;  %v178_v4 = vld [vmem:[%s8188_s27 + $0x30] sm:$0xff] }
 0x196   : > { %v7038_v3 = vadd.f32 %v7037_v6, %v7036_v15  ;;  %v1975_v29 = vadd.f32 %v7035_v32, %v10546_v9  ;;  %v2140_v7 = vpop.f32.mrb[75].mxu1  ;;  %v10557_v32 = vld [vmem:[#allocation24_spill] sm:$0xff]  ;;  %v174_v15 = vld [vmem:[%s8188_s27 + $0x10] sm:$0xff]  ;;  %v179_v9 = vld [vmem:[%s8188_s27 + $0x38] sm:$0xff] }
 0x197   : > { %2797 = vmatmul.mubr.bf16.gmra.mrb[180].mxu0 %v10547_v8 }
 0x198   : > { %v9142_v31 = vadd.f32 %v2135_v63, %v1975_v29  ;;  %v1978_v10 = vadd.f32 %v7038_v3, %v10548_v33  ;;  %2958 = vmatmul.mubr.bf16.gmra.mrb[180].mxu1 %v10549_v41  ;;  %2804 = vmatprep.mubr.bf16.mxu0 %v10550_v43  ;;  %v10556_v63 = vld [vmem:[#allocation23_spill] sm:$0xff]  ;;  %v6313_v41 = vcombine.high %v174_v15, %v178_v4 }
 0x199   : > { %2965 = vmatprep.mubr.bf16.mxu1 %v10551_v23  ;;  %v175_v3 = vld [vmem:[%s8188_s27 + $0x18] sm:$0xff] }
 0x19a   : > { %v9148_v25 = vadd.f32 %v2138_v16, %v1978_v10  ;;  %v7039_v21 = vpop.f32.mrb[76].mxu0 }
 0x19b   : > { %v7040_v47 = vpop.f32.mrb[77].mxu0  ;;  %v2143_v55 = vpop.f32.mrb[76].mxu1 }
 0x19c   : > { %v7041_v49 = vadd.f32 %v7040_v47, %v7039_v21  ;;  %v7042_v39 = vpop.f32.mrb[78].mxu0  ;;  %v2145_v51 = vpop.f32.mrb[77].mxu1  ;;  %v6315_v21 = vcombine.high %v175_v3, %v179_v9 }
 0x19d   : > { %v7043_v60 = vpop.f32.mrb[79].mxu0  ;;  %v2146_v54 = vpop.f32.mrb[78].mxu1 }
 0x19e   : > { %v7044_v0 = vadd.f32 %v7043_v60, %v7042_v39  ;;  %v1983_v37 = vadd.f32 %v7041_v49, %v10552_v53  ;;  %v2148_v17 = vpop.f32.mrb[79].mxu1  ;;  %v10558_v39 = vld [vmem:[#allocation25_spill] sm:$0xff] }
 0x19f   : > { %2805 = vmatmul.mubr.bf16.gmra.mrb[184].mxu0 %v10553_v40  ;;  %v6312_v40 = vcombine.low %v174_v15, %v178_v4  ;;  %v7928_v15 = vld [vmem:[%s10349_s1 + $0x428] sm:$0xff]  }
 0x1a0   : > { %v9152_v48 = vadd.f32 %v2143_v55, %v1983_v37  ;;  %v1986_v38 = vadd.f32 %v7044_v0, %v10554_v19  ;;  %2966 = vmatmul.mubr.bf16.gmra.mrb[184].mxu1 %v10555_v11  ;;  %2812 = vmatprep.mubr.bf16.mxu0 %v10556_v63  ;;  %v6314_v11 = vcombine.low %v175_v3, %v179_v9  ;;  %v7925_v63 = vld [vmem:[%s10349_s1 + $0x3e0] sm:$0xff]   ;;  %v7930_v4 = vld [vmem:[%s10349_s1 + $0x4a8] sm:$0xff]  }
 0x1a1   : > { %2973 = vmatprep.mubr.bf16.mxu1 %v10557_v32 }
 0x1a2   : > { %v9160_v6 = vadd.f32 %v2146_v54, %v1986_v38  ;;  %v7045_v16 = vpop.f32.mrb[80].mxu0  ;;  %v10559_v54 = vld [vmem:[#allocation26_spill] sm:$0xff] }
 0x1a3   : > { %v7046_v29 = vpop.f32.mrb[81].mxu0  ;;  %v2151_v7 = vpop.f32.mrb[80].mxu1 }
 0x1a4   : > { %v7047_v8 = vadd.f32 %v7046_v29, %v7045_v16  ;;  %v7048_v33 = vpop.f32.mrb[82].mxu0  ;;  %v2153_v10 = vpop.f32.mrb[81].mxu1  ;;  %v7927_v16 = vld [vmem:[%s10349_s1 + $0x460] sm:$0xff]  }
 0x1a5   : > { %v7049_v43 = vpop.f32.mrb[83].mxu0  ;;  %v2154_v23 = vpop.f32.mrb[82].mxu1  ;;  %v7931_v10 = vld [vmem:[%s10349_s1 + $0x468] sm:$0xff]  }
 0x1a6   : > { %v7050_v47 = vadd.f32 %v7049_v43, %v7048_v33  ;;  %v1991_v55 = vadd.f32 %v7047_v8, %v8924_v62  ;;  %v2156_v49 = vpop.f32.mrb[83].mxu1  ;;  %v10560_v33 = vld [vmem:[#allocation27_spill] sm:$0xff] }
 0x1a7   : > { %2813 = vmatmul.mubr.bf16.gmra.mrb[188].mxu0 %v10558_v39 }
 0x1a8   : > { %v9166_v51 = vadd.f32 %v2151_v7, %v1991_v55  ;;  %v1994_v60 = vadd.f32 %v7050_v47, %v8926_v42  ;;  %2974 = vmatmul.mubr.bf16.gmra.mrb[188].mxu1 %v10559_v54  ;;  %3014 = vmatprep.mubr.bf16.mxu0 %v6313_v41  ;;  %v7932_v41 = vld [vmem:[%s10349_s1 + $0x430] sm:$0xff]  }
 0x1a9   : > { %6378 = vmatprep.mubr.msk.bf16.mxu1 %vm1553_vm0, %v6315_v21  ;;  %v7934_v21 = vld [vmem:[%s10349_s1 + $0x4b0] sm:$0xff]  }
 0x1aa   : > { %v9171_v0 = vadd.f32 %v2154_v23, %v1994_v60  ;;  %v7051_v53 = vpop.f32.mrb[84].mxu0  ;;  %v10561_v23 = vld [vmem:[#allocation28_spill] sm:$0xff] }
 0x1ab   : > { %v7052_v37 = vpop.f32.mrb[85].mxu0  ;;  %v2159_v17 = vpop.f32.mrb[84].mxu1 }
 0x1ac   : > { %v7053_v19 = vadd.f32 %v7052_v37, %v7051_v53  ;;  %v7054_v62 = vpop.f32.mrb[86].mxu0  ;;  %v2161_v38 = vpop.f32.mrb[85].mxu1  ;;  %v7933_v37 = vld [vmem:[%s10349_s1 + $0x3f0] sm:$0xff]  }
 0x1ad   : > { %v7055_v42 = vpop.f32.mrb[87].mxu0  ;;  %v2162_v32 = vpop.f32.mrb[86].mxu1  ;;  %v7936_v38 = vld [vmem:[%s10349_s1 + $0x438] sm:$0xff]  }
 0x1ae   : > { %v7056_v29 = vadd.f32 %v7055_v42, %v7054_v62  ;;  %v1999_v7 = vadd.f32 %v7053_v19, %v8934_v14  ;;  %v2164_v8 = vpop.f32.mrb[87].mxu1  ;;  %v7929_v14 = vld [vmem:[%s10349_s1 + $0x3e8] sm:$0xff]   ;;  %v7935_v62 = vld [vmem:[%s10349_s1 + $0x470] sm:$0xff]  }
 0x1af   : > { %3015 = vmatmul.mubr.bf16.vlgmr.msra.gmra.mrb[192].mxu0 %v6312_v40 }
 0x1b0   : > { %v9186_v3 = vadd.f32 %v2159_v17, %v1999_v7  ;;  %v2002_v9 = vadd.f32 %v7056_v29, %v8942_v1  ;;  %3176 = vmatmul.mubr.bf16.vlgmr.msra.gmra.mrb[192].mxu1 %v6314_v11  ;;  %7454 = vmatpush3.bf16.msra.mxu0 %v7925_v63  ;;  %v10562_v11 = vld [vmem:[#allocation29_spill] sm:$0xff]  ;;  %v7938_v63 = vld [vmem:[%s10349_s1 + $0x4b8] sm:$0xff]   ;;  %v10565_v29 = vld [vmem:[#allocation32_spill] sm:$0xff] }
 0x1b1   : > { %7566 = vmatpush3.bf16.msra.mxu1 %v7927_v16  ;;  %3022 = vmatprep.mubr.bf16.mxu0 %v10560_v33  ;;  %v10564_v16 = vld [vmem:[#allocation31_spill] sm:$0xff]  ;;  %v7942_v33 = vld [vmem:[%s10349_s1 + $0x4c0] sm:$0xff]  }
 0x1b2   : > { %v9199_v43 = vadd.f32 %v2162_v32, %v2002_v9  ;;  %v7057_v1 = vpop.f32.mrb[88].mxu0  ;;  %6379 = vmatprep.mubr.msk.bf16.mxu1 %vm1553_vm0, %v10561_v23  ;;  %7455 = vmatprep.subr.bf16.mxu0 %v7928_v15  ;;  %v10563_v32 = vld [vmem:[#allocation30_spill] sm:$0xff]  ;;  %v7937_v7 = vld [vmem:[%s10349_s1 + $0x3f8] sm:$0xff]  }
 0x1b3   : > { %v7058_v47 = vpop.f32.mrb[89].mxu0  ;;  %v2167_v55 = vpop.f32.mrb[88].mxu1  ;;  %7567 = vmatprep.subr.bf16.mxu1 %v7930_v4  ;;  %v7940_v4 = vld [vmem:[%s10349_s1 + $0x440] sm:$0xff]  }
 0x1b4   : > { %v7059_v49 = vadd.f32 %v7058_v47, %v7057_v1  ;;  %v7060_v39 = vpop.f32.mrb[90].mxu0  ;;  %v2169_v60 = vpop.f32.mrb[89].mxu1  ;;  %7456 = vmatpush3.bf16.msra.mxu0 %v7929_v14  ;;  %v7941_v47 = vld [vmem:[%s10349_s1 + $0x400] sm:$0xff]  }
 0x1b5   : > { %v7061_v54 = vpop.f32.mrb[91].mxu0  ;;  %v2170_v53 = vpop.f32.mrb[90].mxu1  ;;  %7568 = vmatpush3.bf16.msra.mxu1 %v7931_v10  ;;  %7457 = vmatprep.subr.bf16.mxu0 %v7932_v41  ;;  %v7943_v60 = vld [vmem:[%s10349_s1 + $0x480] sm:$0xff]  }
 0x1b6   : > { %v7062_v17 = vadd.f32 %v7061_v54, %v7060_v39  ;;  %v2007_v40 = vadd.f32 %v7059_v49, %v8960_v28  ;;  %v2172_v19 = vpop.f32.mrb[91].mxu1  ;;  %7569 = vmatprep.subr.bf16.mxu1 %v7934_v21  ;;  %v7944_v54 = vld [vmem:[%s10349_s1 + $0x448] sm:$0xff]  }
 0x1b7   : > { %3023 = vmatmul.mubr.bf16.gmra.mrb[196].mxu0 %v10562_v11  ;;  %v10568_v19 = vld [vmem:[#allocation35_spill] sm:$0xff] }
 0x1b8   : > { %v9220_v42 = vadd.f32 %v2167_v55, %v2007_v40  ;;  %v2010_v28 = vadd.f32 %v7062_v17, %v8968_v52  ;;  %3184 = vmatmul.mubr.bf16.gmra.mrb[196].mxu1 %v10563_v32  ;;  %3030 = vmatprep.mubr.bf16.mxu0 %v10564_v16  ;;  %v7939_v52 = vld [vmem:[%s10349_s1 + $0x478] sm:$0xff]   ;;  %v10567_v40 = vld [vmem:[#allocation34_spill] sm:$0xff] }
 0x1b9   : > { %6380 = vmatprep.mubr.msk.bf16.mxu1 %vm1553_vm0, %v10565_v29  ;;  %7458 = vmatpush3.bf16.msra.mxu0 %v7933_v37  ;;  %v7946_v37 = vld [vmem:[%s10349_s1 + $0x4c8] sm:$0xff]   ;;  %v7950_v29 = vld [vmem:[%s10349_s1 + $0x4d0] sm:$0xff]  }
 0x1ba   : > { %v9230_v8 = vadd.f32 %v2170_v53, %v2010_v28  ;;  %v7063_v15 = vpop.f32.mrb[92].mxu0  ;;  %7570 = vmatpush3.bf16.msra.mxu1 %v7935_v62  ;;  %7459 = vmatprep.subr.bf16.mxu0 %v7936_v38  ;;  %v10566_v53 = vld [vmem:[#allocation33_spill] sm:$0xff]  ;;  %v10569_v62 = vld [vmem:[#allocation36_spill] sm:$0xff]  ;;  %v7948_v28 = vld [vmem:[%s10349_s1 + $0x450] sm:$0xff]  }
 0x1bb   : > { %v7064_v9 = vpop.f32.mrb[93].mxu0  ;;  %v2175_v14 = vpop.f32.mrb[92].mxu1  ;;  %7571 = vmatprep.subr.bf16.mxu1 %v7938_v63  ;;  %v7945_v38 = vld [vmem:[%s10349_s1 + $0x408] sm:$0xff]  }
 0x1bc   : > { %v7065_v10 = vadd.f32 %v7064_v9, %v7063_v15  ;;  %v7066_v41 = vpop.f32.mrb[94].mxu0  ;;  %v2177_v1 = vpop.f32.mrb[93].mxu1 }
 0x1bd   : > { %v7067_v23 = vpop.f32.mrb[95].mxu0  ;;  %v2178_v21 = vpop.f32.mrb[94].mxu1  ;;  %7460 = vmatpush3.bf16.msra.mxu0 %v7937_v7  ;;  %v7951_v1 = vld [vmem:[%s10349_s1 + $0x490] sm:$0xff]  }
 0x1be   : > { %v7068_v55 = vadd.f32 %v7067_v23, %v7066_v41  ;;  %v2015_v49 = vadd.f32 %v7065_v10, %v8988_v56  ;;  %v2180_v39 = vpop.f32.mrb[95].mxu1  ;;  %7572 = vmatpush3.bf16.msra.mxu1 %v7939_v52  ;;  %7461 = vmatprep.subr.bf16.mxu0 %v7940_v4  ;;  %v7952_v23 = vld [vmem:[%s10349_s1 + $0x458] sm:$0xff]  }
 0x1bf   : > { %3031 = vmatmul.mubr.bf16.gmra.mrb[200].mxu0 %v10566_v53  ;;  %7573 = vmatprep.subr.bf16.mxu1 %v7942_v33  ;;  %v10572_v39 = vld [vmem:[#allocation39_spill] sm:$0xff] }
 0x1c0   : > { %v9255_v17 = vadd.f32 %v2175_v14, %v2015_v49  ;;  %v2018_v56 = vadd.f32 %v7068_v55, %v8996_v45  ;;  %3192 = vmatmul.mubr.bf16.gmra.mrb[200].mxu1 %v10567_v40  ;;  %3038 = vmatprep.mubr.bf16.mxu0 %v10568_v19  ;;  %v7947_v45 = vld [vmem:[%s10349_s1 + $0x488] sm:$0xff]   ;;  %v7949_v14 = vld [vmem:[%s10349_s1 + $0x410] sm:$0xff]  }
 0x1c1   : > { %6381 = vmatprep.mubr.msk.bf16.mxu1 %vm1553_vm0, %v10569_v62  ;;  %7462 = vmatpush3.bf16.msra.mxu0 %v7941_v47  ;;  %v7954_v47 = vld [vmem:[%s10349_s1 + $0x4d8] sm:$0xff]   ;;  %v10571_v49 = vld [vmem:[#allocation38_spill] sm:$0xff] }
 0x1c2   : > { %v9265_v11 = vadd.f32 %v2178_v21, %v2018_v56  ;;  %v7069_v63 = vpop.f32.mrb[96].mxu0  ;;  %7574 = vmatpush3.bf16.msra.mxu1 %v7943_v60  ;;  %7463 = vmatprep.subr.bf16.mxu0 %v7944_v54  ;;  %v10570_v21 = vld [vmem:[#allocation37_spill] sm:$0xff]  ;;  %v10573_v60 = vld [vmem:[#allocation40_spill] sm:$0xff]  ;;  %v7953_v54 = vld [vmem:[%s10349_s1 + $0x418] sm:$0xff]  }
 0x1c3   : > { %v7070_v32 = vpop.f32.mrb[97].mxu0  ;;  %v2183_v16 = vpop.f32.mrb[96].mxu1  ;;  %7575 = vmatprep.subr.bf16.mxu1 %v7946_v37  ;;  %v7956_v56 = vld [vmem:[%s10349_s1 + $0x520] sm:$0xff]  }
 0x1c4   : > { %v7071_v7 = vadd.f32 %v7070_v32, %v7069_v63  ;;  %v7072_v15 = vpop.f32.mrb[98].mxu0  ;;  %v2185_v52 = vpop.f32.mrb[97].mxu1 }
 0x1c5   : > { %v7073_v4 = vpop.f32.mrb[99].mxu0  ;;  %v2186_v9 = vpop.f32.mrb[98].mxu1  ;;  %7464 = vmatpush3.bf16.msra.mxu0 %v7945_v38 }
 0x1c6   : > { %v7074_v33 = vadd.f32 %v7073_v4, %v7072_v15  ;;  %v2023_v10 = vadd.f32 %v7071_v7, %v9016_v50  ;;  %v2188_v41 = vpop.f32.mrb[99].mxu1  ;;  %7576 = vmatpush3.bf16.msra.mxu1 %v7947_v45  ;;  %7465 = vmatprep.subr.bf16.mxu0 %v7948_v28  ;;  %v10574_v7 = vld [vmem:[#allocation41_spill] sm:$0xff]  ;;  %v10575_v4 = vld [vmem:[#allocation42_spill] sm:$0xff] }
 0x1c7   : > { %3039 = vmatmul.mubr.bf16.gmra.mrb[204].mxu0 %v10570_v21  ;;  %7577 = vmatprep.subr.bf16.mxu1 %v7950_v29 }
 0x1c8   : > { %v9290_v55 = vadd.f32 %v2183_v16, %v2023_v10  ;;  %v2026_v50 = vadd.f32 %v7074_v33, %v9024_v27  ;;  %3200 = vmatmul.mubr.bf16.gmra.mrb[204].mxu1 %v10571_v49  ;;  %3046 = vmatprep.mubr.bf16.mxu0 %v10572_v39  ;;  %v7955_v27 = vld [vmem:[%s10349_s1 + $0x498] sm:$0xff]  }
 0x1c9   : > { %6382 = vmatprep.mubr.msk.bf16.mxu1 %vm1553_vm0, %v10573_v60  ;;  %7466 = vmatpush3.bf16.msra.mxu0 %v7949_v14  ;;  %v10577_v14 = vld [vmem:[#allocation44_spill] sm:$0xff]  ;;  %v10578_v60 = vld [vmem:[#allocation45_spill] sm:$0xff] }
 0x1ca   : > { %v9300_v53 = vadd.f32 %v2186_v9, %v2026_v50  ;;  %v7075_v37 = vpop.f32.mrb[100].mxu0  ;;  %7578 = vmatpush3.bf16.msra.mxu1 %v7951_v1  ;;  %7467 = vmatprep.subr.bf16.mxu0 %v7952_v23  ;;  %v10576_v9 = vld [vmem:[#allocation43_spill] sm:$0xff] }
 0x1cb   : > { %v7076_v40 = vpop.f32.mrb[101].mxu0  ;;  %v2191_v19 = vpop.f32.mrb[100].mxu1  ;;  %7579 = vmatprep.subr.bf16.mxu1 %v7954_v47 }
 0x1cc   : > { %v7077_v62 = vadd.f32 %v7076_v40, %v7075_v37  ;;  %v7078_v38 = vpop.f32.mrb[102].mxu0  ;;  %v2193_v63 = vpop.f32.mrb[101].mxu1  ;;  %v10581_v40 = vld [vmem:[#allocation48_spill] sm:$0xff] }
 0x1cd   : > { %v7079_v45 = vpop.f32.mrb[103].mxu0  ;;  %v2194_v28 = vpop.f32.mrb[102].mxu1  ;;  %7468 = vmatpush3.bf16.msra.mxu0 %v7953_v54 }
 0x1ce   : > { %v7080_v32 = vadd.f32 %v7079_v45, %v7078_v38  ;;  %v2031_v16 = vadd.f32 %v7077_v62, %v9041_v57  ;;  %v2196_v29 = vpop.f32.mrb[103].mxu1  ;;  %7580 = vmatpush3.bf16.msra.mxu1 %v7955_v27  ;;  %7677 = vmatprep.subr.bf16.mxu0 %v7956_v56  ;;  %v10579_v27 = vld [vmem:[#allocation46_spill] sm:$0xff]  ;;  %v10580_v56 = vld [vmem:[#allocation47_spill] sm:$0xff] }
 0x1cf   : > { %3047 = vmatmul.mubr.bf16.gmra.mrb[208].mxu0 %v10574_v7  ;;  %5084 = vmatprep.subr.bf16.mxu1 %v10482_v61 }
 0x1d0   : > { %v9311_v15 = vadd.f32 %v2191_v19, %v2031_v16  ;;  %v2034_v52 = vadd.f32 %v7080_v32, %v9046_v58  ;;  %3208 = vmatmul.mubr.bf16.gmra.mrb[208].mxu1 %v10575_v4  ;;  %3054 = vmatprep.mubr.bf16.mxu0 %v10576_v9 }
 0x1d1   : > { %6383 = vmatprep.mubr.msk.bf16.mxu1 %vm1553_vm0, %v10577_v14  ;;  %v10583_v14 = vld [vmem:[#allocation50_spill] sm:$0xff] }
 0x1d2   : > { %v9318_v33 = vadd.f32 %v2194_v28, %v2034_v52  ;;  %v7081_v57 = vpop.f32.mrb[104].mxu0  ;;  %v10582_v52 = vld [vmem:[#allocation49_spill] sm:$0xff] }
 0x1d3   : > { %v7082_v10 = vpop.f32.mrb[105].mxu0  ;;  %v2199_v41 = vpop.f32.mrb[104].mxu1 }
 0x1d4   : > { %v7083_v1 = vadd.f32 %v7082_v10, %v7081_v57  ;;  %v7084_v23 = vpop.f32.mrb[106].mxu0  ;;  %v2201_v21 = vpop.f32.mrb[105].mxu1  ;;  %v10584_v57 = vld [vmem:[#allocation51_spill] sm:$0xff]  ;;  %v10585_v10 = vld [vmem:[#allocation52_spill] sm:$0xff] }
 0x1d5   : > { %v7085_v47 = vpop.f32.mrb[107].mxu0  ;;  %v2202_v50 = vpop.f32.mrb[106].mxu1 }
 0x1d6   : > { %v7086_v49 = vadd.f32 %v7085_v47, %v7084_v23  ;;  %v2039_v58 = vadd.f32 %v7083_v1, %v9057_v46  ;;  %v2204_v39 = vpop.f32.mrb[107].mxu1 }
 0x1d7   : > { %3055 = vmatmul.mubr.bf16.gmra.mrb[212].mxu0 %v10578_v60 }
 0x1d8   : > { %v9322_v54 = vadd.f32 %v2199_v41, %v2039_v58  ;;  %v2042_v37 = vadd.f32 %v7086_v49, %v9062_v13  ;;  %3216 = vmatmul.mubr.bf16.gmra.mrb[212].mxu1 %v10579_v27  ;;  %3062 = vmatprep.mubr.bf16.mxu0 %v10580_v56 }
 0x1d9   : > { %6384 = vmatprep.mubr.msk.bf16.mxu1 %vm1553_vm0, %v10581_v40  ;;  %v10587_v40 = vld [vmem:[#allocation54_spill] sm:$0xff] }
 0x1da   : > { %v9329_v19 = vadd.f32 %v2202_v50, %v2042_v37  ;;  %v7087_v62 = vpop.f32.mrb[108].mxu0  ;;  %v10586_v37 = vld [vmem:[#allocation53_spill] sm:$0xff] }
 0x1db   : > { %v7088_v38 = vpop.f32.mrb[109].mxu0  ;;  %v2207_v63 = vpop.f32.mrb[108].mxu1 }
 0x1dc   : > { %v7089_v46 = vadd.f32 %v7088_v38, %v7087_v62  ;;  %v7090_v45 = vpop.f32.mrb[110].mxu0  ;;  %v2209_v28 = vpop.f32.mrb[109].mxu1  ;;  %v10588_v62 = vld [vmem:[#allocation55_spill] sm:$0xff]  ;;  %v10589_v38 = vld [vmem:[#allocation56_spill] sm:$0xff] }
 0x1dd   : > { %v7091_v32 = vpop.f32.mrb[111].mxu0  ;;  %v2210_v16 = vpop.f32.mrb[110].mxu1 }
 0x1de   : > { %v7092_v29 = vadd.f32 %v7091_v32, %v7090_v45  ;;  %v2047_v13 = vadd.f32 %v7089_v46, %v9073_v26  ;;  %v2212_v7 = vpop.f32.mrb[111].mxu1 }
 0x1df   : > { %3063 = vmatmul.mubr.bf16.gmra.mrb[216].mxu0 %v10582_v52 }
 0x1e0   : > { %v9333_v4 = vadd.f32 %v2207_v63, %v2047_v13  ;;  %v2050_v9 = vadd.f32 %v7092_v29, %v9078_v59  ;;  %3224 = vmatmul.mubr.bf16.gmra.mrb[216].mxu1 %v10583_v14  ;;  %3070 = vmatprep.mubr.bf16.mxu0 %v10584_v57 }
 0x1e1   : > { %6385 = vmatprep.mubr.msk.bf16.mxu1 %vm1553_vm0, %v10585_v10  ;;  %v10591_v10 = vld [vmem:[#allocation58_spill] sm:$0xff] }
 0x1e2   : > { %v9340_v41 = vadd.f32 %v2210_v16, %v2050_v9  ;;  %v7093_v1 = vpop.f32.mrb[112].mxu0  ;;  %v10590_v9 = vld [vmem:[#allocation57_spill] sm:$0xff] }
 0x1e3   : > { %v7094_v23 = vpop.f32.mrb[113].mxu0  ;;  %v2215_v21 = vpop.f32.mrb[112].mxu1 }
 0x1e4   : > { %v7095_v26 = vadd.f32 %v7094_v23, %v7093_v1  ;;  %v7096_v47 = vpop.f32.mrb[114].mxu0  ;;  %v2217_v50 = vpop.f32.mrb[113].mxu1  ;;  %v10592_v1 = vld [vmem:[#allocation59_spill] sm:$0xff]  ;;  %v10593_v23 = vld [vmem:[#allocation60_spill] sm:$0xff] }
 0x1e5   : > { %v7097_v49 = vpop.f32.mrb[115].mxu0  ;;  %v2218_v58 = vpop.f32.mrb[114].mxu1 }
 0x1e6   : > { %v7098_v39 = vadd.f32 %v7097_v49, %v7096_v47  ;;  %v2055_v59 = vadd.f32 %v7095_v26, %v9088_v12  ;;  %v2220_v60 = vpop.f32.mrb[115].mxu1 }
 0x1e7   : > { %3071 = vmatmul.mubr.bf16.gmra.mrb[220].mxu0 %v10586_v37 }
 0x1e8   : > { %v9344_v27 = vadd.f32 %v2215_v21, %v2055_v59  ;;  %v2058_v56 = vadd.f32 %v7098_v39, %v9093_v18  ;;  %3232 = vmatmul.mubr.bf16.gmra.mrb[220].mxu1 %v10587_v40  ;;  %3078 = vmatprep.mubr.bf16.mxu0 %v10588_v62 }
 0x1e9   : > { %6386 = vmatprep.mubr.msk.bf16.mxu1 %vm1553_vm0, %v10589_v38  ;;  %v10595_v38 = vld [vmem:[#allocation62_spill] sm:$0xff] }
 0x1ea   : > { %v9351_v63 = vadd.f32 %v2218_v58, %v2058_v56  ;;  %v7099_v46 = vpop.f32.mrb[116].mxu0  ;;  %v10594_v56 = vld [vmem:[#allocation61_spill] sm:$0xff] }
 0x1eb   : > { %v7100_v45 = vpop.f32.mrb[117].mxu0  ;;  %v2223_v28 = vpop.f32.mrb[116].mxu1 }
 0x1ec   : > { %v7101_v12 = vadd.f32 %v7100_v45, %v7099_v46  ;;  %v7102_v32 = vpop.f32.mrb[118].mxu0  ;;  %v2225_v16 = vpop.f32.mrb[117].mxu1  ;;  %v10596_v46 = vld [vmem:[#allocation63_spill] sm:$0xff]  ;;  %v10597_v45 = vld [vmem:[#allocation64_spill] sm:$0xff] }
 0x1ed   : > { %v7103_v29 = vpop.f32.mrb[119].mxu0  ;;  %v2226_v13 = vpop.f32.mrb[118].mxu1 }
 0x1ee   : > { %v7104_v7 = vadd.f32 %v7103_v29, %v7102_v32  ;;  %v2063_v18 = vadd.f32 %v7101_v12, %v9096_v2  ;;  %v2228_v52 = vpop.f32.mrb[119].mxu1 }
 0x1ef   : > { %3079 = vmatmul.mubr.bf16.gmra.mrb[224].mxu0 %v10590_v9 }
 0x1f0   : > { %v9355_v14 = vadd.f32 %v2223_v28, %v2063_v18  ;;  %v2066_v57 = vadd.f32 %v7104_v7, %v9101_v5  ;;  %3240 = vmatmul.mubr.bf16.gmra.mrb[224].mxu1 %v10591_v10  ;;  %3086 = vmatprep.mubr.bf16.mxu0 %v10592_v1 }
 0x1f1   : > { %6387 = vmatprep.mubr.msk.bf16.mxu1 %vm1553_vm0, %v10593_v23  ;;  %v10599_v23 = vld [vmem:[#allocation66_spill] sm:$0xff] }
 0x1f2   : > { %v9362_v21 = vadd.f32 %v2226_v13, %v2066_v57  ;;  %v7105_v26 = vpop.f32.mrb[120].mxu0  ;;  %v10598_v57 = vld [vmem:[#allocation65_spill] sm:$0xff] }
 0x1f3   : > { %v7106_v47 = vpop.f32.mrb[121].mxu0  ;;  %v2231_v50 = vpop.f32.mrb[120].mxu1 }
 0x1f4   : > { %v7107_v2 = vadd.f32 %v7106_v47, %v7105_v26  ;;  %v7108_v49 = vpop.f32.mrb[122].mxu0  ;;  %v2233_v58 = vpop.f32.mrb[121].mxu1  ;;  %v10600_v26 = vld [vmem:[#allocation67_spill] sm:$0xff]  ;;  %v10601_v47 = vld [vmem:[#allocation68_spill] sm:$0xff] }
 0x1f5   : > { %v7109_v39 = vpop.f32.mrb[123].mxu0  ;;  %v2234_v59 = vpop.f32.mrb[122].mxu1 }
 0x1f6   : > { %v7110_v60 = vadd.f32 %v7109_v39, %v7108_v49  ;;  %v2071_v5 = vadd.f32 %v7107_v2, %v9104_v22  ;;  %v2236_v37 = vpop.f32.mrb[123].mxu1 }
 0x1f7   : > { %3087 = vmatmul.mubr.bf16.gmra.mrb[228].mxu0 %v10594_v56 }
 0x1f8   : > { %v9366_v40 = vadd.f32 %v2231_v50, %v2071_v5  ;;  %v2074_v62 = vadd.f32 %v7110_v60, %v9109_v24  ;;  %3248 = vmatmul.mubr.bf16.gmra.mrb[228].mxu1 %v10595_v38  ;;  %3094 = vmatprep.mubr.bf16.mxu0 %v10596_v46  ;;  %v10602_v46 = vld [vmem:[#allocation69_spill] sm:$0xff] }
 0x1f9   : > { %6388 = vmatprep.mubr.msk.bf16.mxu1 %vm1553_vm0, %v10597_v45 }
 0x1fa   : > { %v9373_v28 = vadd.f32 %v2234_v59, %v2074_v62  ;;  %v7111_v12 = vpop.f32.mrb[124].mxu0 }
 0x1fb   : > { %v7112_v32 = vpop.f32.mrb[125].mxu0  ;;  %v2239_v16 = vpop.f32.mrb[124].mxu1 }
 0x1fc   : > { %v7113_v22 = vadd.f32 %v7112_v32, %v7111_v12  ;;  %v7114_v29 = vpop.f32.mrb[126].mxu0  ;;  %v2241_v13 = vpop.f32.mrb[125].mxu1  ;;  %v10603_v32 = vld [vmem:[#allocation70_spill] sm:$0xff] }
 0x1fd   : > { %v7115_v7 = vpop.f32.mrb[127].mxu0  ;;  %v2242_v18 = vpop.f32.mrb[126].mxu1 }
 0x1fe   : > { %v7116_v52 = vadd.f32 %v7115_v7, %v7114_v29  ;;  %v2079_v24 = vadd.f32 %v7113_v22, %v9112_v34  ;;  %v2244_v9 = vpop.f32.mrb[127].mxu1  ;;  %v10605_v22 = vld [vmem:[#allocation72_spill] sm:$0xff] }
 0x1ff   : > { %3095 = vmatmul.mubr.bf16.gmra.mrb[232].mxu0 %v10598_v57 }
 0x200   : > { %v9377_v10 = vadd.f32 %v2239_v16, %v2079_v24  ;;  %v2082_v1 = vadd.f32 %v7116_v52, %v9117_v35  ;;  %3256 = vmatmul.mubr.bf16.gmra.mrb[232].mxu1 %v10599_v23  ;;  %3102 = vmatprep.mubr.bf16.mxu0 %v10600_v26  ;;  %v10604_v16 = vld [vmem:[#allocation71_spill] sm:$0xff] }
 0x201   : > { %6389 = vmatprep.mubr.msk.bf16.mxu1 %vm1553_vm0, %v10601_v47 }
 0x202   : > { %v9384_v50 = vadd.f32 %v2242_v18, %v2082_v1  ;;  %v7133_v2 = vpop.f32.mrb[128].mxu0 }
 0x203   : > { %v7134_v49 = vpop.f32.mrb[129].mxu0  ;;  %v7245_v58 = vpop.f32.mrb[128].mxu1 }
 0x204   : > { %v7135_v34 = vadd.f32 %v7134_v49, %v7133_v2  ;;  %v7136_v39 = vpop.f32.mrb[130].mxu0  ;;  %v7246_v59 = vpop.f32.mrb[129].mxu1  ;;  %v10606_v2 = vld [vmem:[#allocation73_spill] sm:$0xff] }
 0x205   : > { %v7137_v60 = vpop.f32.mrb[131].mxu0  ;;  %v7247_v5 = vadd.f32 %v7246_v59, %v7245_v58  ;;  %v7248_v37 = vpop.f32.mrb[130].mxu1  ;;  %v10609_v59 = vld [vmem:[#allocation76_spill] sm:$0xff] }
 0x206   : > { %v2695_v35 = vadd.f32 %v7135_v34, %v9122_v30  ;;  %v7138_v56 = vadd.f32 %v7137_v60, %v7136_v39  ;;  %v7249_v62 = vpop.f32.mrb[131].mxu1  ;;  %v10607_v34 = vld [vmem:[#allocation74_spill] sm:$0xff]  ;;  %v10608_v39 = vld [vmem:[#allocation75_spill] sm:$0xff] }
 0x207   : > { %v7250_v38 = vadd.f32 %v7249_v62, %v7248_v37  ;;  %3103 = vmatmul.mubr.bf16.gmra.mrb[236].mxu0 %v10602_v46 }
 0x208   : > { %v2698_v45 = vadd.f32 %v7138_v56, %v9128_v36  ;;  %v9389_v12 = vadd.f32 %v7247_v5, %v2695_v35  ;;  %3264 = vmatmul.mubr.bf16.gmra.mrb[236].mxu1 %v10603_v32  ;;  %3110 = vmatprep.mubr.bf16.mxu0 %v10604_v16 }
 0x209   : > { %6390 = vmatprep.mubr.msk.bf16.mxu1 %vm1553_vm0, %v10605_v22 }
 0x20a   : > { %v9395_v29 = vadd.f32 %v7250_v38, %v2698_v45  ;;  %v7139_v13 = vpop.f32.mrb[132].mxu0 }
 0x20b   : > { %v7140_v30 = vpop.f32.mrb[133].mxu0  ;;  %v7251_v7 = vpop.f32.mrb[132].mxu1 }
 0x20c   : > { %v7141_v18 = vadd.f32 %v7140_v30, %v7139_v13  ;;  %v7142_v52 = vpop.f32.mrb[134].mxu0  ;;  %v7252_v24 = vpop.f32.mrb[133].mxu1  ;;  %v10610_v13 = vld [vmem:[#allocation79_spill] sm:$0xff] }
 0x20d   : > { %v7143_v9 = vpop.f32.mrb[135].mxu0  ;;  %v7253_v57 = vadd.f32 %v7252_v24, %v7251_v7  ;;  %v7254_v36 = vpop.f32.mrb[134].mxu1  ;;  %v10613_v24 = vld [vmem:[#allocation82_spill] sm:$0xff] }
 0x20e   : > { %v2703_v1 = vadd.f32 %v7141_v18, %v9132_v44  ;;  %v7144_v23 = vadd.f32 %v7143_v9, %v7142_v52  ;;  %v7255_v26 = vpop.f32.mrb[135].mxu1  ;;  %v10611_v18 = vld [vmem:[#allocation80_spill] sm:$0xff]  ;;  %v10612_v52 = vld [vmem:[#allocation81_spill] sm:$0xff] }
 0x20f   : > { %v7256_v47 = vadd.f32 %v7255_v26, %v7254_v36  ;;  %3111 = vmatmul.mubr.bf16.gmra.mrb[240].mxu0 %v10606_v2 }
 0x210   : > { %v2706_v49 = vadd.f32 %v7144_v23, %v9138_v20  ;;  %v9400_v58 = vadd.f32 %v7253_v57, %v2703_v1  ;;  %3272 = vmatmul.mubr.bf16.gmra.mrb[240].mxu1 %v10607_v34  ;;  %3118 = vmatprep.mubr.bf16.mxu0 %v10608_v39 }
 0x211   : > { %6391 = vmatprep.mubr.msk.bf16.mxu1 %vm1553_vm0, %v10609_v59 }
 0x212   : > { %v9406_v60 = vadd.f32 %v7256_v47, %v2706_v49  ;;  %v7145_v5 = vpop.f32.mrb[136].mxu0 }
 0x213   : > { %v7146_v44 = vpop.f32.mrb[137].mxu0  ;;  %v7257_v37 = vpop.f32.mrb[136].mxu1 }
 0x214   : > { %v7147_v35 = vadd.f32 %v7146_v44, %v7145_v5  ;;  %v7148_v56 = vpop.f32.mrb[138].mxu0  ;;  %v7258_v62 = vpop.f32.mrb[137].mxu1  ;;  %v10614_v5 = vld [vmem:[#allocation85_spill] sm:$0xff] }
 0x215   : > { %v7149_v38 = vpop.f32.mrb[139].mxu0  ;;  %v7259_v46 = vadd.f32 %v7258_v62, %v7257_v37  ;;  %v7260_v20 = vpop.f32.mrb[138].mxu1  ;;  %v10617_v62 = vld [vmem:[#allocation88_spill] sm:$0xff] }
 0x216   : > { %v2711_v45 = vadd.f32 %v7147_v35, %v9142_v31  ;;  %v7150_v32 = vadd.f32 %v7149_v38, %v7148_v56  ;;  %v7261_v16 = vpop.f32.mrb[139].mxu1  ;;  %v10615_v35 = vld [vmem:[#allocation86_spill] sm:$0xff]  ;;  %v10616_v56 = vld [vmem:[#allocation87_spill] sm:$0xff]  ;;  %v3304_v38 = vld [vmem:[%s8188_s27 + $0x80] sm:$0xff] }
 0x217   : > { %v7262_v22 = vadd.f32 %v7261_v16, %v7260_v20  ;;  %3119 = vmatmul.mubr.bf16.gmra.mrb[244].mxu0 %v10610_v13 }
 0x218   : > { %v2714_v30 = vadd.f32 %v7150_v32, %v9148_v25  ;;  %v9411_v7 = vadd.f32 %v7259_v46, %v2711_v45  ;;  %3280 = vmatmul.mubr.bf16.gmra.mrb[244].mxu1 %v10611_v18  ;;  %3126 = vmatprep.mubr.bf16.mxu0 %v10612_v52  ;;  %v3308_v46 = vld [vmem:[%s8188_s27 + $0xa0] sm:$0xff]  ;;  %v3305_v45 = vld [vmem:[%s8188_s27 + $0x88] sm:$0xff] }
 0x219   : > { %6392 = vmatprep.mubr.msk.bf16.mxu1 %vm1553_vm0, %v10613_v24  ;;  %v3309_v32 = vld [vmem:[%s8188_s27 + $0xa8] sm:$0xff]  ;;  %v6519_v18 = vcombine.high %v3304_v38, %v3308_v46 }
 0x21a   : > { %v9417_v9 = vadd.f32 %v7262_v22, %v2714_v30  ;;  %v7151_v57 = vpop.f32.mrb[140].mxu0 }
 0x21b   : > { %v7152_v31 = vpop.f32.mrb[141].mxu0  ;;  %v7263_v36 = vpop.f32.mrb[140].mxu1 }
 0x21c   : > { %v7153_v1 = vadd.f32 %v7152_v31, %v7151_v57  ;;  %v7154_v23 = vpop.f32.mrb[142].mxu0  ;;  %v7264_v26 = vpop.f32.mrb[141].mxu1  ;;  %v6521_v31 = vcombine.high %v3305_v45, %v3309_v32 }
 0x21d   : > { %v7155_v25 = vpop.f32.mrb[143].mxu0  ;;  %v7265_v47 = vadd.f32 %v7264_v26, %v7263_v36  ;;  %v7266_v2 = vpop.f32.mrb[142].mxu1 }
 0x21e   : > { %v2719_v49 = vadd.f32 %v7153_v1, %v9152_v48  ;;  %v7156_v34 = vadd.f32 %v7155_v25, %v7154_v23  ;;  %v7267_v39 = vpop.f32.mrb[143].mxu1  ;;  %v10618_v25 = vld [vmem:[#allocation91_spill] sm:$0xff] }
 0x21f   : > { %v7268_v59 = vadd.f32 %v7267_v39, %v7266_v2  ;;  %3127 = vmatmul.mubr.bf16.gmra.mrb[248].mxu0 %v10614_v5 }
 0x220   : > { %v2722_v44 = vadd.f32 %v7156_v34, %v9160_v6  ;;  %v9422_v37 = vadd.f32 %v7265_v47, %v2719_v49  ;;  %3288 = vmatmul.mubr.bf16.gmra.mrb[248].mxu1 %v10615_v35  ;;  %3134 = vmatprep.mubr.bf16.mxu0 %v10616_v56  ;;  %v10619_v49 = vld [vmem:[#allocation92_spill] sm:$0xff]  ;;  %v6518_v35 = vcombine.low %v3304_v38, %v3308_v46  ;;  %v9449_v56 = vld [vmem:[%s8188_s27 + $0xc8] sm:$0xff] }
 0x221   : > { %6393 = vmatprep.mubr.msk.bf16.mxu1 %vm1553_vm0, %v10617_v62  ;;  %v3317_v62 = vld [vmem:[%s8188_s27 + $0xe8] sm:$0xff] }
 0x222   : > { %v9430_v20 = vadd.f32 %v7268_v59, %v2722_v44  ;;  %v7157_v48 = vpop.f32.mrb[144].mxu0  ;;  %v9443_v59 = vld [vmem:[%s8188_s27 + $0xc0] sm:$0xff] }
 0x223   : > { %v7158_v16 = vpop.f32.mrb[145].mxu0  ;;  %v7269_v22 = vpop.f32.mrb[144].mxu1 }
 0x224   : > { %v7159_v13 = vadd.f32 %v7158_v16, %v7157_v48  ;;  %v7160_v6 = vpop.f32.mrb[146].mxu0  ;;  %v7270_v30 = vpop.f32.mrb[145].mxu1 }
 0x225   : > { %v7161_v52 = vpop.f32.mrb[147].mxu0  ;;  %v7271_v24 = vadd.f32 %v7270_v30, %v7269_v22  ;;  %v7272_v57 = vpop.f32.mrb[146].mxu1  ;;  %v6520_v22 = vcombine.low %v3305_v45, %v3309_v32  ;;  %v6529_v32 = vcombine.high %v9449_v56, %v3317_v62 }
 0x226   : > { %v2727_v36 = vadd.f32 %v7159_v13, %v9166_v51  ;;  %v7162_v1 = vadd.f32 %v7161_v52, %v7160_v6  ;;  %v7273_v23 = vpop.f32.mrb[147].mxu1  ;;  %v9446_v51 = vld [vmem:[%s8188_s27 + $0xe0] sm:$0xff] }
 0x227   : > { %v7274_v26 = vadd.f32 %v7273_v23, %v7272_v57  ;;  %3135 = vmatmul.mubr.bf16.gmra.mrb[252].mxu0 %v10618_v25  ;;  %v7957_v13 = vld [vmem:[%s10349_s1 + $0x4e0] sm:$0xff]   ;;  %v6527_v38 = vcombine.high %v9443_v59, %v9446_v51  ;;  %v7960_v25 = vld [vmem:[%s10349_s1 + $0x568] sm:$0xff]  }
 0x228   : > { %v2730_v47 = vadd.f32 %v7162_v1, %v9171_v0  ;;  %v9437_v2 = vadd.f32 %v7271_v24, %v2727_v36  ;;  %3296 = vmatmul.mubr.bf16.gmra.mrb[252].mxu1 %v10619_v49  ;;  %4633 = vmatprep.mubr.bf16.mxu0 %v6519_v18  ;;  %v7958_v52 = vld [vmem:[%s10349_s1 + $0x560] sm:$0xff]  }
 0x229   : > { %4794 = vmatprep.mubr.bf16.mxu1 %v6521_v31  ;;  %v7959_v31 = vld [vmem:[%s10349_s1 + $0x528] sm:$0xff]   ;;  %v9469_v23 = vld [vmem:[%s8188_s27 + $0x100] sm:$0xff] }
 0x22a   : > { %v9440_v34 = vadd.f32 %v7274_v26, %v2730_v47  ;;  %v7163_v39 = vpop.f32.mrb[148].mxu0  ;;  %v9475_v26 = vld [vmem:[%s8188_s27 + $0x120] sm:$0xff] }
 0x22b   : > { %v7164_v5 = vpop.f32.mrb[149].mxu0  ;;  %v7275_v44 = vpop.f32.mrb[148].mxu1 }
 0x22c   : > { %v7165_v0 = vadd.f32 %v7164_v5, %v7163_v39  ;;  %v7166_v48 = vpop.f32.mrb[150].mxu0  ;;  %v7276_v16 = vpop.f32.mrb[149].mxu1  ;;  %v9486_v39 = vld [vmem:[%s8188_s27 + $0x108] sm:$0xff] }
 0x22d   : > { %v7167_v6 = vpop.f32.mrb[151].mxu0  ;;  %v7277_v30 = vadd.f32 %v7276_v16, %v7275_v44  ;;  %v7278_v18 = vpop.f32.mrb[150].mxu1  ;;  %v9489_v5 = vld [vmem:[%s8188_s27 + $0x128] sm:$0xff] }
 0x22e   : > { %v2735_v46 = vadd.f32 %v7165_v0, %v9186_v3  ;;  %v7168_v24 = vadd.f32 %v7167_v6, %v7166_v48  ;;  %v7279_v45 = vpop.f32.mrb[151].mxu1  ;;  %v7961_v3 = vld [vmem:[%s10349_s1 + $0x4e8] sm:$0xff]   ;;  %v6526_v0 = vcombine.low %v9443_v59, %v9446_v51  ;;  %v6535_v6 = vcombine.high %v9469_v23, %v9475_v26  ;;  %v7962_v59 = vld [vmem:[%s10349_s1 + $0x570] sm:$0xff]  }
 0x22f   : > { %v7280_v57 = vadd.f32 %v7279_v45, %v7278_v18  ;;  %4634 = vmatmul.mubr.bf16.vlgmr.msra.gmra.mrb[0].mxu0 %v6518_v35  ;;  %v7967_v45 = vld [vmem:[%s10349_s1 + $0x538] sm:$0xff]  }
 0x230   : > { %v2738_v36 = vadd.f32 %v7168_v24, %v9199_v43  ;;  %v9466_v1 = vadd.f32 %v7277_v30, %v2735_v46  ;;  %4795 = vmatmul.mubr.bf16.vlgmr.msra.gmra.mrb[0].mxu1 %v6520_v22  ;;  %7678 = vmatpush3.bf16.msra.mxu0 %v7957_v13  ;;  %v7963_v43 = vld [vmem:[%s10349_s1 + $0x530] sm:$0xff]   ;;  %v6528_v13 = vcombine.low %v9449_v56, %v3317_v62 }
 0x231   : > { %5085 = vmatpush1.bf16.msra.mxu1 %v7958_v52  ;;  %4641 = vmatprep.mubr.bf16.mxu0 %v6527_v38  ;;  %v6537_v38 = vcombine.high %v9486_v39, %v9489_v5  ;;  %v7964_v46 = vld [vmem:[%s10349_s1 + $0x4f0] sm:$0xff]  }
 0x232   : > { %v9483_v47 = vadd.f32 %v7280_v57, %v2738_v36  ;;  %v7169_v49 = vpop.f32.mrb[152].mxu0  ;;  %4802 = vmatprep.mubr.bf16.mxu1 %v6529_v32  ;;  %5086 = vmatprep.subr.bf16.mxu1 %v10482_v61  ;;  %v7965_v36 = vld [vmem:[%s10349_s1 + $0x578] sm:$0xff]  }
 0x233   : > { %v7170_v44 = vpop.f32.mrb[153].mxu0  ;;  %v7281_v35 = vpop.f32.mrb[152].mxu1  ;;  %7679 = vmatprep.subr.bf16.mxu0 %v7959_v31  ;;  %v9517_v31 = vld [vmem:[%s8188_s27 + $0x160] sm:$0xff] }
 0x234   : > { %v7171_v48 = vadd.f32 %v7170_v44, %v7169_v49  ;;  %v7172_v16 = vpop.f32.mrb[154].mxu0  ;;  %v7282_v22 = vpop.f32.mrb[153].mxu1  ;;  %7680 = vmatpush3.bf16.msra.mxu0 %v7961_v3  ;;  %v7968_v49 = vld [vmem:[%s10349_s1 + $0x4f8] sm:$0xff]  }
 0x235   : > { %v7173_v30 = vpop.f32.mrb[155].mxu0  ;;  %v7283_v18 = vadd.f32 %v7282_v22, %v7281_v35  ;;  %v7284_v52 = vpop.f32.mrb[154].mxu1  ;;  %5087 = vmatpush1.bf16.msra.mxu1 %v7960_v25  ;;  %7681 = vmatprep.subr.bf16.mxu0 %v7963_v43  ;;  %v9525_v43 = vld [vmem:[%s8188_s27 + $0x148] sm:$0xff] }
 0x236   : > { %v2743_v51 = vadd.f32 %v7171_v48, %v9220_v42  ;;  %v7174_v56 = vadd.f32 %v7173_v30, %v7172_v16  ;;  %v7285_v62 = vpop.f32.mrb[155].mxu1  ;;  %5088 = vmatprep.subr.bf16.mxu1 %v10482_v61  ;;  %v9514_v42 = vld [vmem:[%s8188_s27 + $0x140] sm:$0xff] }
 0x237   : > { %v7286_v24 = vadd.f32 %v7285_v62, %v7284_v52  ;;  %4642 = vmatmul.mubr.bf16.gmra.mrb[4].mxu0 %v6526_v0  ;;  %v6534_v0 = vcombine.low %v9469_v23, %v9475_v26  ;;  %v7971_v48 = vld [vmem:[%s10349_s1 + $0x540] sm:$0xff]   ;;  %v6543_v30 = vcombine.high %v9514_v42, %v9517_v31  ;;  %v7974_v62 = vld [vmem:[%s10349_s1 + $0x548] sm:$0xff]  }
 0x238   : > { %v2746_v32 = vadd.f32 %v7174_v56, %v9230_v8  ;;  %v9511_v57 = vadd.f32 %v7283_v18, %v2743_v51  ;;  %4803 = vmatmul.mubr.bf16.gmra.mrb[4].mxu1 %v6528_v13  ;;  %4649 = vmatprep.mubr.bf16.mxu0 %v6535_v6  ;;  %v9528_v8 = vld [vmem:[%s8188_s27 + $0x168] sm:$0xff]  ;;  %v6536_v6 = vcombine.low %v9486_v39, %v9489_v5  ;;  %v7966_v26 = vld [vmem:[%s10349_s1 + $0x580] sm:$0xff]  }
 0x239   : > { %4810 = vmatprep.mubr.bf16.mxu1 %v6537_v38  ;;  %5089 = vmatpush1.bf16.msra.mxu1 %v7962_v59  ;;  %v6545_v23 = vcombine.high %v9525_v43, %v9528_v8  ;;  %v7972_v5 = vld [vmem:[%s10349_s1 + $0x500] sm:$0xff]  }
 0x23a   : > { %v9522_v3 = vadd.f32 %v7286_v24, %v2746_v32  ;;  %v7175_v25 = vpop.f32.mrb[156].mxu0  ;;  %7682 = vmatpush3.bf16.msra.mxu0 %v7964_v46  ;;  %5090 = vmatprep.subr.bf16.mxu1 %v10482_v61  ;;  %v9560_v24 = vld [vmem:[%s8188_s27 + $0x180] sm:$0xff]  ;;  %v7969_v32 = vld [vmem:[%s10349_s1 + $0x588] sm:$0xff]  }
 0x23b   : > { %v7176_v44 = vpop.f32.mrb[157].mxu0  ;;  %v7287_v35 = vpop.f32.mrb[156].mxu1  ;;  %7683 = vmatprep.subr.bf16.mxu0 %v7967_v45  ;;  %v9563_v45 = vld [vmem:[%s8188_s27 + $0x1a0] sm:$0xff] }
 0x23c   : > { %v7177_v16 = vadd.f32 %v7176_v44, %v7175_v25  ;;  %v7178_v22 = vpop.f32.mrb[158].mxu0  ;;  %v7288_v13 = vpop.f32.mrb[157].mxu1  ;;  %v7976_v44 = vld [vmem:[%s10349_s1 + $0x508] sm:$0xff]  }
 0x23d   : > { %v7179_v18 = vpop.f32.mrb[159].mxu0  ;;  %v7289_v52 = vadd.f32 %v7288_v13, %v7287_v35  ;;  %v7290_v38 = vpop.f32.mrb[158].mxu1  ;;  %5091 = vmatpush1.bf16.msra.mxu1 %v7965_v36 }
 0x23e   : > { %v2751_v59 = vadd.f32 %v7177_v16, %v9255_v17  ;;  %v7180_v51 = vadd.f32 %v7179_v18, %v7178_v22  ;;  %v7291_v39 = vpop.f32.mrb[159].mxu1  ;;  %5092 = vmatprep.subr.bf16.mxu1 %v10482_v61  ;;  %7684 = vmatpush3.bf16.msra.mxu0 %v7968_v49  ;;  %v9571_v49 = vld [vmem:[%s8188_s27 + $0x188] sm:$0xff]  ;;  %v7978_v16 = vld [vmem:[%s10349_s1 + $0x550] sm:$0xff]   ;;  %v6551_v18 = vcombine.high %v9560_v24, %v9563_v45 }
 0x23f   : > { %v7292_v56 = vadd.f32 %v7291_v39, %v7290_v38  ;;  %4650 = vmatmul.mubr.bf16.gmra.mrb[8].mxu0 %v6534_v0  ;;  %7685 = vmatprep.subr.bf16.mxu0 %v7971_v48  ;;  %v6542_v48 = vcombine.low %v9514_v42, %v9517_v31  ;;  %v7970_v31 = vld [vmem:[%s10349_s1 + $0x590] sm:$0xff]   ;;  %v7982_v39 = vld [vmem:[%s10349_s1 + $0x558] sm:$0xff]  }
 0x240   : > { %v2754_v17 = vadd.f32 %v7180_v51, %v9265_v11  ;;  %v9557_v46 = vadd.f32 %v7289_v52, %v2751_v59  ;;  %4811 = vmatmul.mubr.bf16.gmra.mrb[8].mxu1 %v6536_v6  ;;  %4657 = vmatprep.mubr.bf16.mxu0 %v6543_v30  ;;  %v9574_v11 = vld [vmem:[%s8188_s27 + $0x1a8] sm:$0xff]  ;;  %v6544_v30 = vcombine.low %v9525_v43, %v9528_v8  ;;  %v7979_v8 = vld [vmem:[%s10349_s1 + $0x510] sm:$0xff]  }
 0x241   : > { %4818 = vmatprep.mubr.bf16.mxu1 %v6545_v23  ;;  %5093 = vmatpush1.bf16.msra.mxu1 %v7966_v26  ;;  %v6553_v42 = vcombine.high %v9571_v49, %v9574_v11 }
 0x242   : > { %v9568_v36 = vadd.f32 %v7292_v56, %v2754_v17  ;;  %v7181_v25 = vpop.f32.mrb[160].mxu0  ;;  %5094 = vmatprep.subr.bf16.mxu1 %v10482_v61  ;;  %7686 = vmatpush3.bf16.msra.mxu0 %v7972_v5  ;;  %v9606_v56 = vld [vmem:[%s8188_s27 + $0x1c0] sm:$0xff]  ;;  %v7973_v17 = vld [vmem:[%s10349_s1 + $0x598] sm:$0xff]  }
 0x243   : > { %v7182_v35 = vpop.f32.mrb[161].mxu0  ;;  %v7293_v0 = vpop.f32.mrb[160].mxu1  ;;  %7687 = vmatprep.subr.bf16.mxu0 %v7974_v62  ;;  %v9609_v62 = vld [vmem:[%s8188_s27 + $0x1e0] sm:$0xff] }
 0x244   : > { %v7183_v22 = vadd.f32 %v7182_v35, %v7181_v25  ;;  %v7184_v13 = vpop.f32.mrb[162].mxu0  ;;  %v7294_v6 = vpop.f32.mrb[161].mxu1  ;;  %v7983_v35 = vld [vmem:[%s10349_s1 + $0x518] sm:$0xff]  }
 0x245   : > { %v7185_v52 = vpop.f32.mrb[163].mxu0  ;;  %v7295_v38 = vadd.f32 %v7294_v6, %v7293_v0  ;;  %v7296_v23 = vpop.f32.mrb[162].mxu1  ;;  %5095 = vmatpush1.bf16.msra.mxu1 %v7969_v32 }
 0x246   : > { %v2759_v26 = vadd.f32 %v7183_v22, %v9290_v55  ;;  %v7186_v59 = vadd.f32 %v7185_v52, %v7184_v13  ;;  %v7297_v43 = vpop.f32.mrb[163].mxu1  ;;  %5096 = vmatprep.subr.bf16.mxu1 %v10482_v61  ;;  %7688 = vmatpush3.bf16.msra.mxu0 %v7976_v44  ;;  %v9617_v44 = vld [vmem:[%s8188_s27 + $0x1c8] sm:$0xff] }
 0x247   : > { %v7298_v51 = vadd.f32 %v7297_v43, %v7296_v23  ;;  %4658 = vmatmul.mubr.bf16.gmra.mrb[12].mxu0 %v6542_v48  ;;  %7689 = vmatprep.subr.bf16.mxu0 %v7978_v16  ;;  %v6550_v16 = vcombine.low %v9560_v24, %v9563_v45  ;;  %v7975_v24 = vld [vmem:[%s10349_s1 + $0x5a0] sm:$0xff]  }
 0x248   : > { %v2762_v55 = vadd.f32 %v7186_v59, %v9300_v53  ;;  %v9603_v5 = vadd.f32 %v7295_v38, %v2759_v26  ;;  %4819 = vmatmul.mubr.bf16.gmra.mrb[12].mxu1 %v6544_v30  ;;  %4665 = vmatprep.mubr.bf16.mxu0 %v6551_v18  ;;  %v3349_v53 = vld [vmem:[%s8188_s27 + $0x1e8] sm:$0xff]  ;;  %v6552_v30 = vcombine.low %v9571_v49, %v9574_v11  ;;  %v3352_v43 = vld [vmem:[%s8188_s27 + $0x200] sm:$0xff] }
 0x249   : > { %4826 = vmatprep.mubr.bf16.mxu1 %v6553_v42  ;;  %5097 = vmatpush1.bf16.msra.mxu1 %v7970_v31  ;;  %v6559_v18 = vcombine.high %v9606_v56, %v9609_v62  ;;  %v6561_v42 = vcombine.high %v9617_v44, %v3349_v53 }
 0x24a   : > { %v9614_v32 = vadd.f32 %v7298_v51, %v2762_v55  ;;  %v7187_v25 = vpop.f32.mrb[164].mxu0  ;;  %5098 = vmatprep.subr.bf16.mxu1 %v10482_v61  ;;  %7690 = vmatpush3.bf16.msra.mxu0 %v7979_v8  ;;  %v3356_v8 = vld [vmem:[%s8188_s27 + $0x220] sm:$0xff]  ;;  %v3353_v55 = vld [vmem:[%s8188_s27 + $0x208] sm:$0xff] }
 0x24b   : > { %v7188_v0 = vpop.f32.mrb[165].mxu0  ;;  %v7299_v48 = vpop.f32.mrb[164].mxu1  ;;  %7691 = vmatprep.subr.bf16.mxu0 %v7982_v39 }
 0x24c   : > { %v7189_v22 = vadd.f32 %v7188_v0, %v7187_v25  ;;  %v7190_v13 = vpop.f32.mrb[166].mxu0  ;;  %v7300_v6 = vpop.f32.mrb[165].mxu1 }
 0x24d   : > { %v7191_v52 = vpop.f32.mrb[167].mxu0  ;;  %v7301_v38 = vadd.f32 %v7300_v6, %v7299_v48  ;;  %v7302_v23 = vpop.f32.mrb[166].mxu1  ;;  %5099 = vmatpush1.bf16.msra.mxu1 %v7973_v17  ;;  %v3357_v17 = vld [vmem:[%s8188_s27 + $0x228] sm:$0xff] }
 0x24e   : > { %v2767_v45 = vadd.f32 %v7189_v22, %v9311_v15  ;;  %v7192_v31 = vadd.f32 %v7191_v52, %v7190_v13  ;;  %v7303_v26 = vpop.f32.mrb[167].mxu1  ;;  %5100 = vmatprep.subr.bf16.mxu1 %v10482_v61  ;;  %7692 = vmatpush3.bf16.msra.mxu0 %v7983_v35  ;;  %v7977_v15 = vld [vmem:[%s10349_s1 + $0x5a8] sm:$0xff]   ;;  %v6558_v35 = vcombine.low %v9606_v56, %v9609_v62 }
 0x24f   : > { %v7304_v49 = vadd.f32 %v7303_v26, %v7302_v23  ;;  %4666 = vmatmul.mubr.bf16.gmra.mrb[16].mxu0 %v6550_v16  ;;  %v6560_v22 = vcombine.low %v9617_v44, %v3349_v53  ;;  %v6567_v13 = vcombine.high %v3352_v43, %v3356_v8  ;;  %v6569_v52 = vcombine.high %v3353_v55, %v3357_v17 }
 0x250   : > { %v2770_v11 = vadd.f32 %v7192_v31, %v9318_v33  ;;  %v9637_v59 = vadd.f32 %v7301_v38, %v2767_v45  ;;  %4827 = vmatmul.mubr.bf16.gmra.mrb[16].mxu1 %v6552_v30  ;;  %4673 = vmatprep.mubr.bf16.mxu0 %v6559_v18  ;;  %v7980_v38 = vld [vmem:[%s10349_s1 + $0x5b0] sm:$0xff]   ;;  %v3364_v45 = vld [vmem:[%s8188_s27 + $0x260] sm:$0xff] }
 0x251   : > { %4834 = vmatprep.mubr.bf16.mxu1 %v6561_v42  ;;  %5101 = vmatpush1.bf16.msra.mxu1 %v7975_v24  ;;  %v3360_v24 = vld [vmem:[%s8188_s27 + $0x240] sm:$0xff] }
 0x252   : > { %v9644_v51 = vadd.f32 %v7304_v49, %v2770_v11  ;;  %v7193_v39 = vpop.f32.mrb[168].mxu0  ;;  %5102 = vmatprep.subr.bf16.mxu1 %v10482_v61  ;;  %v3361_v49 = vld [vmem:[%s8188_s27 + $0x248] sm:$0xff] }
 0x253   : > { %v7194_v33 = vpop.f32.mrb[169].mxu0  ;;  %v7305_v25 = vpop.f32.mrb[168].mxu1  ;;  %v3365_v11 = vld [vmem:[%s8188_s27 + $0x268] sm:$0xff] }
 0x254   : > { %v7195_v0 = vadd.f32 %v7194_v33, %v7193_v39  ;;  %v7196_v48 = vpop.f32.mrb[170].mxu0  ;;  %v7306_v16 = vpop.f32.mrb[169].mxu1  ;;  %v6566_v39 = vcombine.low %v3352_v43, %v3356_v8 }
 0x255   : > { %v7197_v6 = vpop.f32.mrb[171].mxu0  ;;  %v7307_v30 = vadd.f32 %v7306_v16, %v7305_v25  ;;  %v7308_v18 = vpop.f32.mrb[170].mxu1  ;;  %5103 = vmatpush1.bf16.msra.mxu1 %v7977_v15 }
 0x256   : > { %v2775_v23 = vadd.f32 %v7195_v0, %v9322_v54  ;;  %v7198_v56 = vadd.f32 %v7197_v6, %v7196_v48  ;;  %v7309_v62 = vpop.f32.mrb[171].mxu1  ;;  %5104 = vmatprep.subr.bf16.mxu1 %v10482_v61  ;;  %v7981_v54 = vld [vmem:[%s10349_s1 + $0x5b8] sm:$0xff]   ;;  %v6568_v0 = vcombine.low %v3353_v55, %v3357_v17  ;;  %v6575_v48 = vcombine.high %v3360_v24, %v3364_v45 }
 0x257   : > { %v7310_v44 = vadd.f32 %v7309_v62, %v7308_v18  ;;  %4674 = vmatmul.mubr.bf16.gmra.mrb[20].mxu0 %v6558_v35  ;;  %v6577_v6 = vcombine.high %v3361_v49, %v3365_v11 }
 0x258   : > { %v2778_v53 = vadd.f32 %v7198_v56, %v9329_v19  ;;  %v9658_v42 = vadd.f32 %v7307_v30, %v2775_v23  ;;  %4835 = vmatmul.mubr.bf16.gmra.mrb[20].mxu1 %v6560_v22  ;;  %4681 = vmatprep.mubr.bf16.mxu0 %v6567_v13  ;;  %v7984_v30 = vld [vmem:[%s10349_s1 + $0x5c0] sm:$0xff]  }
 0x259   : > { %4842 = vmatprep.mubr.bf16.mxu1 %v6569_v52  ;;  %5105 = vmatpush1.bf16.msra.mxu1 %v7980_v38  ;;  %v3368_v38 = vld [vmem:[%s8188_s27 + $0x280] sm:$0xff] }
 0x25a   : > { %v9665_v31 = vadd.f32 %v7310_v44, %v2778_v53  ;;  %v7199_v26 = vpop.f32.mrb[172].mxu0  ;;  %5106 = vmatprep.subr.bf16.mxu1 %v10482_v61  ;;  %v3372_v23 = vld [vmem:[%s8188_s27 + $0x2a0] sm:$0xff]  ;;  %v3369_v44 = vld [vmem:[%s8188_s27 + $0x288] sm:$0xff] }
 0x25b   : > { %v7200_v19 = vpop.f32.mrb[173].mxu0  ;;  %v7311_v15 = vpop.f32.mrb[172].mxu1  ;;  %v3373_v53 = vld [vmem:[%s8188_s27 + $0x2a8] sm:$0xff] }
 0x25c   : > { %v7201_v33 = vadd.f32 %v7200_v19, %v7199_v26  ;;  %v7202_v25 = vpop.f32.mrb[174].mxu0  ;;  %v7312_v35 = vpop.f32.mrb[173].mxu1  ;;  %v6574_v26 = vcombine.low %v3360_v24, %v3364_v45 }
 0x25d   : > { %v7203_v16 = vpop.f32.mrb[175].mxu0  ;;  %v7313_v22 = vadd.f32 %v7312_v35, %v7311_v15  ;;  %v7314_v13 = vpop.f32.mrb[174].mxu1  ;;  %5107 = vmatpush1.bf16.msra.mxu1 %v7981_v54 }
 0x25e   : > { %v2783_v18 = vadd.f32 %v7201_v33, %v9333_v4  ;;  %v7204_v52 = vadd.f32 %v7203_v16, %v7202_v25  ;;  %v7315_v43 = vpop.f32.mrb[175].mxu1  ;;  %5108 = vmatprep.subr.bf16.mxu1 %v10482_v61  ;;  %v7985_v4 = vld [vmem:[%s10349_s1 + $0x5c8] sm:$0xff]   ;;  %v6576_v33 = vcombine.low %v3361_v49, %v3365_v11  ;;  %v6583_v25 = vcombine.high %v3368_v38, %v3372_v23  ;;  %v3376_v49 = vld [vmem:[%s8188_s27 + $0x2c0] sm:$0xff] }
 0x25f   : > { %v7316_v8 = vadd.f32 %v7315_v43, %v7314_v13  ;;  %4682 = vmatmul.mubr.bf16.gmra.mrb[24].mxu0 %v6566_v39  ;;  %v6585_v16 = vcombine.high %v3369_v44, %v3373_v53  ;;  %v3380_v11 = vld [vmem:[%s8188_s27 + $0x2e0] sm:$0xff]  ;;  %v3381_v43 = vld [vmem:[%s8188_s27 + $0x2e8] sm:$0xff] }
 0x260   : > { %v2786_v55 = vadd.f32 %v7204_v52, %v9340_v41  ;;  %v9676_v17 = vadd.f32 %v7313_v22, %v2783_v18  ;;  %4843 = vmatmul.mubr.bf16.gmra.mrb[24].mxu1 %v6568_v0  ;;  %4689 = vmatprep.mubr.bf16.mxu0 %v6575_v48  ;;  %v3377_v52 = vld [vmem:[%s8188_s27 + $0x2c8] sm:$0xff] }
 0x261   : > { %4850 = vmatprep.mubr.bf16.mxu1 %v6577_v6  ;;  %5109 = vmatpush1.bf16.msra.mxu1 %v7984_v30 }
 0x262   : > { %v9683_v56 = vadd.f32 %v7316_v8, %v2786_v55  ;;  %v7205_v62 = vpop.f32.mrb[176].mxu0  ;;  %5110 = vmatprep.subr.bf16.mxu1 %v10482_v61  ;;  %v6582_v55 = vcombine.low %v3368_v38, %v3372_v23 }
 0x263   : > { %v7206_v41 = vpop.f32.mrb[177].mxu0  ;;  %v7317_v54 = vpop.f32.mrb[176].mxu1 }
 0x264   : > { %v7207_v19 = vadd.f32 %v7206_v41, %v7205_v62  ;;  %v7208_v15 = vpop.f32.mrb[178].mxu0  ;;  %v7318_v39 = vpop.f32.mrb[177].mxu1 }
 0x265   : > { %v7209_v35 = vpop.f32.mrb[179].mxu0  ;;  %v7319_v0 = vadd.f32 %v7318_v39, %v7317_v54  ;;  %v7320_v48 = vpop.f32.mrb[178].mxu1  ;;  %5111 = vmatpush1.bf16.msra.mxu1 %v7985_v4  ;;  %v6584_v54 = vcombine.low %v3369_v44, %v3373_v53  ;;  %v6593_v39 = vcombine.high %v3377_v52, %v3381_v43  ;;  %v3384_v44 = vld [vmem:[%s8188_s27 + $0x300] sm:$0xff] }
 0x266   : > { %v2791_v22 = vadd.f32 %v7207_v19, %v9344_v27  ;;  %v7210_v61 = vadd.f32 %v7209_v35, %v7208_v15  ;;  %v7321_v13 = vpop.f32.mrb[179].mxu1  ;;  %v3388_v53 = vld [vmem:[%s8188_s27 + $0x320] sm:$0xff] }
 0x267   : > { %v7322_v6 = vadd.f32 %v7321_v13, %v7320_v48  ;;  %4690 = vmatmul.mubr.bf16.gmra.mrb[28].mxu0 %v6574_v26 }
 0x268   : > { %v2794_v24 = vadd.f32 %v7210_v61, %v9351_v63  ;;  %v9690_v45 = vadd.f32 %v7319_v0, %v2791_v22  ;;  %4851 = vmatmul.mubr.bf16.gmra.mrb[28].mxu1 %v6576_v33  ;;  %4697 = vmatprep.mubr.bf16.mxu0 %v6583_v25  ;;  %v6591_v63 = vcombine.high %v3376_v49, %v3380_v11  ;;  %v3385_v22 = vld [vmem:[%s8188_s27 + $0x308] sm:$0xff] }
 0x269   : > { %4858 = vmatprep.mubr.bf16.mxu1 %v6585_v16  ;;  %v3389_v61 = vld [vmem:[%s8188_s27 + $0x328] sm:$0xff] }
 0x26a   : > { %v9694_v30 = vadd.f32 %v7322_v6, %v2794_v24  ;;  %v7211_v18 = vpop.f32.mrb[180].mxu0  ;;  %v6590_v6 = vcombine.low %v3376_v49, %v3380_v11 }
 0x26b   : > { %v7212_v8 = vpop.f32.mrb[181].mxu0  ;;  %v7323_v27 = vpop.f32.mrb[180].mxu1 }
 0x26c   : > { %v7213_v4 = vadd.f32 %v7212_v8, %v7211_v18  ;;  %v7214_v62 = vpop.f32.mrb[182].mxu0  ;;  %v7324_v41 = vpop.f32.mrb[181].mxu1 }
 0x26d   : > { %v7215_v26 = vpop.f32.mrb[183].mxu0  ;;  %v7325_v19 = vadd.f32 %v7324_v41, %v7323_v27  ;;  %v7326_v15 = vpop.f32.mrb[182].mxu1  ;;  %v6592_v27 = vcombine.low %v3377_v52, %v3381_v43  ;;  %v6601_v41 = vcombine.high %v3385_v22, %v3389_v61  ;;  %v3392_v52 = vld [vmem:[%s8188_s27 + $0x340] sm:$0xff] }
 0x26e   : > { %v2799_v33 = vadd.f32 %v7213_v4, %v9355_v14  ;;  %v7216_v25 = vadd.f32 %v7215_v26, %v7214_v62  ;;  %v7327_v35 = vpop.f32.mrb[183].mxu1  ;;  %v3396_v43 = vld [vmem:[%s8188_s27 + $0x360] sm:$0xff] }
 0x26f   : > { %v7328_v0 = vadd.f32 %v7327_v35, %v7326_v15  ;;  %4698 = vmatmul.mubr.bf16.gmra.mrb[32].mxu0 %v6582_v55 }
 0x270   : > { %v2802_v38 = vadd.f32 %v7216_v25, %v9362_v21  ;;  %v9700_v23 = vadd.f32 %v7325_v19, %v2799_v33  ;;  %4859 = vmatmul.mubr.bf16.gmra.mrb[32].mxu1 %v6584_v54  ;;  %4705 = vmatprep.mubr.bf16.mxu0 %v6591_v63  ;;  %v6599_v21 = vcombine.high %v3384_v44, %v3388_v53  ;;  %v3393_v33 = vld [vmem:[%s8188_s27 + $0x348] sm:$0xff] }
 0x271   : > { %4866 = vmatprep.mubr.bf16.mxu1 %v6593_v39  ;;  %v3397_v25 = vld [vmem:[%s8188_s27 + $0x368] sm:$0xff] }
 0x272   : > { %v9704_v48 = vadd.f32 %v7328_v0, %v2802_v38  ;;  %v7217_v16 = vpop.f32.mrb[184].mxu0  ;;  %v6598_v0 = vcombine.low %v3384_v44, %v3388_v53 }
 0x273   : > { %v7218_v13 = vpop.f32.mrb[185].mxu0  ;;  %v7329_v14 = vpop.f32.mrb[184].mxu1 }
 0x274   : > { %v7219_v24 = vadd.f32 %v7218_v13, %v7217_v16  ;;  %v7220_v18 = vpop.f32.mrb[186].mxu0  ;;  %v7330_v8 = vpop.f32.mrb[185].mxu1 }
 0x275   : > { %v7221_v55 = vpop.f32.mrb[187].mxu0  ;;  %v7331_v4 = vadd.f32 %v7330_v8, %v7329_v14  ;;  %v7332_v62 = vpop.f32.mrb[186].mxu1  ;;  %v6600_v14 = vcombine.low %v3385_v22, %v3389_v61  ;;  %v6609_v8 = vcombine.high %v3393_v33, %v3397_v25  ;;  %v3400_v22 = vld [vmem:[%s8188_s27 + $0x380] sm:$0xff] }
 0x276   : > { %v2807_v54 = vadd.f32 %v7219_v24, %v9366_v40  ;;  %v7222_v63 = vadd.f32 %v7221_v55, %v7220_v18  ;;  %v7333_v26 = vpop.f32.mrb[187].mxu1  ;;  %v3404_v61 = vld [vmem:[%s8188_s27 + $0x3a0] sm:$0xff] }
 0x277   : > { %v7334_v19 = vadd.f32 %v7333_v26, %v7332_v62  ;;  %4706 = vmatmul.mubr.bf16.gmra.mrb[36].mxu0 %v6590_v6 }
 0x278   : > { %v2810_v49 = vadd.f32 %v7222_v63, %v9373_v28  ;;  %v9710_v11 = vadd.f32 %v7331_v4, %v2807_v54  ;;  %4867 = vmatmul.mubr.bf16.gmra.mrb[36].mxu1 %v6592_v27  ;;  %4713 = vmatprep.mubr.bf16.mxu0 %v6599_v21  ;;  %v6607_v28 = vcombine.high %v3392_v52, %v3396_v43  ;;  %v3401_v54 = vld [vmem:[%s8188_s27 + $0x388] sm:$0xff] }
 0x279   : > { %4874 = vmatprep.mubr.bf16.mxu1 %v6601_v41  ;;  %v3405_v63 = vld [vmem:[%s8188_s27 + $0x3a8] sm:$0xff] }
 0x27a   : > { %v9714_v15 = vadd.f32 %v7334_v19, %v2810_v49  ;;  %v7223_v39 = vpop.f32.mrb[188].mxu0  ;;  %v6606_v19 = vcombine.low %v3392_v52, %v3396_v43  ;;  %v3408_v43 = vld [vmem:[%s8188_s27 + $0x3c0] sm:$0xff] }
 0x27b   : > { %v7224_v35 = vpop.f32.mrb[189].mxu0  ;;  %v7335_v40 = vpop.f32.mrb[188].mxu1 }
 0x27c   : > { %v7225_v38 = vadd.f32 %v7224_v35, %v7223_v39  ;;  %v7226_v16 = vpop.f32.mrb[190].mxu0  ;;  %v7336_v13 = vpop.f32.mrb[189].mxu1 }
 0x27d   : > { %v7227_v6 = vpop.f32.mrb[191].mxu0  ;;  %v7337_v24 = vadd.f32 %v7336_v13, %v7335_v40  ;;  %v7338_v18 = vpop.f32.mrb[190].mxu1  ;;  %v6615_v40 = vcombine.high %v3400_v22, %v3404_v61 }
 0x27e   : > { %v2815_v27 = vadd.f32 %v7225_v38, %v9377_v10  ;;  %v7228_v21 = vadd.f32 %v7227_v6, %v7226_v16  ;;  %v7339_v55 = vpop.f32.mrb[191].mxu1  ;;  %v6617_v16 = vcombine.high %v3401_v54, %v3405_v63 }
 0x27f   : > { %v7340_v4 = vadd.f32 %v7339_v55, %v7338_v18  ;;  %4714 = vmatmul.mubr.bf16.gmra.mrb[40].mxu0 %v6598_v0  ;;  %v3409_v18 = vld [vmem:[%s8188_s27 + $0x3c8] sm:$0xff]  ;;  %v6614_v55 = vcombine.low %v3400_v22, %v3404_v61  ;;  %v3416_v61 = vld [vmem:[%s8188_s27 + $0x400] sm:$0xff] }
 0x280   : > { %v2818_v44 = vadd.f32 %v7228_v21, %v9384_v50  ;;  %v9720_v53 = vadd.f32 %v7337_v24, %v2815_v27  ;;  %4875 = vmatmul.mubr.bf16.gmra.mrb[40].mxu1 %v6600_v14  ;;  %4721 = vmatprep.mubr.bf16.mxu0 %v6607_v28  ;;  %v6608_v50 = vcombine.low %v3393_v33, %v3397_v25  ;;  %v3412_v33 = vld [vmem:[%s8188_s27 + $0x3e0] sm:$0xff] }
 0x281   : > { %4882 = vmatprep.mubr.bf16.mxu1 %v6609_v8  ;;  %v3413_v8 = vld [vmem:[%s8188_s27 + $0x3e8] sm:$0xff] }
 0x282   : > { %v9724_v62 = vadd.f32 %v7340_v4, %v2818_v44  ;;  %v7357_v41 = vpop.f32.mrb[192].mxu0 }
 0x283   : > { %v7358_v26 = vpop.f32.mrb[193].mxu0  ;;  %v3177_v10 = vpop.f32.mrb[192].mxu1 }
 0x284   : > { %v7359_v49 = vadd.f32 %v7358_v26, %v7357_v41  ;;  %v7360_v39 = vpop.f32.mrb[194].mxu0  ;;  %v3179_v35 = vpop.f32.mrb[193].mxu1  ;;  %v6616_v41 = vcombine.low %v3401_v54, %v3405_v63  ;;  %v3420_v54 = vld [vmem:[%s8188_s27 + $0x420] sm:$0xff] }
 0x285   : > { %v7361_v0 = vpop.f32.mrb[195].mxu0  ;;  %v3180_v38 = vpop.f32.mrb[194].mxu1 }
 0x286   : > { %v7362_v13 = vadd.f32 %v7361_v0, %v7360_v39  ;;  %v3017_v14 = vadd.f32 %v7359_v49, %v9389_v12  ;;  %v3182_v28 = vpop.f32.mrb[195].mxu1  ;;  %v3417_v0 = vld [vmem:[%s8188_s27 + $0x408] sm:$0xff] }
 0x287   : > { %4722 = vmatmul.mubr.bf16.gmra.mrb[44].mxu0 %v6606_v19  ;;  %v6625_v19 = vcombine.high %v3409_v18, %v3413_v8 }
 0x288   : > { %v9729_v6 = vadd.f32 %v3177_v10, %v3017_v14  ;;  %v3020_v52 = vadd.f32 %v7362_v13, %v9395_v29  ;;  %4883 = vmatmul.mubr.bf16.gmra.mrb[44].mxu1 %v6608_v50  ;;  %4729 = vmatprep.mubr.bf16.mxu0 %v6615_v40  ;;  %v6623_v29 = vcombine.high %v3408_v43, %v3412_v33 }
 0x289   : > { %4890 = vmatprep.mubr.bf16.mxu1 %v6617_v16  ;;  %v6622_v14 = vcombine.low %v3408_v43, %v3412_v33  ;;  %v3424_v33 = vld [vmem:[%s8188_s27 + $0x440] sm:$0xff] }
 0x28a   : > { %v9734_v25 = vadd.f32 %v3180_v38, %v3020_v52  ;;  %v7363_v24 = vpop.f32.mrb[196].mxu0  ;;  %v3421_v38 = vld [vmem:[%s8188_s27 + $0x428] sm:$0xff] }
 0x28b   : > { %v7364_v27 = vpop.f32.mrb[197].mxu0  ;;  %v3185_v21 = vpop.f32.mrb[196].mxu1 }
 0x28c   : > { %v7365_v12 = vadd.f32 %v7364_v27, %v7363_v24  ;;  %v7366_v4 = vpop.f32.mrb[198].mxu0  ;;  %v3187_v44 = vpop.f32.mrb[197].mxu1  ;;  %v6624_v24 = vcombine.low %v3409_v18, %v3413_v8  ;;  %v3428_v18 = vld [vmem:[%s8188_s27 + $0x460] sm:$0xff] }
 0x28d   : > { %v7367_v26 = vpop.f32.mrb[199].mxu0  ;;  %v3188_v10 = vpop.f32.mrb[198].mxu1 }
 0x28e   : > { %v7368_v49 = vadd.f32 %v7367_v26, %v7366_v4  ;;  %v3025_v39 = vadd.f32 %v7365_v12, %v9400_v58  ;;  %v3190_v35 = vpop.f32.mrb[199].mxu1  ;;  %v3425_v26 = vld [vmem:[%s8188_s27 + $0x448] sm:$0xff] }
 0x28f   : > { %4730 = vmatmul.mubr.bf16.gmra.mrb[48].mxu0 %v6614_v55  ;;  %v6633_v55 = vcombine.high %v3417_v0, %v3421_v38 }
 0x290   : > { %v9739_v50 = vadd.f32 %v3185_v21, %v3025_v39  ;;  %v3028_v22 = vadd.f32 %v7368_v49, %v9406_v60  ;;  %4891 = vmatmul.mubr.bf16.gmra.mrb[48].mxu1 %v6616_v41  ;;  %4737 = vmatprep.mubr.bf16.mxu0 %v6623_v29  ;;  %v6631_v60 = vcombine.high %v3416_v61, %v3420_v54 }
 0x291   : > { %4898 = vmatprep.mubr.bf16.mxu1 %v6625_v19  ;;  %v6630_v39 = vcombine.low %v3416_v61, %v3420_v54  ;;  %v3306_v54 = vld [vmem:[%s8188_s27 + $0x90] sm:$0xff] }
 0x292   : > { %v9744_v63 = vadd.f32 %v3188_v10, %v3028_v22  ;;  %v7369_v40 = vpop.f32.mrb[200].mxu0  ;;  %v3429_v10 = vld [vmem:[%s8188_s27 + $0x468] sm:$0xff] }
 0x293   : > { %v7370_v16 = vpop.f32.mrb[201].mxu0  ;;  %v3193_v13 = vpop.f32.mrb[200].mxu1 }
 0x294   : > { %v7371_v58 = vadd.f32 %v7370_v16, %v7369_v40  ;;  %v7372_v28 = vpop.f32.mrb[202].mxu0  ;;  %v3195_v52 = vpop.f32.mrb[201].mxu1  ;;  %v6632_v40 = vcombine.low %v3417_v0, %v3421_v38  ;;  %v3310_v0 = vld [vmem:[%s8188_s27 + $0xb0] sm:$0xff] }
 0x295   : > { %v7373_v27 = vpop.f32.mrb[203].mxu0  ;;  %v3196_v21 = vpop.f32.mrb[202].mxu1 }
 0x296   : > { %v7374_v12 = vadd.f32 %v7373_v27, %v7372_v28  ;;  %v3033_v4 = vadd.f32 %v7371_v58, %v9411_v7  ;;  %v3198_v44 = vpop.f32.mrb[203].mxu1  ;;  %v3307_v27 = vld [vmem:[%s8188_s27 + $0x98] sm:$0xff] }
 0x297   : > { %4738 = vmatmul.mubr.bf16.gmra.mrb[52].mxu0 %v6622_v14  ;;  %v6641_v14 = vcombine.high %v3425_v26, %v3429_v10 }
 0x298   : > { %v9749_v41 = vadd.f32 %v3193_v13, %v3033_v4  ;;  %v3036_v43 = vadd.f32 %v7374_v12, %v9417_v9  ;;  %4899 = vmatmul.mubr.bf16.gmra.mrb[52].mxu1 %v6624_v24  ;;  %4745 = vmatprep.mubr.bf16.mxu0 %v6631_v60  ;;  %v6639_v9 = vcombine.high %v3424_v33, %v3428_v18 }
 0x299   : > { %4906 = vmatprep.mubr.bf16.mxu1 %v6633_v55  ;;  %v6638_v4 = vcombine.low %v3424_v33, %v3428_v18  ;;  %v3314_v18 = vld [vmem:[%s8188_s27 + $0xd0] sm:$0xff] }
 0x29a   : > { %v9754_v8 = vadd.f32 %v3196_v21, %v3036_v43  ;;  %v7375_v29 = vpop.f32.mrb[204].mxu0  ;;  %v3311_v21 = vld [vmem:[%s8188_s27 + $0xb8] sm:$0xff] }
 0x29b   : > { %v7376_v19 = vpop.f32.mrb[205].mxu0  ;;  %v3201_v49 = vpop.f32.mrb[204].mxu1 }
 0x29c   : > { %v7377_v7 = vadd.f32 %v7376_v19, %v7375_v29  ;;  %v7378_v35 = vpop.f32.mrb[206].mxu0  ;;  %v3203_v22 = vpop.f32.mrb[205].mxu1  ;;  %v6640_v29 = vcombine.low %v3425_v26, %v3429_v10  ;;  %v3318_v26 = vld [vmem:[%s8188_s27 + $0xf0] sm:$0xff] }
 0x29d   : > { %v7379_v16 = vpop.f32.mrb[207].mxu0  ;;  %v3204_v13 = vpop.f32.mrb[206].mxu1 }
 0x29e   : > { %v7380_v58 = vadd.f32 %v7379_v16, %v7378_v35  ;;  %v3041_v28 = vadd.f32 %v7377_v7, %v9422_v37  ;;  %v3206_v52 = vpop.f32.mrb[207].mxu1  ;;  %v3315_v16 = vld [vmem:[%s8188_s27 + $0xd8] sm:$0xff] }
 0x29f   : > { %4746 = vmatmul.mubr.bf16.gmra.mrb[56].mxu0 %v6630_v39  ;;  %v6525_v39 = vcombine.high %v3307_v27, %v3311_v21 }
 0x2a0   : > { %v9759_v24 = vadd.f32 %v3201_v49, %v3041_v28  ;;  %v3044_v61 = vadd.f32 %v7380_v58, %v9430_v20  ;;  %4907 = vmatmul.mubr.bf16.gmra.mrb[56].mxu1 %v6632_v40  ;;  %4753 = vmatprep.mubr.bf16.mxu0 %v6639_v9  ;;  %v6523_v20 = vcombine.high %v3306_v54, %v3310_v0 }
 0x2a1   : > { %4914 = vmatprep.mubr.bf16.mxu1 %v6641_v14 }
 0x2a2   : > { %v9764_v38 = vadd.f32 %v3204_v13, %v3044_v61  ;;  %v7381_v60 = vpop.f32.mrb[208].mxu0  ;;  %v3319_v13 = vld [vmem:[%s8188_s27 + $0xf8] sm:$0xff] }
 0x2a3   : > { %v7382_v55 = vpop.f32.mrb[209].mxu0  ;;  %v3209_v12 = vpop.f32.mrb[208].mxu1 }
 0x2a4   : > { %v7383_v37 = vadd.f32 %v7382_v55, %v7381_v60  ;;  %v7384_v44 = vpop.f32.mrb[210].mxu0  ;;  %v3211_v43 = vpop.f32.mrb[209].mxu1  ;;  %v6531_v60 = vcombine.high %v3314_v18, %v3318_v26 }
 0x2a5   : > { %v7385_v19 = vpop.f32.mrb[211].mxu0  ;;  %v3212_v49 = vpop.f32.mrb[210].mxu1 }
 0x2a6   : > { %v7386_v7 = vadd.f32 %v7385_v19, %v7384_v44  ;;  %v3049_v35 = vadd.f32 %v7383_v37, %v9437_v2  ;;  %v3214_v22 = vpop.f32.mrb[211].mxu1  ;;  %v6522_v2 = vcombine.low %v3306_v54, %v3310_v0  ;;  %v3322_v0 = vld [vmem:[%s8188_s27 + $0x110] sm:$0xff]  ;;  %v3323_v19 = vld [vmem:[%s8188_s27 + $0x118] sm:$0xff] }
 0x2a7   : > { %4754 = vmatmul.mubr.bf16.gmra.mrb[60].mxu0 %v6638_v4  ;;  %v6533_v4 = vcombine.high %v3315_v16, %v3319_v13 }
 0x2a8   : > { %v9769_v40 = vadd.f32 %v3209_v12, %v3049_v35  ;;  %v3052_v33 = vadd.f32 %v7386_v7, %v9440_v34  ;;  %4915 = vmatmul.mubr.bf16.gmra.mrb[60].mxu1 %v6640_v29  ;;  %4955 = vmatprep.mubr.bf16.mxu0 %v6523_v20  ;;  %v6524_v34 = vcombine.low %v3307_v27, %v3311_v21  ;;  %v3326_v27 = vld [vmem:[%s8188_s27 + $0x130] sm:$0xff] }
 0x2a9   : > { %6708 = vmatprep.mubr.msk.bf16.mxu1 %vm1553_vm0, %v6525_v39 }
 0x2aa   : > { %v9775_v10 = vadd.f32 %v3212_v49, %v3052_v33  ;;  %v7387_v9 = vpop.f32.mrb[212].mxu0  ;;  %v3327_v49 = vld [vmem:[%s8188_s27 + $0x138] sm:$0xff] }
 0x2ab   : > { %v7388_v14 = vpop.f32.mrb[213].mxu0  ;;  %v3217_v58 = vpop.f32.mrb[212].mxu1 }
 0x2ac   : > { %v7389_v28 = vadd.f32 %v7388_v14, %v7387_v9  ;;  %v7390_v52 = vpop.f32.mrb[214].mxu0  ;;  %v3219_v61 = vpop.f32.mrb[213].mxu1  ;;  %v6539_v9 = vcombine.high %v3322_v0, %v3326_v27 }
 0x2ad   : > { %v7391_v55 = vpop.f32.mrb[215].mxu0  ;;  %v3220_v12 = vpop.f32.mrb[214].mxu1 }
 0x2ae   : > { %v7392_v37 = vadd.f32 %v7391_v55, %v7390_v52  ;;  %v3057_v44 = vadd.f32 %v7389_v28, %v9466_v1  ;;  %v3222_v43 = vpop.f32.mrb[215].mxu1  ;;  %v6530_v1 = vcombine.low %v3314_v18, %v3318_v26  ;;  %v3330_v26 = vld [vmem:[%s8188_s27 + $0x150] sm:$0xff]  ;;  %v3331_v55 = vld [vmem:[%s8188_s27 + $0x158] sm:$0xff] }
 0x2af   : > { %4956 = vmatmul.mubr.bf16.vlgmr.msra.gmra.mrb[64].mxu0 %v6522_v2  ;;  %v6541_v2 = vcombine.high %v3323_v19, %v3327_v49 }
 0x2b0   : > { %v9780_v29 = vadd.f32 %v3217_v58, %v3057_v44  ;;  %v3060_v54 = vadd.f32 %v7392_v37, %v9483_v47  ;;  %5117 = vmatmul.mubr.bf16.vlgmr.msra.gmra.mrb[64].mxu1 %v6524_v34  ;;  %4963 = vmatprep.mubr.bf16.mxu0 %v6531_v60  ;;  %v6532_v47 = vcombine.low %v3315_v16, %v3319_v13  ;;  %v3334_v16 = vld [vmem:[%s8188_s27 + $0x170] sm:$0xff] }
 0x2b1   : > { %6709 = vmatprep.mubr.msk.bf16.mxu1 %vm1553_vm0, %v6533_v4 }
 0x2b2   : > { %v9786_v21 = vadd.f32 %v3220_v12, %v3060_v54  ;;  %v7393_v20 = vpop.f32.mrb[216].mxu0  ;;  %v3335_v12 = vld [vmem:[%s8188_s27 + $0x178] sm:$0xff] }
 0x2b3   : > { %v7394_v39 = vpop.f32.mrb[217].mxu0  ;;  %v3225_v7 = vpop.f32.mrb[216].mxu1 }
 0x2b4   : > { %v7395_v35 = vadd.f32 %v7394_v39, %v7393_v20  ;;  %v7396_v22 = vpop.f32.mrb[218].mxu0  ;;  %v3227_v33 = vpop.f32.mrb[217].mxu1  ;;  %v6547_v20 = vcombine.high %v3330_v26, %v3334_v16 }
 0x2b5   : > { %v7397_v14 = vpop.f32.mrb[219].mxu0  ;;  %v3228_v58 = vpop.f32.mrb[218].mxu1 }
 0x2b6   : > { %v7398_v28 = vadd.f32 %v7397_v14, %v7396_v22  ;;  %v3065_v52 = vadd.f32 %v7395_v35, %v9511_v57  ;;  %v3230_v61 = vpop.f32.mrb[219].mxu1  ;;  %v6538_v57 = vcombine.low %v3322_v0, %v3326_v27  ;;  %v3338_v27 = vld [vmem:[%s8188_s27 + $0x190] sm:$0xff]  ;;  %v3339_v14 = vld [vmem:[%s8188_s27 + $0x198] sm:$0xff] }
 0x2b7   : > { %4964 = vmatmul.mubr.bf16.gmra.mrb[68].mxu0 %v6530_v1  ;;  %v6549_v1 = vcombine.high %v3331_v55, %v3335_v12 }
 0x2b8   : > { %v9791_v34 = vadd.f32 %v3225_v7, %v3065_v52  ;;  %v3068_v18 = vadd.f32 %v7398_v28, %v9522_v3  ;;  %5125 = vmatmul.mubr.bf16.gmra.mrb[68].mxu1 %v6532_v47  ;;  %4971 = vmatprep.mubr.bf16.mxu0 %v6539_v9  ;;  %v6540_v3 = vcombine.low %v3323_v19, %v3327_v49  ;;  %v3342_v19 = vld [vmem:[%s8188_s27 + $0x1b0] sm:$0xff] }
 0x2b9   : > { %6710 = vmatprep.mubr.msk.bf16.mxu1 %vm1553_vm0, %v6541_v2 }
 0x2ba   : > { %v9797_v13 = vadd.f32 %v3228_v58, %v3068_v18  ;;  %v7399_v60 = vpop.f32.mrb[220].mxu0  ;;  %v3343_v58 = vld [vmem:[%s8188_s27 + $0x1b8] sm:$0xff] }
 0x2bb   : > { %v7400_v4 = vpop.f32.mrb[221].mxu0  ;;  %v3233_v37 = vpop.f32.mrb[220].mxu1 }
 0x2bc   : > { %v7401_v44 = vadd.f32 %v7400_v4, %v7399_v60  ;;  %v7402_v43 = vpop.f32.mrb[222].mxu0  ;;  %v3235_v54 = vpop.f32.mrb[221].mxu1  ;;  %v6555_v60 = vcombine.high %v3338_v27, %v3342_v19 }
 0x2bd   : > { %v7403_v39 = vpop.f32.mrb[223].mxu0  ;;  %v3236_v7 = vpop.f32.mrb[222].mxu1 }
 0x2be   : > { %v7404_v35 = vadd.f32 %v7403_v39, %v7402_v43  ;;  %v3073_v22 = vadd.f32 %v7401_v44, %v9557_v46  ;;  %v3238_v33 = vpop.f32.mrb[223].mxu1  ;;  %v6546_v46 = vcombine.low %v3330_v26, %v3334_v16  ;;  %v3346_v16 = vld [vmem:[%s8188_s27 + $0x1d0] sm:$0xff]  ;;  %v3347_v39 = vld [vmem:[%s8188_s27 + $0x1d8] sm:$0xff] }
 0x2bf   : > { %4972 = vmatmul.mubr.bf16.gmra.mrb[72].mxu0 %v6538_v57  ;;  %v6557_v57 = vcombine.high %v3339_v14, %v3343_v58 }
 0x2c0   : > { %v9802_v47 = vadd.f32 %v3233_v37, %v3073_v22  ;;  %v3076_v0 = vadd.f32 %v7404_v35, %v9568_v36  ;;  %5133 = vmatmul.mubr.bf16.gmra.mrb[72].mxu1 %v6540_v3  ;;  %4979 = vmatprep.mubr.bf16.mxu0 %v6547_v20  ;;  %v6548_v36 = vcombine.low %v3331_v55, %v3335_v12  ;;  %v3350_v55 = vld [vmem:[%s8188_s27 + $0x1f0] sm:$0xff] }
 0x2c1   : > { %6711 = vmatprep.mubr.msk.bf16.mxu1 %vm1553_vm0, %v6549_v1 }
 0x2c2   : > { %v9808_v49 = vadd.f32 %v3236_v7, %v3076_v0  ;;  %v7405_v9 = vpop.f32.mrb[224].mxu0  ;;  %v3351_v7 = vld [vmem:[%s8188_s27 + $0x1f8] sm:$0xff] }
 0x2c3   : > { %v7406_v2 = vpop.f32.mrb[225].mxu0  ;;  %v3241_v28 = vpop.f32.mrb[224].mxu1 }
 0x2c4   : > { %v7407_v52 = vadd.f32 %v7406_v2, %v7405_v9  ;;  %v7408_v61 = vpop.f32.mrb[226].mxu0  ;;  %v3243_v18 = vpop.f32.mrb[225].mxu1  ;;  %v6563_v9 = vcombine.high %v3346_v16, %v3350_v55 }
 0x2c5   : > { %v7409_v4 = vpop.f32.mrb[227].mxu0  ;;  %v3244_v37 = vpop.f32.mrb[226].mxu1 }
 0x2c6   : > { %v7410_v44 = vadd.f32 %v7409_v4, %v7408_v61  ;;  %v3081_v43 = vadd.f32 %v7407_v52, %v9603_v5  ;;  %v3246_v54 = vpop.f32.mrb[227].mxu1  ;;  %v6554_v5 = vcombine.low %v3338_v27, %v3342_v19  ;;  %v3354_v19 = vld [vmem:[%s8188_s27 + $0x210] sm:$0xff]  ;;  %v3355_v4 = vld [vmem:[%s8188_s27 + $0x218] sm:$0xff] }
 0x2c7   : > { %4980 = vmatmul.mubr.bf16.gmra.mrb[76].mxu0 %v6546_v46  ;;  %v6565_v46 = vcombine.high %v3347_v39, %v3351_v7 }
 0x2c8   : > { %v9813_v3 = vadd.f32 %v3241_v28, %v3081_v43  ;;  %v3084_v26 = vadd.f32 %v7410_v44, %v9614_v32  ;;  %5141 = vmatmul.mubr.bf16.gmra.mrb[76].mxu1 %v6548_v36  ;;  %4987 = vmatprep.mubr.bf16.mxu0 %v6555_v60  ;;  %v6556_v32 = vcombine.low %v3339_v14, %v3343_v58  ;;  %v3358_v14 = vld [vmem:[%s8188_s27 + $0x230] sm:$0xff] }
 0x2c9   : > { %6712 = vmatprep.mubr.msk.bf16.mxu1 %vm1553_vm0, %v6557_v57 }
 0x2ca   : > { %v9819_v12 = vadd.f32 %v3244_v37, %v3084_v26  ;;  %v7411_v20 = vpop.f32.mrb[228].mxu0  ;;  %v3359_v37 = vld [vmem:[%s8188_s27 + $0x238] sm:$0xff] }
 0x2cb   : > { %v7412_v1 = vpop.f32.mrb[229].mxu0  ;;  %v3249_v35 = vpop.f32.mrb[228].mxu1 }
 0x2cc   : > { %v7413_v22 = vadd.f32 %v7412_v1, %v7411_v20  ;;  %v7414_v33 = vpop.f32.mrb[230].mxu0  ;;  %v3251_v0 = vpop.f32.mrb[229].mxu1  ;;  %v6571_v20 = vcombine.high %v3354_v19, %v3358_v14 }
 0x2cd   : > { %v7415_v2 = vpop.f32.mrb[231].mxu0  ;;  %v3252_v28 = vpop.f32.mrb[230].mxu1 }
 0x2ce   : > { %v7416_v52 = vadd.f32 %v7415_v2, %v7414_v33  ;;  %v3089_v61 = vadd.f32 %v7413_v22, %v9637_v59  ;;  %v3254_v18 = vpop.f32.mrb[231].mxu1  ;;  %v6562_v59 = vcombine.low %v3346_v16, %v3350_v55  ;;  %v3362_v55 = vld [vmem:[%s8188_s27 + $0x250] sm:$0xff]  ;;  %v3363_v2 = vld [vmem:[%s8188_s27 + $0x258] sm:$0xff] }
 0x2cf   : > { %4988 = vmatmul.mubr.bf16.gmra.mrb[80].mxu0 %v6554_v5  ;;  %v6573_v5 = vcombine.high %v3355_v4, %v3359_v37 }
 0x2d0   : > { %v9824_v36 = vadd.f32 %v3249_v35, %v3089_v61  ;;  %v3092_v27 = vadd.f32 %v7416_v52, %v9644_v51  ;;  %5149 = vmatmul.mubr.bf16.gmra.mrb[80].mxu1 %v6556_v32  ;;  %4995 = vmatprep.mubr.bf16.mxu0 %v6563_v9  ;;  %v6564_v51 = vcombine.low %v3347_v39, %v3351_v7  ;;  %v3366_v39 = vld [vmem:[%s8188_s27 + $0x270] sm:$0xff] }
 0x2d1   : > { %6713 = vmatprep.mubr.msk.bf16.mxu1 %vm1553_vm0, %v6565_v46 }
 0x2d2   : > { %v9830_v58 = vadd.f32 %v3252_v28, %v3092_v27  ;;  %v7417_v60 = vpop.f32.mrb[232].mxu0  ;;  %v3367_v28 = vld [vmem:[%s8188_s27 + $0x278] sm:$0xff] }
 0x2d3   : > { %v7418_v57 = vpop.f32.mrb[233].mxu0  ;;  %v3257_v44 = vpop.f32.mrb[232].mxu1 }
 0x2d4   : > { %v7419_v43 = vadd.f32 %v7418_v57, %v7417_v60  ;;  %v7420_v54 = vpop.f32.mrb[234].mxu0  ;;  %v3259_v26 = vpop.f32.mrb[233].mxu1  ;;  %v6579_v60 = vcombine.high %v3362_v55, %v3366_v39 }
 0x2d5   : > { %v7421_v1 = vpop.f32.mrb[235].mxu0  ;;  %v3260_v35 = vpop.f32.mrb[234].mxu1 }
 0x2d6   : > { %v7422_v22 = vadd.f32 %v7421_v1, %v7420_v54  ;;  %v3097_v33 = vadd.f32 %v7419_v43, %v9658_v42  ;;  %v3262_v0 = vpop.f32.mrb[235].mxu1  ;;  %v6570_v42 = vcombine.low %v3354_v19, %v3358_v14  ;;  %v3370_v14 = vld [vmem:[%s8188_s27 + $0x290] sm:$0xff]  ;;  %v3371_v1 = vld [vmem:[%s8188_s27 + $0x298] sm:$0xff] }
 0x2d7   : > { %4996 = vmatmul.mubr.bf16.gmra.mrb[84].mxu0 %v6562_v59  ;;  %v6581_v59 = vcombine.high %v3363_v2, %v3367_v28 }
 0x2d8   : > { %v9835_v32 = vadd.f32 %v3257_v44, %v3097_v33  ;;  %v3100_v16 = vadd.f32 %v7422_v22, %v9665_v31  ;;  %5157 = vmatmul.mubr.bf16.gmra.mrb[84].mxu1 %v6564_v51  ;;  %5003 = vmatprep.mubr.bf16.mxu0 %v6571_v20  ;;  %v6572_v31 = vcombine.low %v3355_v4, %v3359_v37  ;;  %v3374_v4 = vld [vmem:[%s8188_s27 + $0x2b0] sm:$0xff] }
 0x2d9   : > { %6714 = vmatprep.mubr.msk.bf16.mxu1 %vm1553_vm0, %v6573_v5 }
 0x2da   : > { %10620 = vst [vmem:[#allocation4_spill] sm:$0xff] %v9835_v32  ;;  %v9841_v7 = vadd.f32 %v3260_v35, %v3100_v16  ;;  %v7423_v9 = vpop.f32.mrb[236].mxu0  ;;  %v3375_v35 = vld [vmem:[%s8188_s27 + $0x2b8] sm:$0xff] }
 0x2db   : > { %v7424_v46 = vpop.f32.mrb[237].mxu0  ;;  %v3265_v52 = vpop.f32.mrb[236].mxu1 }
 0x2dc   : > { %10621 = vst [vmem:[#allocation5_spill] sm:$0xff] %v9841_v7  ;;  %v7425_v61 = vadd.f32 %v7424_v46, %v7423_v9  ;;  %v7426_v18 = vpop.f32.mrb[238].mxu0  ;;  %v3267_v27 = vpop.f32.mrb[237].mxu1  ;;  %v6587_v9 = vcombine.high %v3370_v14, %v3374_v4 }
 0x2dd   : > { %v7427_v57 = vpop.f32.mrb[239].mxu0  ;;  %v3268_v44 = vpop.f32.mrb[238].mxu1 }
 0x2de   : > { %v7428_v43 = vadd.f32 %v7427_v57, %v7426_v18  ;;  %v3105_v54 = vadd.f32 %v7425_v61, %v9676_v17  ;;  %v3270_v26 = vpop.f32.mrb[239].mxu1  ;;  %v6578_v17 = vcombine.low %v3362_v55, %v3366_v39  ;;  %v3378_v39 = vld [vmem:[%s8188_s27 + $0x2d0] sm:$0xff]  ;;  %v3379_v57 = vld [vmem:[%s8188_s27 + $0x2d8] sm:$0xff] }
 0x2df   : > { %5004 = vmatmul.mubr.bf16.gmra.mrb[88].mxu0 %v6570_v42  ;;  %v6589_v42 = vcombine.high %v3371_v1, %v3375_v35 }
 0x2e0   : > { %v9846_v51 = vadd.f32 %v3265_v52, %v3105_v54  ;;  %v3108_v19 = vadd.f32 %v7428_v43, %v9683_v56  ;;  %5165 = vmatmul.mubr.bf16.gmra.mrb[88].mxu1 %v6572_v31  ;;  %5011 = vmatprep.mubr.bf16.mxu0 %v6579_v60  ;;  %v6580_v56 = vcombine.low %v3363_v2, %v3367_v28  ;;  %v3382_v2 = vld [vmem:[%s8188_s27 + $0x2f0] sm:$0xff] }
 0x2e1   : > { %6715 = vmatprep.mubr.msk.bf16.mxu1 %vm1553_vm0, %v6581_v59 }
 0x2e2   : > { %10622 = vst [vmem:[#allocation6_spill] sm:$0xff] %v9846_v51  ;;  %v9852_v37 = vadd.f32 %v3268_v44, %v3108_v19  ;;  %v7429_v20 = vpop.f32.mrb[240].mxu0  ;;  %v3383_v44 = vld [vmem:[%s8188_s27 + $0x2f8] sm:$0xff] }
 0x2e3   : > { %v7430_v5 = vpop.f32.mrb[241].mxu0  ;;  %v3273_v22 = vpop.f32.mrb[240].mxu1 }
 0x2e4   : > { %10623 = vst [vmem:[#allocation7_spill] sm:$0xff] %v9852_v37  ;;  %v7431_v33 = vadd.f32 %v7430_v5, %v7429_v20  ;;  %v7432_v0 = vpop.f32.mrb[242].mxu0  ;;  %v3275_v16 = vpop.f32.mrb[241].mxu1  ;;  %v6595_v20 = vcombine.high %v3378_v39, %v3382_v2 }
 0x2e5   : > { %v7433_v46 = vpop.f32.mrb[243].mxu0  ;;  %v3276_v52 = vpop.f32.mrb[242].mxu1 }
 0x2e6   : > { %v7434_v61 = vadd.f32 %v7433_v46, %v7432_v0  ;;  %v3113_v18 = vadd.f32 %v7431_v33, %v9690_v45  ;;  %v3278_v27 = vpop.f32.mrb[243].mxu1  ;;  %v6586_v45 = vcombine.low %v3370_v14, %v3374_v4  ;;  %v3386_v4 = vld [vmem:[%s8188_s27 + $0x310] sm:$0xff]  ;;  %v3387_v46 = vld [vmem:[%s8188_s27 + $0x318] sm:$0xff] }
 0x2e7   : > { %5012 = vmatmul.mubr.bf16.gmra.mrb[92].mxu0 %v6578_v17  ;;  %v6597_v17 = vcombine.high %v3379_v57, %v3383_v44 }
 0x2e8   : > { %v9857_v31 = vadd.f32 %v3273_v22, %v3113_v18  ;;  %v3116_v55 = vadd.f32 %v7434_v61, %v9694_v30  ;;  %5173 = vmatmul.mubr.bf16.gmra.mrb[92].mxu1 %v6580_v56  ;;  %5019 = vmatprep.mubr.bf16.mxu0 %v6587_v9  ;;  %v6588_v30 = vcombine.low %v3371_v1, %v3375_v35  ;;  %v3390_v1 = vld [vmem:[%s8188_s27 + $0x330] sm:$0xff] }
 0x2e9   : > { %6716 = vmatprep.mubr.msk.bf16.mxu1 %vm1553_vm0, %v6589_v42 }
 0x2ea   : > { %10624 = vst [vmem:[#allocation8_spill] sm:$0xff] %v9857_v31  ;;  %v9863_v28 = vadd.f32 %v3276_v52, %v3116_v55  ;;  %v7435_v60 = vpop.f32.mrb[244].mxu0  ;;  %v3391_v52 = vld [vmem:[%s8188_s27 + $0x338] sm:$0xff] }
 0x2eb   : > { %v7436_v59 = vpop.f32.mrb[245].mxu0  ;;  %v3281_v43 = vpop.f32.mrb[244].mxu1 }
 0x2ec   : > { %10625 = vst [vmem:[#allocation77_spill] sm:$0xff] %v9863_v28  ;;  %v7437_v54 = vadd.f32 %v7436_v59, %v7435_v60  ;;  %v7438_v26 = vpop.f32.mrb[246].mxu0  ;;  %v3283_v19 = vpop.f32.mrb[245].mxu1  ;;  %v6603_v60 = vcombine.high %v3386_v4, %v3390_v1 }
 0x2ed   : > { %v7439_v5 = vpop.f32.mrb[247].mxu0  ;;  %v3284_v22 = vpop.f32.mrb[246].mxu1 }
 0x2ee   : > { %v7440_v33 = vadd.f32 %v7439_v5, %v7438_v26  ;;  %v3121_v0 = vadd.f32 %v7437_v54, %v9700_v23  ;;  %v3286_v16 = vpop.f32.mrb[247].mxu1  ;;  %v6594_v23 = vcombine.low %v3378_v39, %v3382_v2  ;;  %v3394_v2 = vld [vmem:[%s8188_s27 + $0x350] sm:$0xff]  ;;  %v3395_v5 = vld [vmem:[%s8188_s27 + $0x358] sm:$0xff] }
 0x2ef   : > { %5020 = vmatmul.mubr.bf16.gmra.mrb[96].mxu0 %v6586_v45  ;;  %v6605_v45 = vcombine.high %v3387_v46, %v3391_v52 }
 0x2f0   : > { %v9868_v56 = vadd.f32 %v3281_v43, %v3121_v0  ;;  %v3124_v14 = vadd.f32 %v7440_v33, %v9704_v48  ;;  %5181 = vmatmul.mubr.bf16.gmra.mrb[96].mxu1 %v6588_v30  ;;  %5027 = vmatprep.mubr.bf16.mxu0 %v6595_v20  ;;  %v6596_v48 = vcombine.low %v3379_v57, %v3383_v44  ;;  %v3398_v57 = vld [vmem:[%s8188_s27 + $0x370] sm:$0xff] }
 0x2f1   : > { %6717 = vmatprep.mubr.msk.bf16.mxu1 %vm1553_vm0, %v6597_v17 }
 0x2f2   : > { %10626 = vst [vmem:[#allocation9_spill] sm:$0xff] %v9868_v56  ;;  %v9874_v35 = vadd.f32 %v3284_v22, %v3124_v14  ;;  %v7441_v9 = vpop.f32.mrb[248].mxu0  ;;  %v3399_v22 = vld [vmem:[%s8188_s27 + $0x378] sm:$0xff] }
 0x2f3   : > { %v7442_v42 = vpop.f32.mrb[249].mxu0  ;;  %v3289_v61 = vpop.f32.mrb[248].mxu1 }
 0x2f4   : > { %10627 = vst [vmem:[#allocation78_spill] sm:$0xff] %v9874_v35  ;;  %v7443_v18 = vadd.f32 %v7442_v42, %v7441_v9  ;;  %v7444_v27 = vpop.f32.mrb[250].mxu0  ;;  %v3291_v55 = vpop.f32.mrb[249].mxu1  ;;  %v6611_v9 = vcombine.high %v3394_v2, %v3398_v57 }
 0x2f5   : > { %v7445_v59 = vpop.f32.mrb[251].mxu0  ;;  %v3292_v43 = vpop.f32.mrb[250].mxu1 }
 0x2f6   : > { %v7446_v54 = vadd.f32 %v7445_v59, %v7444_v27  ;;  %v3129_v26 = vadd.f32 %v7443_v18, %v9710_v11  ;;  %v3294_v19 = vpop.f32.mrb[251].mxu1  ;;  %v6602_v11 = vcombine.low %v3386_v4, %v3390_v1  ;;  %v3402_v1 = vld [vmem:[%s8188_s27 + $0x390] sm:$0xff]  ;;  %v3403_v59 = vld [vmem:[%s8188_s27 + $0x398] sm:$0xff] }
 0x2f7   : > { %5028 = vmatmul.mubr.bf16.gmra.mrb[100].mxu0 %v6594_v23  ;;  %v6613_v23 = vcombine.high %v3395_v5, %v3399_v22 }
 0x2f8   : > { %v9879_v30 = vadd.f32 %v3289_v61, %v3129_v26  ;;  %v3132_v39 = vadd.f32 %v7446_v54, %v9714_v15  ;;  %5189 = vmatmul.mubr.bf16.gmra.mrb[100].mxu1 %v6596_v48  ;;  %5035 = vmatprep.mubr.bf16.mxu0 %v6603_v60  ;;  %v6604_v15 = vcombine.low %v3387_v46, %v3391_v52  ;;  %v3406_v46 = vld [vmem:[%s8188_s27 + $0x3b0] sm:$0xff] }
 0x2f9   : > { %6718 = vmatprep.mubr.msk.bf16.mxu1 %vm1553_vm0, %v6605_v45 }
 0x2fa   : > { %10628 = vst [vmem:[#allocation10_spill] sm:$0xff] %v9879_v30  ;;  %v9885_v44 = vadd.f32 %v3292_v43, %v3132_v39  ;;  %v7447_v20 = vpop.f32.mrb[252].mxu0  ;;  %v3407_v43 = vld [vmem:[%s8188_s27 + $0x3b8] sm:$0xff] }
 0x2fb   : > { %v7448_v17 = vpop.f32.mrb[253].mxu0  ;;  %v3297_v33 = vpop.f32.mrb[252].mxu1 }
 0x2fc   : > { %10629 = vst [vmem:[#allocation11_spill] sm:$0xff] %v9885_v44  ;;  %v7449_v0 = vadd.f32 %v7448_v17, %v7447_v20  ;;  %v7450_v16 = vpop.f32.mrb[254].mxu0  ;;  %v3299_v14 = vpop.f32.mrb[253].mxu1  ;;  %v6612_v20 = vcombine.low %v3395_v5, %v3399_v22  ;;  %v3414_v5 = vld [vmem:[%s8188_s27 + $0x3f0] sm:$0xff] }
 0x2fd   : > { %v7451_v42 = vpop.f32.mrb[255].mxu0  ;;  %v3300_v61 = vpop.f32.mrb[254].mxu1 }
 0x2fe   : > { %v7452_v18 = vadd.f32 %v7451_v42, %v7450_v16  ;;  %v3137_v27 = vadd.f32 %v7449_v0, %v9720_v53  ;;  %v3302_v55 = vpop.f32.mrb[255].mxu1  ;;  %v6610_v53 = vcombine.low %v3394_v2, %v3398_v57  ;;  %v6621_v0 = vcombine.high %v3403_v59, %v3407_v43  ;;  %v3410_v57 = vld [vmem:[%s8188_s27 + $0x3d0] sm:$0xff]  ;;  %v3411_v42 = vld [vmem:[%s8188_s27 + $0x3d8] sm:$0xff] }
 0x2ff   : > { %5036 = vmatmul.mubr.bf16.gmra.mrb[104].mxu0 %v6602_v11 }
 0x300   : > { %v9890_v48 = vadd.f32 %v3297_v33, %v3137_v27  ;;  %v3140_v4 = vadd.f32 %v7452_v18, %v9724_v62  ;;  %5197 = vmatmul.mubr.bf16.gmra.mrb[104].mxu1 %v6604_v15  ;;  %5043 = vmatprep.mubr.bf16.mxu0 %v6611_v9  ;;  %v6619_v62 = vcombine.high %v3402_v1, %v3406_v46 }
 0x301   : > { %6719 = vmatprep.mubr.msk.bf16.mxu1 %vm1553_vm0, %v6613_v23  ;;  %v6618_v27 = vcombine.low %v3402_v1, %v3406_v46  ;;  %v3418_v46 = vld [vmem:[%s8188_s27 + $0x410] sm:$0xff] }
 0x302   : > { %10630 = vst [vmem:[#allocation12_spill] sm:$0xff] %v9890_v48  ;;  %v9896_v52 = vadd.f32 %v3300_v61, %v3140_v4  ;;  %v7469_v60 = vpop.f32.mrb[0].mxu0  ;;  %v3415_v61 = vld [vmem:[%s8188_s27 + $0x3f8] sm:$0xff] }
 0x303   : > { %v7581_v45 = vpop.f32.mrb[0].mxu1  ;;  %v7470_v54 = vpop.f32.mrb[1].mxu0 }
 0x304   : > { %10631 = vst [vmem:[#allocation83_spill] sm:$0xff] %v9896_v52  ;;  %v7471_v26 = vadd.f32 %v7470_v54, %v7469_v60  ;;  %v7582_v19 = vpop.f32.mrb[1].mxu1  ;;  %v7472_v39 = vpop.f32.mrb[2].mxu0  ;;  %v6627_v54 = vcombine.high %v3410_v57, %v3414_v5 }
 0x305   : > { %v7583_v17 = vadd.f32 %v7582_v19, %v7581_v45  ;;  %v7584_v33 = vpop.f32.mrb[2].mxu1  ;;  %v7473_v11 = vpop.f32.mrb[3].mxu0  ;;  %v6620_v45 = vcombine.low %v3403_v59, %v3407_v43  ;;  %v3422_v59 = vld [vmem:[%s8188_s27 + $0x430] sm:$0xff] }
 0x306   : > { %v7474_v16 = vadd.f32 %v7473_v11, %v7472_v39  ;;  %v7585_v14 = vpop.f32.mrb[3].mxu1  ;;  %v6629_v39 = vcombine.high %v3411_v42, %v3415_v61  ;;  %v3419_v11 = vld [vmem:[%s8188_s27 + $0x418] sm:$0xff] }
 0x307   : > { %v9900_v15 = vadd.f32 %v7583_v17, %v7471_v26  ;;  %v7586_v9 = vadd.f32 %v7585_v14, %v7584_v33  ;;  %5044 = vmatmul.mubr.bf16.gmra.mrb[108].mxu0 %v6610_v53 }
 0x308   : > { %5205 = vmatmul.mubr.bf16.gmra.mrb[108].mxu1 %v6612_v20  ;;  %5051 = vmatprep.mubr.bf16.mxu0 %v6619_v62 }
 0x309   : > { %v9902_v2 = vadd.f32 %v7586_v9, %v7474_v16  ;;  %6720 = vmatprep.mubr.msk.bf16.mxu1 %vm1553_vm0, %v6621_v0  ;;  %v3423_v0 = vld [vmem:[%s8188_s27 + $0x438] sm:$0xff]  ;;  %v6626_v9 = vcombine.low %v3410_v57, %v3414_v5  ;;  %v3426_v5 = vld [vmem:[%s8188_s27 + $0x450] sm:$0xff] }
 0x30a   : > { %v7475_v22 = vpop.f32.mrb[4].mxu0 }
 0x30b   : > { %v7587_v23 = vpop.f32.mrb[4].mxu1  ;;  %v7476_v18 = vpop.f32.mrb[5].mxu0 }
 0x30c   : > { %v7477_v55 = vadd.f32 %v7476_v18, %v7475_v22  ;;  %v7588_v4 = vpop.f32.mrb[5].mxu1  ;;  %v7478_v60 = vpop.f32.mrb[6].mxu0 }
 0x30d   : > { %v7589_v53 = vadd.f32 %v7588_v4, %v7587_v23  ;;  %v7590_v26 = vpop.f32.mrb[6].mxu1  ;;  %v7479_v19 = vpop.f32.mrb[7].mxu0 }
 0x30e   : > { %v7480_v20 = vadd.f32 %v7479_v19, %v7478_v60  ;;  %v7591_v62 = vpop.f32.mrb[7].mxu1 }
 0x30f   : > { %v9909_v17 = vadd.f32 %v7589_v53, %v7477_v55  ;;  %v7592_v33 = vadd.f32 %v7591_v62, %v7590_v26  ;;  %5052 = vmatmul.mubr.bf16.gmra.mrb[112].mxu0 %v6618_v27  ;;  %v6628_v55 = vcombine.low %v3411_v42, %v3415_v61  ;;  %v6635_v27 = vcombine.high %v3418_v46, %v3422_v59  ;;  %v3430_v42 = vld [vmem:[%s8188_s27 + $0x470] sm:$0xff]  ;;  %v3431_v62 = vld [vmem:[%s8188_s27 + $0x478] sm:$0xff] }
 0x310   : > { %5213 = vmatmul.mubr.bf16.gmra.mrb[112].mxu1 %v6620_v45  ;;  %5059 = vmatprep.mubr.bf16.mxu0 %v6627_v54  ;;  %v6637_v54 = vcombine.high %v3419_v11, %v3423_v0 }
 0x311   : > { %v9911_v1 = vadd.f32 %v7592_v33, %v7480_v20  ;;  %6721 = vmatprep.mubr.msk.bf16.mxu1 %vm1553_vm0, %v6629_v39  ;;  %v3427_v20 = vld [vmem:[%s8188_s27 + $0x458] sm:$0xff] }
 0x312   : > { %v7481_v43 = vpop.f32.mrb[8].mxu0 }
 0x313   : > { %v7593_v16 = vpop.f32.mrb[8].mxu1  ;;  %v7482_v14 = vpop.f32.mrb[9].mxu0 }
 0x314   : > { %v7483_v22 = vadd.f32 %v7482_v14, %v7481_v43  ;;  %v7594_v23 = vpop.f32.mrb[9].mxu1  ;;  %v7484_v18 = vpop.f32.mrb[10].mxu0 }
 0x315   : > { %v7595_v4 = vadd.f32 %v7594_v23, %v7593_v16  ;;  %v7596_v60 = vpop.f32.mrb[10].mxu1  ;;  %v7485_v45 = vpop.f32.mrb[11].mxu0  ;;  %v6634_v16 = vcombine.low %v3418_v46, %v3422_v59 }
 0x316   : > { %v7486_v53 = vadd.f32 %v7485_v45, %v7484_v18  ;;  %v7597_v26 = vpop.f32.mrb[11].mxu1  ;;  %v6636_v18 = vcombine.low %v3419_v11, %v3423_v0  ;;  %v6642_v0 = vcombine.low %v3426_v5, %v3430_v42 }
 0x317   : > { %v9918_v19 = vadd.f32 %v7595_v4, %v7483_v22  ;;  %v7598_v39 = vadd.f32 %v7597_v26, %v7596_v60  ;;  %5060 = vmatmul.mubr.bf16.gmra.mrb[116].mxu0 %v6626_v9  ;;  %v6643_v4 = vcombine.high %v3426_v5, %v3430_v42  ;;  %v6645_v60 = vcombine.high %v3427_v20, %v3431_v62 }
 0x318   : > { %5221 = vmatmul.mubr.bf16.gmra.mrb[116].mxu1 %v6628_v55  ;;  %5067 = vmatprep.mubr.bf16.mxu0 %v6635_v27 }
 0x319   : > { %v9920_v57 = vadd.f32 %v7598_v39, %v7486_v53  ;;  %6722 = vmatprep.mubr.msk.bf16.mxu1 %vm1553_vm0, %v6637_v54 }
 0x31a   : > { %v7487_v61 = vpop.f32.mrb[12].mxu0 }
 0x31b   : > { %v7599_v33 = vpop.f32.mrb[12].mxu1  ;;  %v7488_v43 = vpop.f32.mrb[13].mxu0 }
 0x31c   : > { %v7489_v14 = vadd.f32 %v7488_v43, %v7487_v61  ;;  %v7600_v23 = vpop.f32.mrb[13].mxu1  ;;  %v7490_v22 = vpop.f32.mrb[14].mxu0 }
 0x31d   : > { %v7601_v9 = vadd.f32 %v7600_v23, %v7599_v33  ;;  %v7602_v55 = vpop.f32.mrb[14].mxu1  ;;  %v7491_v27 = vpop.f32.mrb[15].mxu0  ;;  %v6644_v23 = vcombine.low %v3427_v20, %v3431_v62 }
 0x31e   : > { %v7492_v45 = vadd.f32 %v7491_v27, %v7490_v22  ;;  %v7603_v53 = vpop.f32.mrb[15].mxu1 }
 0x31f   : > { %v9927_v54 = vadd.f32 %v7601_v9, %v7489_v14  ;;  %v7604_v26 = vadd.f32 %v7603_v53, %v7602_v55  ;;  %5068 = vmatmul.mubr.bf16.gmra.mrb[120].mxu0 %v6634_v16 }
 0x320   : > { %5229 = vmatmul.mubr.bf16.gmra.mrb[120].mxu1 %v6636_v18  ;;  %5075 = vmatprep.mubr.bf16.mxu0 %v6643_v4 }
 0x321   : > { %v9929_v39 = vadd.f32 %v7604_v26, %v7492_v45  ;;  %6723 = vmatprep.mubr.msk.bf16.mxu1 %vm1553_vm0, %v6645_v60 }
 0x322   : > { %v7493_v46 = vpop.f32.mrb[16].mxu0 }
 0x323   : > { %v7605_v59 = vpop.f32.mrb[16].mxu1  ;;  %v7494_v11 = vpop.f32.mrb[17].mxu0 }
 0x324   : > { %v7495_v61 = vadd.f32 %v7494_v11, %v7493_v46  ;;  %v7606_v33 = vpop.f32.mrb[17].mxu1  ;;  %v7496_v43 = vpop.f32.mrb[18].mxu0 }
 0x325   : > { %v7607_v22 = vadd.f32 %v7606_v33, %v7605_v59  ;;  %v7608_v27 = vpop.f32.mrb[18].mxu1  ;;  %v7497_v14 = vpop.f32.mrb[19].mxu0 }
 0x326   : > { %v7498_v9 = vadd.f32 %v7497_v14, %v7496_v43  ;;  %v7609_v55 = vpop.f32.mrb[19].mxu1 }
 0x327   : > { %v9932_v16 = vadd.f32 %v7607_v22, %v7495_v61  ;;  %v7610_v18 = vadd.f32 %v7609_v55, %v7608_v27  ;;  %5076 = vmatmul.mubr.bf16.gmra.mrb[124].mxu0 %v6642_v0 }
 0x328   : > { %5237 = vmatmul.mubr.bf16.gmra.mrb[124].mxu1 %v6644_v23 }
 0x329   : > { %v9934_v4 = vadd.f32 %v7610_v18, %v7498_v9 }
 0x32a   : > { %v7499_v60 = vpop.f32.mrb[20].mxu0 }
 0x32b   : > { %v7611_v45 = vpop.f32.mrb[20].mxu1  ;;  %v7500_v53 = vpop.f32.mrb[21].mxu0 }
 0x32c   : > { %v7501_v5 = vadd.f32 %v7500_v53, %v7499_v60  ;;  %v7612_v42 = vpop.f32.mrb[21].mxu1  ;;  %v7502_v26 = vpop.f32.mrb[22].mxu0 }
 0x32d   : > { %v7613_v46 = vadd.f32 %v7612_v42, %v7611_v45  ;;  %v7614_v20 = vpop.f32.mrb[22].mxu1  ;;  %v7503_v62 = vpop.f32.mrb[23].mxu0 }
 0x32e   : > { %v7504_v59 = vadd.f32 %v7503_v62, %v7502_v26  ;;  %v7615_v11 = vpop.f32.mrb[23].mxu1 }
 0x32f   : > { %v9936_v33 = vadd.f32 %v7613_v46, %v7501_v5  ;;  %v7616_v61 = vadd.f32 %v7615_v11, %v7614_v20 }
 0x331   : > { %v9938_v43 = vadd.f32 %v7616_v61, %v7504_v59 }
 0x332   : > { %v7505_v0 = vpop.f32.mrb[24].mxu0 }
 0x333   : > { %v7617_v23 = vpop.f32.mrb[24].mxu1  ;;  %v7506_v22 = vpop.f32.mrb[25].mxu0 }
 0x334   : > { %v7507_v27 = vadd.f32 %v7506_v22, %v7505_v0  ;;  %v7618_v14 = vpop.f32.mrb[25].mxu1  ;;  %v7508_v9 = vpop.f32.mrb[26].mxu0 }
 0x335   : > { %v7619_v55 = vadd.f32 %v7618_v14, %v7617_v23  ;;  %v7620_v18 = vpop.f32.mrb[26].mxu1  ;;  %v7509_v60 = vpop.f32.mrb[27].mxu0 }
 0x336   : > { %v7510_v53 = vadd.f32 %v7509_v60, %v7508_v9  ;;  %v7621_v45 = vpop.f32.mrb[27].mxu1 }
 0x337   : > { %v9940_v42 = vadd.f32 %v7619_v55, %v7507_v27  ;;  %v7622_v26 = vadd.f32 %v7621_v45, %v7620_v18 }
 0x339   : > { %v9942_v62 = vadd.f32 %v7622_v26, %v7510_v53 }
 0x33a   : > { %v7511_v5 = vpop.f32.mrb[28].mxu0 }
 0x33b   : > { %v7623_v46 = vpop.f32.mrb[28].mxu1  ;;  %v7512_v20 = vpop.f32.mrb[29].mxu0 }
 0x33c   : > { %v7513_v59 = vadd.f32 %v7512_v20, %v7511_v5  ;;  %v7624_v11 = vpop.f32.mrb[29].mxu1  ;;  %v7514_v61 = vpop.f32.mrb[30].mxu0 }
 0x33d   : > { %v7625_v52 = vadd.f32 %v7624_v11, %v7623_v46  ;;  %v7626_v0 = vpop.f32.mrb[30].mxu1  ;;  %v7515_v22 = vpop.f32.mrb[31].mxu0 }
 0x33e   : > { %v7516_v48 = vadd.f32 %v7515_v22, %v7514_v61  ;;  %v7627_v23 = vpop.f32.mrb[31].mxu1 }
 0x33f   : > { %v9944_v14 = vadd.f32 %v7625_v52, %v7513_v59  ;;  %v7628_v9 = vadd.f32 %v7627_v23, %v7626_v0 }
 0x341   : > { %v9946_v60 = vadd.f32 %v7628_v9, %v7516_v48 }
 0x342   : > { %v7517_v27 = vpop.f32.mrb[32].mxu0 }
 0x343   : > { %v7629_v55 = vpop.f32.mrb[32].mxu1  ;;  %v7518_v18 = vpop.f32.mrb[33].mxu0 }
 0x344   : > { %v7519_v53 = vadd.f32 %v7518_v18, %v7517_v27  ;;  %v7630_v45 = vpop.f32.mrb[33].mxu1  ;;  %v7520_v26 = vpop.f32.mrb[34].mxu0 }
 0x345   : > { %v7631_v44 = vadd.f32 %v7630_v45, %v7629_v55  ;;  %v7632_v5 = vpop.f32.mrb[34].mxu1  ;;  %v7521_v20 = vpop.f32.mrb[35].mxu0 }
 0x346   : > { %v7522_v30 = vadd.f32 %v7521_v20, %v7520_v26  ;;  %v7633_v46 = vpop.f32.mrb[35].mxu1 }
 0x347   : > { %v9948_v11 = vadd.f32 %v7631_v44, %v7519_v53  ;;  %v7634_v61 = vadd.f32 %v7633_v46, %v7632_v5 }
 0x349   : > { %v9950_v22 = vadd.f32 %v7634_v61, %v7522_v30 }
 0x34a   : > { %v7523_v52 = vpop.f32.mrb[36].mxu0 }
 0x34b   : > { %v7635_v59 = vpop.f32.mrb[36].mxu1  ;;  %v7524_v48 = vpop.f32.mrb[37].mxu0 }
 0x34c   : > { %v7525_v0 = vadd.f32 %v7524_v48, %v7523_v52  ;;  %v7636_v23 = vpop.f32.mrb[37].mxu1  ;;  %v7526_v9 = vpop.f32.mrb[38].mxu0 }
 0x34d   : > { %v7637_v35 = vadd.f32 %v7636_v23, %v7635_v59  ;;  %v7638_v27 = vpop.f32.mrb[38].mxu1  ;;  %v7527_v18 = vpop.f32.mrb[39].mxu0 }
 0x34e   : > { %v7528_v56 = vadd.f32 %v7527_v18, %v7526_v9  ;;  %v7639_v55 = vpop.f32.mrb[39].mxu1 }
 0x34f   : > { %v9952_v45 = vadd.f32 %v7637_v35, %v7525_v0  ;;  %v7640_v26 = vadd.f32 %v7639_v55, %v7638_v27 }
 0x351   : > { %v9954_v20 = vadd.f32 %v7640_v26, %v7528_v56 }
 0x352   : > { %v7529_v44 = vpop.f32.mrb[40].mxu0 }
 0x353   : > { %v7641_v53 = vpop.f32.mrb[40].mxu1  ;;  %v7530_v30 = vpop.f32.mrb[41].mxu0 }
 0x354   : > { %v7531_v5 = vadd.f32 %v7530_v30, %v7529_v44  ;;  %v7642_v46 = vpop.f32.mrb[41].mxu1  ;;  %v7532_v61 = vpop.f32.mrb[42].mxu0 }
 0x355   : > { %v7643_v28 = vadd.f32 %v7642_v46, %v7641_v53  ;;  %v7644_v52 = vpop.f32.mrb[42].mxu1  ;;  %v7533_v48 = vpop.f32.mrb[43].mxu0 }
 0x356   : > { %v7534_v31 = vadd.f32 %v7533_v48, %v7532_v61  ;;  %v7645_v59 = vpop.f32.mrb[43].mxu1 }
 0x357   : > { %v9956_v23 = vadd.f32 %v7643_v28, %v7531_v5  ;;  %v7646_v9 = vadd.f32 %v7645_v59, %v7644_v52 }
 0x359   : > { %v9958_v18 = vadd.f32 %v7646_v9, %v7534_v31 }
 0x35a   : > { %v7535_v35 = vpop.f32.mrb[44].mxu0 }
 0x35b   : > { %v7647_v0 = vpop.f32.mrb[44].mxu1  ;;  %v7536_v56 = vpop.f32.mrb[45].mxu0 }
 0x35c   : > { %v7537_v27 = vadd.f32 %v7536_v56, %v7535_v35  ;;  %v7648_v55 = vpop.f32.mrb[45].mxu1  ;;  %v7538_v26 = vpop.f32.mrb[46].mxu0 }
 0x35d   : > { %v7649_v37 = vadd.f32 %v7648_v55, %v7647_v0  ;;  %v7650_v44 = vpop.f32.mrb[46].mxu1  ;;  %v7539_v30 = vpop.f32.mrb[47].mxu0 }
 0x35e   : > { %v7540_v51 = vadd.f32 %v7539_v30, %v7538_v26  ;;  %v7651_v53 = vpop.f32.mrb[47].mxu1 }
 0x35f   : > { %v9960_v46 = vadd.f32 %v7649_v37, %v7537_v27  ;;  %v7652_v61 = vadd.f32 %v7651_v53, %v7650_v44 }
 0x361   : > { %10632 = vst [vmem:[#allocation13_spill] sm:$0xff] %v9960_v46  ;;  %v9962_v48 = vadd.f32 %v7652_v61, %v7540_v51 }
 0x362   : > { %v7541_v28 = vpop.f32.mrb[48].mxu0 }
 0x363   : > { %10633 = vst [vmem:[#allocation84_spill] sm:$0xff] %v9962_v48  ;;  %v7653_v5 = vpop.f32.mrb[48].mxu1  ;;  %v7542_v31 = vpop.f32.mrb[49].mxu0 }
 0x364   : > { %v7543_v52 = vadd.f32 %v7542_v31, %v7541_v28  ;;  %v7654_v59 = vpop.f32.mrb[49].mxu1  ;;  %v7544_v9 = vpop.f32.mrb[50].mxu0 }
 0x365   : > { %v7655_v7 = vadd.f32 %v7654_v59, %v7653_v5  ;;  %v7656_v35 = vpop.f32.mrb[50].mxu1  ;;  %v7545_v56 = vpop.f32.mrb[51].mxu0 }
 0x366   : > { %v7546_v32 = vadd.f32 %v7545_v56, %v7544_v9  ;;  %v7657_v0 = vpop.f32.mrb[51].mxu1 }
 0x367   : > { %v9964_v55 = vadd.f32 %v7655_v7, %v7543_v52  ;;  %v7658_v26 = vadd.f32 %v7657_v0, %v7656_v35 }
 0x369   : > { %10634 = vst [vmem:[#allocation14_spill] sm:$0xff] %v9964_v55  ;;  %v9966_v30 = vadd.f32 %v7658_v26, %v7546_v32 }
 0x36a   : > { %v7547_v37 = vpop.f32.mrb[52].mxu0 }
 0x36b   : > { %10635 = vst [vmem:[#allocation15_spill] sm:$0xff] %v9966_v30  ;;  %v7659_v27 = vpop.f32.mrb[52].mxu1  ;;  %v7548_v51 = vpop.f32.mrb[53].mxu0 }
 0x36c   : > { %v7549_v44 = vadd.f32 %v7548_v51, %v7547_v37  ;;  %v7660_v53 = vpop.f32.mrb[53].mxu1  ;;  %v7550_v61 = vpop.f32.mrb[54].mxu0 }
 0x36d   : > { %v7661_v48 = vadd.f32 %v7660_v53, %v7659_v27  ;;  %v7662_v28 = vpop.f32.mrb[54].mxu1  ;;  %v7551_v31 = vpop.f32.mrb[55].mxu0 }
 0x36e   : > { %v7552_v46 = vadd.f32 %v7551_v31, %v7550_v61  ;;  %v7663_v5 = vpop.f32.mrb[55].mxu1 }
 0x36f   : > { %v9968_v59 = vadd.f32 %v7661_v48, %v7549_v44  ;;  %v7664_v9 = vadd.f32 %v7663_v5, %v7662_v28 }
 0x371   : > { %10636 = vst [vmem:[#allocation16_spill] sm:$0xff] %v9968_v59  ;;  %v9970_v56 = vadd.f32 %v7664_v9, %v7552_v46 }
 0x372   : > { %v7553_v7 = vpop.f32.mrb[56].mxu0 }
 0x373   : > { %10637 = vst [vmem:[#allocation89_spill] sm:$0xff] %v9970_v56  ;;  %v7665_v52 = vpop.f32.mrb[56].mxu1  ;;  %v7554_v32 = vpop.f32.mrb[57].mxu0 }
 0x374   : > { %v7555_v35 = vadd.f32 %v7554_v32, %v7553_v7  ;;  %v7666_v0 = vpop.f32.mrb[57].mxu1  ;;  %v7556_v26 = vpop.f32.mrb[58].mxu0 }
 0x375   : > { %v7667_v30 = vadd.f32 %v7666_v0, %v7665_v52  ;;  %v7668_v37 = vpop.f32.mrb[58].mxu1  ;;  %v7557_v51 = vpop.f32.mrb[59].mxu0 }
 0x376   : > { %v7558_v55 = vadd.f32 %v7557_v51, %v7556_v26  ;;  %v7669_v27 = vpop.f32.mrb[59].mxu1 }
 0x377   : > { %v9972_v53 = vadd.f32 %v7667_v30, %v7555_v35  ;;  %v7670_v61 = vadd.f32 %v7669_v27, %v7668_v37 }
 0x379   : > { %10638 = vst [vmem:[#allocation17_spill] sm:$0xff] %v9972_v53  ;;  %v9974_v31 = vadd.f32 %v7670_v61, %v7558_v55 }
 0x37a   : > { %v7559_v48 = vpop.f32.mrb[60].mxu0 }
 0x37b   : > { %10639 = vst [vmem:[#allocation90_spill] sm:$0xff] %v9974_v31  ;;  %v7671_v44 = vpop.f32.mrb[60].mxu1  ;;  %v7560_v46 = vpop.f32.mrb[61].mxu0 }
 0x37c   : > { %v7561_v28 = vadd.f32 %v7560_v46, %v7559_v48  ;;  %v7672_v5 = vpop.f32.mrb[61].mxu1  ;;  %v7562_v9 = vpop.f32.mrb[62].mxu0 }
 0x37d   : > { %v7673_v56 = vadd.f32 %v7672_v5, %v7671_v44  ;;  %v7674_v7 = vpop.f32.mrb[62].mxu1  ;;  %v7563_v32 = vpop.f32.mrb[63].mxu0 }
 0x37e   : > { %v7564_v59 = vadd.f32 %v7563_v32, %v7562_v9  ;;  %v7675_v52 = vpop.f32.mrb[63].mxu1 }
 0x37f   : > { %v9976_v0 = vadd.f32 %v7673_v56, %v7561_v28  ;;  %v7676_v26 = vadd.f32 %v7675_v52, %v7674_v7 }
 0x381   : > { %v9978_v51 = vadd.f32 %v7676_v26, %v7564_v59  ;;  %v9985_v59 = vld [vmem:[%s10350_s2] ss:$0 sm:$0xff] }
 0x382   : > { %v7693_v30 = vpop.f32.mrb[64].mxu0 }
 0x383   : > { %v7694_v35 = vpop.f32.mrb[65].mxu0  ;;  %v5118_v55 = vpop.f32.mrb[64].mxu1 }
 0x384   : > { %v7695_v37 = vadd.f32 %v7694_v35, %v7693_v30  ;;  %v7696_v27 = vpop.f32.mrb[66].mxu0  ;;  %v5120_v61 = vpop.f32.mrb[65].mxu1 }
 0x385   : > { %v7697_v31 = vpop.f32.mrb[67].mxu0  ;;  %v5121_v48 = vpop.f32.mrb[66].mxu1 }
 0x386   : > { %v7698_v46 = vadd.f32 %v7697_v31, %v7696_v27  ;;  %v4958_v44 = vadd.f32 %v7695_v37, %v9900_v15  ;;  %v5123_v5 = vpop.f32.mrb[67].mxu1 }
 0x388   : > { %v5119_v53 = vadd.f32 %v5118_v55, %v4958_v44  ;;  %v4961_v9 = vadd.f32 %v7698_v46, %v9902_v2 }
 0x38a   : > { %v5245_v56 = vadd.f32 %v5119_v53, %v9729_v6  ;;  %v5122_v28 = vadd.f32 %v5121_v48, %v4961_v9  ;;  %v7699_v7 = vpop.f32.mrb[68].mxu0 }
 0x38b   : > { %v7700_v32 = vpop.f32.mrb[69].mxu0  ;;  %v5126_v52 = vpop.f32.mrb[68].mxu1 }
 0x38c   : > { %v9989_v26 = vadd.f32 %v9985_v59, %v5245_v56  ;;  %v5246_v15 = vadd.f32 %v5122_v28, %v9734_v25  ;;  %v7701_v31 = vadd.f32 %v7700_v32, %v7699_v7  ;;  %v7702_v30 = vpop.f32.mrb[70].mxu0  ;;  %v5128_v35 = vpop.f32.mrb[69].mxu1 }
 0x38d   : > { %v7703_v2 = vpop.f32.mrb[71].mxu0  ;;  %v5129_v55 = vpop.f32.mrb[70].mxu1 }
 0x38e   : > { %v5348_v37 = vmin.f32 %v9989_v26, 0.0  ;;  %v9994_v27 = vadd.f32 %v9985_v59, %v5246_v15  ;;  %v7704_v6 = vadd.f32 %v7703_v2, %v7702_v30  ;;  %v5131_v53 = vpop.f32.mrb[71].mxu1  ;;  %v4966_v61 = vadd.f32 %v7701_v31, %v9909_v17 }
 0x38f   : > { %vm5316_vm2 = vcmp.gt.f32.partialorder %v9989_v26, 0.0 }
 0x390   : > { %v5380_v48 = vmul.f32 1.442695, %v5348_v37  ;;  %v5349_v46 = vmin.f32 %v9994_v27, 0.0  ;;  %v4969_v44 = vadd.f32 %v7704_v6, %v9911_v1  ;;  %v5127_v25 = vadd.f32 %v5126_v52, %v4966_v61 }
 0x391   : > { %vm5317_vm3 = vcmp.gt.f32.partialorder %v9994_v27, 0.0 }
 0x392   : > { %7986 = vpow2.f32 %v5380_v48  ;;  %v5382_v5 = vmul.f32 1.442695, %v5349_v46  ;;  %v5130_v9 = vadd.f32 %v5129_v55, %v4969_v44  ;;  %v7705_v56 = vpop.f32.mrb[72].mxu0  ;;  %v5247_v28 = vadd.f32 %v5127_v25, %v9739_v50 }
 0x393   : > { %v7706_v7 = vpop.f32.mrb[73].mxu0  ;;  %v5134_v32 = vpop.f32.mrb[72].mxu1 }
 0x394   : > { %7988 = vpow2.f32 %v5382_v5  ;;  %v5248_v15 = vadd.f32 %v5130_v9, %v9744_v63  ;;  %v7707_v30 = vadd.f32 %v7706_v7, %v7705_v56  ;;  %v7708_v35 = vpop.f32.mrb[74].mxu0  ;;  %v5136_v17 = vpop.f32.mrb[73].mxu1  ;;  %v10002_v31 = vadd.f32 %v9985_v59, %v5247_v28 }
 0x395   : > { %v7709_v2 = vpop.f32.mrb[75].mxu0  ;;  %v5137_v1 = vpop.f32.mrb[74].mxu1 }
 0x396   : > { %v10005_v52 = vadd.f32 %v9985_v59, %v5248_v15  ;;  %v7710_v55 = vadd.f32 %v7709_v2, %v7708_v35  ;;  %v4974_v37 = vadd.f32 %v7707_v30, %v9918_v19  ;;  %v5139_v50 = vpop.f32.mrb[75].mxu1  ;;  %v5350_v6 = vmin.f32 %v10002_v31, 0.0 }
 0x397   : > { %vm5318_vm4 = vcmp.gt.f32.partialorder %v10002_v31, 0.0 }
 0x398   : > { %v5351_v53 = vmin.f32 %v10005_v52, 0.0  ;;  %v5135_v63 = vadd.f32 %v5134_v32, %v4974_v37  ;;  %v4977_v61 = vadd.f32 %v7710_v55, %v9920_v57  ;;  %v5384_v48 = vmul.f32 1.442695, %v5350_v6 }
 0x399   : > { %vm5319_vm5 = vcmp.gt.f32.partialorder %v10005_v52, 0.0 }
 0x39a   : > { %v5386_v46 = vmul.f32 1.442695, %v5351_v53  ;;  %v5249_v44 = vadd.f32 %v5135_v63, %v9749_v41  ;;  %v5138_v25 = vadd.f32 %v5137_v1, %v4977_v61  ;;  %v7711_v5 = vpop.f32.mrb[76].mxu0  ;;  %7990 = vpow2.f32 %v5384_v48 }
 0x39b   : > { %v7712_v9 = vpop.f32.mrb[77].mxu0  ;;  %v5142_v56 = vpop.f32.mrb[76].mxu1 }
 0x39c   : > { %v7987_v28 = vpop.eup %7986  ;;  %7992 = vpow2.f32 %v5386_v46  ;;  %v10013_v19 = vadd.f32 %v9985_v59, %v5249_v44  ;;  %v5250_v7 = vadd.f32 %v5138_v25, %v9754_v8  ;;  %v7713_v15 = vadd.f32 %v7712_v9, %v7711_v5  ;;  %v7714_v32 = vpop.f32.mrb[78].mxu0 }
 0x39d   : > { %v5144_v30 = vpop.f32.mrb[77].mxu1  ;;  %v6725_v57 = vadd.f32 -1.0, %v7987_v28  ;;  %v7715_v35 = vpop.f32.mrb[79].mxu0 }
 0x39e   : > { %v5145_v17 = vpop.f32.mrb[78].mxu1  ;;  %v7989_v41 = vpop.eup %7988  ;;  %v5352_v2 = vmin.f32 %v10013_v19, 0.0  ;;  %v10019_v1 = vadd.f32 %v9985_v59, %v5250_v7  ;;  %v7716_v55 = vadd.f32 %v7715_v35, %v7714_v32  ;;  %v4982_v6 = vadd.f32 %v7713_v15, %v9927_v54 }
 0x39f   : > { %v5147_v37 = vpop.f32.mrb[79].mxu1  ;;  %v5476_v50 = vsel %vm5316_vm2, %v9989_v26, %v6725_v57  ;;  %v6726_v8 = vadd.f32 -1.0, %v7989_v41  ;;  %vm5320_vm6 = vcmp.gt.f32.partialorder %v10013_v19, 0.0 }
 0x3a0   : > { %5509 = vst.msk [vmem:[#allocation2] sm:$0xff] %vm5508_vm1, %v5476_v50  ;;  %v5388_v53 = vmul.f32 1.442695, %v5352_v2  ;;  %v5353_v63 = vmin.f32 %v10019_v1, 0.0  ;;  %v4985_v61 = vadd.f32 %v7716_v55, %v9929_v39  ;;  %v5143_v46 = vadd.f32 %v5142_v56, %v4982_v6 }
 0x3a1   : > { %v5477_v48 = vsel %vm5317_vm3, %v9994_v27, %v6726_v8  ;;  %vm5321_vm7 = vcmp.gt.f32.partialorder %v10019_v1, 0.0 }
 0x3a2   : > { %5510 = vst.msk [vmem:[#allocation2 + $0x8] sm:$0xff] %vm5508_vm1, %v5477_v48  ;;  %7994 = vpow2.f32 %v5388_v53  ;;  %v5390_v44 = vmul.f32 1.442695, %v5353_v63  ;;  %v5146_v26 = vadd.f32 %v5145_v17, %v4985_v61  ;;  %v7717_v25 = vpop.f32.mrb[80].mxu0  ;;  %v5251_v54 = vadd.f32 %v5143_v46, %v9759_v24 }
 0x3a3   : > { %v7718_v5 = vpop.f32.mrb[81].mxu0  ;;  %v5150_v9 = vpop.f32.mrb[80].mxu1 }
 0x3a4   : > { %7996 = vpow2.f32 %v5390_v44  ;;  %v5252_v28 = vadd.f32 %v5146_v26, %v9764_v38  ;;  %v7719_v7 = vadd.f32 %v7718_v5, %v7717_v25  ;;  %v7720_v15 = vpop.f32.mrb[82].mxu0  ;;  %v5152_v32 = vpop.f32.mrb[81].mxu1  ;;  %v10032_v27 = vadd.f32 %v9985_v59, %v5251_v54 }
 0x3a5   : > { %v7991_v39 = vpop.eup %7990  ;;  %v7721_v56 = vpop.f32.mrb[83].mxu0 }
 0x3a6   : > { %v5153_v30 = vpop.f32.mrb[82].mxu1  ;;  %v7993_v57 = vpop.eup %7992  ;;  %v6727_v35 = vadd.f32 -1.0, %v7991_v39  ;;  %v10035_v17 = vadd.f32 %v9985_v59, %v5252_v28  ;;  %v7722_v24 = vadd.f32 %v7721_v56, %v7720_v15  ;;  %v4990_v41 = vadd.f32 %v7719_v7, %v9932_v16 }
 0x3a7   : > { %v5155_v2 = vpop.f32.mrb[83].mxu1  ;;  %v6728_v38 = vadd.f32 -1.0, %v7993_v57  ;;  %v5354_v55 = vmin.f32 %v10032_v27, 0.0  ;;  %v5541_v6 = vld [vmem:[#allocation2] sm:$0xff]  ;;  %vm5322_vm8 = vcmp.gt.f32.partialorder %v10032_v27, 0.0 }
 0x3a8   : > { %v5478_v37 = vsel %vm5318_vm4, %v10002_v31, %v6727_v35  ;;  %v5355_v50 = vmin.f32 %v10035_v17, 0.0  ;;  %v5151_v8 = vadd.f32 %v5150_v9, %v4990_v41  ;;  %v4993_v61 = vadd.f32 %v7722_v24, %v9934_v4 }
 0x3a9   : > { %v5573_v53 = vld [vmem:[#allocation2 + $0x1] sm:$0xff]  ;;  %5511 = vst.msk [vmem:[#allocation2 + $0x10] sm:$0xff] %vm5508_vm1, %v5478_v37  ;;  %v5479_v63 = vsel %vm5319_vm5, %v10005_v52, %v6728_v38  ;;  %v5392_v16 = vmul.f32 1.442695, %v5354_v55  ;;  %vm5323_vm9 = vcmp.gt.f32.partialorder %v10035_v17, 0.0 }
 0x3aa   : > { %v5605_v48 = vmax.f32 %v5541_v6, %v5573_v53  ;;  %5512 = vst.msk [vmem:[#allocation2 + $0x18] sm:$0xff] %vm5508_vm1, %v5479_v63  ;;  %v5394_v46 = vmul.f32 1.442695, %v5355_v50  ;;  %v5253_v31 = vadd.f32 %v5151_v8, %v9769_v40  ;;  %v7723_v44 = vpop.f32.mrb[84].mxu0  ;;  %v5637_v26 = vld [vmem:[#allocation2 + $0x2] sm:$0xff]  ;;  %v5154_v25 = vadd.f32 %v5153_v30, %v4993_v61 }
 0x3ab   : > { %7998 = vpow2.f32 %v5392_v16  ;;  %v7724_v54 = vpop.f32.mrb[85].mxu0  ;;  %v5158_v5 = vpop.f32.mrb[84].mxu1 }
 0x3ac   : > { %v7995_v9 = vpop.eup %7994  ;;  %v5669_v28 = vmax.f32 %v5605_v48, %v5637_v26  ;;  %8000 = vpow2.f32 %v5394_v46  ;;  %v10049_v52 = vadd.f32 %v9985_v59, %v5253_v31  ;;  %v7725_v7 = vadd.f32 %v7724_v54, %v7723_v44  ;;  %v7726_v4 = vpop.f32.mrb[86].mxu0 }
 0x3ad   : > { %v5160_v15 = vpop.f32.mrb[85].mxu1  ;;  %v6729_v32 = vadd.f32 -1.0, %v7995_v9  ;;  %v5254_v39 = vadd.f32 %v5154_v25, %v9775_v10  ;;  %v7727_v56 = vpop.f32.mrb[87].mxu0  ;;  %v5542_v10 = vld [vmem:[#allocation2 + $0x8] sm:$0xff] }
 0x3ae   : > { %v5161_v40 = vpop.f32.mrb[86].mxu1  ;;  %v7997_v57 = vpop.eup %7996  ;;  %5701 = vst.msk [vmem:[#allocation3] sm:$0xff] %vm5508_vm1, %v5669_v28  ;;  %v5356_v30 = vmin.f32 %v10049_v52, 0.0  ;;  %v7728_v35 = vadd.f32 %v7727_v56, %v7726_v4  ;;  %v4998_v24 = vadd.f32 %v7725_v7, %v9936_v33  ;;  %vm5324_vm10 = vcmp.gt.f32.partialorder %v10049_v52, 0.0 }
 0x3af   : > { %v5163_v41 = vpop.f32.mrb[87].mxu1  ;;  %v5480_v2 = vsel %vm5320_vm6, %v10013_v19, %v6729_v32  ;;  %v6730_v38 = vadd.f32 -1.0, %v7997_v57  ;;  %v10058_v55 = vadd.f32 %v9985_v59, %v5254_v39 }
 0x3b0   : > { %v5574_v37 = vld [vmem:[#allocation2 + $0x9] sm:$0xff]  ;;  %5513 = vst.msk [vmem:[#allocation2 + $0x20] sm:$0xff] %vm5508_vm1, %v5480_v2  ;;  %v5396_v50 = vmul.f32 1.442695, %v5356_v30  ;;  %v5159_v8 = vadd.f32 %v5158_v5, %v4998_v24  ;;  %v5001_v6 = vadd.f32 %v7728_v35, %v9938_v43 }
 0x3b1   : > { %v5543_v53 = vld [vmem:[#allocation2 + $0x10] sm:$0xff]  ;;  %v5606_v63 = vmax.f32 %v5542_v10, %v5574_v37  ;;  %v5481_v16 = vsel %vm5321_vm7, %v10019_v1, %v6730_v38  ;;  %v5357_v19 = vmin.f32 %v10058_v55, 0.0  ;;  %vm5325_vm11 = vcmp.gt.f32.partialorder %v10058_v55, 0.0 }
 0x3b2   : > { %v5575_v33 = vld [vmem:[#allocation2 + $0x11] sm:$0xff]  ;;  %5514 = vst.msk [vmem:[#allocation2 + $0x28] sm:$0xff] %vm5508_vm1, %v5481_v16  ;;  %8002 = vpow2.f32 %v5396_v50  ;;  %v5255_v46 = vadd.f32 %v5159_v8, %v9780_v29  ;;  %v5162_v31 = vadd.f32 %v5161_v40, %v5001_v6  ;;  %v7729_v44 = vpop.f32.mrb[88].mxu0 }
 0x3b3   : > { %v5638_v61 = vld [vmem:[#allocation2 + $0xa] sm:$0xff]  ;;  %v5607_v48 = vmax.f32 %v5543_v53, %v5575_v33  ;;  %v5639_v25 = vld [vmem:[#allocation2 + $0x12] sm:$0xff]  ;;  %v5398_v54 = vmul.f32 1.442695, %v5357_v19  ;;  %v7730_v43 = vpop.f32.mrb[89].mxu0  ;;  %v5166_v5 = vpop.f32.mrb[88].mxu1 }
 0x3b4   : > { %v5670_v26 = vmax.f32 %v5606_v63, %v5638_v61  ;;  %v10068_v28 = vadd.f32 %v9985_v59, %v5255_v46  ;;  %v5256_v1 = vadd.f32 %v5162_v31, %v9786_v21  ;;  %v7731_v7 = vadd.f32 %v7730_v43, %v7729_v44  ;;  %v7732_v4 = vpop.f32.mrb[90].mxu0  ;;  %v5168_v15 = vpop.f32.mrb[89].mxu1  ;;  %v5544_v21 = vld [vmem:[#allocation2 + $0x18] sm:$0xff] }
 0x3b5   : > { %v5671_v9 = vmax.f32 %v5607_v48, %v5639_v25  ;;  %v7999_v32 = vpop.eup %7998  ;;  %8004 = vpow2.f32 %v5398_v54  ;;  %v7733_v29 = vpop.f32.mrb[91].mxu0 }
 0x3b6   : > { %5702 = vst.msk [vmem:[#allocation3 + $0x8] sm:$0xff] %vm5508_vm1, %v5670_v26  ;;  %v5169_v39 = vpop.f32.mrb[90].mxu1  ;;  %v8001_v56 = vpop.eup %8000  ;;  %v6731_v40 = vadd.f32 -1.0, %v7999_v32  ;;  %v5358_v57 = vmin.f32 %v10068_v28, 0.0  ;;  %v10075_v30 = vadd.f32 %v9985_v59, %v5256_v1  ;;  %v7734_v2 = vadd.f32 %v7733_v29, %v7732_v4 }
 0x3b7   : > { %5703 = vst.msk [vmem:[#allocation3 + $0x10] sm:$0xff] %vm5508_vm1, %v5671_v9  ;;  %v5171_v35 = vpop.f32.mrb[91].mxu1  ;;  %v5576_v24 = vld [vmem:[#allocation2 + $0x19] sm:$0xff]  ;;  %v6732_v41 = vadd.f32 -1.0, %v8001_v56  ;;  %v5006_v38 = vadd.f32 %v7731_v7, %v9940_v42  ;;  %vm5326_vm12 = vcmp.gt.f32.partialorder %v10068_v28, 0.0 }
 0x3b8   : > { %v5608_v10 = vmax.f32 %v5544_v21, %v5576_v24  ;;  %v5482_v37 = vsel %vm5322_vm8, %v10032_v27, %v6731_v40  ;;  %v5400_v50 = vmul.f32 1.442695, %v5358_v57  ;;  %v5545_v8 = vld [vmem:[#allocation2 + $0x20] sm:$0xff]  ;;  %v5359_v33 = vmin.f32 %v10075_v30, 0.0 }
 0x3b9   : > { %v5640_v6 = vld [vmem:[#allocation2 + $0x1a] sm:$0xff]  ;;  %5515 = vst.msk [vmem:[#allocation2 + $0x30] sm:$0xff] %vm5508_vm1, %v5482_v37  ;;  %v5483_v63 = vsel %vm5323_vm9, %v10035_v17, %v6732_v41  ;;  %v5167_v16 = vadd.f32 %v5166_v5, %v5006_v38  ;;  %v5009_v19 = vadd.f32 %v7734_v2, %v9942_v62  ;;  %v5641_v48 = vld [vmem:[#allocation2 + $0x22] sm:$0xff]  ;;  %vm5327_vm14 = vcmp.gt.f32.partialorder %v10075_v30, 0.0 }
 0x3ba   : > { %v5577_v53 = vld [vmem:[#allocation2 + $0x21] sm:$0xff]  ;;  %v5672_v61 = vmax.f32 %v5608_v10, %v5640_v6  ;;  %5516 = vst.msk [vmem:[#allocation2 + $0x38] sm:$0xff] %vm5508_vm1, %v5483_v63  ;;  %8006 = vpow2.f32 %v5400_v50  ;;  %v7735_v27 = vpop.f32.mrb[92].mxu0  ;;  %v5402_v46 = vmul.f32 1.442695, %v5359_v33 }
 0x3bb   : > { %v5609_v42 = vmax.f32 %v5545_v8, %v5577_v53  ;;  %v5257_v31 = vadd.f32 %v5167_v16, %v9791_v34  ;;  %v5170_v44 = vadd.f32 %v5169_v39, %v5009_v19  ;;  %v7736_v26 = vpop.f32.mrb[93].mxu0  ;;  %v5174_v25 = vpop.f32.mrb[92].mxu1 }
 0x3bc   : > { %v8003_v54 = vpop.eup %8002  ;;  %5704 = vst.msk [vmem:[#allocation3 + $0x18] sm:$0xff] %vm5508_vm1, %v5672_v61  ;;  %v7737_v43 = vadd.f32 %v7736_v26, %v7735_v27  ;;  %v7738_v5 = vpop.f32.mrb[94].mxu0  ;;  %8008 = vpow2.f32 %v5402_v46 }
 0x3bd   : > { %v5673_v17 = vmax.f32 %v5609_v42, %v5641_v48  ;;  %v5176_v62 = vpop.f32.mrb[93].mxu1  ;;  %v6733_v9 = vadd.f32 -1.0, %v8003_v54  ;;  %v10089_v1 = vadd.f32 %v9985_v59, %v5257_v31  ;;  %v5258_v7 = vadd.f32 %v5170_v44, %v9797_v13  ;;  %v7739_v4 = vpop.f32.mrb[95].mxu0  ;;  %v5546_v13 = vld [vmem:[#allocation2 + $0x28] sm:$0xff] }
 0x3be   : > { %v5177_v15 = vpop.f32.mrb[94].mxu1  ;;  %v7740_v34 = vadd.f32 %v7739_v4, %v7738_v5  ;;  %v5014_v32 = vadd.f32 %v7737_v43, %v9944_v14  ;;  %v5734_v10 = vld [vmem:[#allocation3] ss:$3 sm:$0xff] }
 0x3bf   : > { %5705 = vst.msk [vmem:[#allocation3 + $0x20] sm:$0xff] %vm5508_vm1, %v5673_v17  ;;  %v5179_v29 = vpop.f32.mrb[95].mxu1  ;;  %v8005_v39 = vpop.eup %8004  ;;  %v5484_v56 = vsel %vm5324_vm10, %v10049_v52, %v6733_v9  ;;  %v5360_v40 = vmin.f32 %v10089_v1, 0.0  ;;  %v10098_v57 = vadd.f32 %v9985_v59, %v5258_v7  ;;  %vm5328_vm15 = vcmp.gt.f32.partialorder %v10089_v1, 0.0 }
 0x3c0   : > { %v5578_v35 = vld [vmem:[#allocation2 + $0x29] sm:$0xff]  ;;  %5517 = vst.msk [vmem:[#allocation2 + $0x40] sm:$0xff] %vm5508_vm1, %v5484_v56  ;;  %v6734_v21 = vadd.f32 -1.0, %v8005_v39  ;;  %v5175_v24 = vadd.f32 %v5174_v25, %v5014_v32  ;;  %v5017_v41 = vadd.f32 %v7740_v34, %v9946_v60 }
 0x3c1   : > { %v5547_v2 = vld [vmem:[#allocation2 + $0x30] sm:$0xff]  ;;  %v5610_v14 = vmax.f32 %v5546_v13, %v5578_v35  ;;  %v5404_v52 = vmul.f32 1.442695, %v5360_v40  ;;  %v5361_v53 = vmin.f32 %v10098_v57, 0.0  ;;  %vm5329_vm0 = vcmp.gt.f32.partialorder %v10098_v57, 0.0 }
 0x3c2   : > { %v5579_v38 = vld [vmem:[#allocation2 + $0x31] sm:$0xff]  ;;  %v5485_v6 = vsel %vm5325_vm11, %v10058_v55, %v6734_v21  ;;  %v5259_v63 = vadd.f32 %v5175_v24, %v9802_v47  ;;  %v7741_v33 = vpop.f32.mrb[96].mxu0  ;;  %v5178_v42 = vadd.f32 %v5177_v15, %v5017_v41 }
 0x3c3   : > { %v5642_v37 = vld [vmem:[#allocation2 + $0x2a] sm:$0xff]  ;;  %v5611_v50 = vmax.f32 %v5547_v2, %v5579_v38  ;;  %v5643_v8 = vld [vmem:[#allocation2 + $0x32] sm:$0xff]  ;;  %5518 = vst.msk [vmem:[#allocation2 + $0x48] sm:$0xff] %vm5508_vm1, %v5485_v6  ;;  %8010 = vpow2.f32 %v5404_v52  ;;  %v5406_v44 = vmul.f32 1.442695, %v5361_v53  ;;  %v7742_v26 = vpop.f32.mrb[97].mxu0 }
 0x3c4   : > { %v5756_v16 = vld [vmem:[#allocation3 + $0x3] ss:$3 sm:$0xff]  ;;  %v5811_v19 = vld [vmem:[#allocation3 + $0x7] ss:$3 sm:$0xff]  ;;  %v5674_v61 = vmax.f32 %v5610_v14, %v5642_v37  ;;  %v8007_v27 = vpop.eup %8006  ;;  %v5182_v55 = vpop.f32.mrb[96].mxu1  ;;  %v10110_v25 = vadd.f32 %v9985_v59, %v5259_v63  ;;  %v5260_v54 = vadd.f32 %v5178_v42, %v9808_v49  ;;  %v7743_v17 = vadd.f32 %v7742_v26, %v7741_v33 }
 0x3c5   : > { %v5789_v60 = vld [vmem:[#allocation3 + $0x6] ss:$3 sm:$0xff]  ;;  %v5777_v48 = vmax.f32 %v5734_v10, %v5756_v16  ;;  %v5675_v31 = vmax.f32 %v5611_v50, %v5643_v8  ;;  %v6735_v47 = vadd.f32 -1.0, %v8007_v27  ;;  %v7744_v43 = vpop.f32.mrb[98].mxu0  ;;  %v5184_v5 = vpop.f32.mrb[97].mxu1  ;;  %8012 = vpow2.f32 %v5406_v44 }
 0x3c6   : > { %v5832_v46 = vmax.f32 %v5789_v60, %v5811_v19  ;;  %5706 = vst.msk [vmem:[#allocation3 + $0x28] sm:$0xff] %vm5508_vm1, %v5674_v61  ;;  %v7745_v9 = vpop.f32.mrb[99].mxu0  ;;  %v5185_v7 = vpop.f32.mrb[98].mxu1  ;;  %v5548_v49 = vld [vmem:[#allocation2 + $0x38] sm:$0xff]  ;;  %v5362_v32 = vmin.f32 %v10110_v25, 0.0  ;;  %v10125_v29 = vadd.f32 %v9985_v59, %v5260_v54  ;;  %vm5330_vm2 = vcmp.gt.f32.partialorder %v10110_v25, 0.0 }
 0x3c7   : > { %5707 = vst.msk [vmem:[#allocation3 + $0x30] sm:$0xff] %vm5508_vm1, %v5675_v31  ;;  %v8009_v4 = vpop.eup %8008  ;;  %v5580_v15 = vld [vmem:[#allocation2 + $0x39] sm:$0xff]  ;;  %v5486_v34 = vsel %vm5326_vm12, %v10068_v28, %v6735_v47  ;;  %v5187_v39 = vpop.f32.mrb[99].mxu1  ;;  %v7746_v35 = vadd.f32 %v7745_v9, %v7744_v43  ;;  %v5022_v28 = vadd.f32 %v7743_v17, %v9948_v11 }
 0x3c8   : > { %v5843_v62 = vmax.f32 %v5777_v48, %v5832_v46  ;;  %v5612_v40 = vmax.f32 %v5548_v49, %v5580_v15  ;;  %5519 = vst.msk [vmem:[#allocation2 + $0x50] sm:$0xff] %vm5508_vm1, %v5486_v34  ;;  %v6736_v13 = vadd.f32 -1.0, %v8009_v4  ;;  %v5644_v21 = vld [vmem:[#allocation2 + $0x3a] sm:$0xff]  ;;  %v5408_v24 = vmul.f32 1.442695, %v5362_v32 }
 0x3c9   : > { %v5363_v41 = vmin.f32 %v10125_v29, 0.0  ;;  %v5549_v2 = vld [vmem:[#allocation2 + $0x40] sm:$0xff]  ;;  %v5025_v10 = vadd.f32 %v7746_v35, %v9950_v22  ;;  %v5183_v6 = vadd.f32 %v5182_v55, %v5022_v28  ;;  %vm5331_vm3 = vcmp.gt.f32.partialorder %v10125_v29, 0.0 }
 0x3ca   : > { %v6770_v56 = vpack.c.bf16 %v5843_v62, %v5843_v62  ;;  %v5676_v14 = vmax.f32 %v5612_v40, %v5644_v21  ;;  %v5581_v38 = vld [vmem:[#allocation2 + $0x41] sm:$0xff]  ;;  %v5487_v52 = vsel %vm5327_vm14, %v10075_v30, %v6736_v13  ;;  %v7747_v37 = vpop.f32.mrb[100].mxu0  ;;  %8014 = vpow2.f32 %v5408_v24 }
 0x3cb   : > { %v5613_v50 = vmax.f32 %v5549_v2, %v5581_v38  ;;  %5520 = vst.msk [vmem:[#allocation2 + $0x58] sm:$0xff] %vm5508_vm1, %v5487_v52  ;;  %v5410_v8 = vmul.f32 1.442695, %v5363_v41  ;;  %v7748_v53 = vpop.f32.mrb[101].mxu0  ;;  %v5190_v63 = vpop.f32.mrb[100].mxu1  ;;  %v5645_v11 = vld [vmem:[#allocation2 + $0x42] sm:$0xff]  ;;  %v5186_v16 = vadd.f32 %v5185_v7, %v5025_v10  ;;  %v5261_v46 = vadd.f32 %v5183_v6, %v9813_v3 }
 0x3cc   : > { %5900 = vst.msk [vmem:[%s10120_s5] sm:$0xf] %vm5899_vm13, %v6770_v56  ;;  %v7749_v60 = vadd.f32 %v7748_v53, %v7747_v37  ;;  %v7750_v19 = vpop.f32.mrb[102].mxu0  ;;  %v5192_v61 = vpop.f32.mrb[101].mxu1  ;;  %v5550_v17 = vld [vmem:[#allocation2 + $0x48] sm:$0xff] }
 0x3cd   : > { %v5736_v33 = vld [vmem:[#allocation3 + $0x18] ss:$3 sm:$0xff]  ;;  %5708 = vst.msk [vmem:[#allocation3 + $0x38] sm:$0xff] %vm5508_vm1, %v5676_v14  ;;  %v8011_v30 = vpop.eup %8010  ;;  %v5677_v48 = vmax.f32 %v5613_v50, %v5645_v11  ;;  %8016 = vpow2.f32 %v5410_v8  ;;  %v5262_v55 = vadd.f32 %v5186_v16, %v9819_v12  ;;  %v7751_v47 = vpop.f32.mrb[103].mxu0  ;;  %v10142_v5 = vadd.f32 %v9985_v59, %v5261_v46 }
 0x3ce   : > { %v5758_v42 = vld [vmem:[#allocation3 + $0x1b] ss:$3 sm:$0xff]  ;;  %v5813_v27 = vld [vmem:[#allocation3 + $0x1f] ss:$3 sm:$0xff]  ;;  %v6737_v26 = vadd.f32 -1.0, %v8011_v30  ;;  %v5193_v54 = vpop.f32.mrb[102].mxu1  ;;  %v7752_v62 = vadd.f32 %v7751_v47, %v7750_v19  ;;  %v5030_v9 = vadd.f32 %v7749_v60, %v9952_v45 }
 0x3cf   : > { %v5791_v22 = vld [vmem:[#allocation3 + $0x1e] ss:$3 sm:$0xff]  ;;  %v5778_v31 = vmax.f32 %v5736_v33, %v5758_v42  ;;  %5709 = vst.msk [vmem:[#allocation3 + $0x40] sm:$0xff] %vm5508_vm1, %v5677_v48  ;;  %v5195_v3 = vpop.f32.mrb[103].mxu1  ;;  %v8013_v7 = vpop.eup %8012  ;;  %v10147_v15 = vadd.f32 %v9985_v59, %v5262_v55  ;;  %v5364_v39 = vmin.f32 %v10142_v5, 0.0  ;;  %vm5332_vm4 = vcmp.gt.f32.partialorder %v10142_v5, 0.0 }
 0x3d0   : > { %v5833_v44 = vmax.f32 %v5791_v22, %v5813_v27  ;;  %v5582_v43 = vld [vmem:[#allocation2 + $0x49] sm:$0xff]  ;;  %v5488_v12 = vsel %vm5328_vm15, %v10089_v1, %v6737_v26  ;;  %v6738_v32 = vadd.f32 -1.0, %v8013_v7  ;;  %v5191_v56 = vadd.f32 %v5190_v63, %v5030_v9  ;;  %v10640_v3 = vld [vmem:[#allocation4_spill] sm:$0xff] }
 0x3d1   : > { %v5614_v49 = vmax.f32 %v5550_v17, %v5582_v43  ;;  %v5646_v34 = vld [vmem:[#allocation2 + $0x4a] sm:$0xff]  ;;  %5521 = vst.msk [vmem:[#allocation2 + $0x60] sm:$0xff] %vm5508_vm1, %v5488_v12  ;;  %v5365_v21 = vmin.f32 %v10147_v15, 0.0  ;;  %v5412_v28 = vmul.f32 1.442695, %v5364_v39  ;;  %v5033_v37 = vadd.f32 %v7752_v62, %v9954_v20 }
 0x3d2   : > { %v5844_v4 = vmax.f32 %v5778_v31, %v5833_v44  ;;  %v5551_v13 = vld [vmem:[#allocation2 + $0x50] sm:$0xff]  ;;  %v7753_v1 = vpop.f32.mrb[104].mxu0  ;;  %v5489_v41 = vsel %vm5329_vm0, %v10098_v57, %v6738_v32  ;;  %v5263_v2 = vadd.f32 %v5191_v56, %v9824_v36  ;;  %v5552_v42 = vld [vmem:[#allocation2 + $0x58] sm:$0xff]  ;;  %vm5333_vm5 = vcmp.gt.f32.partialorder %v10147_v15, 0.0 }
 0x3d3   : > { %v5678_v45 = vmax.f32 %v5614_v49, %v5646_v34  ;;  %v5583_v35 = vld [vmem:[#allocation2 + $0x51] sm:$0xff]  ;;  %v7754_v14 = vpop.f32.mrb[105].mxu0  ;;  %v5198_v38 = vpop.f32.mrb[104].mxu1  ;;  %5522 = vst.msk [vmem:[#allocation2 + $0x68] sm:$0xff] %vm5508_vm1, %v5489_v41  ;;  %v5414_v10 = vmul.f32 1.442695, %v5365_v21  ;;  %8018 = vpow2.f32 %v5412_v28  ;;  %v5194_v16 = vadd.f32 %v5193_v54, %v5033_v37 }
 0x3d4   : > { %v6771_v40 = vpack.c.bf16 %v5844_v4, %v5844_v4  ;;  %v5615_v24 = vmax.f32 %v5551_v13, %v5583_v35  ;;  %v5647_v52 = vld [vmem:[#allocation2 + $0x52] sm:$0xff]  ;;  %v7755_v50 = vadd.f32 %v7754_v14, %v7753_v1  ;;  %v7756_v8 = vpop.f32.mrb[106].mxu0  ;;  %v5200_v6 = vpop.f32.mrb[105].mxu1  ;;  %v10161_v36 = vadd.f32 %v9985_v59, %v5263_v2 }
 0x3d5   : > { %5710 = vst.msk [vmem:[#allocation3 + $0x48] sm:$0xff] %vm5508_vm1, %v5678_v45  ;;  %v8015_v53 = vpop.eup %8014  ;;  %v7757_v63 = vpop.f32.mrb[107].mxu0  ;;  %8020 = vpow2.f32 %v5414_v10  ;;  %v5264_v46 = vadd.f32 %v5194_v16, %v9830_v58 }
 0x3d6   : > { %5901 = vst.msk [vmem:[%s10120_s5 + $0x4] sm:$0xf] %vm5899_vm13, %v6771_v40  ;;  %v5679_v57 = vmax.f32 %v5615_v24, %v5647_v52  ;;  %v5201_v33 = vpop.f32.mrb[106].mxu1  ;;  %v6739_v11 = vadd.f32 -1.0, %v8015_v53  ;;  %v7758_v60 = vadd.f32 %v7757_v63, %v7756_v8  ;;  %v5366_v20 = vmin.f32 %v10161_v36, 0.0  ;;  %v10641_v40 = vld [vmem:[#allocation5_spill] sm:$0xff] }
 0x3d7   : > { %v5203_v19 = vpop.f32.mrb[107].mxu1  ;;  %v8017_v61 = vpop.eup %8016  ;;  %v5038_v30 = vadd.f32 %v7755_v50, %v9956_v23  ;;  %v5738_v47 = vld [vmem:[#allocation3 + $0x30] ss:$3 sm:$0xff]  ;;  %v10174_v17 = vadd.f32 %v9985_v59, %v5264_v46  ;;  %vm5334_vm6 = vcmp.gt.f32.partialorder %v10161_v36, 0.0 }
 0x3d8   : > { %5711 = vst.msk [vmem:[#allocation3 + $0x50] sm:$0xff] %vm5508_vm1, %v5679_v57  ;;  %v5584_v22 = vld [vmem:[#allocation2 + $0x59] sm:$0xff]  ;;  %v5490_v27 = vsel %vm5330_vm2, %v10110_v25, %v6739_v11  ;;  %v6740_v48 = vadd.f32 -1.0, %v8017_v61  ;;  %v5041_v31 = vadd.f32 %v7758_v60, %v9958_v18  ;;  %v5416_v26 = vmul.f32 1.442695, %v5366_v20 }
 0x3d9   : > { %v5616_v44 = vmax.f32 %v5552_v42, %v5584_v22  ;;  %5523 = vst.msk [vmem:[#allocation2 + $0x70] sm:$0xff] %vm5508_vm1, %v5490_v27  ;;  %v5199_v55 = vadd.f32 %v5198_v38, %v5038_v30  ;;  %v5648_v54 = vld [vmem:[#allocation2 + $0x5a] sm:$0xff]  ;;  %v10642_v22 = vld [vmem:[#allocation13_spill] sm:$0xff]  ;;  %vm5335_vm7 = vcmp.gt.f32.partialorder %v10174_v17, 0.0 }
 0x3da   : > { %v5491_v23 = vsel %vm5331_vm3, %v10125_v29, %v6740_v48  ;;  %v5202_v25 = vadd.f32 %v5201_v33, %v5041_v31  ;;  %v7759_v43 = vpop.f32.mrb[108].mxu0  ;;  %8022 = vpow2.f32 %v5416_v26  ;;  %v5553_v12 = vld [vmem:[#allocation2 + $0x60] sm:$0xff]  ;;  %v5367_v29 = vmin.f32 %v10174_v17, 0.0  ;;  %v5554_v6 = vld [vmem:[#allocation2 + $0x68] sm:$0xff] }
 0x3db   : > { %v5680_v18 = vmax.f32 %v5616_v44, %v5648_v54  ;;  %5524 = vst.msk [vmem:[#allocation2 + $0x78] sm:$0xff] %vm5508_vm1, %v5491_v23  ;;  %v5265_v7 = vadd.f32 %v5199_v55, %v10640_v3  ;;  %v5585_v34 = vld [vmem:[#allocation2 + $0x61] sm:$0xff]  ;;  %v7760_v32 = vpop.f32.mrb[109].mxu0  ;;  %v5206_v21 = vpop.f32.mrb[108].mxu1 }
 0x3dc   : > { %v5760_v62 = vld [vmem:[#allocation3 + $0x33] ss:$3 sm:$0xff]  ;;  %v5815_v9 = vld [vmem:[#allocation3 + $0x37] ss:$3 sm:$0xff]  ;;  %v5617_v39 = vmax.f32 %v5553_v12, %v5585_v34  ;;  %v5266_v13 = vadd.f32 %v5202_v25, %v10641_v40  ;;  %v7761_v45 = vadd.f32 %v7760_v32, %v7759_v43  ;;  %v7762_v35 = vpop.f32.mrb[110].mxu0  ;;  %v5208_v2 = vpop.f32.mrb[109].mxu1 }
 0x3dd   : > { %v5793_v58 = vld [vmem:[#allocation3 + $0x36] ss:$3 sm:$0xff]  ;;  %v5779_v4 = vmax.f32 %v5738_v47, %v5760_v62  ;;  %5712 = vst.msk [vmem:[#allocation3 + $0x58] sm:$0xff] %vm5508_vm1, %v5680_v18  ;;  %v10181_v56 = vadd.f32 %v9985_v59, %v5265_v7  ;;  %v5418_v41 = vmul.f32 1.442695, %v5367_v29  ;;  %v7763_v28 = vpop.f32.mrb[111].mxu0  ;;  %v8019_v14 = vpop.eup %8018 }
 0x3de   : > { %v5834_v49 = vmax.f32 %v5793_v58, %v5815_v9  ;;  %v5649_v24 = vld [vmem:[#allocation2 + $0x62] sm:$0xff]  ;;  %v10187_v10 = vadd.f32 %v9985_v59, %v5266_v13  ;;  %v5209_v37 = vpop.f32.mrb[110].mxu1  ;;  %v6741_v57 = vadd.f32 -1.0, %v8019_v14  ;;  %v7764_v63 = vadd.f32 %v7763_v28, %v7762_v35  ;;  %v10645_v34 = vld [vmem:[#allocation7_spill] sm:$0xff]  ;;  %v10646_v13 = vld [vmem:[#allocation14_spill] sm:$0xff] }
 0x3df   : > { %v5681_v38 = vmax.f32 %v5617_v39, %v5649_v24  ;;  %v5368_v52 = vmin.f32 %v10181_v56, 0.0  ;;  %v8021_v50 = vpop.eup %8020  ;;  %8024 = vpow2.f32 %v5418_v41  ;;  %v5211_v33 = vpop.f32.mrb[111].mxu1  ;;  %v5046_v27 = vadd.f32 %v7761_v45, %v10642_v22  ;;  %v10643_v48 = vld [vmem:[#allocation84_spill] sm:$0xff] }
 0x3e0   : > { %v5845_v1 = vmax.f32 %v5779_v4, %v5834_v49  ;;  %v5586_v53 = vld [vmem:[#allocation2 + $0x69] sm:$0xff]  ;;  %v6742_v16 = vadd.f32 -1.0, %v8021_v50  ;;  %v5492_v30 = vsel %vm5332_vm4, %v10142_v5, %v6741_v57  ;;  %v5369_v42 = vmin.f32 %v10187_v10, 0.0 }
 0x3e1   : > { %5713 = vst.msk [vmem:[#allocation3 + $0x60] sm:$0xff] %vm5508_vm1, %v5681_v38  ;;  %v5618_v11 = vmax.f32 %v5554_v6, %v5586_v53  ;;  %v5420_v60 = vmul.f32 1.442695, %v5368_v52  ;;  %v5555_v19 = vld [vmem:[#allocation2 + $0x70] sm:$0xff]  ;;  %v5049_v46 = vadd.f32 %v7764_v63, %v10643_v48  ;;  %5525 = vst.msk [vmem:[#allocation2 + $0x80] sm:$0xff] %vm5508_vm1, %v5492_v30  ;;  %v5207_v25 = vadd.f32 %v5206_v21, %v5046_v27  ;;  %v10647_v52 = vld [vmem:[#allocation15_spill] sm:$0xff] }
 0x3e2   : > { %v6772_v8 = vpack.c.bf16 %v5845_v1, %v5845_v1  ;;  %v5650_v61 = vld [vmem:[#allocation2 + $0x6a] sm:$0xff]  ;;  %v7765_v31 = vpop.f32.mrb[112].mxu0  ;;  %v5493_v55 = vsel %vm5333_vm5, %v10147_v15, %v6742_v16  ;;  %v5651_v23 = vld [vmem:[#allocation2 + $0x72] sm:$0xff]  ;;  %v5422_v5 = vmul.f32 1.442695, %v5369_v42  ;;  %vm5336_vm8 = vcmp.gt.f32.partialorder %v10181_v56, 0.0 }
 0x3e3   : > { %v5587_v20 = vld [vmem:[#allocation2 + $0x71] sm:$0xff]  ;;  %v5682_v44 = vmax.f32 %v5618_v11, %v5650_v61  ;;  %8026 = vpow2.f32 %v5420_v60  ;;  %v7766_v47 = vpop.f32.mrb[113].mxu0  ;;  %v5214_v54 = vpop.f32.mrb[112].mxu1  ;;  %5526 = vst.msk [vmem:[#allocation2 + $0x88] sm:$0xff] %vm5508_vm1, %v5493_v55  ;;  %v5210_v43 = vadd.f32 %v5209_v37, %v5049_v46  ;;  %vm5337_vm9 = vcmp.gt.f32.partialorder %v10187_v10, 0.0 }
 0x3e4   : > { %5902 = vst.msk [vmem:[%s10120_s5 + $0x8] sm:$0xf] %vm5899_vm13, %v6772_v8  ;;  %v5619_v26 = vmax.f32 %v5555_v19, %v5587_v20  ;;  %v7767_v62 = vadd.f32 %v7766_v47, %v7765_v31  ;;  %v7768_v58 = vpop.f32.mrb[114].mxu0  ;;  %v5216_v9 = vpop.f32.mrb[113].mxu1  ;;  %8028 = vpow2.f32 %v5422_v5  ;;  %v10644_v15 = vld [vmem:[#allocation6_spill] sm:$0xff]  ;;  %v5556_v8 = vld [vmem:[#allocation2 + $0x78] sm:$0xff] }
 0x3e5   : > { %v8023_v18 = vpop.eup %8022  ;;  %5714 = vst.msk [vmem:[#allocation3 + $0x68] sm:$0xff] %vm5508_vm1, %v5682_v44  ;;  %v7769_v7 = vpop.f32.mrb[115].mxu0  ;;  %v5267_v12 = vadd.f32 %v5207_v25, %v10644_v15  ;;  %v5268_v29 = vadd.f32 %v5210_v43, %v10645_v34  ;;  %v5740_v39 = vld [vmem:[#allocation3 + $0x48] ss:$3 sm:$0xff]  ;;  %v10648_v20 = vld [vmem:[#allocation8_spill] sm:$0xff] }
 0x3e6   : > { %v5683_v3 = vmax.f32 %v5619_v26, %v5651_v23  ;;  %v5217_v4 = vpop.f32.mrb[114].mxu1  ;;  %v6743_v49 = vadd.f32 -1.0, %v8023_v18  ;;  %v7770_v40 = vadd.f32 %v7769_v7, %v7768_v58  ;;  %v5054_v45 = vadd.f32 %v7767_v62, %v10646_v13  ;;  %v10229_v25 = vld [vmem:[%s10350_s2] ss:$0 sm:$0xff] }
 0x3e7   : > { %v5219_v32 = vpop.f32.mrb[115].mxu1  ;;  %v10210_v41 = vadd.f32 %v9985_v59, %v5267_v12  ;;  %v10213_v28 = vadd.f32 %v9985_v59, %v5268_v29 }
 0x3e8   : > { %5715 = vst.msk [vmem:[#allocation3 + $0x70] sm:$0xff] %vm5508_vm1, %v5683_v3  ;;  %v5762_v35 = vld [vmem:[#allocation3 + $0x4b] ss:$3 sm:$0xff]  ;;  %v5817_v1 = vld [vmem:[#allocation3 + $0x4f] ss:$3 sm:$0xff]  ;;  %v5494_v24 = vsel %vm5334_vm6, %v10161_v36, %v6743_v49  ;;  %v5215_v38 = vadd.f32 %v5214_v54, %v5054_v45  ;;  %v5057_v37 = vadd.f32 %v7770_v40, %v10647_v52  ;;  %vm5732_vm6 = vcmask 324608  }
 0x3e9   : > { %v5795_v21 = vld [vmem:[#allocation3 + $0x4e] ss:$3 sm:$0xff]  ;;  %v5780_v2 = vmax.f32 %v5740_v39, %v5762_v35  ;;  %5527 = vst.msk [vmem:[#allocation2 + $0x90] sm:$0xff] %vm5508_vm1, %v5494_v24  ;;  %v8025_v50 = vpop.eup %8024  ;;  %v5370_v36 = vmin.f32 %v10210_v41, 0.0  ;;  %v5371_v11 = vmin.f32 %v10213_v28, 0.0  ;;  %vm5338_vm10 = vcmp.gt.f32.partialorder %v10210_v41, 0.0 }
 0x3ea   : > { %v5835_v14 = vmax.f32 %v5795_v21, %v5817_v1  ;;  %v5588_v6 = vld [vmem:[#allocation2 + $0x79] sm:$0xff]  ;;  %v5589_v63 = vld [vmem:[#allocation2 + $0x81] sm:$0xff]  ;;  %v6744_v33 = vadd.f32 -1.0, %v8025_v50  ;;  %v7771_v16 = vpop.f32.mrb[116].mxu0  ;;  %v5269_v30 = vadd.f32 %v5215_v38, %v10648_v20  ;;  %v5218_v42 = vadd.f32 %v5217_v4, %v5057_v37  ;;  %v10653_v20 = vld [vmem:[#allocation78_spill] sm:$0xff] }
 0x3eb   : > { %v5557_v57 = vld [vmem:[#allocation2 + $0x80] sm:$0xff]  ;;  %v5620_v59 = vmax.f32 %v5556_v8, %v5588_v6  ;;  %v5424_v61 = vmul.f32 1.442695, %v5370_v36  ;;  %v7772_v22 = vpop.f32.mrb[117].mxu0  ;;  %v5222_v27 = vpop.f32.mrb[116].mxu1  ;;  %v5558_v49 = vld [vmem:[#allocation2 + $0x88] sm:$0xff] }
 0x3ec   : > { %v5846_v53 = vmax.f32 %v5780_v2, %v5835_v14  ;;  %v5652_v60 = vld [vmem:[#allocation2 + $0x7a] sm:$0xff]  ;;  %v5621_v19 = vmax.f32 %v5557_v57, %v5589_v63  ;;  %v5653_v44 = vld [vmem:[#allocation2 + $0x82] sm:$0xff]  ;;  %v5495_v26 = vsel %vm5335_vm7, %v10174_v17, %v6744_v33  ;;  %v5426_v55 = vmul.f32 1.442695, %v5371_v11  ;;  %v7774_v47 = vpop.f32.mrb[118].mxu0  ;;  %v5224_v54 = vpop.f32.mrb[117].mxu1 }
 0x3ed   : > { %v8027_v48 = vpop.eup %8026  ;;  %v5684_v31 = vmax.f32 %v5620_v59, %v5652_v60  ;;  %5528 = vst.msk [vmem:[#allocation2 + $0x98] sm:$0xff] %vm5508_vm1, %v5495_v26  ;;  %8030 = vpow2.f32 %v5424_v61  ;;  %v10232_v43 = vadd.f32 %v10229_v25, %v5269_v30  ;;  %v7775_v62 = vpop.f32.mrb[119].mxu0  ;;  %v10649_v17 = vld [vmem:[#allocation77_spill] sm:$0xff]  ;;  %v7773_v18 = vadd.f32 %v7772_v22, %v7771_v16  ;;  %v10650_v40 = vld [vmem:[#allocation16_spill] sm:$0xff] }
 0x3ee   : > { %v6773_v46 = vpack.c.bf16 %v5846_v53, %v5846_v53  ;;  %v5685_v23 = vmax.f32 %v5621_v19, %v5653_v44  ;;  %v6745_v5 = vadd.f32 -1.0, %v8027_v48  ;;  %v5225_v58 = vpop.f32.mrb[118].mxu1  ;;  %8032 = vpow2.f32 %v5426_v55  ;;  %v8029_v4 = vpop.eup %8028  ;;  %v10651_v21 = vld [vmem:[#allocation89_spill] sm:$0xff] }
 0x3ef   : > { %5716 = vst.msk [vmem:[#allocation3 + $0x78] sm:$0xff] %vm5508_vm1, %v5684_v31  ;;  %v5270_v9 = vadd.f32 %v5218_v42, %v10649_v17  ;;  %v7776_v3 = vadd.f32 %v7775_v62, %v7774_v47  ;;  %v5227_v7 = vpop.f32.mrb[119].mxu1  ;;  %v5372_v34 = vmin.f32 %v10232_v43, 0.0  ;;  %v6746_v32 = vadd.f32 -1.0, %v8029_v4  ;;  %v5742_v37 = vld [vmem:[#allocation3 + $0x60] ss:$3 sm:$0xff] }
 0x3f0   : > { %5903 = vst.msk [vmem:[%s10120_s5 + $0xc] sm:$0xf] %vm5899_vm13, %v6773_v46  ;;  %v5590_v15 = vld [vmem:[#allocation2 + $0x89] sm:$0xff]  ;;  %v5496_v12 = vsel %vm5336_vm8, %v10181_v56, %v6745_v5  ;;  %v5062_v13 = vadd.f32 %v7773_v18, %v10650_v40  ;;  %vm5339_vm11 = vcmp.gt.f32.partialorder %v10213_v28, 0.0  ;;  %vm5340_vm12 = vcmp.gt.f32.partialorder %v10232_v43, 0.0 }
 0x3f1   : > { %5717 = vst.msk [vmem:[#allocation3 + $0x80] sm:$0xff] %vm5508_vm1, %v5685_v23  ;;  %v5622_v29 = vmax.f32 %v5558_v49, %v5590_v15  ;;  %5529 = vst.msk [vmem:[#allocation2 + $0xa0] sm:$0xff] %vm5508_vm1, %v5496_v12  ;;  %v10245_v39 = vadd.f32 %v10229_v25, %v5270_v9  ;;  %v5654_v45 = vld [vmem:[#allocation2 + $0x8a] sm:$0xff]  ;;  %v5428_v35 = vmul.f32 1.442695, %v5372_v34  ;;  %v5065_v1 = vadd.f32 %v7776_v3, %v10651_v21 }
 0x3f2   : > { %v7777_v24 = vpop.f32.mrb[120].mxu0  ;;  %v5497_v56 = vsel %vm5337_vm9, %v10187_v10, %v6746_v32  ;;  %v5223_v50 = vadd.f32 %v5222_v27, %v5062_v13  ;;  %v5559_v57 = vld [vmem:[#allocation2 + $0x90] sm:$0xff]  ;;  %v10652_v19 = vld [vmem:[#allocation9_spill] sm:$0xff]  ;;  %vm5911_vm7 = vsmask.f32 1280 }
 0x3f3   : > { %v5686_v2 = vmax.f32 %v5622_v29, %v5654_v45  ;;  %v5373_v14 = vmin.f32 %v10245_v39, 0.0  ;;  %v7778_v38 = vpop.f32.mrb[121].mxu0  ;;  %v5230_v52 = vpop.f32.mrb[120].mxu1  ;;  %5530 = vst.msk [vmem:[#allocation2 + $0xa8] sm:$0xff] %vm5508_vm1, %v5497_v56  ;;  %8034 = vpow2.f32 %v5428_v35  ;;  %v5226_v8 = vadd.f32 %v5225_v58, %v5065_v1  ;;  %v10654_v46 = vld [vmem:[#allocation17_spill] sm:$0xff]  ;;  %v10655_v62 = vld [vmem:[#allocation90_spill] sm:$0xff] }
 0x3f4   : > { %v7779_v6 = vadd.f32 %v7778_v38, %v7777_v24  ;;  %v7780_v36 = vpop.f32.mrb[122].mxu0  ;;  %v5232_v53 = vpop.f32.mrb[121].mxu1  ;;  %v5591_v59 = vld [vmem:[#allocation2 + $0x91] sm:$0xff]  ;;  %v5271_v61 = vadd.f32 %v5223_v50, %v10652_v19  ;;  %vm5341_vm14 = vcmp.gt.f32.partialorder %v10245_v39, 0.0 }
 0x3f5   : > { %5718 = vst.msk [vmem:[#allocation3 + $0x88] sm:$0xff] %vm5508_vm1, %v5686_v2  ;;  %v5430_v63 = vmul.f32 1.442695, %v5373_v14  ;;  %v7781_v33 = vpop.f32.mrb[123].mxu0  ;;  %v5623_v60 = vmax.f32 %v5559_v57, %v5591_v59  ;;  %v5272_v30 = vadd.f32 %v5226_v8, %v10653_v20  ;;  %v5655_v48 = vld [vmem:[#allocation2 + $0x92] sm:$0xff]  ;;  %v5233_v44 = vpop.f32.mrb[122].mxu1 }
 0x3f6   : > { %v5764_v10 = vld [vmem:[#allocation3 + $0x63] ss:$3 sm:$0xff]  ;;  %v5819_v16 = vld [vmem:[#allocation3 + $0x67] ss:$3 sm:$0xff]  ;;  %v7782_v42 = vadd.f32 %v7781_v33, %v7780_v36  ;;  %v5070_v31 = vadd.f32 %v7779_v6, %v10654_v46  ;;  %v10258_v23 = vadd.f32 %v10229_v25, %v5271_v61  ;;  %v5235_v17 = vpop.f32.mrb[123].mxu1 }
 0x3f7   : > { %v5797_v11 = vld [vmem:[#allocation3 + $0x66] ss:$3 sm:$0xff]  ;;  %v5781_v22 = vmax.f32 %v5742_v37, %v5764_v10  ;;  %8036 = vpow2.f32 %v5430_v63  ;;  %v8031_v26 = vpop.eup %8030  ;;  %v5687_v47 = vmax.f32 %v5623_v60, %v5655_v48  ;;  %v10261_v5 = vadd.f32 %v10229_v25, %v5272_v30 }
 0x3f8   : > { %v5836_v27 = vmax.f32 %v5797_v11, %v5819_v16  ;;  %v5560_v55 = vld [vmem:[#allocation2 + $0x98] sm:$0xff]  ;;  %v5073_v58 = vadd.f32 %v7782_v42, %v10655_v62  ;;  %v8033_v9 = vpop.eup %8032  ;;  %v6747_v7 = vadd.f32 -1.0, %v8031_v26  ;;  %v5231_v4 = vadd.f32 %v5230_v52, %v5070_v31  ;;  %v5561_v32 = vld [vmem:[#allocation2 + $0xa0] sm:$0xff]  ;;  %v10656_v14 = vld [vmem:[#allocation10_spill] sm:$0xff] }
 0x3f9   : > { %v5592_v54 = vld [vmem:[#allocation2 + $0x99] sm:$0xff]  ;;  %5719 = vst.msk [vmem:[#allocation3 + $0x90] sm:$0xff] %vm5508_vm1, %v5687_v47  ;;  %v6748_v15 = vadd.f32 -1.0, %v8033_v9  ;;  %v5374_v12 = vmin.f32 %v10258_v23, 0.0  ;;  %v5375_v35 = vmin.f32 %v10261_v5, 0.0  ;;  %vm5342_vm15 = vcmp.gt.f32.partialorder %v10258_v23, 0.0 }
 0x3fa   : > { %v5847_v18 = vmax.f32 %v5781_v22, %v5836_v27  ;;  %v5624_v3 = vmax.f32 %v5560_v55, %v5592_v54  ;;  %v5656_v49 = vld [vmem:[#allocation2 + $0x9a] sm:$0xff]  ;;  %v7783_v34 = vpop.f32.mrb[124].mxu0  ;;  %v5498_v45 = vsel %vm5338_vm10, %v10210_v41, %v6747_v7  ;;  %v5273_v38 = vadd.f32 %v5231_v4, %v10656_v14  ;;  %v5657_v50 = vld [vmem:[#allocation2 + $0xa2] sm:$0xff] }
 0x3fb   : > { %v5593_v13 = vld [vmem:[#allocation2 + $0xa1] sm:$0xff]  ;;  %v7784_v21 = vpop.f32.mrb[125].mxu0  ;;  %v5238_v1 = vpop.f32.mrb[124].mxu1  ;;  %5531 = vst.msk [vmem:[#allocation2 + $0xb0] sm:$0xff] %vm5508_vm1, %v5498_v45  ;;  %v5499_v2 = vsel %vm5339_vm11, %v10213_v28, %v6748_v15  ;;  %v5432_v56 = vmul.f32 1.442695, %v5374_v12  ;;  %v5234_v8 = vadd.f32 %v5233_v44, %v5073_v58 }
 0x3fc   : > { %v6774_v29 = vpack.c.bf16 %v5847_v18, %v5847_v18  ;;  %v5688_v40 = vmax.f32 %v5624_v3, %v5656_v49  ;;  %v5625_v24 = vmax.f32 %v5561_v32, %v5593_v13  ;;  %v7786_v52 = vpop.f32.mrb[126].mxu0  ;;  %v5240_v37 = vpop.f32.mrb[125].mxu1  ;;  %5532 = vst.msk [vmem:[#allocation2 + $0xb8] sm:$0xff] %vm5508_vm1, %v5499_v2  ;;  %v5434_v41 = vmul.f32 1.442695, %v5375_v35  ;;  %v10657_v11 = vld [vmem:[#allocation11_spill] sm:$0xff] }
 0x3fd   : > { %v7785_v6 = vadd.f32 %v7784_v21, %v7783_v34  ;;  %v7787_v36 = vpop.f32.mrb[127].mxu0  ;;  %v5241_v53 = vpop.f32.mrb[126].mxu1  ;;  %8038 = vpow2.f32 %v5432_v56  ;;  %v10278_v28 = vadd.f32 %v10229_v25, %v5273_v38  ;;  %v5274_v16 = vadd.f32 %v5234_v8, %v10657_v11  ;;  %v5744_v19 = vld [vmem:[#allocation3 + $0x78] ss:$3 sm:$0xff] }
 0x3fe   : > { %5904 = vst.msk [vmem:[%s10120_s5 + $0x10] sm:$0xf] %vm5899_vm13, %v6774_v29  ;;  %v8035_v57 = vpop.eup %8034  ;;  %v5689_v59 = vmax.f32 %v5625_v24, %v5657_v50  ;;  %v7788_v63 = vadd.f32 %v7787_v36, %v7786_v52  ;;  %v5243_v33 = vpop.f32.mrb[127].mxu1  ;;  %8040 = vpow2.f32 %v5434_v41  ;;  %v5562_v47 = vld [vmem:[#allocation2 + $0xa8] sm:$0xff]  ;;  %v10658_v62 = vld [vmem:[#allocation12_spill] sm:$0xff]  ;;  %v10659_v34 = vld [vmem:[#allocation83_spill] sm:$0xff] }
 0x3ff   : > { %5720 = vst.msk [vmem:[#allocation3 + $0x98] sm:$0xff] %vm5508_vm1, %v5688_v40  ;;  %v6749_v10 = vadd.f32 -1.0, %v8035_v57  ;;  %v5078_v60 = vadd.f32 %v7785_v6, %v9976_v0  ;;  %v5376_v61 = vmin.f32 %v10278_v28, 0.0  ;;  %v10288_v46 = vadd.f32 %v10229_v25, %v5274_v16 }
 0x400   : > { %5721 = vst.msk [vmem:[#allocation3 + $0xa0] sm:$0xff] %vm5508_vm1, %v5689_v59  ;;  %v5081_v20 = vadd.f32 %v7788_v63, %v9978_v51  ;;  %v5766_v42 = vld [vmem:[#allocation3 + $0x7b] ss:$3 sm:$0xff]  ;;  %v5821_v27 = vld [vmem:[#allocation3 + $0x7f] ss:$3 sm:$0xff]  ;;  %vm5343_vm0 = vcmp.gt.f32.partialorder %v10261_v5, 0.0 }
 0x401   : > { %v8037_v30 = vpop.eup %8036  ;;  %v5799_v22 = vld [vmem:[#allocation3 + $0x7e] ss:$3 sm:$0xff]  ;;  %v5500_v48 = vsel %vm5340_vm12, %v10232_v43, %v6749_v10  ;;  %v5239_v31 = vadd.f32 %v5238_v1, %v5078_v60  ;;  %v5782_v0 = vmax.f32 %v5744_v19, %v5766_v42  ;;  %v5436_v55 = vmul.f32 1.442695, %v5376_v61 }
 0x402   : > { %v5837_v44 = vmax.f32 %v5799_v22, %v5821_v27  ;;  %5533 = vst.msk [vmem:[#allocation2 + $0xc0] sm:$0xff] %vm5508_vm1, %v5500_v48  ;;  %v6750_v26 = vadd.f32 -1.0, %v8037_v30  ;;  %v5594_v54 = vld [vmem:[#allocation2 + $0xa9] sm:$0xff]  ;;  %v5377_v51 = vmin.f32 %v10288_v46, 0.0  ;;  %v5242_v17 = vadd.f32 %v5241_v53, %v5081_v20 }
 0x403   : > { %v5275_v58 = vadd.f32 %v5239_v31, %v10658_v62  ;;  %v5563_v9 = vld [vmem:[#allocation2 + $0xb0] sm:$0xff]  ;;  %v5626_v18 = vmax.f32 %v5562_v47, %v5594_v54  ;;  %8042 = vpow2.f32 %v5436_v55  ;;  %v5564_v24 = vld [vmem:[#allocation2 + $0xb8] sm:$0xff]  ;;  %vm5344_vm2 = vcmp.gt.f32.partialorder %v10278_v28, 0.0 }
 0x404   : > { %v5848_v43 = vmax.f32 %v5782_v0, %v5837_v44  ;;  %v5595_v3 = vld [vmem:[#allocation2 + $0xb1] sm:$0xff]  ;;  %v5501_v7 = vsel %vm5341_vm14, %v10245_v39, %v6750_v26  ;;  %v5438_v15 = vmul.f32 1.442695, %v5377_v51  ;;  %v5276_v29 = vadd.f32 %v5242_v17, %v10659_v34 }
 0x405   : > { %v5658_v4 = vld [vmem:[#allocation2 + $0xaa] sm:$0xff]  ;;  %v5627_v49 = vmax.f32 %v5563_v9, %v5595_v3  ;;  %5534 = vst.msk [vmem:[#allocation2 + $0xc8] sm:$0xff] %vm5508_vm1, %v5501_v7  ;;  %v10297_v12 = vadd.f32 %v10229_v25, %v5275_v58  ;;  %v5659_v13 = vld [vmem:[#allocation2 + $0xb2] sm:$0xff]  ;;  %vm5345_vm3 = vcmp.gt.f32.partialorder %v10288_v46, 0.0 }
 0x406   : > { %v6775_v32 = vpack.c.bf16 %v5848_v43, %v5848_v43  ;;  %v5690_v40 = vmax.f32 %v5626_v18, %v5658_v4  ;;  %8044 = vpow2.f32 %v5438_v15  ;;  %v10305_v39 = vadd.f32 %v10229_v25, %v5276_v29 }
 0x407   : > { %v5691_v45 = vmax.f32 %v5627_v49, %v5659_v13  ;;  %v5378_v35 = vmin.f32 %v10297_v12, 0.0  ;;  %v8039_v21 = vpop.eup %8038  ;;  %v5746_v63 = vld [vmem:[#allocation3 + $0x90] ss:$3 sm:$0xff]  ;;  %vm5346_vm4 = vcmp.gt.f32.partialorder %v10297_v12, 0.0 }
 0x408   : > { %5905 = vst.msk [vmem:[%s10120_s5 + $0x14] sm:$0xf] %vm5899_vm13, %v6775_v32  ;;  %v8041_v1 = vpop.eup %8040  ;;  %v6751_v56 = vadd.f32 -1.0, %v8039_v21  ;;  %v5379_v37 = vmin.f32 %v10305_v39, 0.0  ;;  %vm5347_vm5 = vcmp.gt.f32.partialorder %v10305_v39, 0.0 }
 0x409   : > { %5722 = vst.msk [vmem:[#allocation3 + $0xa8] sm:$0xff] %vm5508_vm1, %v5690_v40  ;;  %5723 = vst.msk [vmem:[#allocation3 + $0xb0] sm:$0xff] %vm5508_vm1, %v5691_v45  ;;  %v5596_v2 = vld [vmem:[#allocation2 + $0xb9] sm:$0xff]  ;;  %v5440_v14 = vmul.f32 1.442695, %v5378_v35  ;;  %v6752_v52 = vadd.f32 -1.0, %v8041_v1 }
 0x40a   : > { %v5628_v38 = vmax.f32 %v5564_v24, %v5596_v2  ;;  %v5660_v50 = vld [vmem:[#allocation2 + $0xba] sm:$0xff]  ;;  %v5502_v41 = vsel %vm5342_vm15, %v10258_v23, %v6751_v56  ;;  %v5442_v53 = vmul.f32 1.442695, %v5379_v37 }
 0x40b   : > { %8046 = vpow2.f32 %v5440_v14  ;;  %v5565_v25 = vld [vmem:[#allocation2 + $0xc0] sm:$0xff]  ;;  %5535 = vst.msk [vmem:[#allocation2 + $0xd0] sm:$0xff] %vm5508_vm1, %v5502_v41  ;;  %v5503_v36 = vsel %vm5343_vm0, %v10261_v5, %v6752_v52 }
 0x40c   : > { %v5692_v8 = vmax.f32 %v5628_v38, %v5660_v50  ;;  %v5597_v6 = vld [vmem:[#allocation2 + $0xc1] sm:$0xff]  ;;  %5536 = vst.msk [vmem:[#allocation2 + $0xd8] sm:$0xff] %vm5508_vm1, %v5503_v36  ;;  %8048 = vpow2.f32 %v5442_v53 }
 0x40d   : > { %v5629_v57 = vmax.f32 %v5565_v25, %v5597_v6  ;;  %v8043_v59 = vpop.eup %8042  ;;  %v5661_v33 = vld [vmem:[#allocation2 + $0xc2] sm:$0xff] }
 0x40e   : > { %5724 = vst.msk [vmem:[#allocation3 + $0xb8] sm:$0xff] %vm5508_vm1, %v5692_v8  ;;  %v6753_v61 = vadd.f32 -1.0, %v8043_v59  ;;  %v5566_v22 = vld [vmem:[#allocation2 + $0xc8] sm:$0xff] }
 0x40f   : > { %v5693_v16 = vmax.f32 %v5629_v57, %v5661_v33 }
 0x410   : > { %v5768_v23 = vld [vmem:[#allocation3 + $0x93] ss:$3 sm:$0xff]  ;;  %v5823_v11 = vld [vmem:[#allocation3 + $0x97] ss:$3 sm:$0xff]  ;;  %v8045_v20 = vpop.eup %8044  ;;  %v5504_v30 = vsel %vm5344_vm2, %v10278_v28, %v6753_v61 }
 0x411   : > { %v5801_v10 = vld [vmem:[#allocation3 + $0x96] ss:$3 sm:$0xff]  ;;  %v5783_v60 = vmax.f32 %v5746_v63, %v5768_v23  ;;  %5725 = vst.msk [vmem:[#allocation3 + $0xc0] sm:$0xff] %vm5508_vm1, %v5693_v16  ;;  %v6754_v42 = vadd.f32 -1.0, %v8045_v20  ;;  %5537 = vst.msk [vmem:[#allocation2 + $0xe0] sm:$0xff] %vm5508_vm1, %v5504_v30 }
 0x412   : > { %v5838_v19 = vmax.f32 %v5801_v10, %v5823_v11  ;;  %v5598_v27 = vld [vmem:[#allocation2 + $0xc9] sm:$0xff] }
 0x413   : > { %v5567_v31 = vld [vmem:[#allocation2 + $0xd0] sm:$0xff]  ;;  %v5630_v0 = vmax.f32 %v5566_v22, %v5598_v27  ;;  %v5505_v26 = vsel %vm5345_vm3, %v10288_v46, %v6754_v42  ;;  %v5568_v15 = vld [vmem:[#allocation2 + $0xd8] sm:$0xff] }
 0x414   : > { %v5849_v5 = vmax.f32 %v5783_v60, %v5838_v19  ;;  %v5599_v44 = vld [vmem:[#allocation2 + $0xd1] sm:$0xff]  ;;  %5538 = vst.msk [vmem:[#allocation2 + $0xe8] sm:$0xff] %vm5508_vm1, %v5505_v26 }
 0x415   : > { %v8047_v55 = vpop.eup %8046  ;;  %v5662_v47 = vld [vmem:[#allocation2 + $0xca] sm:$0xff]  ;;  %v5631_v54 = vmax.f32 %v5567_v31, %v5599_v44  ;;  %v5663_v51 = vld [vmem:[#allocation2 + $0xd2] sm:$0xff] }
 0x416   : > { %v6776_v48 = vpack.c.bf16 %v5849_v5, %v5849_v5  ;;  %v5694_v28 = vmax.f32 %v5630_v0, %v5662_v47  ;;  %v6755_v62 = vadd.f32 -1.0, %v8047_v55  ;;  %v5748_v58 = vld [vmem:[#allocation3 + $0xa8] ss:$3 sm:$0xff]  ;;  %v8049_v43 = vpop.eup %8048 }
 0x417   : > { %v5695_v17 = vmax.f32 %v5631_v54, %v5663_v51  ;;  %v6756_v49 = vadd.f32 -1.0, %v8049_v43 }
 0x418   : > { %5906 = vst.msk [vmem:[%s10120_s5 + $0x18] sm:$0xf] %vm5899_vm13, %v6776_v48  ;;  %v5770_v9 = vld [vmem:[#allocation3 + $0xab] ss:$3 sm:$0xff]  ;;  %v5825_v3 = vld [vmem:[#allocation3 + $0xaf] ss:$3 sm:$0xff]  ;;  %v5506_v46 = vsel %vm5346_vm4, %v10297_v12, %v6755_v62 }
 0x419   : > { %v5803_v18 = vld [vmem:[#allocation3 + $0xae] ss:$3 sm:$0xff]  ;;  %5726 = vst.msk [vmem:[#allocation3 + $0xc8] sm:$0xff] %vm5508_vm1, %v5694_v28  ;;  %v5784_v7 = vmax.f32 %v5748_v58, %v5770_v9  ;;  %5727 = vst.msk [vmem:[#allocation3 + $0xd0] sm:$0xff] %vm5508_vm1, %v5695_v17  ;;  %v5507_v40 = vsel %vm5347_vm5, %v10305_v39, %v6756_v49  ;;  %v5913_v28 = vld [vmem:[%s10120_s5 + $0x28] sm:$0x3] }
 0x41a   : > { %v5839_v4 = vmax.f32 %v5803_v18, %v5825_v3  ;;  %5539 = vst.msk [vmem:[#allocation2 + $0xf0] sm:$0xff] %vm5508_vm1, %v5506_v46  ;;  %v5600_v34 = vld [vmem:[#allocation2 + $0xd9] sm:$0xff]  ;;  %5540 = vst.msk [vmem:[#allocation2 + $0xf8] sm:$0xff] %vm5508_vm1, %v5507_v40 }
 0x41b   : > { %v5632_v32 = vmax.f32 %v5568_v15, %v5600_v34  ;;  %v5569_v13 = vld [vmem:[#allocation2 + $0xe0] sm:$0xff]  ;;  %v5570_v56 = vld [vmem:[#allocation2 + $0xe8] sm:$0xff] }
 0x41c   : > { %v5850_v29 = vmax.f32 %v5784_v7, %v5839_v4  ;;  %v5664_v45 = vld [vmem:[#allocation2 + $0xda] sm:$0xff]  ;;  %v5665_v24 = vld [vmem:[#allocation2 + $0xe2] sm:$0xff] }
 0x41d   : > { %v5601_v35 = vld [vmem:[#allocation2 + $0xe1] sm:$0xff]  ;;  %v5696_v21 = vmax.f32 %v5632_v32, %v5664_v45 }
 0x41e   : > { %v6777_v12 = vpack.c.bf16 %v5850_v29, %v5850_v29  ;;  %v5633_v1 = vmax.f32 %v5569_v13, %v5601_v35 }
 0x41f   : > { %5728 = vst.msk [vmem:[#allocation3 + $0xd8] sm:$0xff] %vm5508_vm1, %v5696_v21 }
 0x420   : > { %5907 = vst.msk [vmem:[%s10120_s5 + $0x1c] sm:$0xf] %vm5899_vm13, %v6777_v12  ;;  %v5697_v2 = vmax.f32 %v5633_v1, %v5665_v24  ;;  %v5750_v36 = vld [vmem:[#allocation3 + $0xc0] ss:$3 sm:$0xff] }
 0x421   : > { %v5602_v14 = vld [vmem:[#allocation2 + $0xe9] sm:$0xff]  ;;  %v5572_v50 = vld [vmem:[#allocation2 + $0xf8] sm:$0x3f] }
 0x422   : > { %5729 = vst.msk [vmem:[#allocation3 + $0xe0] sm:$0xff] %vm5508_vm1, %v5697_v2  ;;  %v5634_v38 = vmax.f32 %v5570_v56, %v5602_v14  ;;  %v5571_v39 = vld [vmem:[#allocation2 + $0xf0] sm:$0xff]  ;;  %v5604_v25 = vld [vmem:[#allocation2 + $0xf9] sm:$0x3f] }
 0x423   : > { %v5666_v52 = vld [vmem:[#allocation2 + $0xea] sm:$0xff]  ;;  %v5636_v6 = vmax.f32 %v5572_v50, %v5604_v25  ;;  %v5667_v53 = vld [vmem:[#allocation2 + $0xf2] sm:$0xff]  ;;  %v5668_v57 = vld [vmem:[#allocation2 + $0xfa] sm:$0x3f] }
 0x424   : > { %v5698_v37 = vmax.f32 %v5634_v38, %v5666_v52  ;;  %v5603_v41 = vld [vmem:[#allocation2 + $0xf1] sm:$0xff] }
 0x425   : > { %v5635_v8 = vmax.f32 %v5571_v39, %v5603_v41  ;;  %v5700_v10 = vmax.f32 %v5636_v6, %v5668_v57 }
 0x426   : > { %5730 = vst.msk [vmem:[#allocation3 + $0xe8] sm:$0xff] %vm5508_vm1, %v5698_v37  ;;  %v5772_v59 = vld [vmem:[#allocation3 + $0xc3] ss:$3 sm:$0xff]  ;;  %v5827_v33 = vld [vmem:[#allocation3 + $0xc7] ss:$3 sm:$0xff] }
 0x427   : > { %v5805_v63 = vld [vmem:[#allocation3 + $0xc6] ss:$3 sm:$0xff]  ;;  %v5699_v23 = vmax.f32 %v5635_v8, %v5667_v53  ;;  %v5785_v11 = vmax.f32 %v5750_v36, %v5772_v59  ;;  %5733 = vst.msk [vmem:[#allocation3 + $0xf8] sm:$0x3f] %vm5732_vm6, %v5700_v10 }
 0x428   : > { %v5840_v16 = vmax.f32 %v5805_v63, %v5827_v33 }
 0x429   : > { %5731 = vst.msk [vmem:[#allocation3 + $0xf0] sm:$0xff] %vm5508_vm1, %v5699_v23  ;;  %vm5910_vm1 = vcmask 320512  }
 0x42a   : > { %v5851_v60 = vmax.f32 %v5785_v11, %v5840_v16  ;;  %vm5912_vm8 = vmand %vm5910_vm1, %vm5911_vm7 }
 0x42c   : > { %v6778_v19 = vpack.c.bf16 %v5851_v60, %v5851_v60 }
 0x42d   : > { %v5752_v61 = vld [vmem:[#allocation3 + $0xd8] ss:$3 sm:$0xff] }
 0x42e   : > { %5908 = vst.msk [vmem:[%s10120_s5 + $0x20] sm:$0xf] %vm5899_vm13, %v6778_v19 }
 0x430   : > { %v5754_v20 = vld [vmem:[#allocation3 + $0xf0] ss:$3 sm:$0x7]  ;;  %v5829_v31 = vld [vmem:[#allocation3 + $0xdf] ss:$3 sm:$0xff] }
 0x431   : > { %v5774_v5 = vld [vmem:[#allocation3 + $0xdb] ss:$3 sm:$0xff]  ;;  %v5776_v30 = vld [vmem:[#allocation3 + $0xf3] ss:$3 sm:$0x7] }
 0x432   : > { %v5786_v42 = vmax.f32 %v5752_v61, %v5774_v5  ;;  %v5807_v22 = vld [vmem:[#allocation3 + $0xde] ss:$3 sm:$0xff]  ;;  %v5787_v27 = vmax.f32 %v5754_v20, %v5776_v30  ;;  %v5809_v48 = vld [vmem:[#allocation3 + $0xf6] ss:$3 sm:$0x7] }
 0x433   : > { %v5831_v0 = vld [vmem:[#allocation3 + $0xf7] ss:$3 sm:$0x7]  ;;  %v5841_v44 = vmax.f32 %v5807_v22, %v5829_v31 }
 0x434   : > { %v5842_v26 = vmax.f32 %v5809_v48, %v5831_v0 }
 0x435   : > { %v5852_v55 = vmax.f32 %v5786_v42, %v5841_v44 }
 0x436   : > { %v5853_v47 = vmax.f32 %v5787_v27, %v5842_v26 }
 0x437   : > { %v6779_v54 = vpack.c.bf16 %v5852_v55, %v5852_v55 }
 0x438   : > { %v6780_v51 = vpack.c.bf16 %v5853_v47, %v5853_v47 }
 0x439   : > { %5909 = vst.msk [vmem:[%s10120_s5 + $0x24] sm:$0xf] %vm5899_vm13, %v6779_v54 }
 0x43a   : > { %v5914_v62 = vsel %vm5912_vm8, %v6780_v51, %v5913_v28 }
 0x43b   : > { %5915 = vst [vmem:[%s10120_s5 + $0x28] sm:$0x3] %v5914_v62 }
 0x43c PF: > { %s13_s12 = sadd.s32 1, %s8057_s12  }
 0x43d   : > { %p10_p4 = scmp.ge.s32.totalorder %s13_s12, 4  }
 0x43f   :  { %12 = sbr.rel (!%p10_p4) target bundleno = 1 (0x1), region = 107 }

</bundles_post_ra>
